<compile_context>
chip_gen: v6e
topology: v6e:2x2x1
jax: 0.10.0
libtpu: 0.0.40
codegen_flags: <defaults>
</compile_context>

<pallas_src>
import jax
import jax.numpy as jnp
from jax import lax
from jax.experimental import pallas as pl
from jax.experimental.pallas import tpu as pltpu

NEG_SLOPE = 0.01   # nn.LeakyReLU default
BN_EPS = 1e-5      # nn.BatchNorm2d default
LANE = 128


def _round_up(x, m):
    return (x + m - 1) // m * m


# ---------------------------------------------------------------------------
# Fused kernel:  [reflect-pad -> im2col -> MXU matmul -> +bias -> LeakyReLU] x2
# ---------------------------------------------------------------------------
def _fused_convblock_kernel(x_ref, w1_ref, b1_ref, w2_ref, b2_ref, o_ref,
                            xp_ref, col_ref):
    # x_ref:   (NB, H, W, C1P)      channel-padded input tile (compute dtype)
    # w1_ref:  (9*C1P, C2P)         layer-1 weights, BN scale folded in
    # b1_ref:  (1, C2P)             layer-1 folded BN bias (f32)
    # w2_ref:  (9*C2P, C2P), b2_ref: (1, C2P)
    # o_ref:   (NB, H, W, C2P)      f32 output tile
    # xp_ref:  VMEM (NB, H+2, W+2, Cmax)  reflect-padded activation scratch
    # col_ref: VMEM (NB*H*W, 9*Cmax)      im2col scratch
    NB, H, W, C1P = x_ref.shape
    C2P = o_ref.shape[3]
    M = NB * H * W

    def reflect_pad(act, cin):
        # Write the 1-pixel reflect-padded tile of `act` into xp_ref[..., :cin].
        xp_ref[:, 1:H + 1, 1:W + 1, :cin] = act
        xp_ref[:, 0:1, 1:W + 1, :cin] = act[:, 1:2]                   # top    <- row 1
        xp_ref[:, H + 1:H + 2, 1:W + 1, :cin] = act[:, H - 2:H - 1]   # bottom <- row H-2
        # Columns are reflected from already-written padded columns, so the
        # corners come out as (1,1), (1,W-2), (H-2,1), (H-2,W-2) like PyTorch.
        xp_ref[:, :, 0:1, :cin] = xp_ref[:, :, 2:3, :cin]
        xp_ref[:, :, W + 1:W + 2, :cin] = xp_ref[:, :, W - 1:W, :cin]

    def conv_bn_lrelu(w_ref, b_ref, cin):
        # im2col: 9 shifted (M, cin) slabs packed side by side along lanes
        # (cin is a multiple of 128, so every store is lane-aligned/dense).
        for k in range(9):
            dy, dx = divmod(k, 3)
            col_ref[:, k * cin:(k + 1) * cin] = (
                xp_ref[:, dy:dy + H, dx:dx + W, :cin].reshape(M, cin))
        # Single lane-dense MXU matmul with K = 9*cin, f32 accumulation.
        y = jnp.dot(col_ref[:, :9 * cin], w_ref[...],
                    preferred_element_type=jnp.float32)
        y = y + b_ref[...]                              # folded BatchNorm bias
        return jnp.where(y >= 0, y, NEG_SLOPE * y)      # LeakyReLU(0.01)

    # ---- layer 1 (Dropout2d is identity in eval mode) ----
    reflect_pad(x_ref[...], C1P)
    y1 = conv_bn_lrelu(w1_ref, b1_ref, C1P)             # (M, C2P) f32
    # ---- layer 2: the intermediate activation never leaves VMEM ----
    reflect_pad(y1.reshape(NB, H, W, C2P).astype(xp_ref.dtype), C2P)
    y2 = conv_bn_lrelu(w2_ref, b2_ref, C2P)
    o_ref[...] = y2.reshape(NB, H, W, C2P).astype(o_ref.dtype)


# ---------------------------------------------------------------------------
# Wrapper
# ---------------------------------------------------------------------------
def _fold_bn(w_hwio, gamma, beta, mean, var):
    """conv(x, w) * scale + shift == conv(x, w * scale) + shift."""
    scale = (gamma / jnp.sqrt(var + BN_EPS)).astype(jnp.float32)   # (cout,)
    bias = (beta - mean * scale).astype(jnp.float32)               # (cout,)
    return w_hwio.astype(jnp.float32) * scale, bias


def _prep_layer(w_hwio, gamma, beta, mean, var, cin_pad, cout_pad, compute_dtype):
    w, bias = _fold_bn(w_hwio, gamma, beta, mean, var)             # (3,3,cin,cout)
    kh, kw, cin, cout = w.shape
    w = jnp.pad(w, ((0, 0), (0, 0), (0, cin_pad - cin), (0, cout_pad - cout)))
    w = w.reshape(kh * kw * cin_pad, cout_pad).astype(compute_dtype)
    b = jnp.pad(bias, (0, cout_pad - cout)).reshape(1, cout_pad)   # stays f32
    return w, b


def _pick_batch_block(n, h, w):
    """Images per grid step: target 256-1024 matmul rows, but keep >=2 grid
    steps when possible so both v7x TensorCores get work."""
    hw = max(h * w, 1)
    nb = 1
    for cand in range(1, n + 1):
        if n % cand:
            continue
        if cand * hw > 1024:
            break
        if n == 1 or n // cand >= 2:
            nb = cand
    return nb


def conv_block_forward(params, x_nchw, compute_dtype=jnp.bfloat16):
    """Fused ConvBlock forward (eval mode). NCHW in, NCHW f32 out."""
    n, cin, h, w = x_nchw.shape
    cout = params["g1"].shape[0]
    if h < 2 or w < 2:
        raise ValueError("reflect padding of 1 requires H, W >= 2")

    c1p = _round_up(cin, LANE)
    c2p = _round_up(cout, LANE)
    cmax = max(c1p, c2p)
    cbytes = jnp.dtype(compute_dtype).itemsize

    # NCHW -> NHWC, channels zero-padded to a lane-dense multiple of 128.
    x = jnp.transpose(x_nchw, (0, 2, 3, 1))
    x = jnp.pad(x, ((0, 0), (0, 0), (0, 0), (0, c1p - cin))).astype(compute_dtype)

    w1, b1 = _prep_layer(params["w1"], params["g1"], params["b1"],
                         params["m1"], params["v1"], c1p, c2p, compute_dtype)
    w2, b2 = _prep_layer(params["w2"], params["g2"], params["b2"],
                         params["m2"], params["v2"], c2p, c2p, compute_dtype)

    nb = _pick_batch_block(n, h, w)
    m = nb * h * w
    # TODO(synk): for large H*W add H-tiling with a 2-row halo so each block
    # (plus double buffering) stays well inside v7x's 64 MiB VMEM.

    est = (2 * nb * h * w * c1p * cbytes              # input blocks (dbl-buffered)
           + 2 * nb * h * w * c2p * 4                 # output blocks
           + 2 * 9 * (c1p + c2p) * c2p * cbytes       # weights
           + nb * (h + 2) * (w + 2) * cmax * cbytes   # xp scratch
           + m * 9 * cmax * cbytes)                   # im2col scratch
    vmem_limit = int(min(max(2 * est, 16 * 2 ** 20), 48 * 2 ** 20))

    out = pl.pallas_call(
        _fused_convblock_kernel,
        out_shape=jax.ShapeDtypeStruct((n, h, w, c2p), jnp.float32),
        grid_spec=pltpu.PrefetchScalarGridSpec(
            num_scalar_prefetch=0,
            grid=(n // nb,),
            in_specs=[
                pl.BlockSpec((nb, h, w, c1p), lambda i: (i, 0, 0, 0)),
                pl.BlockSpec((9 * c1p, c2p), lambda i: (0, 0)),
                pl.BlockSpec((1, c2p), lambda i: (0, 0)),
                pl.BlockSpec((9 * c2p, c2p), lambda i: (0, 0)),
                pl.BlockSpec((1, c2p), lambda i: (0, 0)),
            ],
            out_specs=pl.BlockSpec((nb, h, w, c2p), lambda i: (i, 0, 0, 0)),
            scratch_shapes=[
                pltpu.VMEM((nb, h + 2, w + 2, cmax), compute_dtype),
                pltpu.VMEM((m, 9 * cmax), compute_dtype),
            ],
        ),
        compiler_params=pltpu.CompilerParams(
            dimension_semantics=("parallel",),
            vmem_limit_bytes=vmem_limit,
        ),
    )(x, w1, b1, w2, b2)

    out = out[..., :cout]                       # drop channel padding
    return jnp.transpose(out, (0, 3, 1, 2))     # NHWC -> NCHW


# ---------------------------------------------------------------------------
# Deterministic synthetic parameters (same shapes as the PyTorch module)
# ---------------------------------------------------------------------------
def init_conv_block_params(key, in_channel, out_channel):
    ks = jax.random.split(key, 10)

    def conv_w(k, cin, cout):
        # PyTorch Conv2d weight shape: (cout, cin, 3, 3); kaiming-uniform-ish bound.
        bound = 1.0 / jnp.sqrt(float(cin * 9))
        w_pt = jax.random.uniform(k, (cout, cin, 3, 3), jnp.float32, -bound, bound)
        return jnp.transpose(w_pt, (2, 3, 1, 0))   # -> (kh, kw, cin, cout)

    def bn(k, c):
        k1, k2, k3, k4 = jax.random.split(k, 4)
        gamma = jax.random.uniform(k1, (c,), jnp.float32, 0.5, 1.5)
        beta = jax.random.uniform(k2, (c,), jnp.float32, -0.5, 0.5)
        mean = jax.random.uniform(k3, (c,), jnp.float32, -0.5, 0.5)
        var = jax.random.uniform(k4, (c,), jnp.float32, 0.5, 1.5)
        return gamma, beta, mean, var

    g1, b1, m1, v1 = bn(ks[1], out_channel)
    g2, b2, m2, v2 = bn(ks[3], out_channel)
    return {
        "w1": conv_w(ks[0], in_channel, out_channel),
        "g1": g1, "b1": b1, "m1": m1, "v1": v1,
        "w2": conv_w(ks[2], out_channel, out_channel),
        "g2": g2, "b2": b2, "m2": m2, "v2": v2,
    }


# ---------------------------------------------------------------------------
# Pure-JAX references
# ---------------------------------------------------------------------------
def _reference_forward(params, x_nchw, operand_dtype=None):
    """Eval-mode ConvBlock reference.

    operand_dtype=None     -> faithful f32 module semantics (HIGHEST precision,
                              BN applied after the conv).
    operand_dtype=bfloat16 -> mirrors the kernel's numerics (BN scale folded
                              into weights, bf16 conv operands, f32 accum).
    """
    x = jnp.transpose(x_nchw, (0, 2, 3, 1)).astype(jnp.float32)

    def layer(a, w_hwio, gamma, beta, mean, var):
        a_pad = jnp.pad(a, ((0, 0), (1, 1), (1, 1), (0, 0)), mode="reflect")
        if operand_dtype is None:
            y = lax.conv_general_dilated(
                a_pad, w_hwio.astype(jnp.float32), (1, 1), "VALID",
                dimension_numbers=("NHWC", "HWIO", "NHWC"),
                precision=lax.Precision.HIGHEST)
            scale = gamma / jnp.sqrt(var + BN_EPS)
            y = y * scale + (beta - mean * scale)
        else:
            w_folded, bias = _fold_bn(w_hwio, gamma, beta, mean, var)
            y = lax.conv_general_dilated(
                a_pad.astype(operand_dtype), w_folded.astype(operand_dtype),
                (1, 1), "VALID",
                dimension_numbers=("NHWC", "HWIO", "NHWC"),
                preferred_element_type=jnp.float32)
            y = y + bias
        return jnp.where(y >= 0, y, NEG_SLOPE * y)

    x = layer(x, params["w1"], params["g1"], params["b1"], params["m1"], params["v1"])
    x = layer(x, params["w2"], params["g2"], params["b2"], params["m2"], params["v2"])
    return jnp.transpose(x, (0, 3, 1, 2))


if __name__ == "__main__":
    key = jax.random.PRNGKey(0)
    k_x, k_p = jax.random.split(key)

    N, C_IN, C_OUT, H, W = 2, 4, 8, 16, 16
    x = jax.random.normal(k_x, (N, C_IN, H, W), jnp.float32)   # PyTorch NCHW input
    params = init_conv_block_params(k_p, C_IN, C_OUT)

    out = jax.jit(conv_block_forward)(params, x)
    out = jax.block_until_ready(out)
    assert out.shape == (N, C_OUT, H, W), out.shape

    # 1) Tight check against a reference that mirrors the kernel's numerics
    #    (bf16 operands, f32 accumulation) — catches algorithmic bugs.
    #    Tolerance covers accumulation-order differences plus at most a bf16
    #    ulp flip in the intermediate activation.
    ref_matched = _reference_forward(params, x, operand_dtype=jnp.bfloat16)
    if not jnp.allclose(out, ref_matched, rtol=2e-3, atol=2e-3):
        err = float(jnp.max(jnp.abs(out - ref_matched)))
        raise AssertionError(
            f"Pallas kernel mismatches matched-precision reference (max|err|={err:.2e})")

    # 2) Looser check against the exact f32 eval-mode module; tolerance
    #    reflects the bf16 operand rounding of the fast MXU path.
    ref_f32 = _reference_forward(params, x)
    if not jnp.allclose(out, ref_f32, rtol=5e-2, atol=5e-2):
        err = float(jnp.max(jnp.abs(out - ref_f32)))
        raise AssertionError(
            f"Pallas kernel mismatches f32 module reference (max|err|={err:.2e})")

    print("KERNEL_OK")
</pallas_src>

<mosaic_0001>
module attributes {stable_mosaic.version = 11 : i64} {
  func.func @_fused_convblock_kernel(%arg0: i32, %arg1: memref<1x16x16x128xbf16, #tpu.memory_space<vmem>>, %arg2: memref<1152x128xbf16, #tpu.memory_space<vmem>>, %arg3: memref<1x128xf32, #tpu.memory_space<vmem>>, %arg4: memref<1152x128xbf16, #tpu.memory_space<vmem>>, %arg5: memref<1x128xf32, #tpu.memory_space<vmem>>, %arg6: memref<1x16x16x128xf32, #tpu.memory_space<vmem>>, %arg7: memref<1x18x18x128xbf16, #tpu.memory_space<vmem>>, %arg8: memref<256x1152xbf16, #tpu.memory_space<vmem>>) attributes {dimension_semantics = [#tpu.dimension_semantics<parallel>], iteration_bounds = array<i64: 2>, scalar_prefetch = 0 : i64, scratch_operands = 2 : i64, tpu.core_type = #tpu.core_type<tc>, window_params = [{transform_indices = @transform_0, window_bounds = array<i64: 1, 16, 16, 128>}, {pipeline_mode = #tpu.pipeline_mode<synchronous>, transform_indices = @transform_1, window_bounds = array<i64: 1152, 128>}, {pipeline_mode = #tpu.pipeline_mode<synchronous>, transform_indices = @transform_2, window_bounds = array<i64: 1, 128>}, {pipeline_mode = #tpu.pipeline_mode<synchronous>, transform_indices = @transform_3, window_bounds = array<i64: 1152, 128>}, {pipeline_mode = #tpu.pipeline_mode<synchronous>, transform_indices = @transform_4, window_bounds = array<i64: 1, 128>}, {transform_indices = @transform_5, window_bounds = array<i64: 1, 16, 16, 128>}]} {
    %c0 = arith.constant 0 : index
    %c0_0 = arith.constant 0 : index
    %c0_1 = arith.constant 0 : index
    %c0_2 = arith.constant 0 : index
    %0 = vector.load %arg1[%c0, %c0_0, %c0_1, %c0_2] : memref<1x16x16x128xbf16, #tpu.memory_space<vmem>>, vector<1x16x16x128xbf16>
    %c0_3 = arith.constant 0 : index
    %c1 = arith.constant 1 : index
    %c1_4 = arith.constant 1 : index
    %c0_5 = arith.constant 0 : index
    %1 = vector.load %arg7[%c0_3, %c1, %c1_4, %c0_5] : memref<1x18x18x128xbf16, #tpu.memory_space<vmem>>, vector<1x16x16x128xbf16>
    tpu.vector_store %arg7[%c0_3, %c1, %c1_4, %c0_5], %0 {strides = array<i32>} : memref<1x18x18x128xbf16, #tpu.memory_space<vmem>>, vector<1x16x16x128xbf16>,
    %2 = vector.extract_strided_slice %0 {offsets = [0, 1, 0, 0], sizes = [1, 1, 16, 128], strides = [1, 1, 1, 1]} : vector<1x16x16x128xbf16> to vector<1x1x16x128xbf16>
    %c0_6 = arith.constant 0 : index
    %c0_7 = arith.constant 0 : index
    %c1_8 = arith.constant 1 : index
    %c0_9 = arith.constant 0 : index
    %3 = vector.load %arg7[%c0_6, %c0_7, %c1_8, %c0_9] : memref<1x18x18x128xbf16, #tpu.memory_space<vmem>>, vector<1x1x16x128xbf16>
    tpu.vector_store %arg7[%c0_6, %c0_7, %c1_8, %c0_9], %2 {strides = array<i32>} : memref<1x18x18x128xbf16, #tpu.memory_space<vmem>>, vector<1x1x16x128xbf16>,
    %4 = vector.extract_strided_slice %0 {offsets = [0, 14, 0, 0], sizes = [1, 1, 16, 128], strides = [1, 1, 1, 1]} : vector<1x16x16x128xbf16> to vector<1x1x16x128xbf16>
    %c0_10 = arith.constant 0 : index
    %c17 = arith.constant 17 : index
    %c1_11 = arith.constant 1 : index
    %c0_12 = arith.constant 0 : index
    %5 = vector.load %arg7[%c0_10, %c17, %c1_11, %c0_12] : memref<1x18x18x128xbf16, #tpu.memory_space<vmem>>, vector<1x1x16x128xbf16>
    tpu.vector_store %arg7[%c0_10, %c17, %c1_11, %c0_12], %4 {strides = array<i32>} : memref<1x18x18x128xbf16, #tpu.memory_space<vmem>>, vector<1x1x16x128xbf16>,
    %c0_13 = arith.constant 0 : index
    %c0_14 = arith.constant 0 : index
    %c2 = arith.constant 2 : index
    %c0_15 = arith.constant 0 : index
    %6 = vector.load %arg7[%c0_13, %c0_14, %c2, %c0_15] : memref<1x18x18x128xbf16, #tpu.memory_space<vmem>>, vector<1x18x1x128xbf16>
    %c0_16 = arith.constant 0 : index
    %c0_17 = arith.constant 0 : index
    %c0_18 = arith.constant 0 : index
    %c0_19 = arith.constant 0 : index
    %7 = vector.load %arg7[%c0_16, %c0_17, %c0_18, %c0_19] : memref<1x18x18x128xbf16, #tpu.memory_space<vmem>>, vector<1x18x1x128xbf16>
    tpu.vector_store %arg7[%c0_16, %c0_17, %c0_18, %c0_19], %6 {strides = array<i32>} : memref<1x18x18x128xbf16, #tpu.memory_space<vmem>>, vector<1x18x1x128xbf16>,
    %c0_20 = arith.constant 0 : index
    %c0_21 = arith.constant 0 : index
    %c15 = arith.constant 15 : index
    %c0_22 = arith.constant 0 : index
    %8 = vector.load %arg7[%c0_20, %c0_21, %c15, %c0_22] : memref<1x18x18x128xbf16, #tpu.memory_space<vmem>>, vector<1x18x1x128xbf16>
    %c0_23 = arith.constant 0 : index
    %c0_24 = arith.constant 0 : index
    %c17_25 = arith.constant 17 : index
    %c0_26 = arith.constant 0 : index
    %9 = vector.load %arg7[%c0_23, %c0_24, %c17_25, %c0_26] : memref<1x18x18x128xbf16, #tpu.memory_space<vmem>>, vector<1x18x1x128xbf16>
    tpu.vector_store %arg7[%c0_23, %c0_24, %c17_25, %c0_26], %8 {strides = array<i32>} : memref<1x18x18x128xbf16, #tpu.memory_space<vmem>>, vector<1x18x1x128xbf16>,
    %c0_27 = arith.constant 0 : index
    %c0_28 = arith.constant 0 : index
    %c0_29 = arith.constant 0 : index
    %c0_30 = arith.constant 0 : index
    %10 = vector.load %arg7[%c0_27, %c0_28, %c0_29, %c0_30] : memref<1x18x18x128xbf16, #tpu.memory_space<vmem>>, vector<1x16x16x128xbf16>
    %11 = vector.shape_cast %10 : vector<1x16x16x128xbf16> to vector<256x128xbf16>
    %c0_31 = arith.constant 0 : index
    %c0_32 = arith.constant 0 : index
    %12 = vector.load %arg8[%c0_31, %c0_32] : memref<256x1152xbf16, #tpu.memory_space<vmem>>, vector<256x128xbf16>
    tpu.vector_store %arg8[%c0_31, %c0_32], %11 {strides = array<i32>} : memref<256x1152xbf16, #tpu.memory_space<vmem>>, vector<256x128xbf16>,
    %c0_33 = arith.constant 0 : index
    %c0_34 = arith.constant 0 : index
    %c1_35 = arith.constant 1 : index
    %c0_36 = arith.constant 0 : index
    %13 = vector.load %arg7[%c0_33, %c0_34, %c1_35, %c0_36] : memref<1x18x18x128xbf16, #tpu.memory_space<vmem>>, vector<1x16x16x128xbf16>
    %14 = vector.shape_cast %13 : vector<1x16x16x128xbf16> to vector<256x128xbf16>
    %c0_37 = arith.constant 0 : index
    %c128 = arith.constant 128 : index
    %15 = vector.load %arg8[%c0_37, %c128] : memref<256x1152xbf16, #tpu.memory_space<vmem>>, vector<256x128xbf16>
    tpu.vector_store %arg8[%c0_37, %c128], %14 {strides = array<i32>} : memref<256x1152xbf16, #tpu.memory_space<vmem>>, vector<256x128xbf16>,
    %c0_38 = arith.constant 0 : index
    %c0_39 = arith.constant 0 : index
    %c2_40 = arith.constant 2 : index
    %c0_41 = arith.constant 0 : index
    %16 = vector.load %arg7[%c0_38, %c0_39, %c2_40, %c0_41] : memref<1x18x18x128xbf16, #tpu.memory_space<vmem>>, vector<1x16x16x128xbf16>
    %17 = vector.shape_cast %16 : vector<1x16x16x128xbf16> to vector<256x128xbf16>
    %c0_42 = arith.constant 0 : index
    %c256 = arith.constant 256 : index
    %18 = vector.load %arg8[%c0_42, %c256] : memref<256x1152xbf16, #tpu.memory_space<vmem>>, vector<256x128xbf16>
    tpu.vector_store %arg8[%c0_42, %c256], %17 {strides = array<i32>} : memref<256x1152xbf16, #tpu.memory_space<vmem>>, vector<256x128xbf16>,
    %c0_43 = arith.constant 0 : index
    %c1_44 = arith.constant 1 : index
    %c0_45 = arith.constant 0 : index
    %c0_46 = arith.constant 0 : index
    %19 = vector.load %arg7[%c0_43, %c1_44, %c0_45, %c0_46] : memref<1x18x18x128xbf16, #tpu.memory_space<vmem>>, vector<1x16x16x128xbf16>
    %20 = vector.shape_cast %19 : vector<1x16x16x128xbf16> to vector<256x128xbf16>
    %c0_47 = arith.constant 0 : index
    %c384 = arith.constant 384 : index
    %21 = vector.load %arg8[%c0_47, %c384] : memref<256x1152xbf16, #tpu.memory_space<vmem>>, vector<256x128xbf16>
    tpu.vector_store %arg8[%c0_47, %c384], %20 {strides = array<i32>} : memref<256x1152xbf16, #tpu.memory_space<vmem>>, vector<256x128xbf16>,
    %c0_48 = arith.constant 0 : index
    %c1_49 = arith.constant 1 : index
    %c1_50 = arith.constant 1 : index
    %c0_51 = arith.constant 0 : index
    %22 = vector.load %arg7[%c0_48, %c1_49, %c1_50, %c0_51] : memref<1x18x18x128xbf16, #tpu.memory_space<vmem>>, vector<1x16x16x128xbf16>
    %23 = vector.shape_cast %22 : vector<1x16x16x128xbf16> to vector<256x128xbf16>
    %c0_52 = arith.constant 0 : index
    %c512 = arith.constant 512 : index
    %24 = vector.load %arg8[%c0_52, %c512] : memref<256x1152xbf16, #tpu.memory_space<vmem>>, vector<256x128xbf16>
    tpu.vector_store %arg8[%c0_52, %c512], %23 {strides = array<i32>} : memref<256x1152xbf16, #tpu.memory_space<vmem>>, vector<256x128xbf16>,
    %c0_53 = arith.constant 0 : index
    %c1_54 = arith.constant 1 : index
    %c2_55 = arith.constant 2 : index
    %c0_56 = arith.constant 0 : index
    %25 = vector.load %arg7[%c0_53, %c1_54, %c2_55, %c0_56] : memref<1x18x18x128xbf16, #tpu.memory_space<vmem>>, vector<1x16x16x128xbf16>
    %26 = vector.shape_cast %25 : vector<1x16x16x128xbf16> to vector<256x128xbf16>
    %c0_57 = arith.constant 0 : index
    %c640 = arith.constant 640 : index
    %27 = vector.load %arg8[%c0_57, %c640] : memref<256x1152xbf16, #tpu.memory_space<vmem>>, vector<256x128xbf16>
    tpu.vector_store %arg8[%c0_57, %c640], %26 {strides = array<i32>} : memref<256x1152xbf16, #tpu.memory_space<vmem>>, vector<256x128xbf16>,
    %c0_58 = arith.constant 0 : index
    %c2_59 = arith.constant 2 : index
    %c0_60 = arith.constant 0 : index
    %c0_61 = arith.constant 0 : index
    %28 = vector.load %arg7[%c0_58, %c2_59, %c0_60, %c0_61] : memref<1x18x18x128xbf16, #tpu.memory_space<vmem>>, vector<1x16x16x128xbf16>
    %29 = vector.shape_cast %28 : vector<1x16x16x128xbf16> to vector<256x128xbf16>
    %c0_62 = arith.constant 0 : index
    %c768 = arith.constant 768 : index
    %30 = vector.load %arg8[%c0_62, %c768] : memref<256x1152xbf16, #tpu.memory_space<vmem>>, vector<256x128xbf16>
    tpu.vector_store %arg8[%c0_62, %c768], %29 {strides = array<i32>} : memref<256x1152xbf16, #tpu.memory_space<vmem>>, vector<256x128xbf16>,
    %c0_63 = arith.constant 0 : index
    %c2_64 = arith.constant 2 : index
    %c1_65 = arith.constant 1 : index
    %c0_66 = arith.constant 0 : index
    %31 = vector.load %arg7[%c0_63, %c2_64, %c1_65, %c0_66] : memref<1x18x18x128xbf16, #tpu.memory_space<vmem>>, vector<1x16x16x128xbf16>
    %32 = vector.shape_cast %31 : vector<1x16x16x128xbf16> to vector<256x128xbf16>
    %c0_67 = arith.constant 0 : index
    %c896 = arith.constant 896 : index
    %33 = vector.load %arg8[%c0_67, %c896] : memref<256x1152xbf16, #tpu.memory_space<vmem>>, vector<256x128xbf16>
    tpu.vector_store %arg8[%c0_67, %c896], %32 {strides = array<i32>} : memref<256x1152xbf16, #tpu.memory_space<vmem>>, vector<256x128xbf16>,
    %c0_68 = arith.constant 0 : index
    %c2_69 = arith.constant 2 : index
    %c2_70 = arith.constant 2 : index
    %c0_71 = arith.constant 0 : index
    %34 = vector.load %arg7[%c0_68, %c2_69, %c2_70, %c0_71] : memref<1x18x18x128xbf16, #tpu.memory_space<vmem>>, vector<1x16x16x128xbf16>
    %35 = vector.shape_cast %34 : vector<1x16x16x128xbf16> to vector<256x128xbf16>
    %c0_72 = arith.constant 0 : index
    %c1024 = arith.constant 1024 : index
    %36 = vector.load %arg8[%c0_72, %c1024] : memref<256x1152xbf16, #tpu.memory_space<vmem>>, vector<256x128xbf16>
    tpu.vector_store %arg8[%c0_72, %c1024], %35 {strides = array<i32>} : memref<256x1152xbf16, #tpu.memory_space<vmem>>, vector<256x128xbf16>,
    %c0_73 = arith.constant 0 : index
    %c0_74 = arith.constant 0 : index
    %37 = vector.load %arg8[%c0_73, %c0_74] : memref<256x1152xbf16, #tpu.memory_space<vmem>>, vector<256x1152xbf16>
    %c0_75 = arith.constant 0 : index
    %c0_76 = arith.constant 0 : index
    %38 = vector.load %arg2[%c0_75, %c0_76] : memref<1152x128xbf16, #tpu.memory_space<vmem>>, vector<1152x128xbf16>
    %cst = arith.constant dense<0.000000e+00> : vector<256x128xf32>
    %39 = tpu.matmul %37, %38, %cst {dimension_numbers = #tpu.dot_dimension_numbers<[1], [0], [0], [1], [0, 0, 1, 1], [], []>} : vector<256x1152xbf16>, vector<1152x128xbf16>, vector<256x128xf32> -> vector<256x128xf32>
    %c0_77 = arith.constant 0 : index
    %c0_78 = arith.constant 0 : index
    %40 = vector.load %arg3[%c0_77, %c0_78] : memref<1x128xf32, #tpu.memory_space<vmem>>, vector<1x128xf32>
    %41 = vector.broadcast %40 : vector<1x128xf32> to vector<256x128xf32>
    %42 = arith.addf %39, %41 : vector<256x128xf32>
    %cst_79 = arith.constant 0.000000e+00 : f32
    %43 = vector.broadcast %cst_79 : f32 to vector<256x128xf32>
    %44 = arith.cmpf oge, %42, %43 : vector<256x128xf32>
    %cst_80 = arith.constant 0.00999999977 : f32
    %45 = vector.broadcast %cst_80 : f32 to vector<256x128xf32>
    %46 = arith.mulf %45, %42 : vector<256x128xf32>
    %47 = arith.select %44, %42, %46 : vector<256x128xi1>, vector<256x128xf32>
    %48 = vector.shape_cast %47 : vector<256x128xf32> to vector<1x16x16x128xf32>
    %49 = arith.truncf %48 : vector<1x16x16x128xf32> to vector<1x16x16x128xbf16>
    %c0_81 = arith.constant 0 : index
    %c1_82 = arith.constant 1 : index
    %c1_83 = arith.constant 1 : index
    %c0_84 = arith.constant 0 : index
    %50 = vector.load %arg7[%c0_81, %c1_82, %c1_83, %c0_84] : memref<1x18x18x128xbf16, #tpu.memory_space<vmem>>, vector<1x16x16x128xbf16>
    tpu.vector_store %arg7[%c0_81, %c1_82, %c1_83, %c0_84], %49 {strides = array<i32>} : memref<1x18x18x128xbf16, #tpu.memory_space<vmem>>, vector<1x16x16x128xbf16>,
    %51 = vector.extract_strided_slice %49 {offsets = [0, 1, 0, 0], sizes = [1, 1, 16, 128], strides = [1, 1, 1, 1]} : vector<1x16x16x128xbf16> to vector<1x1x16x128xbf16>
    %c0_85 = arith.constant 0 : index
    %c0_86 = arith.constant 0 : index
    %c1_87 = arith.constant 1 : index
    %c0_88 = arith.constant 0 : index
    %52 = vector.load %arg7[%c0_85, %c0_86, %c1_87, %c0_88] : memref<1x18x18x128xbf16, #tpu.memory_space<vmem>>, vector<1x1x16x128xbf16>
    tpu.vector_store %arg7[%c0_85, %c0_86, %c1_87, %c0_88], %51 {strides = array<i32>} : memref<1x18x18x128xbf16, #tpu.memory_space<vmem>>, vector<1x1x16x128xbf16>,
    %53 = vector.extract_strided_slice %49 {offsets = [0, 14, 0, 0], sizes = [1, 1, 16, 128], strides = [1, 1, 1, 1]} : vector<1x16x16x128xbf16> to vector<1x1x16x128xbf16>
    %c0_89 = arith.constant 0 : index
    %c17_90 = arith.constant 17 : index
    %c1_91 = arith.constant 1 : index
    %c0_92 = arith.constant 0 : index
    %54 = vector.load %arg7[%c0_89, %c17_90, %c1_91, %c0_92] : memref<1x18x18x128xbf16, #tpu.memory_space<vmem>>, vector<1x1x16x128xbf16>
    tpu.vector_store %arg7[%c0_89, %c17_90, %c1_91, %c0_92], %53 {strides = array<i32>} : memref<1x18x18x128xbf16, #tpu.memory_space<vmem>>, vector<1x1x16x128xbf16>,
    %c0_93 = arith.constant 0 : index
    %c0_94 = arith.constant 0 : index
    %c2_95 = arith.constant 2 : index
    %c0_96 = arith.constant 0 : index
    %55 = vector.load %arg7[%c0_93, %c0_94, %c2_95, %c0_96] : memref<1x18x18x128xbf16, #tpu.memory_space<vmem>>, vector<1x18x1x128xbf16>
    %c0_97 = arith.constant 0 : index
    %c0_98 = arith.constant 0 : index
    %c0_99 = arith.constant 0 : index
    %c0_100 = arith.constant 0 : index
    %56 = vector.load %arg7[%c0_97, %c0_98, %c0_99, %c0_100] : memref<1x18x18x128xbf16, #tpu.memory_space<vmem>>, vector<1x18x1x128xbf16>
    tpu.vector_store %arg7[%c0_97, %c0_98, %c0_99, %c0_100], %55 {strides = array<i32>} : memref<1x18x18x128xbf16, #tpu.memory_space<vmem>>, vector<1x18x1x128xbf16>,
    %c0_101 = arith.constant 0 : index
    %c0_102 = arith.constant 0 : index
    %c15_103 = arith.constant 15 : index
    %c0_104 = arith.constant 0 : index
    %57 = vector.load %arg7[%c0_101, %c0_102, %c15_103, %c0_104] : memref<1x18x18x128xbf16, #tpu.memory_space<vmem>>, vector<1x18x1x128xbf16>
    %c0_105 = arith.constant 0 : index
    %c0_106 = arith.constant 0 : index
    %c17_107 = arith.constant 17 : index
    %c0_108 = arith.constant 0 : index
    %58 = vector.load %arg7[%c0_105, %c0_106, %c17_107, %c0_108] : memref<1x18x18x128xbf16, #tpu.memory_space<vmem>>, vector<1x18x1x128xbf16>
    tpu.vector_store %arg7[%c0_105, %c0_106, %c17_107, %c0_108], %57 {strides = array<i32>} : memref<1x18x18x128xbf16, #tpu.memory_space<vmem>>, vector<1x18x1x128xbf16>,
    %c0_109 = arith.constant 0 : index
    %c0_110 = arith.constant 0 : index
    %c0_111 = arith.constant 0 : index
    %c0_112 = arith.constant 0 : index
    %59 = vector.load %arg7[%c0_109, %c0_110, %c0_111, %c0_112] : memref<1x18x18x128xbf16, #tpu.memory_space<vmem>>, vector<1x16x16x128xbf16>
    %60 = vector.shape_cast %59 : vector<1x16x16x128xbf16> to vector<256x128xbf16>
    %c0_113 = arith.constant 0 : index
    %c0_114 = arith.constant 0 : index
    %61 = vector.load %arg8[%c0_113, %c0_114] : memref<256x1152xbf16, #tpu.memory_space<vmem>>, vector<256x128xbf16>
    tpu.vector_store %arg8[%c0_113, %c0_114], %60 {strides = array<i32>} : memref<256x1152xbf16, #tpu.memory_space<vmem>>, vector<256x128xbf16>,
    %c0_115 = arith.constant 0 : index
    %c0_116 = arith.constant 0 : index
    %c1_117 = arith.constant 1 : index
    %c0_118 = arith.constant 0 : index
    %62 = vector.load %arg7[%c0_115, %c0_116, %c1_117, %c0_118] : memref<1x18x18x128xbf16, #tpu.memory_space<vmem>>, vector<1x16x16x128xbf16>
    %63 = vector.shape_cast %62 : vector<1x16x16x128xbf16> to vector<256x128xbf16>
    %c0_119 = arith.constant 0 : index
    %c128_120 = arith.constant 128 : index
    %64 = vector.load %arg8[%c0_119, %c128_120] : memref<256x1152xbf16, #tpu.memory_space<vmem>>, vector<256x128xbf16>
    tpu.vector_store %arg8[%c0_119, %c128_120], %63 {strides = array<i32>} : memref<256x1152xbf16, #tpu.memory_space<vmem>>, vector<256x128xbf16>,
    %c0_121 = arith.constant 0 : index
    %c0_122 = arith.constant 0 : index
    %c2_123 = arith.constant 2 : index
    %c0_124 = arith.constant 0 : index
    %65 = vector.load %arg7[%c0_121, %c0_122, %c2_123, %c0_124] : memref<1x18x18x128xbf16, #tpu.memory_space<vmem>>, vector<1x16x16x128xbf16>
    %66 = vector.shape_cast %65 : vector<1x16x16x128xbf16> to vector<256x128xbf16>
    %c0_125 = arith.constant 0 : index
    %c256_126 = arith.constant 256 : index
    %67 = vector.load %arg8[%c0_125, %c256_126] : memref<256x1152xbf16, #tpu.memory_space<vmem>>, vector<256x128xbf16>
    tpu.vector_store %arg8[%c0_125, %c256_126], %66 {strides = array<i32>} : memref<256x1152xbf16, #tpu.memory_space<vmem>>, vector<256x128xbf16>,
    %c0_127 = arith.constant 0 : index
    %c1_128 = arith.constant 1 : index
    %c0_129 = arith.constant 0 : index
    %c0_130 = arith.constant 0 : index
    %68 = vector.load %arg7[%c0_127, %c1_128, %c0_129, %c0_130] : memref<1x18x18x128xbf16, #tpu.memory_space<vmem>>, vector<1x16x16x128xbf16>
    %69 = vector.shape_cast %68 : vector<1x16x16x128xbf16> to vector<256x128xbf16>
    %c0_131 = arith.constant 0 : index
    %c384_132 = arith.constant 384 : index
    %70 = vector.load %arg8[%c0_131, %c384_132] : memref<256x1152xbf16, #tpu.memory_space<vmem>>, vector<256x128xbf16>
    tpu.vector_store %arg8[%c0_131, %c384_132], %69 {strides = array<i32>} : memref<256x1152xbf16, #tpu.memory_space<vmem>>, vector<256x128xbf16>,
    %c0_133 = arith.constant 0 : index
    %c1_134 = arith.constant 1 : index
    %c1_135 = arith.constant 1 : index
    %c0_136 = arith.constant 0 : index
    %71 = vector.load %arg7[%c0_133, %c1_134, %c1_135, %c0_136] : memref<1x18x18x128xbf16, #tpu.memory_space<vmem>>, vector<1x16x16x128xbf16>
    %72 = vector.shape_cast %71 : vector<1x16x16x128xbf16> to vector<256x128xbf16>
    %c0_137 = arith.constant 0 : index
    %c512_138 = arith.constant 512 : index
    %73 = vector.load %arg8[%c0_137, %c512_138] : memref<256x1152xbf16, #tpu.memory_space<vmem>>, vector<256x128xbf16>
    tpu.vector_store %arg8[%c0_137, %c512_138], %72 {strides = array<i32>} : memref<256x1152xbf16, #tpu.memory_space<vmem>>, vector<256x128xbf16>,
    %c0_139 = arith.constant 0 : index
    %c1_140 = arith.constant 1 : index
    %c2_141 = arith.constant 2 : index
    %c0_142 = arith.constant 0 : index
    %74 = vector.load %arg7[%c0_139, %c1_140, %c2_141, %c0_142] : memref<1x18x18x128xbf16, #tpu.memory_space<vmem>>, vector<1x16x16x128xbf16>
    %75 = vector.shape_cast %74 : vector<1x16x16x128xbf16> to vector<256x128xbf16>
    %c0_143 = arith.constant 0 : index
    %c640_144 = arith.constant 640 : index
    %76 = vector.load %arg8[%c0_143, %c640_144] : memref<256x1152xbf16, #tpu.memory_space<vmem>>, vector<256x128xbf16>
    tpu.vector_store %arg8[%c0_143, %c640_144], %75 {strides = array<i32>} : memref<256x1152xbf16, #tpu.memory_space<vmem>>, vector<256x128xbf16>,
    %c0_145 = arith.constant 0 : index
    %c2_146 = arith.constant 2 : index
    %c0_147 = arith.constant 0 : index
    %c0_148 = arith.constant 0 : index
    %77 = vector.load %arg7[%c0_145, %c2_146, %c0_147, %c0_148] : memref<1x18x18x128xbf16, #tpu.memory_space<vmem>>, vector<1x16x16x128xbf16>
    %78 = vector.shape_cast %77 : vector<1x16x16x128xbf16> to vector<256x128xbf16>
    %c0_149 = arith.constant 0 : index
    %c768_150 = arith.constant 768 : index
    %79 = vector.load %arg8[%c0_149, %c768_150] : memref<256x1152xbf16, #tpu.memory_space<vmem>>, vector<256x128xbf16>
    tpu.vector_store %arg8[%c0_149, %c768_150], %78 {strides = array<i32>} : memref<256x1152xbf16, #tpu.memory_space<vmem>>, vector<256x128xbf16>,
    %c0_151 = arith.constant 0 : index
    %c2_152 = arith.constant 2 : index
    %c1_153 = arith.constant 1 : index
    %c0_154 = arith.constant 0 : index
    %80 = vector.load %arg7[%c0_151, %c2_152, %c1_153, %c0_154] : memref<1x18x18x128xbf16, #tpu.memory_space<vmem>>, vector<1x16x16x128xbf16>
    %81 = vector.shape_cast %80 : vector<1x16x16x128xbf16> to vector<256x128xbf16>
    %c0_155 = arith.constant 0 : index
    %c896_156 = arith.constant 896 : index
    %82 = vector.load %arg8[%c0_155, %c896_156] : memref<256x1152xbf16, #tpu.memory_space<vmem>>, vector<256x128xbf16>
    tpu.vector_store %arg8[%c0_155, %c896_156], %81 {strides = array<i32>} : memref<256x1152xbf16, #tpu.memory_space<vmem>>, vector<256x128xbf16>,
    %c0_157 = arith.constant 0 : index
    %c2_158 = arith.constant 2 : index
    %c2_159 = arith.constant 2 : index
    %c0_160 = arith.constant 0 : index
    %83 = vector.load %arg7[%c0_157, %c2_158, %c2_159, %c0_160] : memref<1x18x18x128xbf16, #tpu.memory_space<vmem>>, vector<1x16x16x128xbf16>
    %84 = vector.shape_cast %83 : vector<1x16x16x128xbf16> to vector<256x128xbf16>
    %c0_161 = arith.constant 0 : index
    %c1024_162 = arith.constant 1024 : index
    %85 = vector.load %arg8[%c0_161, %c1024_162] : memref<256x1152xbf16, #tpu.memory_space<vmem>>, vector<256x128xbf16>
    tpu.vector_store %arg8[%c0_161, %c1024_162], %84 {strides = array<i32>} : memref<256x1152xbf16, #tpu.memory_space<vmem>>, vector<256x128xbf16>,
    %c0_163 = arith.constant 0 : index
    %c0_164 = arith.constant 0 : index
    %86 = vector.load %arg8[%c0_163, %c0_164] : memref<256x1152xbf16, #tpu.memory_space<vmem>>, vector<256x1152xbf16>
    %c0_165 = arith.constant 0 : index
    %c0_166 = arith.constant 0 : index
    %87 = vector.load %arg4[%c0_165, %c0_166] : memref<1152x128xbf16, #tpu.memory_space<vmem>>, vector<1152x128xbf16>
    %cst_167 = arith.constant dense<0.000000e+00> : vector<256x128xf32>
    %88 = tpu.matmul %86, %87, %cst_167 {dimension_numbers = #tpu.dot_dimension_numbers<[1], [0], [0], [1], [0, 0, 1, 1], [], []>} : vector<256x1152xbf16>, vector<1152x128xbf16>, vector<256x128xf32> -> vector<256x128xf32>
    %c0_168 = arith.constant 0 : index
    %c0_169 = arith.constant 0 : index
    %89 = vector.load %arg5[%c0_168, %c0_169] : memref<1x128xf32, #tpu.memory_space<vmem>>, vector<1x128xf32>
    %90 = vector.broadcast %89 : vector<1x128xf32> to vector<256x128xf32>
    %91 = arith.addf %88, %90 : vector<256x128xf32>
    %cst_170 = arith.constant 0.000000e+00 : f32
    %92 = vector.broadcast %cst_170 : f32 to vector<256x128xf32>
    %93 = arith.cmpf oge, %91, %92 : vector<256x128xf32>
    %cst_171 = arith.constant 0.00999999977 : f32
    %94 = vector.broadcast %cst_171 : f32 to vector<256x128xf32>
    %95 = arith.mulf %94, %91 : vector<256x128xf32>
    %96 = arith.select %93, %91, %95 : vector<256x128xi1>, vector<256x128xf32>
    %97 = vector.shape_cast %96 : vector<256x128xf32> to vector<1x16x16x128xf32>
    %c0_172 = arith.constant 0 : index
    %c0_173 = arith.constant 0 : index
    %c0_174 = arith.constant 0 : index
    %c0_175 = arith.constant 0 : index
    %98 = vector.load %arg6[%c0_172, %c0_173, %c0_174, %c0_175] : memref<1x16x16x128xf32, #tpu.memory_space<vmem>>, vector<1x16x16x128xf32>
    tpu.vector_store %arg6[%c0_172, %c0_173, %c0_174, %c0_175], %97 {strides = array<i32>} : memref<1x16x16x128xf32, #tpu.memory_space<vmem>>, vector<1x16x16x128xf32>,
    return
  }
  func.func @transform_0(%arg0: i32) -> (i32, i32, i32, i32) {
    %c0_i32 = arith.constant 0 : i32
    %c0_i32_0 = arith.constant 0 : i32
    %c0_i32_1 = arith.constant 0 : i32
    %c0_i32_2 = arith.constant 0 : i32
    return %arg0, %c0_i32, %c0_i32_0, %c0_i32_1 : i32, i32, i32, i32
  }
  func.func @transform_1(%arg0: i32) -> (i32, i32) {
    %c0_i32 = arith.constant 0 : i32
    %c0_i32_0 = arith.constant 0 : i32
    %c0_i32_1 = arith.constant 0 : i32
    return %c0_i32, %c0_i32_0 : i32, i32
  }
  func.func @transform_2(%arg0: i32) -> (i32, i32) {
    %c0_i32 = arith.constant 0 : i32
    %c0_i32_0 = arith.constant 0 : i32
    %c0_i32_1 = arith.constant 0 : i32
    return %c0_i32, %c0_i32_0 : i32, i32
  }
  func.func @transform_3(%arg0: i32) -> (i32, i32) {
    %c0_i32 = arith.constant 0 : i32
    %c0_i32_0 = arith.constant 0 : i32
    %c0_i32_1 = arith.constant 0 : i32
    return %c0_i32, %c0_i32_0 : i32, i32
  }
  func.func @transform_4(%arg0: i32) -> (i32, i32) {
    %c0_i32 = arith.constant 0 : i32
    %c0_i32_0 = arith.constant 0 : i32
    %c0_i32_1 = arith.constant 0 : i32
    return %c0_i32, %c0_i32_0 : i32, i32
  }
  func.func @transform_5(%arg0: i32) -> (i32, i32, i32, i32) {
    %c0_i32 = arith.constant 0 : i32
    %c0_i32_0 = arith.constant 0 : i32
    %c0_i32_1 = arith.constant 0 : i32
    %c0_i32_2 = arith.constant 0 : i32
    return %arg0, %c0_i32, %c0_i32_0, %c0_i32_1 : i32, i32, i32, i32
  }
}

</mosaic_0001>

<bundles_post_ra>
// kernel: conv_block_forward.1
= control target key start
LH: loop header
LB: loop body
LE: loop exit
PB: predicated region body
PF: predicated region fallthrough
CT: control target
= control target key end

     0   :  { %s14008_s18 = smov 0   ;;  %s17745_s0 = inlined_call_operand.vmem [shape: bf16[2,16,16,128], index: 0, kind: input, shape index: {}]   ;;  %s17746_s1 = inlined_call_operand.vmem [shape: bf16[1152,128], index: 1, kind: input, shape index: {}]   ;;  %s17747_s2 = inlined_call_operand.vmem [shape: f32[1,128], index: 2, kind: input, shape index: {}]   ;;  %s17748_s3 = inlined_call_operand.vmem [shape: bf16[1152,128], index: 3, kind: input, shape index: {}]   ;;  %s17749_s4 = inlined_call_operand.vmem [shape: f32[1,128], index: 4, kind: input, shape index: {}]   ;;  %s17750_s5 = inlined_call_operand.vmem [shape: f32[2,16,16,128], index: 5, kind: output, shape index: {}]  }
   0x1 LB: > { %s11679_s19 = sadd.s32 4294967295, %s13976_s18   ;;  %p11683_p0 = scmp.ge.s32.totalorder %s13976_s18, 1  ;;  %s13976_s18 = sphi %s14008_s18, %s15_s18  }
   0x2   : > { %p187_p1 = scmp.lt.s32.totalorder %s13976_s18, 3 }
   0x4   : > { %p188_p2 = pnand %p11683_p0, %p187_p1 }
   0x6   : > { %191 = sbr.rel (%p188_p2) target bundleno = 1507 (0x5e3), region = 40 }
   0xb   : > { %v13406_v0 = vld [vmem:[%s17746_s1 + $0x78] sm:$0xff]   ;;  %v13409_v3 = vld [vmem:[%s17746_s1 + $0x70] sm:$0xff]   ;;  %v13413_v7 = vld [vmem:[%s17746_s1 + $0x68] sm:$0xff]   ;;  %p215_p3 = scmp.lt.s32.totalorder %s11679_s19, 1  ;;  %vm589_vm0 = vcmask 1040384   ;;  %vm582_vm1 = vcmask 1043456  }
   0xc   : > { %v13407_v1 = vld [vmem:[%s17746_s1 + $0x38] sm:$0xff]   ;;  %12358 = vmatprep.subr.bf16.mxu0 %v13406_v0  ;;  %v13411_v5 = vld [vmem:[%s17746_s1 + $0x30] sm:$0xff]   ;;  %v13415_v9 = vld [vmem:[%s17746_s1 + $0x28] sm:$0xff]   ;;  %vm258_vm2 = vsmask.f32 256  ;;  %v17769_v36 = vmov 0 }
   0xd   : > { %v13408_v2 = vld [vmem:[%s17746_s1 + $0xf8] sm:$0xff]   ;;  %12359 = vmatpush3.bf16.msra.mxu0 %v13407_v1  ;;  %v13412_v6 = vld [vmem:[%s17746_s1 + $0xf0] sm:$0xff]   ;;  %v13416_v10 = vld [vmem:[%s17746_s1 + $0xe8] sm:$0xff]   ;;  %s17974_s19 = smov (!%p215_p3, %s11679_s19), 1  ;;  %vm259_vm3 = vsmask.f32 4368 }
   0xe   : > { %12470 = vmatprep.subr.bf16.mxu1 %v13408_v2  ;;  %v13410_v4 = vld [vmem:[%s17746_s1 + $0xb8] sm:$0xff]   ;;  %12360 = vmatprep.subr.bf16.mxu0 %v13409_v3  ;;  %v13414_v8 = vld [vmem:[%s17746_s1 + $0xb0] sm:$0xff]   ;;  %v13417_v11 = vld [vmem:[%s17746_s1 + $0x60] sm:$0xff]   ;;  %s12324_s26 = sshll.u32 %s17974_s19, 7  ;;  %v17772_v38 = vmov 0  ;;  %v17775_v43 = vmov 0 }
   0xf   : > { %12471 = vmatpush3.bf16.msra.mxu1 %v13410_v4  ;;  %v13418_v12 = vld [vmem:[%s17746_s1 + $0xa8] sm:$0xff]   ;;  %v13419_v13 = vld [vmem:[%s17746_s1 + $0x20] sm:$0xff]   ;;  %v13421_v15 = vld [vmem:[%s17746_s1 + $0x58] sm:$0xff]   ;;  %s14113_s10 = scalar_lea.vmem %s17745_s0, %s12324_s26  ;;  %vm583_vm6 = vsmask.f32 7938  ;;  %vm1662_vm8 = vcmask 1042432  }
  0x10   : > { %12472 = vmatprep.subr.bf16.mxu1 %v13412_v6  ;;  %v13420_v14 = vld [vmem:[%s17746_s1 + $0xe0] sm:$0xff]   ;;  %v13423_v17 = vld [vmem:[%s17746_s1 + $0x18] sm:$0xff]   ;;  %v13425_v19 = vld [vmem:[%s17746_s1 + $0x50] sm:$0xff]   ;;  %vm1663_vm9 = vcmask 1046532   ;;  %vm1115_vm11 = vsmask.f32 3328 }
  0x11   : > { %12361 = vmatpush3.bf16.msra.mxu0 %v13411_v5  ;;  %v13422_v16 = vld [vmem:[%s17746_s1 + $0xa0] sm:$0xff]   ;;  %v13424_v18 = vld [vmem:[%s17746_s1 + $0xd8] sm:$0xff]   ;;  %v13427_v21 = vld [vmem:[%s17746_s1 + $0x10] sm:$0xff]   ;;  %vm1116_vm12 = vsmask.f32 7440  ;;  %s12325_s27 = sshll.u32 %s17974_s19, 8 }
  0x12   : > { %12362 = vmatprep.subr.bf16.mxu0 %v13413_v7  ;;  %v13426_v20 = vld [vmem:[%s17746_s1 + $0x98] sm:$0xff]   ;;  %v13428_v22 = vld [vmem:[%s17746_s1 + $0xd0] sm:$0xff]   ;;  %v13429_v23 = vld [vmem:[%s17746_s1 + $0x48] sm:$0xff]   ;;  %s17603_s30 = scalar_lea.vmem %s17750_s5, %s12325_s27 }
  0x13   : > { %12473 = vmatpush3.bf16.msra.mxu1 %v13414_v8  ;;  %v13430_v24 = vld [vmem:[%s17746_s1 + $0x90] sm:$0xff]   ;;  %v13431_v25 = vld [vmem:[%s17746_s1 + $0x8] sm:$0xff]   ;;  %v13433_v27 = vld [vmem:[%s17746_s1 + $0x40] sm:$0xff]  }
  0x14   : > { %12474 = vmatprep.subr.bf16.mxu1 %v13416_v10  ;;  %v13432_v26 = vld [vmem:[%s17746_s1 + $0xc8] sm:$0xff]   ;;  %v13435_v29 = vld [vmem:[%s17746_s1] sm:$0xff]   ;;  %vm14124_vm4 = vmand %vm589_vm0, %vm258_vm2 }
  0x15   : > { %12363 = vmatpush3.bf16.msra.mxu0 %v13415_v9  ;;  %v13434_v28 = vld [vmem:[%s17746_s1 + $0x88] sm:$0xff]   ;;  %v13436_v30 = vld [vmem:[%s17746_s1 + $0xc0] sm:$0xff]   ;;  %v17770_v36 = vsel %vm14124_vm4, 4294967295, %v17769_v36  ;;  %vm14131_vm5 = vmor %vm258_vm2, %vm259_vm3 }
  0x16   : > { %12364 = vmatprep.subr.bf16.mxu0 %v13417_v11  ;;  %v228_v31 = vld [vmem:[%s14113_s10 + $0x8] sm:$0xf]  ;;  %v229_v32 = vld [vmem:[%s14113_s10 + $0xc] sm:$0xf]  ;;  %17771 = vst [vmem:[#allocation4_spill] sm:$0xff] %v17770_v36  ;;  %v13439_v37 = vld [vmem:[%s17746_s1 + $0x80] sm:$0xff]  }
  0x17   : > { %12475 = vmatpush3.bf16.msra.mxu1 %v13418_v12  ;;  %v279_v33 = vshrl.u32 %v228_v31, 16  ;;  %v282_v34 = vshll.u32 %v228_v31, 16  ;;  %v287_v35 = vshrl.u32 %v229_v32, 16  ;;  %v17773_v38 = vsel %vm14131_vm5, 4294967295, %v17772_v38  ;;  %v13440_v40 = vld [vmem:[%s17746_s1 + $0x178] sm:$0xff]   ;;  %vm14140_vm7 = vmand %vm582_vm1, %vm583_vm6 }
  0x18   : > { %12476 = vmatprep.subr.bf16.mxu1 %v13420_v14  ;;  %17774 = vst [vmem:[#allocation5_spill] sm:$0xff] %v17773_v38  ;;  %v290_v39 = vshll.u32 %v229_v32, 16  ;;  %v17776_v43 = vsel %vm14140_vm7, 4294967295, %v17775_v43  ;;  %v598_v44 = vld [vmem:[#allocation2 + $0x20] sm:$0x1]  ;;  %vm14167_vm10 = vmand %vm589_vm0, %vm583_vm6  ;;  %v17778_v12 = vmov 0 }
  0x19   : > { %12365 = vmatpush3.bf16.msra.mxu0 %v13419_v13  ;;  %v281_v41 = vrot.slane %v279_v33, 7  ;;  %v289_v42 = vrot.slane %v287_v35, 7  ;;  %17777 = vst [vmem:[#allocation6_spill] sm:$0xff] %v17776_v43  ;;  %v699_v45 = vld [vmem:[#allocation2] sm:$0xf]  ;;  %v17779_v12 = vsel %vm14167_vm10, 4294967295, %v17778_v12  ;;  %vm14184_vm13 = vmor %vm1662_vm8, %vm1663_vm9 }
  0x1a   : > { %12366 = vmatprep.subr.bf16.mxu0 %v13421_v15  ;;  %v703_v46 = vld [vmem:[#allocation2 + $0x8] sm:$0x1]  ;;  %v226_v55 = vld [vmem:[%s14113_s10] sm:$0xf]  ;;  %v227_v56 = vld [vmem:[%s14113_s10 + $0x4] sm:$0xf] }
  0x1b   : > { %12477 = vmatpush3.bf16.msra.mxu1 %v13422_v16  ;;  %v284_v47 = vor.u32 %v282_v34, %v281_v41  ;;  %v285_v48 = vrot.slane %v281_v41, 4  ;;  %v292_v49 = vor.u32 %v290_v39, %v289_v42  ;;  %v294_v50 = vrot.slane %v289_v42, 4  ;;  %v585_v61 = vld [vmem:[#allocation2 + $0xc] sm:$0xf]  ;;  %v594_v62 = vld [vmem:[#allocation2 + $0x18] sm:$0xf]  ;;  %vm14213_vm14 = vmor %vm1115_vm11, %vm1116_vm12 }
  0x1c   : > { %12478 = vmatprep.subr.bf16.mxu1 %v13424_v18  ;;  %v262_v57 = vshrl.u32 %v226_v55, 16  ;;  %v265_v58 = vshll.u32 %v226_v55, 16  ;;  %v270_v59 = vshrl.u32 %v227_v56, 16  ;;  %v273_v60 = vshll.u32 %v227_v56, 16  ;;  %v591_v1 = vld [vmem:[#allocation2 + $0x14] sm:$0x1] }
  0x1d   : > { %12367 = vmatpush3.bf16.msra.mxu0 %v13423_v17  ;;  %v293_v51 = vsel %vm14131_vm5, %v285_v48, %v292_v49  ;;  %v599_v52 = vsel %vm14124_vm4, %v294_v50, %v598_v44  ;;  %v700_v53 = vsel %vm14140_vm7, %v284_v47, %v699_v45  ;;  %v704_v54 = vsel %vm14124_vm4, %v294_v50, %v703_v46  ;;  %v14157_v3 = vld [vmem:[%s14113_s10 + $0x10] sm:$0xf]  ;;  %v14160_v8 = vld [vmem:[%s14113_s10 + $0x14] sm:$0xf]  ;;  %v601_v41 = vld [vmem:[#allocation2 + $0x24] sm:$0xf] }
  0x1e   : > { %12368 = vmatprep.subr.bf16.mxu0 %v13425_v19  ;;  %597 = vst [vmem:[#allocation2 + $0x1c] sm:$0xf] %v293_v51  ;;  %701 = vst [vmem:[#allocation2] sm:$0xf] %v700_v53  ;;  %v264_v63 = vrot.slane %v262_v57, 7  ;;  %v272_v0 = vrot.slane %v270_v59, 7  ;;  %v595_v2 = vsel %vm14140_vm7, %v284_v47, %v594_v62 }
  0x1f   : > { %12479 = vmatpush3.bf16.msra.mxu1 %v13426_v20  ;;  %702 = vst [vmem:[#allocation2 + $0x4] sm:$0xf] %v293_v51  ;;  %705 = vst [vmem:[#allocation2 + $0x8] sm:$0x1] %v704_v54  ;;  %v296_v9 = vshrl.u32 %v14157_v3, 16  ;;  %v299_v10 = vshll.u32 %v14157_v3, 16 }
  0x20   : > { %12480 = vmatprep.subr.bf16.mxu1 %v13428_v22  ;;  %600 = vst [vmem:[#allocation2 + $0x20] sm:$0x1] %v599_v52  ;;  %596 = vst [vmem:[#allocation2 + $0x18] sm:$0xf] %v595_v2  ;;  %v267_v4 = vor.u32 %v265_v58, %v264_v63  ;;  %v268_v5 = vrot.slane %v264_v63, 4  ;;  %v275_v6 = vor.u32 %v273_v60, %v272_v0  ;;  %v277_v7 = vrot.slane %v272_v0, 4 }
  0x21   : > { %12369 = vmatpush3.bf16.msra.mxu0 %v13427_v21  ;;  %v304_v11 = vshrl.u32 %v14160_v8, 16  ;;  %17780 = vst [vmem:[#allocation7_spill] sm:$0xff] %v17779_v12  ;;  %v307_v16 = vshll.u32 %v14160_v8, 16  ;;  %v17781_v31 = vmov 0 }
  0x22   : > { %12370 = vmatprep.subr.bf16.mxu0 %v13429_v23  ;;  %v276_v13 = vsel %vm14131_vm5, %v268_v5, %v275_v6  ;;  %v586_v14 = vsel %vm14140_vm7, %v267_v4, %v585_v61  ;;  %v592_v15 = vsel %vm14124_vm4, %v277_v7, %v591_v1  ;;  %v17782_v31 = vsel %vm14184_vm13, 4294967295, %v17781_v31 }
  0x23   : > { %12481 = vmatpush3.bf16.msra.mxu1 %v13430_v24  ;;  %587 = vst [vmem:[#allocation2 + $0xc] sm:$0xf] %v586_v14  ;;  %588 = vst [vmem:[#allocation2 + $0x10] sm:$0xf] %v276_v13 }
  0x24   : > { %12482 = vmatprep.subr.bf16.mxu1 %v13432_v26  ;;  %593 = vst [vmem:[#allocation2 + $0x14] sm:$0x1] %v592_v15  ;;  %17783 = vst [vmem:[#allocation8_spill] sm:$0xff] %v17782_v31 }
  0x25   : > { %12371 = vmatpush3.bf16.msra.mxu0 %v13431_v25  ;;  %v714_v17 = vld [vmem:[#allocation2] sm:$0x2]  ;;  %v804_v18 = vld [vmem:[#allocation2] sm:$0x1]  ;;  %v1844_v39 = vld [vmem:[#allocation2 + $0x1c] sm:$0xf] }
  0x26   : > { %12372 = vmatprep.subr.bf16.mxu0 %v13433_v27  ;;  %v858_v19 = vld [vmem:[#allocation2 + $0x4] sm:$0x8]  ;;  %v11688_v20 = vrot.slane %v714_v17, 9  ;;  %v949_v22 = vld [vmem:[#allocation2 + $0x8] sm:$0x1] }
  0x27   : > { %12483 = vmatpush3.bf16.msra.mxu1 %v13434_v28  ;;  %v11706_v21 = vrot.slane %v858_v19, 11  ;;  %v1004_v23 = vld [vmem:[#allocation2 + $0x4] sm:$0xf]  ;;  %v1566_v25 = vld [vmem:[#allocation2] sm:$0xe] }
  0x28   : > { %12484 = vmatprep.subr.bf16.mxu1 %v13436_v30  ;;  %1036 = vst [vmem:[#allocation3 + $0x24] sm:$0xf] %v1004_v23  ;;  %v1068_v24 = vld [vmem:[#allocation2 + $0x4] sm:$0xf]  ;;  %v805_v27 = vsel %vm14124_vm4, %v11688_v20, %v804_v18  ;;  %v716_v32 = vld [vmem:[#allocation2 + $0x18] sm:$0x2] }
  0x29   : > { %12373 = vmatpush3.bf16.msra.mxu0 %v13435_v29  ;;  %v1567_v26 = vld [vmem:[#allocation2 + $0x4] sm:$0xf]  ;;  %v950_v28 = vsel %vm14167_vm10, %v11706_v21, %v949_v22  ;;  %v1128_v29 = vshll.u32 %v1068_v24, 16  ;;  %v1132_v30 = vshrl.u32 %v1068_v24, 16  ;;  %v810_v33 = vld [vmem:[#allocation2 + $0x18] sm:$0x1] }
  0x2a   : > { %12582 = vmatprep.subr.bf16.mxu0 %v13440_v40  ;;  %806 = vst [vmem:[#allocation2] sm:$0x1] %v805_v27  ;;  %951 = vst [vmem:[#allocation2 + $0x8] sm:$0x1] %v950_v28  ;;  %v11724_v34 = vrot.slane %v1566_v25, 9  ;;  %v1667_v35 = vrot.slane %v1567_v26, 5 }
  0x2b   : > { %12485 = vmatpush3.bf16.msra.mxu1 %v13439_v37  ;;  %v11690_v37 = vrot.slane %v716_v32, 9  ;;  %v14188_v40 = vrot.slane %v296_v9, 7  ;;  %v14190_v42 = vrot.slane %v1128_v29, 5  ;;  %v1134_v44 = vrot.slane %v1132_v30, 4  ;;  %1876 = vst [vmem:[#allocation3 + $0x78] sm:$0xf] %v1844_v39 }
  0x2c   : > { %v860_v45 = vld [vmem:[#allocation2 + $0x1c] sm:$0x8]  ;;  %v955_v46 = vld [vmem:[#allocation2 + $0x20] sm:$0x1]  ;;  %v1668_v47 = vsel %vm14184_vm13, %v11724_v34, %v1667_v35  ;;  %v1669_v48 = vrot.slane %v1667_v35, 4  ;;  %v17784_v22 = vmov 0 }
  0x2d   : > { %v811_v49 = vsel %vm14124_vm4, %v11690_v37, %v810_v33  ;;  %v11708_v50 = vrot.slane %v860_v45, 11  ;;  %v1008_v51 = vld [vmem:[#allocation2 + $0x1c] sm:$0xf]  ;;  %v1135_v53 = vor.u32 %v1134_v44, %v14190_v42  ;;  %v715_v54 = vld [vmem:[#allocation2 + $0xc] sm:$0x2]  ;;  %v301_v57 = vor.u32 %v299_v10, %v14188_v40 }
  0x2e   : > { %v14196_v52 = vld [vmem:[#allocation2 + $0x1c] sm:$0xf]  ;;  %v807_v55 = vld [vmem:[#allocation2 + $0xc] sm:$0x1]  ;;  %1809 = vst [vmem:[#allocation3 + $0x8] sm:$0xf] %v1668_v47 }
  0x2f   : > { %v1842_v56 = vld [vmem:[#allocation2 + $0x10] sm:$0xf]  ;;  %812 = vst [vmem:[#allocation2 + $0x18] sm:$0x1] %v811_v49  ;;  %1040 = vst [vmem:[#allocation3 + $0xb4] sm:$0xf] %v1008_v51  ;;  %v956_v61 = vsel %vm14167_vm10, %v11708_v50, %v955_v46  ;;  %v602_v3 = vsel %vm14140_vm7, %v301_v57, %v601_v41 }
  0x30   : > { %v11689_v58 = vrot.slane %v715_v54, 9  ;;  %1874 = vst [vmem:[#allocation3 + $0x30] sm:$0xf] %v1842_v56  ;;  %v859_v59 = vld [vmem:[#allocation2 + $0x10] sm:$0x8]  ;;  %v1176_v62 = vshll.u32 %v14196_v52, 16 }
  0x31   : > { %v952_v60 = vld [vmem:[#allocation2 + $0x14] sm:$0x1]  ;;  %v1136_v63 = vrot.slane %v1135_v53, 4  ;;  %v11707_v0 = vrot.slane %v859_v59, 11  ;;  %v1006_v1 = vld [vmem:[#allocation2 + $0x10] sm:$0xf] }
  0x32   : > { %v1071_v2 = vld [vmem:[#allocation2 + $0x10] sm:$0xf]  ;;  %957 = vst [vmem:[#allocation2 + $0x20] sm:$0x1] %v956_v61  ;;  %v808_v4 = vsel %vm14124_vm4, %v11689_v58, %v807_v55  ;;  %1038 = vst [vmem:[#allocation3 + $0x6c] sm:$0xf] %v1006_v1 }
  0x33   : > { %v1152_v5 = vshll.u32 %v1071_v2, 16  ;;  %v1156_v6 = vshrl.u32 %v1071_v2, 16  ;;  %v1569_v7 = vld [vmem:[#allocation2 + $0xc] sm:$0xe]  ;;  %v1570_v9 = vld [vmem:[#allocation2 + $0x10] sm:$0xf]  ;;  %v953_v15 = vsel %vm14167_vm10, %v11707_v0, %v952_v60 }
  0x34   : > { %603 = vst [vmem:[#allocation2 + $0x24] sm:$0xf] %v602_v3  ;;  %v1003_v10 = vld [vmem:[#allocation2] sm:$0xf]  ;;  %v1069_v14 = vld [vmem:[#allocation2 + $0x8] sm:$0x1] }
  0x35   : > { %v1067_v13 = vld [vmem:[#allocation2] sm:$0xf]  ;;  %809 = vst [vmem:[#allocation2 + $0xc] sm:$0x1] %v808_v4  ;;  %1035 = vst [vmem:[#allocation3] sm:$0xf] %v1003_v10 }
  0x36   : > { %v1119_v17 = vshrl.u32 %v1067_v13, 16  ;;  %v1122_v18 = vshll.u32 %v1067_v13, 16  ;;  %v1138_v19 = vshll.u32 %v1069_v14, 16  ;;  %v1568_v20 = vld [vmem:[#allocation2 + $0x8] sm:$0x1]  ;;  %v14209_v21 = vrot.slane %v1152_v5, 5 }
  0x37   : > { %954 = vst [vmem:[#allocation2 + $0x14] sm:$0x1] %v953_v15  ;;  %v17785_v22 = vsel %vm14213_vm14, 4294967295, %v17784_v22  ;;  %v1670_v23 = vrot.slane %v1568_v20, 5  ;;  %v1158_v24 = vrot.slane %v1156_v6, 4  ;;  %v11725_v25 = vrot.slane %v1569_v7, 9 }
  0x38   : > { %17786 = vst [vmem:[#allocation9_spill] sm:$0xff] %v17785_v22  ;;  %v1674_v26 = vrot.slane %v1570_v9, 5  ;;  %v1121_v27 = vrot.slane %v1119_v17, 4  ;;  %v1124_v28 = vrot.slane %v1122_v18, 5  ;;  %v1140_v29 = vrot.slane %v1138_v19, 5 }
  0x39   : > { %v1843_v30 = vld [vmem:[#allocation2 + $0x18] sm:$0xf]  ;;  %v14217_v32 = vrot.slane %v1176_v62, 5  ;;  %v1671_v33 = vsel %vm14184_vm13, %v1669_v48, %v1670_v23  ;;  %v1159_v34 = vor.u32 %v1158_v24, %v14209_v21  ;;  %v1075_v46 = vld [vmem:[#allocation2 + $0x20] sm:$0x1]  ;;  %v1180_v50 = vshrl.u32 %v14196_v52, 16 }
  0x3a   : > { %v1675_v35 = vsel %vm14184_vm13, %v11725_v25, %v1674_v26  ;;  %v1676_v37 = vrot.slane %v1674_v26, 4  ;;  %1875 = vst [vmem:[#allocation3 + $0x54] sm:$0xf] %v1843_v30  ;;  %v1007_v39 = vld [vmem:[#allocation2 + $0x18] sm:$0xf]  ;;  %v1125_v44 = vor.u32 %v1124_v28, %v1121_v27  ;;  %v1141_v45 = vsel %vm14213_vm14, %v1136_v63, %v1140_v29 }
  0x3b   : > { %v1073_v41 = vld [vmem:[#allocation2 + $0x18] sm:$0xf]  ;;  %1810 = vst [vmem:[#allocation3 + $0x2c] sm:$0xf] %v1671_v33  ;;  %1811 = vst [vmem:[#allocation3 + $0x50] sm:$0xf] %v1675_v35 }
  0x3c   : > { %1039 = vst [vmem:[#allocation3 + $0x90] sm:$0xf] %v1007_v39  ;;  %v1167_v47 = vshrl.u32 %v1073_v41, 16  ;;  %v1170_v49 = vshll.u32 %v1073_v41, 16  ;;  %1535 = vst [vmem:[#allocation3 + $0x28] sm:$0xf] %v1141_v45 }
  0x3d   : > { %v1160_v48 = vrot.slane %v1159_v34, 4  ;;  %v1186_v51 = vshll.u32 %v1075_v46, 16  ;;  %v302_v53 = vrot.slane %v14188_v40, 4  ;;  %v1126_v54 = vrot.slane %v1125_v44, 4  ;;  %v1841_v55 = vld [vmem:[#allocation2 + $0xc] sm:$0xf] }
  0x3e   : > { %v1005_v56 = vld [vmem:[#allocation2 + $0xc] sm:$0xf]  ;;  %v1169_v57 = vrot.slane %v1167_v47, 4  ;;  %1873 = vst [vmem:[#allocation3 + $0xc] sm:$0xf] %v1841_v55  ;;  %v1172_v40 = vrot.slane %v1170_v49, 5 }
  0x3f   : > { %1037 = vst [vmem:[#allocation3 + $0x48] sm:$0xf] %v1005_v56  ;;  %v1070_v58 = vld [vmem:[#allocation2 + $0xc] sm:$0xf]  ;;  %v1072_v59 = vld [vmem:[#allocation2 + $0x14] sm:$0x1]  ;;  %v1131_v61 = vsel %vm14213_vm14, %v1126_v54, %v14190_v42 }
  0x40   : > { %v1571_v60 = vld [vmem:[#allocation2 + $0x14] sm:$0x1]  ;;  %v1143_v62 = vshrl.u32 %v1070_v58, 16  ;;  %v1146_v63 = vshll.u32 %v1070_v58, 16  ;;  %v1162_v0 = vshll.u32 %v1072_v59, 16  ;;  %v1182_v2 = vrot.slane %v1180_v50, 4 }
  0x41   : > { %v717_v52 = vld [vmem:[#allocation2 + $0x24] sm:$0x2]  ;;  %1534 = vst [vmem:[#allocation3 + $0x4] sm:$0xf] %v1131_v61  ;;  %v1677_v1 = vrot.slane %v1571_v60, 5  ;;  %v1188_v3 = vrot.slane %v1186_v51, 5  ;;  %v1173_v15 = vor.u32 %v1172_v40, %v1169_v57 }
  0x42   : > { %v1572_v4 = vld [vmem:[#allocation2 + $0x18] sm:$0xe]  ;;  %v605_v5 = vld [vmem:[#allocation2 + $0x2c] sm:$0x1]  ;;  %v1145_v6 = vrot.slane %v1143_v62, 4  ;;  %v1148_v7 = vrot.slane %v1146_v63, 5  ;;  %v1183_v17 = vor.u32 %v1182_v2, %v14217_v32 }
  0x43   : > { %v1164_v9 = vrot.slane %v1162_v0, 5  ;;  %v306_v10 = vrot.slane %v304_v11, 7  ;;  %v813_v42 = vld [vmem:[#allocation2 + $0x24] sm:$0x1]  ;;  %v1573_v13 = vld [vmem:[#allocation2 + $0x1c] sm:$0xf]  ;;  %v1678_v14 = vsel %vm14184_vm13, %v1676_v37, %v1677_v1 }
  0x44   : > { %v11691_v18 = vrot.slane %v717_v52, 9  ;;  %v1574_v19 = vld [vmem:[#allocation2 + $0x20] sm:$0x1]  ;;  %v232_v20 = vld [vmem:[%s14113_s10 + $0x18] sm:$0xf]  ;;  %v1149_v23 = vor.u32 %v1148_v7, %v1145_v6  ;;  %v1174_v27 = vrot.slane %v1173_v15, 4 }
  0x45   : > { %v1165_v24 = vsel %vm14213_vm14, %v1160_v48, %v1164_v9  ;;  %1812 = vst [vmem:[#allocation3 + $0x74] sm:$0xf] %v1678_v14  ;;  %v309_v25 = vor.u32 %v307_v16, %v306_v10  ;;  %v311_v11 = vrot.slane %v306_v10, 4  ;;  %v233_v26 = vld [vmem:[%s14113_s10 + $0x1c] sm:$0xf]  ;;  %v1184_v28 = vrot.slane %v1183_v17, 4 }
  0x46   : > { %1537 = vst [vmem:[#allocation3 + $0x70] sm:$0xf] %v1165_v24  ;;  %v814_v29 = vsel %vm14124_vm4, %v11691_v18, %v813_v42  ;;  %v11726_v30 = vrot.slane %v1572_v4, 9  ;;  %v13442_v33 = vld [vmem:[%s17746_s1 + $0x138] sm:$0xff]   ;;  %v13443_v34 = vld [vmem:[#allocation3 + $0xc] ss:$36 sps:$4 sm:$0xff]   ;;  %v1179_v39 = vsel %vm14213_vm14, %v1174_v27, %v14217_v32 }
  0x47   : > { %v13445_v35 = vld [vmem:[#allocation3 + $0x8] ss:$36 sps:$4 sm:$0xff]   ;;  %v1150_v37 = vrot.slane %v1149_v23, 4  ;;  %v310_v8 = vsel %vm14131_vm5, %v302_v53, %v309_v25  ;;  %815 = vst [vmem:[#allocation2 + $0x24] sm:$0x1] %v814_v29  ;;  %v606_v16 = vsel %vm14124_vm4, %v311_v11, %v605_v5  ;;  %v1189_v41 = vsel %vm14213_vm14, %v1184_v28, %v1188_v3  ;;  %5178 = vmatprep.mubr.bf16.mxu1 %v13443_v34  ;;  %v13454_v32 = vld [vmem:[%s17746_s1 + $0x170] sm:$0xff]  }
  0x48   : > { %604 = vst [vmem:[#allocation2 + $0x28] sm:$0xf] %v310_v8  ;;  %v1681_v44 = vrot.slane %v1573_v13, 5  ;;  %v1684_v45 = vrot.slane %v1574_v19, 5  ;;  %607 = vst [vmem:[#allocation2 + $0x2c] sm:$0x1] %v606_v16  ;;  %5179 = vmatmul.mubr.bf16.vlgmr.msra.gmra.mxu1 %v13445_v35 }
  0x49   : > { %v234_v46 = vld [vmem:[%s14113_s10 + $0x20] sm:$0xf]  ;;  %v13441_v49 = vld [vmem:[#allocation3] ss:$36 sps:$4 sm:$0xff]   ;;  %v1155_v48 = vsel %vm14213_vm14, %v1150_v37, %v14209_v21  ;;  %1538 = vst [vmem:[#allocation3 + $0x94] sm:$0xf] %v1179_v39 }
  0x4a   : > { %v13437_v47 = vld [vmem:[#allocation3 + $0x4] ss:$36 sps:$4 sm:$0xff]   ;;  %1539 = vst [vmem:[#allocation3 + $0xb8] sm:$0xf] %v1189_v41  ;;  %v313_v50 = vshrl.u32 %v232_v20, 16  ;;  %v1682_v51 = vsel %vm14184_vm13, %v11726_v30, %v1681_v44  ;;  %v1683_v53 = vrot.slane %v1681_v44, 4 }
  0x4b   : > { %1536 = vst [vmem:[#allocation3 + $0x4c] sm:$0xf] %v1155_v48  ;;  %v316_v54 = vshll.u32 %v232_v20, 16  ;;  %v321_v55 = vshrl.u32 %v233_v26, 16  ;;  %5017 = vmatprep.mubr.bf16.mxu0 %v13437_v47  ;;  %v13456_v21 = vld [vmem:[%s17746_s1 + $0x130] sm:$0xff]   ;;  %v324_v57 = vshll.u32 %v233_v26, 16 }
  0x4c   : > { %1813 = vst [vmem:[#allocation3 + $0x98] sm:$0xf] %v1682_v51  ;;  %v315_v56 = vrot.slane %v313_v50, 7  ;;  %v608_v58 = vld [vmem:[#allocation2 + $0x30] sm:$0xf]  ;;  %v330_v59 = vshrl.u32 %v234_v46, 16  ;;  %5018 = vmatmul.mubr.bf16.vlgmr.msra.gmra.mxu0 %v13441_v49  ;;  %v1685_v61 = vsel %vm14184_vm13, %v1683_v53, %v1684_v45 }
  0x4d   : > { %v13449_v60 = vld [vmem:[#allocation3 + $0x54] ss:$36 sps:$4 sm:$0xff]   ;;  %v14270_v62 = vrot.slane %v321_v55, 7  ;;  %v615_v0 = vld [vmem:[#allocation2 + $0x3c] sm:$0xf]  ;;  %12583 = vmatpush3.bf16.msra.mxu0 %v13442_v33  ;;  %v333_v4 = vshll.u32 %v234_v46, 16 }
  0x4e   : > { %v13468_v63 = vld [vmem:[%s17746_s1 + $0x168] sm:$0xff]   ;;  %1814 = vst [vmem:[#allocation3 + $0xbc] sm:$0xf] %v1685_v61  ;;  %v318_v1 = vor.u32 %v316_v54, %v315_v56  ;;  %v319_v40 = vrot.slane %v315_v56, 4  ;;  %v1575_v2 = vld [vmem:[#allocation2 + $0x24] sm:$0xe]  ;;  %5186 = vmatprep.mubr.bf16.mxu1 %v13449_v60  ;;  %12584 = vmatprep.subr.bf16.mxu0 %v13454_v32 }
  0x4f   : > { %v13451_v52 = vld [vmem:[#allocation3 + $0x50] ss:$36 sps:$4 sm:$0xff]   ;;  %v14275_v3 = vrot.slane %v330_v59, 7  ;;  %v1845_v5 = vld [vmem:[#allocation2 + $0x24] sm:$0xf]  ;;  %v326_v9 = vor.u32 %v324_v57, %v14270_v62  ;;  %v11727_v34 = vrot.slane %v1575_v2, 9 }
  0x50   : > { %v1009_v6 = vld [vmem:[#allocation2 + $0x24] sm:$0xf]  ;;  %v1846_v10 = vld [vmem:[#allocation2 + $0x28] sm:$0xf]  ;;  %1877 = vst [vmem:[#allocation3 + $0x9c] sm:$0xf] %v1845_v5  ;;  %v609_v14 = vsel %vm14140_vm7, %v318_v1, %v608_v58  ;;  %5187 = vmatmul.mubr.bf16.gmra.mxu1 %v13451_v52 }
  0x51   : > { %v1076_v7 = vld [vmem:[#allocation2 + $0x24] sm:$0xf]  ;;  %v861_v42 = vld [vmem:[#allocation2 + $0x28] sm:$0x8]  ;;  %v958_v13 = vld [vmem:[#allocation2 + $0x2c] sm:$0x1]  ;;  %v335_v18 = vor.u32 %v333_v4, %v14275_v3  ;;  %v327_v24 = vsel %vm14131_vm5, %v319_v40, %v326_v9  ;;  %12585 = vmatpush3.bf16.msra.mxu0 %v13456_v21 }
  0x52   : > { %1041 = vst [vmem:[#allocation3 + $0xd8] sm:$0xf] %v1009_v6  ;;  %v13470_v15 = vld [vmem:[%s17746_s1 + $0x128] sm:$0xff]   ;;  %v235_v17 = vld [vmem:[%s14113_s10 + $0x24] sm:$0xf]  ;;  %v11709_v20 = vrot.slane %v861_v42, 11  ;;  %12586 = vmatprep.subr.bf16.mxu0 %v13468_v63 }
  0x53   : > { %v13452_v19 = vld [vmem:[#allocation3 + $0x94] ss:$36 sps:$4 sm:$0xff]   ;;  %1878 = vst [vmem:[#allocation3 + $0xc0] sm:$0xf] %v1846_v10  ;;  %v1191_v23 = vshrl.u32 %v1076_v7, 16  ;;  %v1194_v26 = vshll.u32 %v1076_v7, 16  ;;  %v616_v28 = vsel %vm14140_vm7, %v335_v18, %v615_v0 }
  0x54   : > { %610 = vst [vmem:[#allocation2 + $0x30] sm:$0xf] %v609_v14  ;;  %v13446_v25 = vld [vmem:[#allocation3 + $0x4c] ss:$36 sps:$4 sm:$0xff]   ;;  %611 = vst [vmem:[#allocation2 + $0x34] sm:$0xf] %v327_v24  ;;  %v959_v29 = vsel %vm14167_vm10, %v11709_v20, %v958_v13 }
  0x55   : > { %v13448_v11 = vld [vmem:[#allocation3 + $0x48] ss:$36 sps:$4 sm:$0xff]   ;;  %v612_v27 = vld [vmem:[#allocation2 + $0x38] sm:$0x1]  ;;  %v1010_v30 = vld [vmem:[#allocation2 + $0x28] sm:$0xf]  ;;  %5025 = vmatprep.mubr.bf16.mxu0 %v13446_v25  ;;  %12587 = vmatpush3.bf16.msra.mxu0 %v13470_v15 }
  0x56   : > { %v1077_v33 = vld [vmem:[#allocation2 + $0x28] sm:$0xf]  ;;  %617 = vst [vmem:[#allocation2 + $0x3c] sm:$0xf] %v616_v28  ;;  %v13482_v35 = vld [vmem:[%s17746_s1 + $0x160] sm:$0xff]   ;;  %v1193_v37 = vrot.slane %v1191_v23, 4  ;;  %5026 = vmatmul.mubr.bf16.gmra.mxu0 %v13448_v11 }
  0x57   : > { %960 = vst [vmem:[#allocation2 + $0x2c] sm:$0x1] %v959_v29  ;;  %1042 = vst [vmem:[#allocation3 + $0xfc] sm:$0xf] %v1010_v30  ;;  %v1196_v8 = vrot.slane %v1194_v26, 5  ;;  %v1200_v16 = vshll.u32 %v1077_v33, 16  ;;  %5033 = vmatprep.mubr.bf16.mxu0 %v13452_v19  ;;  %12588 = vmatprep.subr.bf16.mxu0 %v13482_v35 }
  0x58   : > { %v1204_v39 = vshrl.u32 %v1077_v33, 16  ;;  %v1576_v41 = vld [vmem:[#allocation2 + $0x28] sm:$0xf]  ;;  %v328_v44 = vrot.slane %v14270_v62, 4  ;;  %v336_v46 = vrot.slane %v14275_v3, 4  ;;  %v338_v47 = vshrl.u32 %v235_v17, 16 }
  0x59   : > { %v1688_v45 = vrot.slane %v1576_v41, 5  ;;  %v1197_v49 = vor.u32 %v1196_v8, %v1193_v37  ;;  %v1202_v48 = vrot.slane %v1200_v16, 5  ;;  %v341_v32 = vshll.u32 %v235_v17, 16  ;;  %v13484_v51 = vld [vmem:[%s17746_s1 + $0x120] sm:$0xff]   ;;  %v13455_v53 = vld [vmem:[#allocation3 + $0x90] ss:$36 sps:$4 sm:$0xff]  }
  0x5a   : > { %v1206_v50 = vrot.slane %v1204_v39, 4  ;;  %v613_v21 = vsel %vm14124_vm4, %v328_v44, %v612_v27  ;;  %v340_v56 = vrot.slane %v338_v47, 7  ;;  %v13496_v57 = vld [vmem:[%s17746_s1 + $0x158] sm:$0xff]   ;;  %v13459_v59 = vld [vmem:[#allocation3 + $0x98] ss:$36 sps:$4 sm:$0xff]   ;;  %12589 = vmatpush3.bf16.msra.mxu0 %v13484_v51 }
  0x5b   : > { %v1689_v54 = vsel %vm14184_vm13, %v11727_v34, %v1688_v45  ;;  %v1690_v55 = vrot.slane %v1688_v45, 4  ;;  %v13457_v58 = vld [vmem:[#allocation3 + $0x9c] ss:$36 sps:$4 sm:$0xff]   ;;  %v1198_v60 = vrot.slane %v1197_v49, 4  ;;  %614 = vst [vmem:[#allocation2 + $0x38] sm:$0x1] %v613_v21  ;;  %12590 = vmatprep.subr.bf16.mxu0 %v13496_v57 }
  0x5c   : > { %v1207_v61 = vor.u32 %v1206_v50, %v1202_v48  ;;  %1815 = vst [vmem:[#allocation3 + $0xe0] sm:$0xf] %v1689_v54  ;;  %v619_v62 = vld [vmem:[#allocation2 + $0x44] sm:$0x1]  ;;  %v13498_v63 = vld [vmem:[%s17746_s1 + $0x118] sm:$0xff]   ;;  %v343_v40 = vor.u32 %v341_v32, %v340_v56  ;;  %5194 = vmatprep.mubr.bf16.mxu1 %v13457_v58  ;;  %v345_v14 = vrot.slane %v340_v56, 4 }
  0x5d   : > { %v718_v0 = vld [vmem:[#allocation2 + $0x30] sm:$0x2]  ;;  %v816_v52 = vld [vmem:[#allocation2 + $0x30] sm:$0x1]  ;;  %v1848_v1 = vld [vmem:[#allocation2 + $0x34] sm:$0xf]  ;;  %v1203_v3 = vsel %vm14213_vm14, %v1198_v60, %v1202_v48  ;;  %5195 = vmatmul.mubr.bf16.gmra.mxu1 %v13459_v59 }
  0x5e   : > { %v14310_v2 = vld [vmem:[%s14113_s10 + $0x28] sm:$0xf]  ;;  %v1208_v4 = vrot.slane %v1207_v61, 4  ;;  %v11692_v5 = vrot.slane %v718_v0, 9  ;;  %1880 = vst [vmem:[#allocation3 + $0x108] sm:$0xf] %v1848_v1  ;;  %v344_v13 = vsel %vm14131_vm5, %v336_v46, %v343_v40  ;;  %5034 = vmatmul.mubr.bf16.gmra.mxu0 %v13455_v53  ;;  %v620_v27 = vsel %vm14124_vm4, %v345_v14, %v619_v62 }
  0x5f   : > { %v862_v6 = vld [vmem:[#allocation2 + $0x34] sm:$0x8]  ;;  %v1078_v9 = vld [vmem:[#allocation2 + $0x2c] sm:$0x1]  ;;  %1540 = vst [vmem:[#allocation3 + $0xdc] sm:$0xf] %v1203_v3  ;;  %12591 = vmatpush3.bf16.msra.mxu0 %v13498_v63 }
  0x60   : > { %v1012_v7 = vld [vmem:[#allocation2 + $0x34] sm:$0xf]  ;;  %v1577_v10 = vld [vmem:[#allocation2 + $0x2c] sm:$0x1]  ;;  %v11710_v42 = vrot.slane %v862_v6, 11  ;;  %v1210_v15 = vshll.u32 %v1078_v9, 16  ;;  %v817_v17 = vsel %vm14124_vm4, %v11692_v5, %v816_v52 }
  0x61   : > { %1044 = vst [vmem:[#allocation3 + $0x144] sm:$0xf] %v1012_v7  ;;  %v1691_v18 = vrot.slane %v1577_v10, 5  ;;  %v1080_v19 = vld [vmem:[#allocation2 + $0x34] sm:$0xf]  ;;  %v347_v35 = vshrl.u32 %v14310_v2, 16 }
  0x62   : > { %618 = vst [vmem:[#allocation2 + $0x40] sm:$0xf] %v344_v13  ;;  %v719_v20 = vld [vmem:[#allocation2 + $0x3c] sm:$0x2]  ;;  %v237_v23 = vld [vmem:[%s14113_s10 + $0x2c] sm:$0xf] }
  0x63   : > { %818 = vst [vmem:[#allocation2 + $0x30] sm:$0x1] %v817_v17  ;;  %v1224_v24 = vshll.u32 %v1080_v19, 16  ;;  %v1228_v25 = vshrl.u32 %v1080_v19, 16  ;;  %v11693_v11 = vrot.slane %v719_v20, 9  ;;  %v13510_v28 = vld [vmem:[%s17746_s1 + $0x150] sm:$0xff]   ;;  %v1692_v30 = vsel %vm14184_vm13, %v1690_v55, %v1691_v18 }
  0x64   : > { %v819_v26 = vld [vmem:[#allocation2 + $0x3c] sm:$0x1]  ;;  %v1212_v29 = vrot.slane %v1210_v15, 5  ;;  %v1578_v33 = vld [vmem:[#allocation2 + $0x30] sm:$0xe]  ;;  %12592 = vmatprep.subr.bf16.mxu0 %v13510_v28  ;;  %v349_v49 = vrot.slane %v347_v35, 7 }
  0x65   : > { %v1579_v34 = vld [vmem:[#allocation2 + $0x34] sm:$0xf]  ;;  %621 = vst [vmem:[#allocation2 + $0x44] sm:$0x1] %v620_v27  ;;  %1816 = vst [vmem:[#allocation3 + $0x104] sm:$0xf] %v1692_v30  ;;  %v820_v39 = vsel %vm14124_vm4, %v11693_v11, %v819_v26 }
  0x66   : > { %v961_v37 = vld [vmem:[#allocation2 + $0x38] sm:$0x1]  ;;  %v14327_v8 = vrot.slane %v1224_v24, 5  ;;  %v1230_v16 = vrot.slane %v1228_v25, 4  ;;  %v11728_v41 = vrot.slane %v1578_v33, 9  ;;  %v13512_v44 = vld [vmem:[%s17746_s1 + $0x110] sm:$0xff]   ;;  %v1213_v45 = vsel %vm14213_vm14, %v1208_v4, %v1212_v29 }
  0x67   : > { %v962_v46 = vsel %vm14167_vm10, %v11710_v42, %v961_v37  ;;  %821 = vst [vmem:[#allocation2 + $0x3c] sm:$0x1] %v820_v39  ;;  %v1695_v47 = vrot.slane %v1579_v34, 5  ;;  %v14338_v48 = vld [vmem:[#allocation2 + $0x3c] sm:$0xe]  ;;  %v350_v32 = vshll.u32 %v14310_v2, 16  ;;  %12593 = vmatpush3.bf16.msra.mxu0 %v13512_v44 }
  0x68   : > { %1541 = vst [vmem:[#allocation3 + $0x100] sm:$0xf] %v1213_v45  ;;  %963 = vst [vmem:[#allocation2 + $0x38] sm:$0x1] %v962_v46  ;;  %v1231_v50 = vor.u32 %v1230_v16, %v14327_v8  ;;  %v355_v51 = vshrl.u32 %v237_v23, 16  ;;  %v358_v53 = vshll.u32 %v237_v23, 16 }
  0x69   : > { %v622_v54 = vld [vmem:[#allocation2 + $0x48] sm:$0xf]  ;;  %v1696_v55 = vsel %vm14184_vm13, %v11728_v41, %v1695_v47  ;;  %v14344_v21 = vrot.slane %v1695_v47, 4  ;;  %v353_v56 = vrot.slane %v349_v49, 4  ;;  %v11729_v57 = vrot.slane %v14338_v48, 9 }
  0x6a   : > { %v14347_v58 = vrot.slane %v1231_v50, 4  ;;  %1817 = vst [vmem:[#allocation3 + $0x128] sm:$0xf] %v1696_v55  ;;  %v1850_v59 = vld [vmem:[#allocation2 + $0x40] sm:$0xf]  ;;  %v352_v61 = vor.u32 %v350_v32, %v349_v49  ;;  %v357_v62 = vrot.slane %v355_v51, 7 }
  0x6b   : > { %v863_v60 = vld [vmem:[#allocation2 + $0x40] sm:$0x8]  ;;  %v626_v63 = vld [vmem:[#allocation2 + $0x50] sm:$0x1]  ;;  %1882 = vst [vmem:[#allocation3 + $0x150] sm:$0xf] %v1850_v59 }
  0x6c   : > { %v1847_v0 = vld [vmem:[#allocation2 + $0x30] sm:$0xf]  ;;  %v11711_v3 = vrot.slane %v863_v60, 11  ;;  %v964_v4 = vld [vmem:[#allocation2 + $0x44] sm:$0x1]  ;;  %v360_v5 = vor.u32 %v358_v53, %v357_v62  ;;  %v13524_v6 = vld [vmem:[%s17746_s1 + $0x148] sm:$0xff]   ;;  %v623_v42 = vsel %vm14140_vm7, %v352_v61, %v622_v54 }
  0x6d   : > { %v1011_v52 = vld [vmem:[#allocation2 + $0x30] sm:$0xf]  ;;  %1879 = vst [vmem:[#allocation3 + $0xe4] sm:$0xf] %v1847_v0  ;;  %v1014_v7 = vld [vmem:[#allocation2 + $0x40] sm:$0xf]  ;;  %12594 = vmatprep.subr.bf16.mxu0 %v13524_v6 }
  0x6e   : > { %v1079_v1 = vld [vmem:[#allocation2 + $0x30] sm:$0xf]  ;;  %1043 = vst [vmem:[#allocation3 + $0x120] sm:$0xf] %v1011_v52  ;;  %v1083_v9 = vld [vmem:[#allocation2 + $0x40] sm:$0xf]  ;;  %v965_v17 = vsel %vm14167_vm10, %v11711_v3, %v964_v4  ;;  %v361_v19 = vsel %vm14131_vm5, %v353_v56, %v360_v5 }
  0x6f   : > { %v1215_v40 = vshrl.u32 %v1079_v1, 16  ;;  %v1218_v2 = vshll.u32 %v1079_v1, 16  ;;  %v362_v10 = vrot.slane %v357_v62, 4  ;;  %v1849_v15 = vld [vmem:[#allocation2 + $0x3c] sm:$0xf]  ;;  %v1248_v24 = vshll.u32 %v1083_v9, 16 }
  0x70   : > { %v1013_v18 = vld [vmem:[#allocation2 + $0x3c] sm:$0xf]  ;;  %1046 = vst [vmem:[#allocation3 + $0x18c] sm:$0xf] %v1014_v7  ;;  %624 = vst [vmem:[#allocation2 + $0x48] sm:$0xf] %v623_v42 }
  0x71   : > { %v1217_v13 = vrot.slane %v1215_v40, 4  ;;  %v1220_v14 = vrot.slane %v1218_v2, 5  ;;  %v13460_v20 = vld [vmem:[#allocation3 + $0xdc] ss:$36 sps:$4 sm:$0xff]   ;;  %1881 = vst [vmem:[#allocation3 + $0x12c] sm:$0xf] %v1849_v15  ;;  %v627_v25 = vsel %vm14124_vm4, %v362_v10, %v626_v63 }
  0x72   : > { %v13462_v23 = vld [vmem:[#allocation3 + $0xd8] ss:$36 sps:$4 sm:$0xff]   ;;  %966 = vst [vmem:[#allocation2 + $0x44] sm:$0x1] %v965_v17  ;;  %1045 = vst [vmem:[#allocation3 + $0x168] sm:$0xf] %v1013_v18  ;;  %5041 = vmatprep.mubr.bf16.mxu0 %v13460_v20 }
  0x73   : > { %625 = vst [vmem:[#allocation2 + $0x4c] sm:$0xf] %v361_v19  ;;  %v1081_v11 = vld [vmem:[#allocation2 + $0x38] sm:$0x1]  ;;  %v1221_v26 = vor.u32 %v1220_v14, %v1217_v13  ;;  %v1082_v28 = vld [vmem:[#allocation2 + $0x3c] sm:$0xf]  ;;  %5042 = vmatmul.mubr.bf16.gmra.mxu0 %v13462_v23 }
  0x74   : > { %v1580_v27 = vld [vmem:[#allocation2 + $0x38] sm:$0x1]  ;;  %628 = vst [vmem:[#allocation2 + $0x50] sm:$0x1] %v627_v25  ;;  %v1234_v29 = vshll.u32 %v1081_v11, 16  ;;  %v1239_v33 = vshrl.u32 %v1082_v28, 16 }
  0x75   : > { %v1698_v30 = vrot.slane %v1580_v27, 5  ;;  %v1242_v34 = vshll.u32 %v1082_v28, 16  ;;  %v1582_v35 = vld [vmem:[#allocation2 + $0x40] sm:$0xf]  ;;  %v1222_v37 = vrot.slane %v1221_v26, 4  ;;  %v1250_v16 = vrot.slane %v1248_v24, 5 }
  0x76   : > { %v1252_v39 = vshrl.u32 %v1083_v9, 16  ;;  %v1702_v41 = vrot.slane %v1582_v35, 5  ;;  %v13463_v44 = vld [vmem:[#allocation3 + $0xe4] ss:$36 sps:$4 sm:$0xff]   ;;  %v1236_v46 = vrot.slane %v1234_v29, 5  ;;  %v1241_v50 = vrot.slane %v1239_v33, 4 }
  0x77   : > { %v13465_v45 = vld [vmem:[#allocation3 + $0xe0] ss:$36 sps:$4 sm:$0xff]   ;;  %v1699_v47 = vsel %vm14184_vm13, %v14344_v21, %v1698_v30  ;;  %v1227_v49 = vsel %vm14213_vm14, %v1222_v37, %v14327_v8  ;;  %v1244_v32 = vrot.slane %v1242_v34, 5  ;;  %v13526_v53 = vld [vmem:[%s17746_s1 + $0x108] sm:$0xff]   ;;  %5202 = vmatprep.mubr.bf16.mxu1 %v13463_v44  ;;  %v13532_v42 = vld [vmem:[%s17746_s1 + $0x1f0] sm:$0xff]  }
  0x78   : > { %1818 = vst [vmem:[#allocation3 + $0x14c] sm:$0xf] %v1699_v47  ;;  %v1254_v51 = vrot.slane %v1252_v39, 4  ;;  %v1237_v54 = vsel %vm14213_vm14, %v14347_v58, %v1236_v46  ;;  %1542 = vst [vmem:[#allocation3 + $0x124] sm:$0xf] %v1227_v49  ;;  %v1703_v8 = vsel %vm14184_vm13, %v11729_v57, %v1702_v41  ;;  %v1704_v56 = vrot.slane %v1702_v41, 4  ;;  %5203 = vmatmul.mubr.bf16.gmra.mxu1 %v13465_v45 }
  0x79   : > { %v720_v55 = vld [vmem:[#allocation2 + $0x48] sm:$0x2]  ;;  %v822_v21 = vld [vmem:[#allocation2 + $0x48] sm:$0x1]  ;;  %v13530_v59 = vld [vmem:[%s17746_s1 + $0x1f8] sm:$0xff]   ;;  %v1245_v61 = vor.u32 %v1244_v32, %v1241_v50  ;;  %12595 = vmatpush3.bf16.msra.mxu0 %v13526_v53 }
  0x7a   : > { %1543 = vst [vmem:[#allocation3 + $0x148] sm:$0xf] %v1237_v54  ;;  %v1084_v60 = vld [vmem:[#allocation2 + $0x44] sm:$0x1]  ;;  %v1255_v62 = vor.u32 %v1254_v51, %v1250_v16  ;;  %v11694_v63 = vrot.slane %v720_v55, 9  ;;  %12694 = vmatprep.subr.bf16.mxu1 %v13530_v59  ;;  %v13531_v5 = vld [vmem:[%s17746_s1 + $0x1b8] sm:$0xff]  }
  0x7b   : > { %v1583_v58 = vld [vmem:[#allocation2 + $0x44] sm:$0x1]  ;;  %1819 = vst [vmem:[#allocation3 + $0x170] sm:$0xf] %v1703_v8  ;;  %v1258_v0 = vshll.u32 %v1084_v60, 16  ;;  %v1246_v57 = vrot.slane %v1245_v61, 4  ;;  %12695 = vmatpush3.bf16.msra.mxu1 %v13531_v5 }
  0x7c   : > { %v1705_v52 = vrot.slane %v1583_v58, 5  ;;  %v1852_v48 = vld [vmem:[#allocation2 + $0x4c] sm:$0xf]  ;;  %v1256_v40 = vrot.slane %v1255_v62, 4  ;;  %v823_v2 = vsel %vm14124_vm4, %v11694_v63, %v822_v21  ;;  %v967_v4 = vld [vmem:[#allocation2 + $0x50] sm:$0x1]  ;;  %12696 = vmatprep.subr.bf16.mxu1 %v13532_v42 }
  0x7d   : > { %v864_v1 = vld [vmem:[#allocation2 + $0x4c] sm:$0x8]  ;;  %1884 = vst [vmem:[#allocation3 + $0x198] sm:$0xf] %v1852_v48  ;;  %v1260_v6 = vrot.slane %v1258_v0, 5  ;;  %v1251_v13 = vsel %vm14213_vm14, %v1246_v57, %v1250_v16  ;;  %v13535_v29 = vld [vmem:[%s17746_s1 + $0x1b0] sm:$0xff]  }
  0x7e   : > { %v11712_v3 = vrot.slane %v864_v1, 11  ;;  %824 = vst [vmem:[#allocation2 + $0x48] sm:$0x1] %v823_v2  ;;  %v1706_v7 = vsel %vm14184_vm13, %v1704_v56, %v1705_v52  ;;  %v1016_v9 = vld [vmem:[#allocation2 + $0x4c] sm:$0xf] }
  0x7f   : > { %v1086_v10 = vld [vmem:[#allocation2 + $0x4c] sm:$0xf]  ;;  %1820 = vst [vmem:[#allocation3 + $0x194] sm:$0xf] %v1706_v7  ;;  %1048 = vst [vmem:[#allocation3 + $0x1d4] sm:$0xf] %v1016_v9  ;;  %v1261_v24 = vsel %vm14213_vm14, %v1256_v40, %v1260_v6  ;;  %12697 = vmatpush3.bf16.msra.mxu1 %v13535_v29 }
  0x80   : > { %v968_v14 = vsel %vm14167_vm10, %v11712_v3, %v967_v4  ;;  %v1272_v15 = vshll.u32 %v1086_v10, 16  ;;  %v1276_v17 = vshrl.u32 %v1086_v10, 16  ;;  %v238_v18 = vld [vmem:[%s14113_s10 + $0x30] sm:$0xf]  ;;  %v239_v19 = vld [vmem:[%s14113_s10 + $0x34] sm:$0xf] }
  0x81   : > { %v13471_v20 = vld [vmem:[#allocation3 + $0x12c] ss:$36 sps:$4 sm:$0xff]   ;;  %1544 = vst [vmem:[#allocation3 + $0x16c] sm:$0xf] %v1251_v13  ;;  %969 = vst [vmem:[#allocation2 + $0x50] sm:$0x1] %v968_v14 }
  0x82   : > { %v13473_v23 = vld [vmem:[#allocation3 + $0x128] ss:$36 sps:$4 sm:$0xff]   ;;  %v364_v25 = vshrl.u32 %v238_v18, 16  ;;  %1545 = vst [vmem:[#allocation3 + $0x190] sm:$0xf] %v1261_v24  ;;  %v14397_v11 = vrot.slane %v1272_v15, 5  ;;  %5210 = vmatprep.mubr.bf16.mxu1 %v13471_v20 }
  0x83   : > { %v1278_v26 = vrot.slane %v1276_v17, 4  ;;  %v367_v27 = vshll.u32 %v238_v18, 16  ;;  %v372_v28 = vshrl.u32 %v239_v19, 16  ;;  %v13466_v30 = vld [vmem:[#allocation3 + $0x124] ss:$36 sps:$4 sm:$0xff]   ;;  %5211 = vmatmul.mubr.bf16.gmra.mxu1 %v13473_v23  ;;  %v375_v16 = vshll.u32 %v239_v19, 16 }
  0x84   : > { %v13469_v33 = vld [vmem:[#allocation3 + $0x120] ss:$36 sps:$4 sm:$0xff]   ;;  %v366_v34 = vrot.slane %v364_v25, 7  ;;  %v629_v39 = vld [vmem:[#allocation2 + $0x54] sm:$0xf]  ;;  %5049 = vmatprep.mubr.bf16.mxu0 %v13466_v30  ;;  %v13540_v56 = vld [vmem:[%s17746_s1 + $0x1e8] sm:$0xff]  }
  0x85   : > { %v1279_v35 = vor.u32 %v1278_v26, %v14397_v11  ;;  %v374_v37 = vrot.slane %v372_v28, 7  ;;  %v1584_v41 = vld [vmem:[#allocation2 + $0x48] sm:$0xe]  ;;  %v1585_v46 = vld [vmem:[#allocation2 + $0x4c] sm:$0xf]  ;;  %5050 = vmatmul.mubr.bf16.gmra.mxu0 %v13469_v33  ;;  %12698 = vmatprep.subr.bf16.mxu1 %v13540_v56  ;;  %v13542_v10 = vld [vmem:[%s17746_s1 + $0x1e0] sm:$0xff]  }
  0x86   : > { %v369_v44 = vor.u32 %v367_v27, %v366_v34  ;;  %v370_v45 = vrot.slane %v366_v34, 4  ;;  %v11730_v47 = vrot.slane %v1584_v41, 9  ;;  %v633_v49 = vld [vmem:[#allocation2 + $0x5c] sm:$0x1]  ;;  %v1851_v50 = vld [vmem:[#allocation2 + $0x48] sm:$0xf] }
  0x87   : > { %v1015_v32 = vld [vmem:[#allocation2 + $0x48] sm:$0xf]  ;;  %v377_v53 = vor.u32 %v375_v16, %v374_v37  ;;  %1883 = vst [vmem:[#allocation3 + $0x174] sm:$0xf] %v1851_v50  ;;  %v1280_v21 = vrot.slane %v1279_v35, 4  ;;  %v379_v8 = vrot.slane %v374_v37, 4 }
  0x88   : > { %v1085_v51 = vld [vmem:[#allocation2 + $0x48] sm:$0xf]  ;;  %1047 = vst [vmem:[#allocation3 + $0x1b0] sm:$0xf] %v1015_v32  ;;  %v1087_v59 = vld [vmem:[#allocation2 + $0x50] sm:$0x1]  ;;  %v630_v61 = vsel %vm14140_vm7, %v369_v44, %v629_v39 }
  0x89   : > { %v1263_v54 = vshrl.u32 %v1085_v51, 16  ;;  %v1266_v55 = vshll.u32 %v1085_v51, 16  ;;  %v378_v60 = vsel %vm14131_vm5, %v370_v45, %v377_v53  ;;  %v1586_v62 = vld [vmem:[#allocation2 + $0x50] sm:$0x1]  ;;  %v1709_v63 = vrot.slane %v1585_v46, 5  ;;  %v13541_v4 = vld [vmem:[%s17746_s1 + $0x1a8] sm:$0xff]  }
  0x8a   : > { %v13474_v58 = vld [vmem:[#allocation3 + $0x16c] ss:$36 sps:$4 sm:$0xff]   ;;  %631 = vst [vmem:[#allocation2 + $0x54] sm:$0xf] %v630_v61  ;;  %632 = vst [vmem:[#allocation2 + $0x58] sm:$0xf] %v378_v60  ;;  %v634_v48 = vsel %vm14124_vm4, %v379_v8, %v633_v49  ;;  %12699 = vmatpush3.bf16.msra.mxu1 %v13541_v4 }
  0x8b   : > { %v13476_v0 = vld [vmem:[#allocation3 + $0x168] ss:$36 sps:$4 sm:$0xff]   ;;  %v1265_v52 = vrot.slane %v1263_v54, 4  ;;  %v1268_v1 = vrot.slane %v1266_v55, 5  ;;  %v1282_v57 = vshll.u32 %v1087_v59, 16  ;;  %v1710_v40 = vsel %vm14184_vm13, %v11730_v47, %v1709_v63  ;;  %5057 = vmatprep.mubr.bf16.mxu0 %v13474_v58  ;;  %12700 = vmatprep.subr.bf16.mxu1 %v13542_v10 }
  0x8c   : > { %v1711_v2 = vrot.slane %v1709_v63, 4  ;;  %635 = vst [vmem:[#allocation2 + $0x5c] sm:$0x1] %v634_v48  ;;  %v240_v3 = vld [vmem:[%s14113_s10 + $0x38] sm:$0xf]  ;;  %v1712_v5 = vrot.slane %v1586_v62, 5 }
  0x8d   : > { %1821 = vst [vmem:[#allocation3 + $0x1b8] sm:$0xf] %v1710_v40  ;;  %v241_v6 = vld [vmem:[%s14113_s10 + $0x3c] sm:$0xf]  ;;  %v381_v7 = vshrl.u32 %v240_v3, 16  ;;  %v384_v9 = vshll.u32 %v240_v3, 16  ;;  %v1269_v42 = vor.u32 %v1268_v1, %v1265_v52  ;;  %5058 = vmatmul.mubr.bf16.gmra.mxu0 %v13476_v0 }
  0x8e   : > { %v1284_v13 = vrot.slane %v1282_v57, 5  ;;  %v389_v14 = vshrl.u32 %v241_v6, 16  ;;  %v1713_v15 = vsel %vm14184_vm13, %v1711_v2, %v1712_v5  ;;  %v392_v18 = vshll.u32 %v241_v6, 16  ;;  %v636_v19 = vld [vmem:[#allocation2 + $0x60] sm:$0xf] }
  0x8f   : > { %v383_v17 = vrot.slane %v381_v7, 7  ;;  %v13477_v20 = vld [vmem:[#allocation3 + $0x174] ss:$36 sps:$4 sm:$0xff]   ;;  %v1270_v24 = vrot.slane %v1269_v42, 4  ;;  %1822 = vst [vmem:[#allocation3 + $0x1dc] sm:$0xf] %v1713_v15 }
  0x90   : > { %v13479_v23 = vld [vmem:[#allocation3 + $0x170] ss:$36 sps:$4 sm:$0xff]   ;;  %v1285_v25 = vsel %vm14213_vm14, %v1280_v21, %v1284_v13  ;;  %v391_v28 = vrot.slane %v389_v14, 7  ;;  %5218 = vmatprep.mubr.bf16.mxu1 %v13477_v20  ;;  %v242_v60 = vld [vmem:[%s14113_s10 + $0x40] sm:$0xf] }
  0x91   : > { %1547 = vst [vmem:[#allocation3 + $0x1d8] sm:$0xf] %v1285_v25  ;;  %v386_v26 = vor.u32 %v384_v9, %v383_v17  ;;  %v387_v27 = vrot.slane %v383_v17, 4  ;;  %v640_v29 = vld [vmem:[#allocation2 + $0x68] sm:$0x1]  ;;  %v1275_v30 = vsel %vm14213_vm14, %v1270_v24, %v14397_v11  ;;  %5219 = vmatmul.mubr.bf16.gmra.mxu1 %v13479_v23  ;;  %v13545_v11 = vld [vmem:[%s17746_s1 + $0x140] sm:$0xff]  }
  0x92   : > { %v721_v33 = vld [vmem:[#allocation2 + $0x54] sm:$0x2]  ;;  %v825_v34 = vld [vmem:[#allocation2 + $0x54] sm:$0x1]  ;;  %v1854_v35 = vld [vmem:[#allocation2 + $0x58] sm:$0xf]  ;;  %v394_v41 = vor.u32 %v392_v18, %v391_v28  ;;  %12596 = vmatprep.subr.bf16.mxu0 %v13545_v11 }
  0x93   : > { %1546 = vst [vmem:[#allocation3 + $0x1b4] sm:$0xf] %v1275_v30  ;;  %v11695_v37 = vrot.slane %v721_v33, 9  ;;  %1886 = vst [vmem:[#allocation3 + $0x1e0] sm:$0xf] %v1854_v35  ;;  %v396_v44 = vrot.slane %v391_v28, 4  ;;  %v637_v45 = vsel %vm14140_vm7, %v386_v26, %v636_v19 }
  0x94   : > { %v865_v16 = vld [vmem:[#allocation2 + $0x58] sm:$0x8]  ;;  %v970_v39 = vld [vmem:[#allocation2 + $0x5c] sm:$0x1]  ;;  %638 = vst [vmem:[#allocation2 + $0x60] sm:$0xf] %v637_v45  ;;  %v395_v53 = vsel %vm14131_vm5, %v387_v27, %v394_v41 }
  0x95   : > { %v11713_v46 = vrot.slane %v865_v16, 11  ;;  %v1018_v47 = vld [vmem:[#allocation2 + $0x58] sm:$0xf]  ;;  %v826_v50 = vsel %vm14124_vm4, %v11695_v37, %v825_v34  ;;  %v1587_v54 = vld [vmem:[#allocation2 + $0x54] sm:$0xe]  ;;  %v641_v59 = vsel %vm14124_vm4, %v396_v44, %v640_v29  ;;  %v398_v58 = vshrl.u32 %v242_v60, 16 }
  0x96   : > { %v1089_v49 = vld [vmem:[#allocation2 + $0x58] sm:$0xf]  ;;  %1050 = vst [vmem:[#allocation3 + $0x21c] sm:$0xf] %v1018_v47  ;;  %827 = vst [vmem:[#allocation2 + $0x54] sm:$0x1] %v826_v50 }
  0x97   : > { %v1296_v32 = vshll.u32 %v1089_v49, 16  ;;  %v1300_v51 = vshrl.u32 %v1089_v49, 16  ;;  %v1588_v55 = vld [vmem:[#allocation2 + $0x58] sm:$0xf]  ;;  %v971_v21 = vsel %vm14167_vm10, %v11713_v46, %v970_v39  ;;  %639 = vst [vmem:[#allocation2 + $0x64] sm:$0xf] %v395_v53 }
  0x98   : > { %v11731_v8 = vrot.slane %v1587_v54, 9  ;;  %v1716_v56 = vrot.slane %v1588_v55, 5  ;;  %972 = vst [vmem:[#allocation2 + $0x5c] sm:$0x1] %v971_v21  ;;  %642 = vst [vmem:[#allocation2 + $0x68] sm:$0x1] %v641_v59 }
  0x99   : > { %v14443_v61 = vrot.slane %v1296_v32, 5  ;;  %v1302_v62 = vrot.slane %v1300_v51, 4  ;;  %v243_v63 = vld [vmem:[%s14113_s10 + $0x44] sm:$0xf]  ;;  %v401_v0 = vshll.u32 %v242_v60, 16  ;;  %v400_v2 = vrot.slane %v398_v58, 7 }
  0x9a   : > { %v1717_v52 = vsel %vm14184_vm13, %v11731_v8, %v1716_v56  ;;  %v406_v48 = vshrl.u32 %v243_v63, 16  ;;  %v409_v1 = vshll.u32 %v243_v63, 16  ;;  %v1718_v40 = vrot.slane %v1716_v56, 4  ;;  %v643_v3 = vld [vmem:[#allocation2 + $0x6c] sm:$0xf]  ;;  %v13546_v4 = vld [vmem:[%s17746_s1 + $0x1a0] sm:$0xff]  }
  0x9b   : > { %v1303_v57 = vor.u32 %v1302_v62, %v14443_v61  ;;  %1823 = vst [vmem:[#allocation3 + $0x200] sm:$0xf] %v1717_v52  ;;  %v13480_v5 = vld [vmem:[#allocation3 + $0x1b4] ss:$36 sps:$4 sm:$0xff]   ;;  %v647_v9 = vld [vmem:[#allocation2 + $0x74] sm:$0x1]  ;;  %v403_v14 = vor.u32 %v401_v0, %v400_v2  ;;  %12701 = vmatpush3.bf16.msra.mxu1 %v13546_v4 }
  0x9c   : > { %v13483_v6 = vld [vmem:[#allocation3 + $0x1b0] ss:$36 sps:$4 sm:$0xff]   ;;  %v408_v7 = vrot.slane %v406_v48, 7  ;;  %v722_v42 = vld [vmem:[#allocation2 + $0x60] sm:$0x2]  ;;  %5065 = vmatprep.mubr.bf16.mxu0 %v13480_v5  ;;  %v404_v17 = vrot.slane %v400_v2, 4 }
  0x9d   : > { %v1304_v10 = vrot.slane %v1303_v57, 4  ;;  %v828_v13 = vld [vmem:[#allocation2 + $0x60] sm:$0x1]  ;;  %v11696_v15 = vrot.slane %v722_v42, 9  ;;  %v1590_v20 = vld [vmem:[#allocation2 + $0x60] sm:$0xe]  ;;  %5066 = vmatmul.mubr.bf16.gmra.mxu0 %v13483_v6  ;;  %v644_v28 = vsel %vm14140_vm7, %v403_v14, %v643_v3 }
  0x9e   : > { %v411_v18 = vor.u32 %v409_v1, %v408_v7  ;;  %v413_v19 = vrot.slane %v408_v7, 4  ;;  %v244_v23 = vld [vmem:[%s14113_s10 + $0x48] sm:$0xf]  ;;  %v13548_v24 = vld [vmem:[%s17746_s1 + $0x100] sm:$0xff]   ;;  %v1853_v25 = vld [vmem:[#allocation2 + $0x54] sm:$0xf] }
  0x9f   : > { %v1017_v26 = vld [vmem:[#allocation2 + $0x54] sm:$0xf]  ;;  %1885 = vst [vmem:[#allocation3 + $0x1bc] sm:$0xf] %v1853_v25  ;;  %v1090_v29 = vld [vmem:[#allocation2 + $0x5c] sm:$0x1]  ;;  %v829_v34 = vsel %vm14124_vm4, %v11696_v15, %v828_v13  ;;  %12597 = vmatpush3.bf16.msra.mxu0 %v13548_v24 }
  0xa0   : > { %v1088_v27 = vld [vmem:[#allocation2 + $0x54] sm:$0xf]  ;;  %1049 = vst [vmem:[#allocation3 + $0x1f8] sm:$0xf] %v1017_v26  ;;  %v1589_v35 = vld [vmem:[#allocation2 + $0x5c] sm:$0x1]  ;;  %v412_v37 = vsel %vm14131_vm5, %v404_v17, %v411_v18  ;;  %v648_v45 = vsel %vm14124_vm4, %v413_v19, %v647_v9 }
  0xa1   : > { %v1287_v30 = vshrl.u32 %v1088_v27, 16  ;;  %v1290_v33 = vshll.u32 %v1088_v27, 16  ;;  %645 = vst [vmem:[#allocation2 + $0x6c] sm:$0xf] %v644_v28  ;;  %v1306_v16 = vshll.u32 %v1090_v29, 16  ;;  %v1719_v39 = vrot.slane %v1589_v35, 5 }
  0xa2   : > { %830 = vst [vmem:[#allocation2 + $0x60] sm:$0x1] %v829_v34  ;;  %v1856_v41 = vld [vmem:[#allocation2 + $0x64] sm:$0xf]  ;;  %646 = vst [vmem:[#allocation2 + $0x70] sm:$0xf] %v412_v37 }
  0xa3   : > { %v866_v44 = vld [vmem:[#allocation2 + $0x64] sm:$0x8]  ;;  %v1289_v46 = vrot.slane %v1287_v30, 4  ;;  %v1292_v47 = vrot.slane %v1290_v33, 5  ;;  %1888 = vst [vmem:[#allocation3 + $0x228] sm:$0xf] %v1856_v41  ;;  %v1720_v51 = vsel %vm14184_vm13, %v1718_v40, %v1719_v39 }
  0xa4   : > { %v11714_v49 = vrot.slane %v866_v44, 11  ;;  %v973_v11 = vld [vmem:[#allocation2 + $0x68] sm:$0x1]  ;;  %v11732_v50 = vrot.slane %v1590_v20, 9  ;;  %649 = vst [vmem:[#allocation2 + $0x74] sm:$0x1] %v648_v45 }
  0xa5   : > { %v1308_v32 = vrot.slane %v1306_v16, 5  ;;  %v1020_v53 = vld [vmem:[#allocation2 + $0x64] sm:$0xf]  ;;  %v415_v55 = vshrl.u32 %v244_v23, 16  ;;  %v1293_v21 = vor.u32 %v1292_v47, %v1289_v46  ;;  %1824 = vst [vmem:[#allocation3 + $0x224] sm:$0xf] %v1720_v51 }
  0xa6   : > { %v1092_v54 = vld [vmem:[#allocation2 + $0x64] sm:$0xf]  ;;  %v974_v8 = vsel %vm14167_vm10, %v11714_v49, %v973_v11  ;;  %1052 = vst [vmem:[#allocation3 + $0x264] sm:$0xf] %v1020_v53  ;;  %v14469_v62 = vld [vmem:[%s14113_s10 + $0x4c] sm:$0xf] }
  0xa7   : > { %v1320_v56 = vshll.u32 %v1092_v54, 16  ;;  %v1324_v59 = vshrl.u32 %v1092_v54, 16  ;;  %v1591_v60 = vld [vmem:[#allocation2 + $0x64] sm:$0xf]  ;;  %v1309_v63 = vsel %vm14213_vm14, %v1304_v10, %v1308_v32  ;;  %975 = vst [vmem:[#allocation2 + $0x68] sm:$0x1] %v974_v8 }
  0xa8   : > { %v1723_v58 = vrot.slane %v1591_v60, 5  ;;  %v14473_v0 = vrot.slane %v415_v55, 7  ;;  %v418_v52 = vshll.u32 %v244_v23, 16  ;;  %v13552_v48 = vld [vmem:[%s17746_s1 + $0x1d8] sm:$0xff]   ;;  %v1294_v1 = vrot.slane %v1293_v21, 4 }
  0xa9   : > { %1549 = vst [vmem:[#allocation3 + $0x220] sm:$0xf] %v1309_v63  ;;  %v14478_v57 = vrot.slane %v1320_v56, 5  ;;  %v1326_v40 = vrot.slane %v1324_v59, 4  ;;  %v423_v2 = vshrl.u32 %v14469_v62, 16  ;;  %12702 = vmatprep.subr.bf16.mxu1 %v13552_v48  ;;  %v13553_v46 = vld [vmem:[%s17746_s1 + $0x198] sm:$0xff]  }
  0xaa   : > { %v650_v3 = vld [vmem:[#allocation2 + $0x78] sm:$0xf]  ;;  %v13487_v5 = vld [vmem:[#allocation3 + $0x1b8] ss:$36 sps:$4 sm:$0xff]   ;;  %v1724_v6 = vsel %vm14184_vm13, %v11732_v50, %v1723_v58  ;;  %v1725_v7 = vrot.slane %v1723_v58, 4  ;;  %v420_v9 = vor.u32 %v418_v52, %v14473_v0  ;;  %v1299_v10 = vsel %vm14213_vm14, %v1294_v1, %v14443_v61  ;;  %12703 = vmatpush3.bf16.msra.mxu1 %v13553_v46 }
  0xab   : > { %v13485_v4 = vld [vmem:[#allocation3 + $0x1bc] ss:$36 sps:$4 sm:$0xff]   ;;  %v1855_v42 = vld [vmem:[#allocation2 + $0x60] sm:$0xf]  ;;  %v1327_v15 = vor.u32 %v1326_v40, %v14478_v57  ;;  %1825 = vst [vmem:[#allocation3 + $0x248] sm:$0xf] %v1724_v6 }
  0xac   : > { %v1019_v13 = vld [vmem:[#allocation2 + $0x60] sm:$0xf]  ;;  %5226 = vmatprep.mubr.bf16.mxu1 %v13485_v4  ;;  %1548 = vst [vmem:[#allocation3 + $0x1fc] sm:$0xf] %v1299_v10  ;;  %1887 = vst [vmem:[#allocation3 + $0x204] sm:$0xf] %v1855_v42  ;;  %v651_v23 = vsel %vm14140_vm7, %v420_v9, %v650_v3 }
  0xad   : > { %v1091_v14 = vld [vmem:[#allocation2 + $0x60] sm:$0xf]  ;;  %1051 = vst [vmem:[#allocation3 + $0x240] sm:$0xf] %v1019_v13  ;;  %v723_v19 = vld [vmem:[#allocation2 + $0x6c] sm:$0x2]  ;;  %5227 = vmatmul.mubr.bf16.gmra.mxu1 %v13487_v5 }
  0xae   : > { %v1311_v17 = vshrl.u32 %v1091_v14, 16  ;;  %v1314_v18 = vshll.u32 %v1091_v14, 16  ;;  %v831_v20 = vld [vmem:[#allocation2 + $0x6c] sm:$0x1]  ;;  %v1328_v24 = vrot.slane %v1327_v15, 4  ;;  %v11697_v61 = vrot.slane %v723_v19, 9 }
  0xaf   : > { %v1858_v25 = vld [vmem:[#allocation2 + $0x70] sm:$0xf]  ;;  %652 = vst [vmem:[#allocation2 + $0x78] sm:$0xf] %v651_v23  ;;  %v976_v30 = vld [vmem:[#allocation2 + $0x74] sm:$0x1] }
  0xb0   : > { %v867_v26 = vld [vmem:[#allocation2 + $0x70] sm:$0x8]  ;;  %v1313_v27 = vrot.slane %v1311_v17, 4  ;;  %v1316_v28 = vrot.slane %v1314_v18, 5  ;;  %1890 = vst [vmem:[#allocation3 + $0x270] sm:$0xf] %v1858_v25  ;;  %v832_v34 = vsel %vm14124_vm4, %v11697_v61, %v831_v20 }
  0xb1   : > { %v11715_v29 = vrot.slane %v867_v26, 11  ;;  %v1093_v33 = vld [vmem:[#allocation2 + $0x68] sm:$0x1]  ;;  %v1022_v37 = vld [vmem:[#allocation2 + $0x70] sm:$0xf]  ;;  %v421_v11 = vrot.slane %v14473_v0, 4 }
  0xb2   : > { %v1592_v35 = vld [vmem:[#allocation2 + $0x68] sm:$0x1]  ;;  %v1317_v16 = vor.u32 %v1316_v28, %v1313_v27  ;;  %v1330_v39 = vshll.u32 %v1093_v33, 16  ;;  %833 = vst [vmem:[#allocation2 + $0x6c] sm:$0x1] %v832_v34  ;;  %v425_v50 = vrot.slane %v423_v2, 7 }
  0xb3   : > { %v1726_v41 = vrot.slane %v1592_v35, 5  ;;  %v977_v44 = vsel %vm14167_vm10, %v11715_v29, %v976_v30  ;;  %1054 = vst [vmem:[#allocation3 + $0x2ac] sm:$0xf] %v1022_v37  ;;  %v1095_v45 = vld [vmem:[#allocation2 + $0x70] sm:$0xf]  ;;  %v426_v55 = vshll.u32 %v14469_v62, 16 }
  0xb4   : > { %978 = vst [vmem:[#allocation2 + $0x74] sm:$0x1] %v977_v44  ;;  %v1344_v47 = vshll.u32 %v1095_v45, 16  ;;  %v1348_v49 = vshrl.u32 %v1095_v45, 16  ;;  %v1593_v32 = vld [vmem:[#allocation2 + $0x6c] sm:$0xe] }
  0xb5   : > { %v1318_v51 = vrot.slane %v1317_v16, 4  ;;  %v1332_v53 = vrot.slane %v1330_v39, 5  ;;  %v1727_v54 = vsel %vm14184_vm13, %v1725_v7, %v1726_v41  ;;  %v1594_v21 = vld [vmem:[#allocation2 + $0x70] sm:$0xf]  ;;  %v654_v8 = vld [vmem:[#allocation2 + $0x80] sm:$0x1]  ;;  %v428_v1 = vor.u32 %v426_v55, %v425_v50 }
  0xb6   : > { %v13554_v56 = vld [vmem:[%s17746_s1 + $0x1d0] sm:$0xff]   ;;  %1826 = vst [vmem:[#allocation3 + $0x26c] sm:$0xf] %v1727_v54  ;;  %v14504_v63 = vrot.slane %v1344_v47, 5  ;;  %v13491_v58 = vld [vmem:[#allocation3 + $0x204] ss:$36 sps:$4 sm:$0xff]  }
  0xb7   : > { %v13488_v59 = vld [vmem:[#allocation3 + $0x1fc] ss:$36 sps:$4 sm:$0xff]   ;;  %v1323_v52 = vsel %vm14213_vm14, %v1318_v51, %v14478_v57  ;;  %v1333_v62 = vsel %vm14213_vm14, %v1328_v24, %v1332_v53  ;;  %v1350_v48 = vrot.slane %v1348_v49, 4  ;;  %12704 = vmatprep.subr.bf16.mxu1 %v13554_v56  ;;  %v430_v40 = vrot.slane %v425_v50, 4  ;;  %5234 = vmatprep.mubr.bf16.mxu1 %v13491_v58  ;;  %v246_v30 = vld [vmem:[%s14113_s10 + $0x50] sm:$0xf] }
  0xb8   : > { %v13490_v60 = vld [vmem:[#allocation3 + $0x1f8] ss:$36 sps:$4 sm:$0xff]   ;;  %v13493_v0 = vld [vmem:[#allocation3 + $0x200] ss:$36 sps:$4 sm:$0xff]   ;;  %5073 = vmatprep.mubr.bf16.mxu0 %v13488_v59  ;;  %1550 = vst [vmem:[#allocation3 + $0x244] sm:$0xf] %v1323_v52  ;;  %v429_v57 = vsel %vm14131_vm5, %v421_v11, %v428_v1 }
  0xb9   : > { %1551 = vst [vmem:[#allocation3 + $0x268] sm:$0xf] %v1333_v62  ;;  %v724_v2 = vld [vmem:[#allocation2 + $0x78] sm:$0x2]  ;;  %v834_v3 = vld [vmem:[#allocation2 + $0x78] sm:$0x1]  ;;  %5074 = vmatmul.mubr.bf16.gmra.mxu0 %v13490_v60  ;;  %v1351_v5 = vor.u32 %v1350_v48, %v14504_v63  ;;  %5235 = vmatmul.mubr.bf16.gmra.mxu1 %v13493_v0  ;;  %v655_v13 = vsel %vm14124_vm4, %v430_v40, %v654_v8 }
  0xba   : > { %v11733_v4 = vrot.slane %v1593_v32, 9  ;;  %v11698_v6 = vrot.slane %v724_v2, 9  ;;  %v1730_v7 = vrot.slane %v1594_v21, 5  ;;  %v1857_v9 = vld [vmem:[#allocation2 + $0x6c] sm:$0xf]  ;;  %v13557_v20 = vld [vmem:[%s17746_s1 + $0x190] sm:$0xff]  }
  0xbb   : > { %v1021_v10 = vld [vmem:[#allocation2 + $0x6c] sm:$0xf]  ;;  %653 = vst [vmem:[#allocation2 + $0x7c] sm:$0xf] %v429_v57  ;;  %1889 = vst [vmem:[#allocation3 + $0x24c] sm:$0xf] %v1857_v9  ;;  %12705 = vmatpush3.bf16.msra.mxu1 %v13557_v20 }
  0xbc   : > { %v1094_v42 = vld [vmem:[#allocation2 + $0x6c] sm:$0xf]  ;;  %1053 = vst [vmem:[#allocation3 + $0x288] sm:$0xf] %v1021_v10  ;;  %v1096_v14 = vld [vmem:[#allocation2 + $0x74] sm:$0x1]  ;;  %v835_v19 = vsel %vm14124_vm4, %v11698_v6, %v834_v3  ;;  %v1731_v61 = vsel %vm14184_vm13, %v11733_v4, %v1730_v7 }
  0xbd   : > { %v1335_v15 = vshrl.u32 %v1094_v42, 16  ;;  %v1338_v17 = vshll.u32 %v1094_v42, 16  ;;  %v1352_v18 = vrot.slane %v1351_v5, 4  ;;  %656 = vst [vmem:[#allocation2 + $0x80] sm:$0x1] %v655_v13  ;;  %v1354_v23 = vshll.u32 %v1096_v14, 16 }
  0xbe   : > { %836 = vst [vmem:[#allocation2 + $0x78] sm:$0x1] %v835_v19  ;;  %v1595_v24 = vld [vmem:[#allocation2 + $0x74] sm:$0x1]  ;;  %v1732_v25 = vrot.slane %v1730_v7, 4  ;;  %v13562_v34 = vld [vmem:[%s17746_s1 + $0x1c8] sm:$0xff]  }
  0xbf   : > { %v1337_v26 = vrot.slane %v1335_v15, 4  ;;  %v1340_v27 = vrot.slane %v1338_v17, 5  ;;  %v1733_v28 = vrot.slane %v1595_v24, 5  ;;  %1827 = vst [vmem:[#allocation3 + $0x290] sm:$0xf] %v1731_v61  ;;  %v1356_v29 = vrot.slane %v1354_v23, 5  ;;  %12706 = vmatprep.subr.bf16.mxu1 %v13562_v34 }
  0xc0   : > { %v247_v33 = vld [vmem:[%s14113_s10 + $0x54] sm:$0xf]  ;;  %v13494_v35 = vld [vmem:[#allocation3 + $0x244] ss:$36 sps:$4 sm:$0xff]   ;;  %v432_v39 = vshrl.u32 %v246_v30, 16  ;;  %v435_v41 = vshll.u32 %v246_v30, 16 }
  0xc1   : > { %v1341_v37 = vor.u32 %v1340_v27, %v1337_v26  ;;  %v1734_v16 = vsel %vm14184_vm13, %v1732_v25, %v1733_v28  ;;  %v13497_v44 = vld [vmem:[#allocation3 + $0x240] ss:$36 sps:$4 sm:$0xff]   ;;  %v1357_v45 = vsel %vm14213_vm14, %v1352_v18, %v1356_v29  ;;  %v440_v46 = vshrl.u32 %v247_v33, 16  ;;  %5081 = vmatprep.mubr.bf16.mxu0 %v13494_v35  ;;  %v657_v51 = vld [vmem:[#allocation2 + $0x84] sm:$0xf]  ;;  %v13563_v7 = vld [vmem:[%s17746_s1 + $0x188] sm:$0xff]  }
  0xc2   : > { %1828 = vst [vmem:[#allocation3 + $0x2b4] sm:$0xf] %v1734_v16  ;;  %v443_v47 = vshll.u32 %v247_v33, 16  ;;  %1553 = vst [vmem:[#allocation3 + $0x2b0] sm:$0xf] %v1357_v45  ;;  %v434_v32 = vrot.slane %v432_v39, 7  ;;  %5082 = vmatmul.mubr.bf16.gmra.mxu0 %v13497_v44  ;;  %12707 = vmatpush3.bf16.msra.mxu1 %v13563_v7 }
  0xc3   : > { %v1342_v49 = vrot.slane %v1341_v37, 4  ;;  %v1860_v11 = vld [vmem:[#allocation2 + $0x7c] sm:$0xf]  ;;  %v13499_v53 = vld [vmem:[#allocation3 + $0x24c] ss:$36 sps:$4 sm:$0xff]   ;;  %v442_v4 = vrot.slane %v440_v46, 7 }
  0xc4   : > { %v868_v50 = vld [vmem:[#allocation2 + $0x7c] sm:$0x8]  ;;  %v13501_v54 = vld [vmem:[#allocation3 + $0x248] ss:$36 sps:$4 sm:$0xff]   ;;  %1892 = vst [vmem:[#allocation3 + $0x2b8] sm:$0xf] %v1860_v11  ;;  %v437_v60 = vor.u32 %v435_v41, %v434_v32  ;;  %5242 = vmatprep.mubr.bf16.mxu1 %v13499_v53 }
  0xc5   : > { %v11716_v55 = vrot.slane %v868_v50, 11  ;;  %v1347_v21 = vsel %vm14213_vm14, %v1342_v49, %v14504_v63  ;;  %v1859_v8 = vld [vmem:[#allocation2 + $0x78] sm:$0xf]  ;;  %v979_v56 = vld [vmem:[#allocation2 + $0x80] sm:$0x1]  ;;  %5243 = vmatmul.mubr.bf16.gmra.mxu1 %v13501_v54  ;;  %v438_v3 = vrot.slane %v434_v32, 4  ;;  %v445_v15 = vor.u32 %v443_v47, %v442_v4 }
  0xc6   : > { %v1023_v59 = vld [vmem:[#allocation2 + $0x78] sm:$0xf]  ;;  %1552 = vst [vmem:[#allocation3 + $0x28c] sm:$0xf] %v1347_v21  ;;  %1891 = vst [vmem:[#allocation3 + $0x294] sm:$0xf] %v1859_v8  ;;  %v658_v5 = vsel %vm14140_vm7, %v437_v60, %v657_v51 }
  0xc7   : > { %v980_v58 = vsel %vm14167_vm10, %v11716_v55, %v979_v56  ;;  %v1024_v0 = vld [vmem:[#allocation2 + $0x7c] sm:$0xf]  ;;  %1055 = vst [vmem:[#allocation3 + $0x2d0] sm:$0xf] %v1023_v59  ;;  %v1097_v52 = vld [vmem:[#allocation2 + $0x78] sm:$0xf]  ;;  %v446_v27 = vsel %vm14131_vm5, %v438_v3, %v445_v15 }
  0xc8   : > { %v1098_v62 = vld [vmem:[#allocation2 + $0x7c] sm:$0xf]  ;;  %981 = vst [vmem:[#allocation2 + $0x80] sm:$0x1] %v980_v58  ;;  %1056 = vst [vmem:[#allocation3 + $0x2f4] sm:$0xf] %v1024_v0 }
  0xc9   : > { %v1359_v48 = vshrl.u32 %v1097_v52, 16  ;;  %v1362_v1 = vshll.u32 %v1097_v52, 16  ;;  %v1368_v63 = vshll.u32 %v1098_v62, 16  ;;  %v1372_v40 = vshrl.u32 %v1098_v62, 16  ;;  %v1596_v2 = vld [vmem:[#allocation2 + $0x78] sm:$0xe] }
  0xca   : > { %v1597_v57 = vld [vmem:[#allocation2 + $0x7c] sm:$0xf]  ;;  %v11734_v6 = vrot.slane %v1596_v2, 9  ;;  %659 = vst [vmem:[#allocation2 + $0x84] sm:$0xf] %v658_v5  ;;  %v447_v17 = vrot.slane %v442_v4, 4 }
  0xcb   : > { %v1361_v9 = vrot.slane %v1359_v48, 4  ;;  %v1364_v10 = vrot.slane %v1362_v1, 5  ;;  %v1370_v42 = vrot.slane %v1368_v63, 5  ;;  %v1374_v13 = vrot.slane %v1372_v40, 4  ;;  %v661_v14 = vld [vmem:[#allocation2 + $0x8c] sm:$0x1] }
  0xcc   : > { %v1737_v18 = vrot.slane %v1597_v57, 5  ;;  %v248_v19 = vld [vmem:[%s14113_s10 + $0x58] sm:$0xf]  ;;  %v13564_v20 = vld [vmem:[%s17746_s1 + $0x1c0] sm:$0xff]   ;;  %v662_v30 = vsel %vm14124_vm4, %v447_v17, %v661_v14  ;;  %v249_v33 = vld [vmem:[%s14113_s10 + $0x5c] sm:$0xf] }
  0xcd   : > { %v1365_v23 = vor.u32 %v1364_v10, %v1361_v9  ;;  %v1375_v24 = vor.u32 %v1374_v13, %v1370_v42  ;;  %v449_v61 = vshrl.u32 %v248_v19, 16  ;;  %v452_v25 = vshll.u32 %v248_v19, 16  ;;  %v13567_v26 = vld [vmem:[%s17746_s1 + $0x180] sm:$0xff]   ;;  %12708 = vmatprep.subr.bf16.mxu1 %v13564_v20  ;;  %v13568_v34 = vld [vmem:[%s17746_s1 + $0x238] sm:$0xff]   ;;  %660 = vst [vmem:[#allocation2 + $0x88] sm:$0xf] %v446_v27 }
  0xce   : > { %v1738_v28 = vsel %vm14184_vm13, %v11734_v6, %v1737_v18  ;;  %v1739_v29 = vrot.slane %v1737_v18, 4  ;;  %v13502_v35 = vld [vmem:[#allocation3 + $0x28c] ss:$36 sps:$4 sm:$0xff]   ;;  %663 = vst [vmem:[#allocation2 + $0x8c] sm:$0x1] %v662_v30  ;;  %12709 = vmatpush3.bf16.msra.mxu1 %v13567_v26  ;;  %13302 = vmatprep.subr.bf16.mxu0 %v13568_v34  ;;  %v457_v50 = vshrl.u32 %v249_v33, 16 }
  0xcf   : > { %v13504_v37 = vld [vmem:[#allocation3 + $0x288] ss:$36 sps:$4 sm:$0xff]   ;;  %v1366_v16 = vrot.slane %v1365_v23, 4  ;;  %1829 = vst [vmem:[#allocation3 + $0x2d8] sm:$0xf] %v1738_v28  ;;  %v1376_v44 = vrot.slane %v1375_v24, 4  ;;  %5089 = vmatprep.mubr.bf16.mxu0 %v13502_v35 }
  0xd0   : > { %v13505_v39 = vld [vmem:[#allocation3 + $0x294] ss:$36 sps:$4 sm:$0xff]   ;;  %v1099_v46 = vld [vmem:[#allocation2 + $0x80] sm:$0x1]  ;;  %v451_v11 = vrot.slane %v449_v61, 7  ;;  %5090 = vmatmul.mubr.bf16.gmra.mxu0 %v13504_v37  ;;  %v459_v56 = vrot.slane %v457_v50, 7 }
  0xd1   : > { %v13507_v41 = vld [vmem:[#allocation3 + $0x290] ss:$36 sps:$4 sm:$0xff]   ;;  %v664_v45 = vld [vmem:[#allocation2 + $0x90] sm:$0xf]  ;;  %v1371_v47 = vsel %vm14213_vm14, %v1366_v16, %v1370_v42  ;;  %v1598_v49 = vld [vmem:[#allocation2 + $0x80] sm:$0x1]  ;;  %5250 = vmatprep.mubr.bf16.mxu1 %v13505_v39 }
  0xd2   : > { %v1378_v32 = vshll.u32 %v1099_v46, 16  ;;  %1554 = vst [vmem:[#allocation3 + $0x2d4] sm:$0xf] %v1371_v47  ;;  %v725_v51 = vld [vmem:[#allocation2 + $0x84] sm:$0x2]  ;;  %v1740_v54 = vrot.slane %v1598_v49, 5  ;;  %5251 = vmatmul.mubr.bf16.gmra.mxu1 %v13507_v41  ;;  %v454_v21 = vor.u32 %v452_v25, %v451_v11 }
  0xd3   : > { %v837_v53 = vld [vmem:[#allocation2 + $0x84] sm:$0x1]  ;;  %v11699_v55 = vrot.slane %v725_v51, 9  ;;  %v455_v8 = vrot.slane %v451_v11, 4  ;;  %v668_v59 = vld [vmem:[#allocation2 + $0x98] sm:$0x1] }
  0xd4   : > { %v1380_v60 = vrot.slane %v1378_v32, 5  ;;  %v1741_v58 = vsel %vm14184_vm13, %v1739_v29, %v1740_v54  ;;  %v460_v0 = vshll.u32 %v249_v33, 16  ;;  %v1599_v52 = vld [vmem:[#allocation2 + $0x84] sm:$0xe]  ;;  %v464_v48 = vrot.slane %v459_v56, 4 }
  0xd5   : > { %v838_v62 = vsel %vm14124_vm4, %v11699_v55, %v837_v53  ;;  %1830 = vst [vmem:[#allocation3 + $0x2fc] sm:$0xf] %v1741_v58  ;;  %v665_v1 = vsel %vm14140_vm7, %v454_v21, %v664_v45  ;;  %v1862_v40 = vld [vmem:[#allocation2 + $0x88] sm:$0xf]  ;;  %v982_v3 = vld [vmem:[#allocation2 + $0x8c] sm:$0x1] }
  0xd6   : > { %v1381_v63 = vsel %vm14213_vm14, %v1376_v44, %v1380_v60  ;;  %839 = vst [vmem:[#allocation2 + $0x84] sm:$0x1] %v838_v62  ;;  %v869_v2 = vld [vmem:[#allocation2 + $0x88] sm:$0x8]  ;;  %v462_v4 = vor.u32 %v460_v0, %v459_v56  ;;  %666 = vst [vmem:[#allocation2 + $0x90] sm:$0xf] %v665_v1  ;;  %v669_v9 = vsel %vm14124_vm4, %v464_v48, %v668_v59 }
  0xd7   : > { %1555 = vst [vmem:[#allocation3 + $0x2f8] sm:$0xf] %v1381_v63  ;;  %1894 = vst [vmem:[#allocation3 + $0x300] sm:$0xf] %v1862_v40  ;;  %v11717_v5 = vrot.slane %v869_v2, 11  ;;  %v11735_v7 = vrot.slane %v1599_v52, 9 }
  0xd8   : > { %v1026_v57 = vld [vmem:[#allocation2 + $0x88] sm:$0xf]  ;;  %v463_v13 = vsel %vm14131_vm5, %v455_v8, %v462_v4  ;;  %670 = vst [vmem:[#allocation2 + $0x98] sm:$0x1] %v669_v9  ;;  %v250_v18 = vld [vmem:[%s14113_s10 + $0x60] sm:$0xf] }
  0xd9   : > { %v1101_v6 = vld [vmem:[#allocation2 + $0x88] sm:$0xf]  ;;  %1058 = vst [vmem:[#allocation3 + $0x33c] sm:$0xf] %v1026_v57  ;;  %v983_v15 = vsel %vm14167_vm10, %v11717_v5, %v982_v3  ;;  %667 = vst [vmem:[#allocation2 + $0x94] sm:$0xf] %v463_v13 }
  0xda   : > { %v1392_v10 = vshll.u32 %v1101_v6, 16  ;;  %v1396_v42 = vshrl.u32 %v1101_v6, 16  ;;  %v1600_v14 = vld [vmem:[#allocation2 + $0x88] sm:$0xf]  ;;  %v251_v19 = vld [vmem:[%s14113_s10 + $0x64] sm:$0xf] }
  0xdb   : > { %v1744_v17 = vrot.slane %v1600_v14, 5  ;;  %984 = vst [vmem:[#allocation2 + $0x8c] sm:$0x1] %v983_v15  ;;  %v466_v24 = vshrl.u32 %v250_v18, 16  ;;  %v469_v61 = vshll.u32 %v250_v18, 16  ;;  %v474_v27 = vshrl.u32 %v251_v19, 16 }
  0xdc   : > { %v14577_v20 = vrot.slane %v1392_v10, 5  ;;  %v1398_v23 = vrot.slane %v1396_v42, 4  ;;  %v671_v28 = vld [vmem:[#allocation2 + $0x9c] sm:$0xf]  ;;  %v477_v33 = vshll.u32 %v251_v19, 16 }
  0xdd   : > { %v1745_v25 = vsel %vm14184_vm13, %v11735_v7, %v1744_v17  ;;  %v1746_v26 = vrot.slane %v1744_v17, 4  ;;  %v468_v30 = vrot.slane %v466_v24, 7  ;;  %v1861_v34 = vld [vmem:[#allocation2 + $0x84] sm:$0xf]  ;;  %v13511_v39 = vld [vmem:[#allocation3 + $0x2d0] ss:$36 sps:$4 sm:$0xff]  }
  0xde   : > { %v1399_v29 = vor.u32 %v1398_v23, %v14577_v20  ;;  %1831 = vst [vmem:[#allocation3 + $0x320] sm:$0xf] %v1745_v25  ;;  %v1025_v35 = vld [vmem:[#allocation2 + $0x84] sm:$0xf]  ;;  %v13508_v16 = vld [vmem:[#allocation3 + $0x2d4] ss:$36 sps:$4 sm:$0xff]  }
  0xdf   : > { %v1100_v37 = vld [vmem:[#allocation2 + $0x84] sm:$0xf]  ;;  %1893 = vst [vmem:[#allocation3 + $0x2dc] sm:$0xf] %v1861_v34  ;;  %1057 = vst [vmem:[#allocation3 + $0x318] sm:$0xf] %v1025_v35  ;;  %v471_v44 = vor.u32 %v469_v61, %v468_v30  ;;  %5097 = vmatprep.mubr.bf16.mxu0 %v13508_v16 }
  0xe0   : > { %v1383_v41 = vshrl.u32 %v1100_v37, 16  ;;  %v1386_v45 = vshll.u32 %v1100_v37, 16  ;;  %v1400_v46 = vrot.slane %v1399_v29, 4  ;;  %v726_v47 = vld [vmem:[#allocation2 + $0x90] sm:$0x2]  ;;  %v472_v49 = vrot.slane %v468_v30, 4  ;;  %5098 = vmatmul.mubr.bf16.gmra.mxu0 %v13511_v39 }
  0xe1   : > { %v11700_v50 = vrot.slane %v726_v47, 9  ;;  %v840_v32 = vld [vmem:[#allocation2 + $0x90] sm:$0x1]  ;;  %v1864_v51 = vld [vmem:[#allocation2 + $0x94] sm:$0xf]  ;;  %v672_v53 = vsel %vm14140_vm7, %v471_v44, %v671_v28  ;;  %v476_v8 = vrot.slane %v474_v27, 7 }
  0xe2   : > { %v1385_v11 = vrot.slane %v1383_v41, 4  ;;  %v1102_v54 = vld [vmem:[#allocation2 + $0x8c] sm:$0x1]  ;;  %v1388_v55 = vrot.slane %v1386_v45, 5  ;;  %1896 = vst [vmem:[#allocation3 + $0x348] sm:$0xf] %v1864_v51 }
  0xe3   : > { %v1601_v21 = vld [vmem:[#allocation2 + $0x8c] sm:$0x1]  ;;  %673 = vst [vmem:[#allocation2 + $0x9c] sm:$0xf] %v672_v53  ;;  %v1402_v56 = vshll.u32 %v1102_v54, 16  ;;  %v841_v59 = vsel %vm14124_vm4, %v11700_v50, %v840_v32  ;;  %v479_v63 = vor.u32 %v477_v33, %v476_v8  ;;  %v481_v40 = vrot.slane %v476_v8, 4 }
  0xe4   : > { %v1747_v60 = vrot.slane %v1601_v21, 5  ;;  %v870_v58 = vld [vmem:[#allocation2 + $0x94] sm:$0x8]  ;;  %v985_v0 = vld [vmem:[#allocation2 + $0x98] sm:$0x1]  ;;  %v1389_v52 = vor.u32 %v1388_v55, %v1385_v11 }
  0xe5   : > { %842 = vst [vmem:[#allocation2 + $0x90] sm:$0x1] %v841_v59  ;;  %v11718_v62 = vrot.slane %v870_v58, 11  ;;  %v1028_v48 = vld [vmem:[#allocation2 + $0x94] sm:$0xf]  ;;  %v1404_v2 = vrot.slane %v1402_v56, 5  ;;  %v480_v42 = vsel %vm14131_vm5, %v472_v49, %v479_v63 }
  0xe6   : > { %v1104_v1 = vld [vmem:[#allocation2 + $0x94] sm:$0xf]  ;;  %v1748_v3 = vsel %vm14184_vm13, %v1746_v26, %v1747_v60  ;;  %1060 = vst [vmem:[#allocation3 + $0x384] sm:$0xf] %v1028_v48  ;;  %v1602_v57 = vld [vmem:[#allocation2 + $0x90] sm:$0xe] }
  0xe7   : > { %v1416_v4 = vshll.u32 %v1104_v1, 16  ;;  %v1420_v5 = vshrl.u32 %v1104_v1, 16  ;;  %v13513_v6 = vld [vmem:[#allocation3 + $0x2dc] ss:$36 sps:$4 sm:$0xff]   ;;  %v1390_v9 = vrot.slane %v1389_v52, 4  ;;  %v986_v10 = vsel %vm14167_vm10, %v11718_v62, %v985_v0 }
  0xe8   : > { %v13515_v7 = vld [vmem:[#allocation3 + $0x2d8] ss:$36 sps:$4 sm:$0xff]   ;;  %1832 = vst [vmem:[#allocation3 + $0x344] sm:$0xf] %v1748_v3  ;;  %v1405_v13 = vsel %vm14213_vm14, %v1400_v46, %v1404_v2  ;;  %987 = vst [vmem:[#allocation2 + $0x98] sm:$0x1] %v986_v10  ;;  %5258 = vmatprep.mubr.bf16.mxu1 %v13513_v6 }
  0xe9   : > { %v14594_v14 = vrot.slane %v1416_v4, 5  ;;  %v1422_v15 = vrot.slane %v1420_v5, 4  ;;  %674 = vst [vmem:[#allocation2 + $0xa0] sm:$0xf] %v480_v42  ;;  %v1603_v17 = vld [vmem:[#allocation2 + $0x94] sm:$0xf]  ;;  %v1395_v19 = vsel %vm14213_vm14, %v1390_v9, %v14577_v20  ;;  %5259 = vmatmul.mubr.bf16.gmra.mxu1 %v13515_v7 }
  0xea   : > { %v11736_v18 = vrot.slane %v1602_v57, 9  ;;  %1557 = vst [vmem:[#allocation3 + $0x340] sm:$0xf] %v1405_v13  ;;  %v1751_v23 = vrot.slane %v1603_v17, 5  ;;  %1556 = vst [vmem:[#allocation3 + $0x31c] sm:$0xf] %v1395_v19 }
  0xeb   : > { %v1423_v24 = vor.u32 %v1422_v15, %v14594_v14  ;;  %v727_v61 = vld [vmem:[#allocation2 + $0x9c] sm:$0x2]  ;;  %v843_v25 = vld [vmem:[#allocation2 + $0x9c] sm:$0x1]  ;;  %v675_v28 = vld [vmem:[#allocation2 + $0xa4] sm:$0x1] }
  0xec   : > { %v11701_v26 = vrot.slane %v727_v61, 9  ;;  %v1752_v27 = vsel %vm14184_vm13, %v11736_v18, %v1751_v23  ;;  %v1863_v29 = vld [vmem:[#allocation2 + $0x90] sm:$0xf]  ;;  %v676_v20 = vsel %vm14124_vm4, %v481_v40, %v675_v28  ;;  %v1753_v16 = vrot.slane %v1751_v23, 4  ;;  %v252_v41 = vld [vmem:[%s14113_s10 + $0x68] sm:$0xf] }
  0xed   : > { %v1027_v30 = vld [vmem:[#allocation2 + $0x90] sm:$0xf]  ;;  %1833 = vst [vmem:[#allocation3 + $0x368] sm:$0xf] %v1752_v27  ;;  %1895 = vst [vmem:[#allocation3 + $0x324] sm:$0xf] %v1863_v29 }
  0xee   : > { %v1103_v33 = vld [vmem:[#allocation2 + $0x90] sm:$0xf]  ;;  %1059 = vst [vmem:[#allocation3 + $0x360] sm:$0xf] %v1027_v30  ;;  %v844_v37 = vsel %vm14124_vm4, %v11701_v26, %v843_v25  ;;  %677 = vst [vmem:[#allocation2 + $0xa4] sm:$0x1] %v676_v20 }
  0xef   : > { %v1407_v34 = vshrl.u32 %v1103_v33, 16  ;;  %v1410_v35 = vshll.u32 %v1103_v33, 16  ;;  %v1424_v39 = vrot.slane %v1423_v24, 4  ;;  %845 = vst [vmem:[#allocation2 + $0x9c] sm:$0x1] %v844_v37  ;;  %v483_v51 = vshrl.u32 %v252_v41, 16 }
  0xf0   : > { %v253_v44 = vld [vmem:[%s14113_s10 + $0x6c] sm:$0xf]  ;;  %v1105_v45 = vld [vmem:[#allocation2 + $0x98] sm:$0x1]  ;;  %v1866_v32 = vld [vmem:[#allocation2 + $0xa0] sm:$0xf] }
  0xf1   : > { %v1409_v46 = vrot.slane %v1407_v34, 4  ;;  %v1412_v47 = vrot.slane %v1410_v35, 5  ;;  %v1604_v49 = vld [vmem:[#allocation2 + $0x98] sm:$0x1]  ;;  %v1426_v11 = vshll.u32 %v1105_v45, 16  ;;  %v486_v21 = vshll.u32 %v252_v41, 16 }
  0xf2   : > { %v1754_v50 = vrot.slane %v1604_v49, 5  ;;  %v13516_v53 = vld [vmem:[#allocation3 + $0x31c] ss:$36 sps:$4 sm:$0xff]   ;;  %1898 = vst [vmem:[#allocation3 + $0x390] sm:$0xf] %v1866_v32  ;;  %v485_v58 = vrot.slane %v483_v51, 7 }
  0xf3   : > { %v13518_v54 = vld [vmem:[#allocation3 + $0x318] ss:$36 sps:$4 sm:$0xff]   ;;  %v1413_v55 = vor.u32 %v1412_v47, %v1409_v46  ;;  %v1428_v8 = vrot.slane %v1426_v11, 5  ;;  %v871_v59 = vld [vmem:[#allocation2 + $0xa0] sm:$0x8]  ;;  %5105 = vmatprep.mubr.bf16.mxu0 %v13516_v53  ;;  %v491_v48 = vshrl.u32 %v253_v44, 16 }
  0xf4   : > { %v1755_v56 = vsel %vm14184_vm13, %v1753_v16, %v1754_v50  ;;  %v1030_v60 = vld [vmem:[#allocation2 + $0xa0] sm:$0xf]  ;;  %v11719_v52 = vrot.slane %v871_v59, 11  ;;  %v494_v1 = vshll.u32 %v253_v44, 16  ;;  %5106 = vmatmul.mubr.bf16.gmra.mxu0 %v13518_v54  ;;  %v13521_v40 = vld [vmem:[#allocation3 + $0x320] ss:$36 sps:$4 sm:$0xff]   ;;  %v488_v4 = vor.u32 %v486_v21, %v485_v58 }
  0xf5   : > { %v1414_v0 = vrot.slane %v1413_v55, 4  ;;  %1834 = vst [vmem:[#allocation3 + $0x38c] sm:$0xf] %v1755_v56  ;;  %1062 = vst [vmem:[#allocation3 + $0x3cc] sm:$0xf] %v1030_v60  ;;  %v1429_v2 = vsel %vm14213_vm14, %v1424_v39, %v1428_v8  ;;  %v489_v18 = vrot.slane %v485_v58, 4 }
  0xf6   : > { %v1107_v62 = vld [vmem:[#allocation2 + $0xa0] sm:$0xf]  ;;  %1559 = vst [vmem:[#allocation3 + $0x388] sm:$0xf] %v1429_v2  ;;  %v1865_v57 = vld [vmem:[#allocation2 + $0x9c] sm:$0xf] }
  0xf7   : > { %v13519_v63 = vld [vmem:[#allocation3 + $0x324] ss:$36 sps:$4 sm:$0xff]   ;;  %v1440_v3 = vshll.u32 %v1107_v62, 16  ;;  %v1419_v5 = vsel %vm14213_vm14, %v1414_v0, %v14594_v14  ;;  %v988_v6 = vld [vmem:[#allocation2 + $0xa4] sm:$0x1]  ;;  %v1444_v13 = vshrl.u32 %v1107_v62, 16 }
  0xf8   : > { %v1029_v7 = vld [vmem:[#allocation2 + $0x9c] sm:$0xf]  ;;  %5266 = vmatprep.mubr.bf16.mxu1 %v13519_v63  ;;  %1558 = vst [vmem:[#allocation3 + $0x364] sm:$0xf] %v1419_v5  ;;  %1897 = vst [vmem:[#allocation3 + $0x36c] sm:$0xf] %v1865_v57  ;;  %v989_v9 = vsel %vm14167_vm10, %v11719_v52, %v988_v6 }
  0xf9   : > { %1061 = vst [vmem:[#allocation3 + $0x3a8] sm:$0xf] %v1029_v7  ;;  %v1106_v10 = vld [vmem:[#allocation2 + $0x9c] sm:$0xf]  ;;  %v1442_v42 = vrot.slane %v1440_v3, 5  ;;  %5267 = vmatmul.mubr.bf16.gmra.mxu1 %v13521_v40  ;;  %v493_v14 = vrot.slane %v491_v48, 7 }
  0xfa   : > { %990 = vst [vmem:[#allocation2 + $0xa4] sm:$0x1] %v989_v9  ;;  %v1431_v15 = vshrl.u32 %v1106_v10, 16  ;;  %v1434_v17 = vshll.u32 %v1106_v10, 16  ;;  %v678_v19 = vld [vmem:[#allocation2 + $0xa8] sm:$0xf] }
  0xfb   : > { %v1446_v23 = vrot.slane %v1444_v13, 4  ;;  %v679_v24 = vsel %vm14140_vm7, %v488_v4, %v678_v19  ;;  %v1605_v61 = vld [vmem:[#allocation2 + $0x9c] sm:$0xe]  ;;  %v1606_v25 = vld [vmem:[#allocation2 + $0xa0] sm:$0xf]  ;;  %v496_v28 = vor.u32 %v494_v1, %v493_v14  ;;  %v498_v37 = vrot.slane %v493_v14, 4 }
  0xfc   : > { %v1433_v26 = vrot.slane %v1431_v15, 4  ;;  %v1436_v27 = vrot.slane %v1434_v17, 5  ;;  %680 = vst [vmem:[#allocation2 + $0xa8] sm:$0xf] %v679_v24  ;;  %v11737_v30 = vrot.slane %v1605_v61, 9  ;;  %v1758_v33 = vrot.slane %v1606_v25, 5 }
  0xfd   : > { %v1447_v29 = vor.u32 %v1446_v23, %v1442_v42  ;;  %v497_v34 = vsel %vm14131_vm5, %v489_v18, %v496_v28  ;;  %v13525_v41 = vld [vmem:[#allocation3 + $0x360] ss:$36 sps:$4 sm:$0xff]   ;;  %v13529_v46 = vld [vmem:[#allocation3 + $0x368] ss:$36 sps:$4 sm:$0xff]   ;;  %v682_v32 = vld [vmem:[#allocation2 + $0xb0] sm:$0x1] }
  0xfe   : > { %v1437_v20 = vor.u32 %v1436_v27, %v1433_v26  ;;  %681 = vst [vmem:[#allocation2 + $0xac] sm:$0xf] %v497_v34  ;;  %v1759_v16 = vsel %vm14184_vm13, %v11737_v30, %v1758_v33  ;;  %v1760_v47 = vrot.slane %v1758_v33, 4  ;;  %v683_v21 = vsel %vm14124_vm4, %v498_v37, %v682_v32  ;;  %v254_v2 = vld [vmem:[%s14113_s10 + $0x70] sm:$0xf] }
  0xff   : > { %v1448_v35 = vrot.slane %v1447_v29, 4  ;;  %v13522_v39 = vld [vmem:[#allocation3 + $0x364] ss:$36 sps:$4 sm:$0xff]   ;;  %1835 = vst [vmem:[#allocation3 + $0x3b0] sm:$0xf] %v1759_v16  ;;  %v500_v4 = vshrl.u32 %v254_v2, 16 }
 0x100   : > { %v1438_v44 = vrot.slane %v1437_v20, 4  ;;  %v13527_v45 = vld [vmem:[#allocation3 + $0x36c] ss:$36 sps:$4 sm:$0xff]   ;;  %5113 = vmatprep.mubr.bf16.mxu0 %v13522_v39  ;;  %684 = vst [vmem:[#allocation2 + $0xb0] sm:$0x1] %v683_v21  ;;  %v503_v5 = vshll.u32 %v254_v2, 16 }
 0x101   : > { %v1108_v49 = vld [vmem:[#allocation2 + $0xa4] sm:$0x1]  ;;  %5114 = vmatmul.mubr.bf16.gmra.mxu0 %v13525_v41  ;;  %5274 = vmatprep.mubr.bf16.mxu1 %v13527_v45  ;;  %v255_v3 = vld [vmem:[%s14113_s10 + $0x74] sm:$0xf]  ;;  %v502_v13 = vrot.slane %v500_v4, 7 }
 0x102   : > { %v1443_v11 = vsel %vm14213_vm14, %v1438_v44, %v1442_v42  ;;  %v1607_v50 = vld [vmem:[#allocation2 + $0xa4] sm:$0x1]  ;;  %v1450_v51 = vshll.u32 %v1108_v49, 16  ;;  %5275 = vmatmul.mubr.bf16.gmra.mxu1 %v13529_v46  ;;  %v508_v7 = vshrl.u32 %v255_v3, 16  ;;  %v511_v9 = vshll.u32 %v255_v3, 16 }
 0x103   : > { %1560 = vst [vmem:[#allocation3 + $0x3ac] sm:$0xf] %v1443_v11  ;;  %v728_v53 = vld [vmem:[#allocation2 + $0xa8] sm:$0x2]  ;;  %v846_v54 = vld [vmem:[#allocation2 + $0xa8] sm:$0x1]  ;;  %v14642_v24 = vor.u32 %v503_v5, %v502_v13 }
 0x104   : > { %v1761_v55 = vrot.slane %v1607_v50, 5  ;;  %v11702_v8 = vrot.slane %v728_v53, 9  ;;  %v1452_v56 = vrot.slane %v1450_v51, 5  ;;  %v685_v10 = vld [vmem:[#allocation2 + $0xb4] sm:$0xf]  ;;  %v14640_v14 = vrot.slane %v508_v7, 7 }
 0x105   : > { %v1868_v58 = vld [vmem:[#allocation2 + $0xac] sm:$0xf]  ;;  %v1608_v15 = vld [vmem:[#allocation2 + $0xa8] sm:$0xe]  ;;  %17788 = vst [vmem:[#allocation11_spill] sm:$0xff] %v14642_v24  ;;  %v506_v61 = vrot.slane %v502_v13, 4  ;;  %v686_v20 = vsel %vm14140_vm7, %v14642_v24, %v685_v10 }
 0x106   : > { %v1762_v59 = vsel %vm14184_vm13, %v1760_v47, %v1761_v55  ;;  %v847_v60 = vsel %vm14124_vm4, %v11702_v8, %v846_v54  ;;  %v872_v0 = vld [vmem:[#allocation2 + $0xac] sm:$0x8]  ;;  %v1453_v62 = vsel %vm14213_vm14, %v1448_v35, %v1452_v56  ;;  %1900 = vst [vmem:[#allocation3 + $0x3d8] sm:$0xf] %v1868_v58  ;;  %17787 = vst [vmem:[#allocation10_spill] sm:$0xff] %v14640_v14  ;;  %v11738_v23 = vrot.slane %v1608_v15, 9 }
 0x107   : > { %1836 = vst [vmem:[#allocation3 + $0x3d4] sm:$0xf] %v1762_v59  ;;  %v1032_v52 = vld [vmem:[#allocation2 + $0xac] sm:$0xf]  ;;  %848 = vst [vmem:[#allocation2 + $0xa8] sm:$0x1] %v847_v60  ;;  %v513_v28 = vor.u32 %v511_v9, %v14640_v14 }
 0x108   : > { %v11720_v48 = vrot.slane %v872_v0, 11  ;;  %1064 = vst [vmem:[#allocation3 + $0x414] sm:$0xf] %v1032_v52  ;;  %v1110_v1 = vld [vmem:[#allocation2 + $0xac] sm:$0xf]  ;;  %v17751_v33 = vrot.slane %v14640_v14, 4 }
 0x109   : > { %1561 = vst [vmem:[#allocation3 + $0x3d0] sm:$0xf] %v1453_v62  ;;  %v1464_v63 = vshll.u32 %v1110_v1, 16  ;;  %v1468_v40 = vshrl.u32 %v1110_v1, 16  ;;  %v991_v42 = vld [vmem:[#allocation2 + $0xb0] sm:$0x1]  ;;  %v514_v16 = vsel %vm14131_vm5, %v506_v61, %v513_v28 }
 0x10a   : > { %v992_v17 = vsel %vm14167_vm10, %v11720_v48, %v991_v42  ;;  %v1609_v19 = vld [vmem:[#allocation2 + $0xac] sm:$0xf]  ;;  %v13536_v30 = vld [vmem:[#allocation3 + $0x3a8] ss:$36 sps:$4 sm:$0xff]   ;;  %687 = vst [vmem:[#allocation2 + $0xb4] sm:$0xf] %v686_v20 }
 0x10b   : > { %v14635_v57 = vrot.slane %v1464_v63, 5  ;;  %v1470_v6 = vrot.slane %v1468_v40, 4  ;;  %993 = vst [vmem:[#allocation2 + $0xb0] sm:$0x1] %v992_v17  ;;  %v1765_v25 = vrot.slane %v1609_v19, 5 }
 0x10c   : > { %688 = vst [vmem:[#allocation2 + $0xb8] sm:$0xf] %v514_v16  ;;  %710 = vst [vmem:[#allocation2 + $0xd0] sm:$0xf] %v514_v16  ;;  %v689_v45 = vld [vmem:[#allocation2 + $0xbc] sm:$0x1] }
 0x10d   : > { %v1471_v18 = vor.u32 %v1470_v6, %v14635_v57  ;;  %v1766_v34 = vsel %vm14184_vm13, %v11738_v23, %v1765_v25  ;;  %v1767_v39 = vrot.slane %v1765_v25, 4  ;;  %v690_v49 = vsel %vm14124_vm4, %v17751_v33, %v689_v45  ;;  %v256_v11 = vld [vmem:[%s14113_s10 + $0x78] sm:$0xf]  ;;  %v257_v50 = vld [vmem:[%s14113_s10 + $0x7c] sm:$0xf] }
 0x10e   : > { %v1867_v26 = vld [vmem:[#allocation2 + $0xa8] sm:$0xf]  ;;  %1837 = vst [vmem:[#allocation3 + $0x3f8] sm:$0xf] %v1766_v34  ;;  %691 = vst [vmem:[#allocation2 + $0xbc] sm:$0x1] %v690_v49 }
 0x10f   : > { %v1031_v27 = vld [vmem:[#allocation2 + $0xa8] sm:$0xf]  ;;  %1899 = vst [vmem:[#allocation3 + $0x3b4] sm:$0xf] %v1867_v26  ;;  %v1472_v37 = vrot.slane %v1471_v18, 4  ;;  %v517_v53 = vshrl.u32 %v256_v11, 16 }
 0x110   : > { %v13533_v29 = vld [vmem:[#allocation3 + $0x3ac] ss:$36 sps:$4 sm:$0xff]   ;;  %1063 = vst [vmem:[#allocation3 + $0x3f0] sm:$0xf] %v1031_v27  ;;  %v520_v54 = vshll.u32 %v256_v11, 16  ;;  %v525_v56 = vshrl.u32 %v257_v50, 16 }
 0x111   : > { %v1109_v35 = vld [vmem:[#allocation2 + $0xa8] sm:$0xf]  ;;  %5121 = vmatprep.mubr.bf16.mxu0 %v13533_v29  ;;  %v519_v58 = vrot.slane %v517_v53, 7  ;;  %v692_v0 = vld [vmem:[#allocation2 + $0xc0] sm:$0xf]  ;;  %v528_v19 = vshll.u32 %v257_v50, 16 }
 0x112   : > { %v1455_v41 = vshrl.u32 %v1109_v35, 16  ;;  %v1458_v44 = vshll.u32 %v1109_v35, 16  ;;  %5122 = vmatmul.mubr.bf16.gmra.mxu0 %v13536_v30  ;;  %v1111_v32 = vld [vmem:[#allocation2 + $0xb0] sm:$0x1]  ;;  %v13539_v60 = vld [vmem:[#allocation3 + $0x3b0] ss:$36 sps:$4 sm:$0xff]  }
 0x113   : > { %v1610_v51 = vld [vmem:[#allocation2 + $0xb0] sm:$0x1]  ;;  %v1474_v21 = vshll.u32 %v1111_v32, 16  ;;  %v729_v48 = vld [vmem:[#allocation2 + $0xb4] sm:$0x2]  ;;  %v522_v4 = vor.u32 %v520_v54, %v519_v58  ;;  %v523_v5 = vrot.slane %v519_v58, 4 }
 0x114   : > { %v1457_v46 = vrot.slane %v1455_v41, 4  ;;  %v1460_v47 = vrot.slane %v1458_v44, 5  ;;  %v1768_v8 = vrot.slane %v1610_v51, 5  ;;  %v849_v1 = vld [vmem:[#allocation2 + $0xb4] sm:$0x1]  ;;  %v11703_v40 = vrot.slane %v729_v48, 9 }
 0x115   : > { %v1476_v62 = vrot.slane %v1474_v21, 5  ;;  %v1870_v2 = vld [vmem:[#allocation2 + $0xb8] sm:$0xf]  ;;  %v14666_v13 = vrot.slane %v525_v56, 7  ;;  %v1611_v23 = vld [vmem:[#allocation2 + $0xb4] sm:$0xe]  ;;  %v693_v61 = vsel %vm14140_vm7, %v522_v4, %v692_v0 }
 0x116   : > { %v1461_v55 = vor.u32 %v1460_v47, %v1457_v46  ;;  %v13537_v59 = vld [vmem:[#allocation3 + $0x3b4] ss:$36 sps:$4 sm:$0xff]   ;;  %v1769_v63 = vsel %vm14184_vm13, %v1767_v39, %v1768_v8  ;;  %v873_v3 = vld [vmem:[#allocation2 + $0xb8] sm:$0x8]  ;;  %1902 = vst [vmem:[#allocation3 + $0x420] sm:$0xf] %v1870_v2  ;;  %v850_v15 = vsel %vm14124_vm4, %v11703_v40, %v849_v1 }
 0x117   : > { %5282 = vmatprep.mubr.bf16.mxu1 %v13537_v59  ;;  %1838 = vst [vmem:[#allocation3 + $0x41c] sm:$0xf] %v1769_v63  ;;  %v1477_v7 = vsel %vm14213_vm14, %v1472_v37, %v1476_v62  ;;  %v11721_v9 = vrot.slane %v873_v3, 11  ;;  %v1034_v10 = vld [vmem:[#allocation2 + $0xb8] sm:$0xf]  ;;  %17789 = vst [vmem:[#allocation12_spill] sm:$0xff] %v14666_v13  ;;  %v530_v29 = vor.u32 %v528_v19, %v14666_v13 }
 0x118   : > { %v1462_v52 = vrot.slane %v1461_v55, 4  ;;  %5283 = vmatmul.mubr.bf16.gmra.mxu1 %v13539_v60  ;;  %v1113_v42 = vld [vmem:[#allocation2 + $0xb8] sm:$0xf]  ;;  %1563 = vst [vmem:[#allocation3 + $0x418] sm:$0xf] %v1477_v7  ;;  %v11739_v26 = vrot.slane %v1611_v23, 9 }
 0x119   : > { %1066 = vst [vmem:[#allocation3 + $0x45c] sm:$0xf] %v1034_v10  ;;  %v1488_v17 = vshll.u32 %v1113_v42, 16  ;;  %v1492_v18 = vshrl.u32 %v1113_v42, 16  ;;  %851 = vst [vmem:[#allocation2 + $0xb4] sm:$0x1] %v850_v15  ;;  %v531_v34 = vsel %vm14131_vm5, %v523_v5, %v530_v29 }
 0x11a   : > { %v1467_v6 = vsel %vm14213_vm14, %v1462_v52, %v14635_v57  ;;  %v994_v57 = vld [vmem:[#allocation2 + $0xbc] sm:$0x1]  ;;  %v1612_v25 = vld [vmem:[#allocation2 + $0xb8] sm:$0xf]  ;;  %694 = vst [vmem:[#allocation2 + $0xc0] sm:$0xf] %v693_v61 }
 0x11b   : > { %1562 = vst [vmem:[#allocation3 + $0x3f4] sm:$0xf] %v1467_v6  ;;  %v995_v27 = vsel %vm14167_vm10, %v11721_v9, %v994_v57  ;;  %v14674_v28 = vrot.slane %v1488_v17, 5  ;;  %v1494_v30 = vrot.slane %v1492_v18, 4  ;;  %v1772_v20 = vrot.slane %v1612_v25, 5 }
 0x11c   : > { %996 = vst [vmem:[#allocation2 + $0xbc] sm:$0x1] %v995_v27  ;;  %v1905_v35 = vld [vmem:[#allocation2 + $0xc] sm:$0xf]  ;;  %695 = vst [vmem:[#allocation2 + $0xc4] sm:$0xf] %v531_v34 }
 0x11d   : > { %v1773_v37 = vsel %vm14184_vm13, %v11739_v26, %v1772_v20  ;;  %v1906_v16 = vld [vmem:[#allocation2 + $0x10] sm:$0xf]  ;;  %v1907_v39 = vld [vmem:[#allocation2 + $0x14] sm:$0x1]  ;;  %v1954_v41 = vshrl.u32 %v1905_v35, 16  ;;  %v1774_v44 = vrot.slane %v1772_v20, 4  ;;  %v1495_v11 = vor.u32 %v1494_v30, %v14674_v28 }
 0x11e   : > { %1839 = vst [vmem:[#allocation3 + $0x440] sm:$0xf] %v1773_v37  ;;  %v1957_v45 = vshll.u32 %v1905_v35, 16  ;;  %v1963_v46 = vshll.u32 %v1906_v16, 16  ;;  %v1967_v47 = vshrl.u32 %v1906_v16, 16  ;;  %v1973_v32 = vshll.u32 %v1907_v39, 16  ;;  %v12486_v39 = vpop.f32.mrf.mxu1 }
 0x11f   : > { %v1956_v50 = vrot.slane %v1954_v41, 4  ;;  %v13547_v51 = vld [vmem:[#allocation3 + $0x3f0] ss:$36 sps:$4 sm:$0xff]   ;;  %v1496_v52 = vrot.slane %v1495_v11, 4  ;;  %v2402_v15 = vld [vmem:[#allocation2 + $0x10] sm:$0xf] }
 0x120   : > { %v1869_v53 = vld [vmem:[#allocation2 + $0xb4] sm:$0xf]  ;;  %v1959_v0 = vrot.slane %v1957_v45, 5  ;;  %v1965_v1 = vrot.slane %v1963_v46, 5  ;;  %v1969_v63 = vrot.slane %v1967_v47, 4  ;;  %v1975_v10 = vrot.slane %v1973_v32, 5 }
 0x121   : > { %v1033_v54 = vld [vmem:[#allocation2 + $0xb4] sm:$0xf]  ;;  %1901 = vst [vmem:[#allocation3 + $0x3fc] sm:$0xf] %v1869_v53  ;;  %v730_v21 = vld [vmem:[#allocation2 + $0xc0] sm:$0x2]  ;;  %v12487_v53 = vpop.f32.mrf.mxu1 }
 0x122   : > { %v13543_v49 = vld [vmem:[#allocation3 + $0x3f4] ss:$36 sps:$4 sm:$0xff]   ;;  %1065 = vst [vmem:[#allocation3 + $0x438] sm:$0xf] %v1033_v54  ;;  %v1112_v55 = vld [vmem:[#allocation2 + $0xb4] sm:$0xf]  ;;  %v1960_v7 = vor.u32 %v1959_v0, %v1956_v50  ;;  %v1970_v9 = vor.u32 %v1969_v63, %v1965_v1 }
 0x123   : > { %5129 = vmatprep.mubr.bf16.mxu0 %v13543_v49  ;;  %v852_v8 = vld [vmem:[#allocation2 + $0xc0] sm:$0x1]  ;;  %v1114_v56 = vld [vmem:[#allocation2 + $0xbc] sm:$0x1]  ;;  %v1479_v59 = vshrl.u32 %v1112_v55, 16  ;;  %v1482_v60 = vshll.u32 %v1112_v55, 16 }
 0x124   : > { %5130 = vmatmul.mubr.bf16.gmra.mxu0 %v13547_v51  ;;  %v11704_v58 = vrot.slane %v730_v21, 9  ;;  %v1498_v62 = vshll.u32 %v1114_v56, 16  ;;  %v1613_v48 = vld [vmem:[#allocation2 + $0xbc] sm:$0x1]  ;;  %v1872_v5 = vld [vmem:[#allocation2 + $0xc4] sm:$0xf]  ;;  %v12374_v51 = vpop.f32.mrf.mxu0 }
 0x125   : > { %v1481_v40 = vrot.slane %v1479_v59, 4  ;;  %v1484_v2 = vrot.slane %v1482_v60, 5  ;;  %v1775_v4 = vrot.slane %v1613_v48, 5  ;;  %1904 = vst [vmem:[#allocation3 + $0x468] sm:$0xf] %v1872_v5  ;;  %v2499_v57 = vrot.slane %v2402_v15, 5 }
 0x126   : > { %v853_v3 = vsel %vm14124_vm4, %v11704_v58, %v852_v8  ;;  %v1500_v6 = vrot.slane %v1498_v62, 5  ;;  %v2401_v42 = vld [vmem:[#allocation2 + $0xc] sm:$0xe]  ;;  %v2403_v19 = vld [vmem:[#allocation2 + $0x14] sm:$0x1]  ;;  %v1961_v25 = vrot.slane %v1960_v7, 4  ;;  %v14699_v8 = vadd.f32 %v12487_v53, %v12486_v39  ;;  %v12375_v0 = vpop.f32.mrf.mxu0 }
 0x127   : > { %854 = vst [vmem:[#allocation2 + $0xc0] sm:$0x1] %v853_v3  ;;  %v1485_v17 = vor.u32 %v1484_v2, %v1481_v40  ;;  %v1776_v18 = vsel %vm14184_vm13, %v1774_v44, %v1775_v4  ;;  %v11740_v23 = vrot.slane %v2401_v42, 9  ;;  %v1971_v26 = vrot.slane %v1970_v9, 4  ;;  %v13551_v30 = vld [vmem:[#allocation3 + $0x3f8] ss:$36 sps:$4 sm:$0xff]  }
 0x128   : > { %v1501_v61 = vsel %vm14213_vm14, %v1496_v52, %v1500_v6  ;;  %1840 = vst [vmem:[#allocation3 + $0x464] sm:$0xf] %v1776_v18  ;;  %v2502_v27 = vrot.slane %v2403_v19, 5  ;;  %v13549_v29 = vld [vmem:[#allocation3 + $0x3fc] ss:$36 sps:$4 sm:$0xff]   ;;  %v1966_v35 = vsel %vm14213_vm14, %v1961_v25, %v1965_v1  ;;  %v2501_v16 = vrot.slane %v2499_v57, 4  ;;  %v14701_v52 = vpop.f32.mrf.mxu1  ;;  %v14705_v6 = vpop.f32.mrf.mxu0 }
 0x129   : > { %v1486_v20 = vrot.slane %v1485_v17, 4  ;;  %1565 = vst [vmem:[#allocation3 + $0x460] sm:$0xf] %v1501_v61  ;;  %v2500_v34 = vsel %vm14184_vm13, %v11740_v23, %v2499_v57  ;;  %v1976_v37 = vsel %vm14213_vm14, %v1971_v26, %v1975_v10  ;;  %5290 = vmatprep.mubr.bf16.mxu1 %v13549_v29  ;;  %2369 = vst [vmem:[#allocation3 + $0x10] sm:$0xf] %v1966_v35 }
 0x12a   : > { %2641 = vst [vmem:[#allocation3 + $0x14] sm:$0xf] %v2500_v34  ;;  %2370 = vst [vmem:[#allocation3 + $0x34] sm:$0xf] %v1976_v37  ;;  %v2674_v44 = vld [vmem:[#allocation2 + $0x18] sm:$0xf]  ;;  %5291 = vmatmul.mubr.bf16.gmra.mxu1 %v13551_v30  ;;  %v2503_v47 = vsel %vm14184_vm13, %v2501_v16, %v2502_v27  ;;  %v14703_v40 = vadd.f32 %v12375_v0, %v12374_v51  ;;  %v14707_v7 = vpop.f32.mrf.mxu1  ;;  %v14709_v61 = vpop.f32.mrf.mxu0 }
 0x12b   : > { %v1491_v41 = vsel %vm14213_vm14, %v1486_v20, %v14674_v28  ;;  %v2675_v45 = vld [vmem:[#allocation2 + $0x1c] sm:$0xf]  ;;  %v2738_v46 = vld [vmem:[#allocation2 + $0x18] sm:$0xf]  ;;  %2706 = vst [vmem:[#allocation3 + $0x18] sm:$0xf] %v2674_v44 }
 0x12c   : > { %1564 = vst [vmem:[#allocation3 + $0x43c] sm:$0xf] %v1491_v41  ;;  %2707 = vst [vmem:[#allocation3 + $0x3c] sm:$0xf] %v2675_v45  ;;  %v2739_v49 = vld [vmem:[#allocation2 + $0x1c] sm:$0xf]  ;;  %v12492_v25 = vpop.f32.mrf.mxu1  ;;  %v12380_v16 = vpop.f32.mrf.mxu0 }
 0x12d   : > { %v2740_v11 = vld [vmem:[#allocation2 + $0x20] sm:$0x1]  ;;  %v2787_v50 = vshrl.u32 %v2738_v46, 16  ;;  %v2790_v32 = vshll.u32 %v2738_v46, 16  ;;  %2642 = vst [vmem:[#allocation3 + $0x38] sm:$0xf] %v2503_v47 }
 0x12e   : > { %v1871_v54 = vld [vmem:[#allocation2 + $0xc0] sm:$0xf]  ;;  %v2796_v28 = vshll.u32 %v2739_v49, 16  ;;  %v2800_v55 = vshrl.u32 %v2739_v49, 16  ;;  %v2806_v21 = vshll.u32 %v2740_v11, 16  ;;  %v12493_v39 = vpop.f32.mrf.mxu1  ;;  %v12381_v53 = vpop.f32.mrf.mxu0 }
 0x12f   : > { %1903 = vst [vmem:[#allocation3 + $0x444] sm:$0xf] %v1871_v54  ;;  %v2789_v56 = vrot.slane %v2787_v50, 4  ;;  %v2792_v59 = vrot.slane %v2790_v32, 5  ;;  %v1908_v60 = vld [vmem:[#allocation2 + $0x18] sm:$0xf]  ;;  %v14715_v47 = vadd.f32 %v12493_v39, %v12492_v25 }
 0x130   : > { %v1909_v58 = vld [vmem:[#allocation2 + $0x1c] sm:$0xf]  ;;  %v2798_v62 = vrot.slane %v2796_v28, 5  ;;  %v2802_v48 = vrot.slane %v2800_v55, 4  ;;  %v2808_v1 = vrot.slane %v2806_v21, 5  ;;  %v1978_v3 = vshrl.u32 %v1908_v60, 16  ;;  %v14717_v54 = vpop.f32.mrf.mxu1 }
 0x131   : > { %v1910_v63 = vld [vmem:[#allocation2 + $0x20] sm:$0x1]  ;;  %v2793_v2 = vor.u32 %v2792_v59, %v2789_v56  ;;  %v1981_v4 = vshll.u32 %v1908_v60, 16  ;;  %v1987_v5 = vshll.u32 %v1909_v58, 16  ;;  %v1991_v10 = vshrl.u32 %v1909_v58, 16  ;;  %v13581_v39 = vld [vmem:[%s17746_s1 + $0x230] sm:$0xff]  }
 0x132   : > { %v2803_v9 = vor.u32 %v2802_v48, %v2798_v62  ;;  %v1997_v42 = vshll.u32 %v1910_v63, 16  ;;  %v2404_v15 = vld [vmem:[#allocation2 + $0x18] sm:$0xe]  ;;  %v2405_v17 = vld [vmem:[#allocation2 + $0x1c] sm:$0xf]  ;;  %v1980_v19 = vrot.slane %v1978_v3, 4  ;;  %v14719_v56 = vadd.f32 %v12381_v53, %v12380_v16  ;;  %v14725_v63 = vpop.f32.mrf.mxu0 }
 0x133   : > { %v2794_v18 = vrot.slane %v2793_v2, 4  ;;  %v1983_v23 = vrot.slane %v1981_v4, 5  ;;  %v1989_v57 = vrot.slane %v1987_v5, 5  ;;  %v13555_v26 = vld [vmem:[#allocation3 + $0x43c] ss:$36 sps:$4 sm:$0xff]   ;;  %v1993_v35 = vrot.slane %v1991_v10, 4  ;;  %v14727_v2 = vpop.f32.mrf.mxu1 }
 0x134   : > { %v13558_v27 = vld [vmem:[#allocation3 + $0x438] ss:$36 sps:$4 sm:$0xff]   ;;  %v2804_v29 = vrot.slane %v2803_v9, 4  ;;  %v2406_v37 = vld [vmem:[#allocation2 + $0x20] sm:$0x1]  ;;  %5137 = vmatprep.mubr.bf16.mxu0 %v13555_v26  ;;  %v1999_v46 = vrot.slane %v1997_v42, 5 }
 0x135   : > { %v13565_v30 = vld [vmem:[#allocation3 + $0x14] ss:$36 sps:$4 sm:$0xff]   ;;  %v2799_v20 = vsel %vm14213_vm14, %v2794_v18, %v2798_v62  ;;  %v1984_v34 = vor.u32 %v1983_v23, %v1980_v19  ;;  %v13561_v44 = vld [vmem:[#allocation3 + $0x440] ss:$36 sps:$4 sm:$0xff]   ;;  %5138 = vmatmul.mubr.bf16.gmra.mxu0 %v13558_v27  ;;  %v1994_v11 = vor.u32 %v1993_v35, %v1989_v57  ;;  %v11741_v50 = vrot.slane %v2404_v15, 9 }
 0x136   : > { %v13559_v41 = vld [vmem:[#allocation3 + $0x444] ss:$36 sps:$4 sm:$0xff]   ;;  %v2809_v45 = vsel %vm14213_vm14, %v2804_v29, %v2808_v1  ;;  %3202 = vst [vmem:[#allocation3 + $0x1c] sm:$0xf] %v2799_v20  ;;  %v2506_v32 = vrot.slane %v2405_v17, 5  ;;  %5339 = vmatprep.mubr.bf16.mxu0 %v13565_v30  ;;  %v2509_v28 = vrot.slane %v2406_v37, 5  ;;  %v12498_v20 = vpop.f32.mrf.mxu1 }
 0x137   : > { %3203 = vst [vmem:[#allocation3 + $0x40] sm:$0xf] %v2809_v45  ;;  %v1985_v49 = vrot.slane %v1984_v34, 4  ;;  %v2676_v51 = vld [vmem:[#allocation2 + $0x24] sm:$0xf]  ;;  %5298 = vmatprep.mubr.bf16.mxu1 %v13559_v41  ;;  %v1995_v58 = vrot.slane %v1994_v11, 4 }
 0x138   : > { %v2677_v55 = vld [vmem:[#allocation2 + $0x28] sm:$0xf]  ;;  %2708 = vst [vmem:[#allocation3 + $0x60] sm:$0xf] %v2676_v51  ;;  %v2741_v21 = vld [vmem:[#allocation2 + $0x24] sm:$0xf]  ;;  %5299 = vmatmul.mubr.bf16.gmra.mxu1 %v13561_v44  ;;  %v2507_v0 = vsel %vm14184_vm13, %v11741_v50, %v2506_v32 }
 0x139   : > { %v13569_v59 = vld [vmem:[#allocation3 + $0x10] ss:$36 sps:$4 sm:$0xff]   ;;  %v1990_v60 = vsel %vm14213_vm14, %v1985_v49, %v1989_v57  ;;  %v2508_v62 = vrot.slane %v2506_v32, 4  ;;  %2709 = vst [vmem:[#allocation3 + $0x84] sm:$0xf] %v2677_v55  ;;  %v2811_v3 = vshrl.u32 %v2741_v21, 16  ;;  %v2000_v42 = vsel %vm14213_vm14, %v1995_v58, %v1999_v46  ;;  %v14733_v57 = vpop.f32.mrf.mxu0 }
 0x13a   : > { %v2742_v48 = vld [vmem:[#allocation2 + $0x28] sm:$0xf]  ;;  %v2743_v1 = vld [vmem:[#allocation2 + $0x2c] sm:$0x1]  ;;  %2371 = vst [vmem:[#allocation3 + $0x58] sm:$0xf] %v1990_v60 }
 0x13b   : > { %2643 = vst [vmem:[#allocation3 + $0x5c] sm:$0xf] %v2507_v0  ;;  %v2814_v4 = vshll.u32 %v2741_v21, 16  ;;  %v2820_v5 = vshll.u32 %v2742_v48, 16  ;;  %v2824_v9 = vshrl.u32 %v2742_v48, 16  ;;  %v2510_v15 = vsel %vm14184_vm13, %v2508_v62, %v2509_v28  ;;  %v12386_v41 = vpop.f32.mrf.mxu0  ;;  %v13966_v21 = vld [vmem:[%s17746_s1 + $0x238] sm:$0xff]  }
 0x13c   : > { %v1911_v10 = vld [vmem:[#allocation2 + $0x24] sm:$0xf]  ;;  %v2830_v17 = vshll.u32 %v2743_v1, 16  ;;  %v1912_v18 = vld [vmem:[#allocation2 + $0x28] sm:$0xf]  ;;  %v2813_v25 = vrot.slane %v2811_v3, 4  ;;  %v12499_v1 = vpop.f32.mrf.mxu1 }
 0x13d   : > { %v1913_v19 = vld [vmem:[#allocation2 + $0x2c] sm:$0x1]  ;;  %v2002_v23 = vshrl.u32 %v1911_v10, 16  ;;  %2372 = vst [vmem:[#allocation3 + $0x7c] sm:$0xf] %v2000_v42  ;;  %v2816_v26 = vrot.slane %v2814_v4, 5  ;;  %5340 = vmatmul.mubr.bf16.vlgmr.msra.gmra.mxu0 %v13569_v59  ;;  %v12387_v55 = vpop.f32.mrf.mxu0 }
 0x13e   : > { %2644 = vst [vmem:[#allocation3 + $0x80] sm:$0xf] %v2510_v15  ;;  %v2822_v27 = vrot.slane %v2820_v5, 5  ;;  %v2826_v29 = vrot.slane %v2824_v9, 4  ;;  %v2407_v30 = vld [vmem:[#allocation2 + $0x24] sm:$0xe]  ;;  %13303 = vmatpush3.bf16.msra.mxu0 %v13966_v21 }
 0x13f   : > { %v2832_v34 = vrot.slane %v2830_v17, 5  ;;  %v2004_v35 = vrot.slane %v2002_v23, 4  ;;  %v2005_v37 = vshll.u32 %v1911_v10, 16  ;;  %v2011_v16 = vshll.u32 %v1912_v18, 16  ;;  %v13570_v44 = vld [vmem:[#allocation3 + $0x1c] ss:$36 sps:$4 sm:$0xff]   ;;  %13304 = vmatprep.subr.bf16.mxu0 %v13581_v39 }
 0x140   : > { %v13572_v45 = vld [vmem:[#allocation3 + $0x18] ss:$36 sps:$4 sm:$0xff]   ;;  %v2817_v46 = vor.u32 %v2816_v26, %v2813_v25  ;;  %v2827_v49 = vor.u32 %v2826_v29, %v2822_v27  ;;  %v2015_v11 = vshrl.u32 %v1912_v18, 16  ;;  %v2021_v51 = vshll.u32 %v1913_v19, 16  ;;  %v2408_v53 = vld [vmem:[#allocation2 + $0x28] sm:$0xf]  ;;  %5500 = vmatprep.mubr.bf16.mxu1 %v13570_v44 }
 0x141   : > { %v2007_v50 = vrot.slane %v2005_v37, 5  ;;  %v2013_v32 = vrot.slane %v2011_v16, 5  ;;  %v11742_v28 = vrot.slane %v2407_v30, 9  ;;  %v2409_v62 = vld [vmem:[#allocation2 + $0x2c] sm:$0x1]  ;;  %v2513_v48 = vrot.slane %v2408_v53, 5  ;;  %5501 = vmatmul.mubr.bf16.vlgmr.msra.gmra.mxu1 %v13572_v45 }
 0x142   : > { %v2818_v60 = vrot.slane %v2817_v46, 4  ;;  %v2828_v58 = vrot.slane %v2827_v49, 4  ;;  %v2017_v0 = vrot.slane %v2015_v11, 4  ;;  %v2023_v3 = vrot.slane %v2021_v51, 5  ;;  %v13594_v5 = vld [vmem:[%s17746_s1 + $0x228] sm:$0xff]   ;;  %13305 = vmatpush3.bf16.msra.mxu0 %v13581_v39 }
 0x143   : > { %v2008_v59 = vor.u32 %v2007_v50, %v2004_v35  ;;  %v2516_v4 = vrot.slane %v2409_v62, 5  ;;  %v2514_v15 = vsel %vm14184_vm13, %v11742_v28, %v2513_v48  ;;  %v2678_v17 = vld [vmem:[#allocation2 + $0x30] sm:$0xf]  ;;  %v2679_v18 = vld [vmem:[#allocation2 + $0x34] sm:$0xf]  ;;  %v14750_v26 = vadd.f32 %v12387_v55, %v12386_v41  ;;  %13306 = vmatprep.subr.bf16.mxu0 %v13594_v5  ;;  %v13607_v41 = vld [vmem:[%s17746_s1 + $0x220] sm:$0xff]  }
 0x144   : > { %v2823_v9 = vsel %vm14213_vm14, %v2818_v60, %v2822_v27  ;;  %v2833_v10 = vsel %vm14213_vm14, %v2828_v58, %v2832_v34  ;;  %v2018_v42 = vor.u32 %v2017_v0, %v2013_v32  ;;  %v13575_v23 = vld [vmem:[#allocation3 + $0x58] ss:$36 sps:$4 sm:$0xff]   ;;  %2645 = vst [vmem:[#allocation3 + $0xa4] sm:$0xf] %v2514_v15  ;;  %2710 = vst [vmem:[#allocation3 + $0xa8] sm:$0xf] %v2678_v17  ;;  %v14752_v27 = vpop.f32.mrf.mxu0  ;;  %v14767_v0 = vpop.f32.mrf.mxu1 }
 0x145   : > { %v13573_v19 = vld [vmem:[#allocation3 + $0x5c] ss:$36 sps:$4 sm:$0xff]   ;;  %3204 = vst [vmem:[#allocation3 + $0x64] sm:$0xf] %v2823_v9  ;;  %3205 = vst [vmem:[#allocation3 + $0x88] sm:$0xf] %v2833_v10  ;;  %v14754_v29 = vadd.f32 %v12499_v1, %v12498_v20 }
 0x146   : > { %v2009_v25 = vrot.slane %v2008_v59, 4  ;;  %2711 = vst [vmem:[#allocation3 + $0xcc] sm:$0xf] %v2679_v18  ;;  %v2019_v30 = vrot.slane %v2018_v42, 4  ;;  %v2515_v34 = vrot.slane %v2513_v48, 4  ;;  %5347 = vmatprep.mubr.bf16.mxu0 %v13573_v19  ;;  %v14765_v58 = vpop.f32.mrf.mxu0  ;;  %13307 = vmatpush3.bf16.msra.mxu0 %v13594_v5  ;;  %v13620_v17 = vld [vmem:[%s17746_s1 + $0x218] sm:$0xff]  }
 0x147   : > { %v2744_v35 = vld [vmem:[#allocation2 + $0x30] sm:$0xf]  ;;  %v2745_v37 = vld [vmem:[#allocation2 + $0x34] sm:$0xf]  ;;  %v2746_v44 = vld [vmem:[#allocation2 + $0x38] sm:$0x1]  ;;  %5348 = vmatmul.mubr.bf16.gmra.mxu0 %v13575_v23  ;;  %13308 = vmatprep.subr.bf16.mxu0 %v13607_v41 }
 0x148   : > { %v2014_v16 = vsel %vm14213_vm14, %v2009_v25, %v2013_v32  ;;  %v2835_v45 = vshrl.u32 %v2744_v35, 16  ;;  %v2838_v46 = vshll.u32 %v2744_v35, 16  ;;  %v2844_v49 = vshll.u32 %v2745_v37, 16  ;;  %v1914_v51 = vld [vmem:[#allocation2 + $0x30] sm:$0xf] }
 0x149   : > { %v2024_v20 = vsel %vm14213_vm14, %v2019_v30, %v2023_v3  ;;  %2373 = vst [vmem:[#allocation3 + $0xa0] sm:$0xf] %v2014_v16  ;;  %v2517_v39 = vsel %vm14184_vm13, %v2515_v34, %v2516_v4  ;;  %v2848_v11 = vshrl.u32 %v2745_v37, 16  ;;  %v2854_v50 = vshll.u32 %v2746_v44, 16  ;;  %v1915_v32 = vld [vmem:[#allocation2 + $0x34] sm:$0xf]  ;;  %v12392_v44 = vpop.f32.mrf.mxu0 }
 0x14a   : > { %2374 = vst [vmem:[#allocation3 + $0xc4] sm:$0xf] %v2024_v20  ;;  %2646 = vst [vmem:[#allocation3 + $0xc8] sm:$0xf] %v2517_v39  ;;  %v2837_v53 = vrot.slane %v2835_v45, 4  ;;  %v2840_v28 = vrot.slane %v2838_v46, 5  ;;  %v14777_v45 = vpop.f32.mrf.mxu1  ;;  %13309 = vmatpush3.bf16.msra.mxu0 %v13607_v41 }
 0x14b   : > { %v2846_v55 = vrot.slane %v2844_v49, 5  ;;  %v1916_v21 = vld [vmem:[#allocation2 + $0x38] sm:$0x1]  ;;  %v2026_v60 = vshrl.u32 %v1914_v51, 16  ;;  %v2850_v62 = vrot.slane %v2848_v11, 4  ;;  %v2856_v48 = vrot.slane %v2854_v50, 5  ;;  %13310 = vmatprep.subr.bf16.mxu0 %v13620_v17 }
 0x14c   : > { %v2029_v1 = vshll.u32 %v1914_v51, 16  ;;  %v2035_v59 = vshll.u32 %v1915_v32, 16  ;;  %v2410_v3 = vld [vmem:[#allocation2 + $0x30] sm:$0xe]  ;;  %v2841_v4 = vor.u32 %v2840_v28, %v2837_v53  ;;  %v2039_v10 = vshrl.u32 %v1915_v32, 16 }
 0x14d   : > { %v2028_v9 = vrot.slane %v2026_v60, 4  ;;  %v2045_v42 = vshll.u32 %v1916_v21, 16  ;;  %v2411_v15 = vld [vmem:[#allocation2 + $0x34] sm:$0xf]  ;;  %v13576_v18 = vld [vmem:[#allocation3 + $0x64] ss:$36 sps:$4 sm:$0xff]   ;;  %v2851_v19 = vor.u32 %v2850_v62, %v2846_v55  ;;  %v12393_v21 = vpop.f32.mrf.mxu0 }
 0x14e   : > { %v2031_v23 = vrot.slane %v2029_v1, 5  ;;  %v2037_v25 = vrot.slane %v2035_v59, 5  ;;  %v13578_v30 = vld [vmem:[#allocation3 + $0x60] ss:$36 sps:$4 sm:$0xff]   ;;  %v2842_v34 = vrot.slane %v2841_v4, 4  ;;  %v2041_v35 = vrot.slane %v2039_v10, 4  ;;  %5508 = vmatprep.mubr.bf16.mxu1 %v13576_v18  ;;  %13311 = vmatpush3.bf16.msra.mxu0 %v13620_v17 }
 0x14f   : > { %v2047_v37 = vrot.slane %v2045_v42, 5  ;;  %v11743_v16 = vrot.slane %v2410_v3, 9  ;;  %v14775_v5 = vld [vmem:[%s17746_s1 + $0x210] sm:$0xff]   ;;  %v2852_v46 = vrot.slane %v2851_v19, 4  ;;  %v2412_v20 = vld [vmem:[#allocation2 + $0x38] sm:$0x1]  ;;  %5509 = vmatmul.mubr.bf16.gmra.mxu1 %v13578_v30  ;;  %v14785_v3 = vadd.f32 %v12393_v21, %v12392_v44  ;;  %v12504_v42 = vpop.f32.mrf.mxu1 }
 0x150   : > { %v2032_v49 = vor.u32 %v2031_v23, %v2028_v9  ;;  %v2520_v39 = vrot.slane %v2411_v15, 5  ;;  %v2680_v11 = vld [vmem:[#allocation2 + $0x3c] sm:$0xf]  ;;  %v2847_v50 = vsel %vm14213_vm14, %v2842_v34, %v2846_v55  ;;  %v2042_v51 = vor.u32 %v2041_v35, %v2037_v25  ;;  %v2681_v53 = vld [vmem:[#allocation2 + $0x40] sm:$0xf]  ;;  %v13646_v30 = vld [vmem:[%s17746_s1 + $0x208] sm:$0xff]   ;;  %13312 = vmatprep.subr.bf16.mxu0 %v14775_v5 }
 0x151   : > { %v2523_v32 = vrot.slane %v2412_v20, 5  ;;  %2712 = vst [vmem:[#allocation3 + $0xf0] sm:$0xf] %v2680_v11  ;;  %v2747_v28 = vld [vmem:[#allocation2 + $0x3c] sm:$0xf]  ;;  %v2857_v1 = vsel %vm14213_vm14, %v2852_v46, %v2856_v48  ;;  %v12505_v17 = vpop.f32.mrf.mxu1 }
 0x152   : > { %v13579_v60 = vld [vmem:[#allocation3 + $0xa4] ss:$36 sps:$4 sm:$0xff]   ;;  %3206 = vst [vmem:[#allocation3 + $0xac] sm:$0xf] %v2847_v50  ;;  %v2033_v59 = vrot.slane %v2032_v49, 4  ;;  %v2521_v41 = vsel %vm14184_vm13, %v11743_v16, %v2520_v39  ;;  %v2043_v55 = vrot.slane %v2042_v51, 4  ;;  %v14797_v49 = vpop.f32.mrf.mxu0  ;;  %13313 = vmatpush3.bf16.msra.mxu0 %v14775_v5 }
 0x153   : > { %v13582_v62 = vld [vmem:[#allocation3 + $0xa0] ss:$36 sps:$4 sm:$0xff]   ;;  %2713 = vst [vmem:[#allocation3 + $0x114] sm:$0xf] %v2681_v53  ;;  %3207 = vst [vmem:[#allocation3 + $0xd0] sm:$0xf] %v2857_v1  ;;  %5355 = vmatprep.mubr.bf16.mxu0 %v13579_v60  ;;  %v14799_v60 = vpop.f32.mrf.mxu1  ;;  %13314 = vmatprep.subr.bf16.mxu0 %v13646_v30 }
 0x154   : > { %v2522_v4 = vrot.slane %v2520_v39, 4  ;;  %2647 = vst [vmem:[#allocation3 + $0xec] sm:$0xf] %v2521_v41  ;;  %v2748_v9 = vld [vmem:[#allocation2 + $0x40] sm:$0xf]  ;;  %v2038_v15 = vsel %vm14213_vm14, %v2033_v59, %v2037_v25  ;;  %v2859_v48 = vshrl.u32 %v2747_v28, 16  ;;  %5356 = vmatmul.mubr.bf16.gmra.mxu0 %v13582_v62  ;;  %v2048_v34 = vsel %vm14213_vm14, %v2043_v55, %v2047_v37 }
 0x155   : > { %v2749_v10 = vld [vmem:[#allocation2 + $0x44] sm:$0x1]  ;;  %v2862_v18 = vshll.u32 %v2747_v28, 16  ;;  %v2868_v19 = vshll.u32 %v2748_v9, 16  ;;  %v1917_v23 = vld [vmem:[#allocation2 + $0x3c] sm:$0xf] }
 0x156   : > { %2375 = vst [vmem:[#allocation3 + $0xe8] sm:$0xf] %v2038_v15  ;;  %v2524_v35 = vsel %vm14184_vm13, %v2522_v4, %v2523_v32  ;;  %v2872_v16 = vshrl.u32 %v2748_v9, 16  ;;  %v2878_v44 = vshll.u32 %v2749_v10, 16  ;;  %v1918_v25 = vld [vmem:[#allocation2 + $0x40] sm:$0xf]  ;;  %13315 = vmatpush3.bf16.msra.mxu0 %v13646_v30 }
 0x157   : > { %v1919_v46 = vld [vmem:[#allocation2 + $0x44] sm:$0x1]  ;;  %2376 = vst [vmem:[#allocation3 + $0x10c] sm:$0xf] %v2048_v34  ;;  %2648 = vst [vmem:[#allocation3 + $0x110] sm:$0xf] %v2524_v35  ;;  %v14806_v35 = vadd.f32 %v12505_v17, %v12504_v42 }
 0x158   : > { %v2861_v20 = vrot.slane %v2859_v48, 4  ;;  %v2864_v39 = vrot.slane %v2862_v18, 5  ;;  %v2870_v11 = vrot.slane %v2868_v19, 5  ;;  %v2050_v50 = vshrl.u32 %v1917_v23, 16  ;;  %v2413_v37 = vld [vmem:[#allocation2 + $0x3c] sm:$0xe]  ;;  %v14802_v48 = vpop.f32.mrf.mxu0  ;;  %v14804_v18 = vpop.f32.mrf.mxu1 }
 0x159   : > { %v2874_v51 = vrot.slane %v2872_v16, 4  ;;  %v2880_v53 = vrot.slane %v2878_v44, 5  ;;  %v2053_v28 = vshll.u32 %v1917_v23, 16  ;;  %v2059_v32 = vshll.u32 %v1918_v25, 16  ;;  %v2414_v21 = vld [vmem:[#allocation2 + $0x40] sm:$0xf] }
 0x15a   : > { %v2865_v62 = vor.u32 %v2864_v39, %v2861_v20  ;;  %v2052_v1 = vrot.slane %v2050_v50, 4  ;;  %v2063_v59 = vshrl.u32 %v1918_v25, 16  ;;  %v2069_v41 = vshll.u32 %v1919_v46, 16  ;;  %v2415_v55 = vld [vmem:[#allocation2 + $0x44] sm:$0x1]  ;;  %v12510_v20 = vpop.f32.mrf.mxu1 }
 0x15b   : > { %v2875_v4 = vor.u32 %v2874_v51, %v2870_v11  ;;  %v2055_v9 = vrot.slane %v2053_v28, 5  ;;  %v2061_v10 = vrot.slane %v2059_v32, 5  ;;  %v11744_v15 = vrot.slane %v2413_v37, 9  ;;  %v13583_v19 = vld [vmem:[#allocation3 + $0xac] ss:$36 sps:$4 sm:$0xff]  }
 0x15c   : > { %v13585_v23 = vld [vmem:[#allocation3 + $0xa8] ss:$36 sps:$4 sm:$0xff]   ;;  %v2866_v34 = vrot.slane %v2865_v62, 4  ;;  %v2065_v25 = vrot.slane %v2063_v59, 4  ;;  %v2071_v46 = vrot.slane %v2069_v41, 5  ;;  %5516 = vmatprep.mubr.bf16.mxu1 %v13583_v19  ;;  %v2527_v39 = vrot.slane %v2414_v21, 5 }
 0x15d   : > { %v2876_v16 = vrot.slane %v2875_v4, 4  ;;  %v2056_v44 = vor.u32 %v2055_v9, %v2052_v1  ;;  %v2530_v50 = vrot.slane %v2415_v55, 5  ;;  %v2682_v37 = vld [vmem:[#allocation2 + $0x48] sm:$0xf]  ;;  %v13659_v51 = vld [vmem:[%s17746_s1 + $0x200] sm:$0xff]   ;;  %5517 = vmatmul.mubr.bf16.gmra.mxu1 %v13585_v23  ;;  %v12398_v1 = vpop.f32.mrf.mxu0 }
 0x15e   : > { %v2871_v5 = vsel %vm14213_vm14, %v2866_v34, %v2870_v11  ;;  %v13586_v42 = vld [vmem:[#allocation3 + $0xec] ss:$36 sps:$4 sm:$0xff]   ;;  %v2066_v62 = vor.u32 %v2065_v25, %v2061_v10  ;;  %2714 = vst [vmem:[#allocation3 + $0x138] sm:$0xf] %v2682_v37  ;;  %v12511_v11 = vpop.f32.mrf.mxu1  ;;  %v2528_v30 = vsel %vm14184_vm13, %v11744_v15, %v2527_v39  ;;  %v2529_v21 = vrot.slane %v2527_v39, 4  ;;  %13316 = vmatprep.subr.bf16.mxu0 %v13659_v51 }
 0x15f   : > { %v13588_v17 = vld [vmem:[#allocation3 + $0xe8] ss:$36 sps:$4 sm:$0xff]   ;;  %v2881_v28 = vsel %vm14213_vm14, %v2876_v16, %v2880_v53  ;;  %3208 = vst [vmem:[#allocation3 + $0xf4] sm:$0xf] %v2871_v5  ;;  %v2057_v32 = vrot.slane %v2056_v44, 4  ;;  %v14817_v55 = vadd.f32 %v12511_v11, %v12510_v20  ;;  %5363 = vmatprep.mubr.bf16.mxu0 %v13586_v42  ;;  %v12399_v34 = vpop.f32.mrf.mxu0  ;;  %13317 = vmatpush3.bf16.msra.mxu0 %v13659_v51 }
 0x160   : > { %3209 = vst [vmem:[#allocation3 + $0x118] sm:$0xf] %v2881_v28  ;;  %v2683_v59 = vld [vmem:[#allocation2 + $0x4c] sm:$0xf]  ;;  %v2750_v41 = vld [vmem:[#allocation2 + $0x48] sm:$0xf]  ;;  %5364 = vmatmul.mubr.bf16.gmra.mxu0 %v13588_v17  ;;  %v2531_v15 = vsel %vm14184_vm13, %v2529_v21, %v2530_v50  ;;  %v14825_v28 = vadd.f32 %v12399_v34, %v12398_v1  ;;  %v14829_v17 = vpop.f32.mrf.mxu1 }
 0x161   : > { %v2062_v53 = vsel %vm14213_vm14, %v2057_v32, %v2061_v10  ;;  %v2067_v4 = vrot.slane %v2066_v62, 4  ;;  %2649 = vst [vmem:[#allocation3 + $0x134] sm:$0xf] %v2528_v30  ;;  %2715 = vst [vmem:[#allocation3 + $0x15c] sm:$0xf] %v2683_v59  ;;  %v2883_v23 = vshrl.u32 %v2750_v41, 16  ;;  %v14827_v32 = vpop.f32.mrf.mxu0 }
 0x162   : > { %v2751_v9 = vld [vmem:[#allocation2 + $0x4c] sm:$0xf]  ;;  %v2752_v19 = vld [vmem:[#allocation2 + $0x50] sm:$0x1]  ;;  %2377 = vst [vmem:[#allocation3 + $0x130] sm:$0xf] %v2062_v53 }
 0x163   : > { %v2886_v16 = vshll.u32 %v2750_v41, 16  ;;  %v2892_v44 = vshll.u32 %v2751_v9, 16  ;;  %v2896_v25 = vshrl.u32 %v2751_v9, 16  ;;  %v1920_v20 = vld [vmem:[#allocation2 + $0x48] sm:$0xf]  ;;  %v2072_v5 = vsel %vm14213_vm14, %v2067_v4, %v2071_v46  ;;  %v14831_v9 = vpop.f32.mrf.mxu0 }
 0x164   : > { %2650 = vst [vmem:[#allocation3 + $0x158] sm:$0xf] %v2531_v15  ;;  %v2885_v10 = vrot.slane %v2883_v23, 4  ;;  %v2902_v39 = vshll.u32 %v2752_v19, 16  ;;  %v1921_v37 = vld [vmem:[#allocation2 + $0x4c] sm:$0xf] }
 0x165   : > { %v1922_v42 = vld [vmem:[#allocation2 + $0x50] sm:$0x1]  ;;  %2378 = vst [vmem:[#allocation3 + $0x154] sm:$0xf] %v2072_v5  ;;  %v2888_v50 = vrot.slane %v2886_v16, 5  ;;  %v2894_v62 = vrot.slane %v2892_v44, 5  ;;  %v12404_v16 = vpop.f32.mrf.mxu0  ;;  %v14833_v44 = vpop.f32.mrf.mxu1 }
 0x166   : > { %v2898_v11 = vrot.slane %v2896_v25, 4  ;;  %v2074_v30 = vshrl.u32 %v1920_v20, 16  ;;  %v2416_v21 = vld [vmem:[#allocation2 + $0x48] sm:$0xe]  ;;  %v2904_v59 = vrot.slane %v2902_v39, 5  ;;  %v2077_v46 = vshll.u32 %v1920_v20, 16 }
 0x167   : > { %v2083_v41 = vshll.u32 %v1921_v37, 16  ;;  %v2087_v53 = vshrl.u32 %v1921_v37, 16  ;;  %v2417_v4 = vld [vmem:[#allocation2 + $0x4c] sm:$0xf]  ;;  %v2889_v1 = vor.u32 %v2888_v50, %v2885_v10  ;;  %v2093_v34 = vshll.u32 %v1922_v42, 16  ;;  %v12405_v42 = vpop.f32.mrf.mxu0 }
 0x168   : > { %v2899_v19 = vor.u32 %v2898_v11, %v2894_v62  ;;  %v2076_v23 = vrot.slane %v2074_v30, 4  ;;  %v2418_v15 = vld [vmem:[#allocation2 + $0x50] sm:$0x1]  ;;  %v13591_v51 = vld [vmem:[#allocation3 + $0xf0] ss:$36 sps:$4 sm:$0xff]   ;;  %v2079_v5 = vrot.slane %v2077_v46, 5 }
 0x169   : > { %v13589_v33 = vld [vmem:[#allocation3 + $0xf4] ss:$36 sps:$4 sm:$0xff]   ;;  %v2890_v25 = vrot.slane %v2889_v1, 4  ;;  %v2085_v39 = vrot.slane %v2083_v41, 5  ;;  %v2089_v20 = vrot.slane %v2087_v53, 4  ;;  %v2095_v12 = vrot.slane %v2093_v34, 5 }
 0x16a   : > { %v2900_v38 = vrot.slane %v2899_v19, 4  ;;  %v2684_v14 = vld [vmem:[#allocation2 + $0x54] sm:$0xf]  ;;  %5524 = vmatprep.mubr.bf16.mxu1 %v13589_v33  ;;  %v2080_v37 = vor.u32 %v2079_v5, %v2076_v23  ;;  %v11745_v43 = vrot.slane %v2416_v21, 9  ;;  %v2534_v10 = vrot.slane %v2417_v4, 5  ;;  %v12516_v23 = vpop.f32.mrf.mxu1 }
 0x16b   : > { %v2685_v50 = vld [vmem:[#allocation2 + $0x58] sm:$0xf]  ;;  %2716 = vst [vmem:[#allocation3 + $0x180] sm:$0xf] %v2684_v14  ;;  %5525 = vmatmul.mubr.bf16.gmra.mxu1 %v13591_v51  ;;  %v2895_v11 = vsel %vm14213_vm14, %v2890_v25, %v2894_v62  ;;  %v2090_v46 = vor.u32 %v2089_v20, %v2085_v39  ;;  %v2537_v1 = vrot.slane %v2418_v15, 5  ;;  %v14841_v4 = vadd.f32 %v12405_v42, %v12404_v16  ;;  %v14843_v51 = vpop.f32.mrf.mxu0 }
 0x16c   : > { %v2905_v30 = vsel %vm14213_vm14, %v2900_v38, %v2904_v59  ;;  %2717 = vst [vmem:[#allocation3 + $0x1a4] sm:$0xf] %v2685_v50  ;;  %v2753_v41 = vld [vmem:[#allocation2 + $0x54] sm:$0xf]  ;;  %v2754_v53 = vld [vmem:[#allocation2 + $0x58] sm:$0xf]  ;;  %v2535_v14 = vsel %vm14184_vm13, %v11745_v43, %v2534_v10 }
 0x16d   : > { %v13592_v33 = vld [vmem:[#allocation3 + $0x134] ss:$36 sps:$4 sm:$0xff]   ;;  %3210 = vst [vmem:[#allocation3 + $0x13c] sm:$0xf] %v2895_v11  ;;  %3211 = vst [vmem:[#allocation3 + $0x160] sm:$0xf] %v2905_v30 }
 0x16e   : > { %v13595_v19 = vld [vmem:[#allocation3 + $0x130] ss:$36 sps:$4 sm:$0xff]   ;;  %v2081_v21 = vrot.slane %v2080_v37, 4  ;;  %17790 = vst [vmem:[#allocation13_spill] sm:$0xff] %v14841_v4  ;;  %v2091_v62 = vrot.slane %v2090_v46, 4  ;;  %v2536_v34 = vrot.slane %v2534_v10, 4  ;;  %5371 = vmatprep.mubr.bf16.mxu0 %v13592_v33 }
 0x16f   : > { %2651 = vst [vmem:[#allocation3 + $0x17c] sm:$0xf] %v2535_v14  ;;  %v2755_v38 = vld [vmem:[#allocation2 + $0x5c] sm:$0x1]  ;;  %v2907_v59 = vshrl.u32 %v2753_v41, 16  ;;  %v2910_v15 = vshll.u32 %v2753_v41, 16  ;;  %5372 = vmatmul.mubr.bf16.gmra.mxu0 %v13595_v19 }
 0x170   : > { %v2086_v5 = vsel %vm14213_vm14, %v2081_v21, %v2085_v39  ;;  %v2916_v25 = vshll.u32 %v2754_v53, 16  ;;  %v2920_v20 = vshrl.u32 %v2754_v53, 16  ;;  %v2926_v37 = vshll.u32 %v2755_v38, 16  ;;  %v1923_v50 = vld [vmem:[#allocation2 + $0x54] sm:$0xf]  ;;  %v12517_v21 = vpop.f32.mrf.mxu1 }
 0x171   : > { %v2096_v43 = vsel %vm14213_vm14, %v2091_v62, %v2095_v12  ;;  %2379 = vst [vmem:[#allocation3 + $0x178] sm:$0xf] %v2086_v5  ;;  %v2538_v16 = vsel %vm14184_vm13, %v2536_v34, %v2537_v1  ;;  %v2909_v10 = vrot.slane %v2907_v59, 4  ;;  %v2912_v42 = vrot.slane %v2910_v15, 5  ;;  %v1924_v11 = vld [vmem:[#allocation2 + $0x58] sm:$0xf]  ;;  %v14851_v5 = vpop.f32.mrf.mxu0 }
 0x172   : > { %v1925_v30 = vld [vmem:[#allocation2 + $0x5c] sm:$0x1]  ;;  %2380 = vst [vmem:[#allocation3 + $0x19c] sm:$0xf] %v2096_v43  ;;  %2652 = vst [vmem:[#allocation3 + $0x1a0] sm:$0xf] %v2538_v16 }
 0x173   : > { %v2918_v46 = vrot.slane %v2916_v25, 5  ;;  %v2922_v39 = vrot.slane %v2920_v20, 4  ;;  %v2928_v41 = vrot.slane %v2926_v37, 5  ;;  %v2098_v53 = vshrl.u32 %v1923_v50, 16  ;;  %v2419_v33 = vld [vmem:[#allocation2 + $0x54] sm:$0xe]  ;;  %v12410_v4 = vpop.f32.mrf.mxu0 }
 0x174   : > { %v2913_v19 = vor.u32 %v2912_v42, %v2909_v10  ;;  %v2101_v14 = vshll.u32 %v1923_v50, 16  ;;  %v2107_v38 = vshll.u32 %v1924_v11, 16  ;;  %v2111_v12 = vshrl.u32 %v1924_v11, 16  ;;  %v2420_v62 = vld [vmem:[#allocation2 + $0x58] sm:$0xf] }
 0x175   : > { %v2923_v1 = vor.u32 %v2922_v39, %v2918_v46  ;;  %v2100_v34 = vrot.slane %v2098_v53, 4  ;;  %v2117_v59 = vshll.u32 %v1925_v30, 16  ;;  %v2421_v15 = vld [vmem:[#allocation2 + $0x5c] sm:$0x1]  ;;  %v11746_v24 = vrot.slane %v2419_v33, 9 }
 0x176   : > { %v13596_v43 = vld [vmem:[#allocation3 + $0x13c] ss:$36 sps:$4 sm:$0xff]   ;;  %v2914_v16 = vrot.slane %v2913_v19, 4  ;;  %v2103_v25 = vrot.slane %v2101_v14, 5  ;;  %v14853_v20 = vadd.f32 %v12517_v21, %v12516_v23  ;;  %v2109_v50 = vrot.slane %v2107_v38, 5 }
 0x177   : > { %v13598_v36 = vld [vmem:[#allocation3 + $0x138] ss:$36 sps:$4 sm:$0xff]   ;;  %v2924_v10 = vrot.slane %v2923_v1, 4  ;;  %v2113_v42 = vrot.slane %v2111_v12, 4  ;;  %5532 = vmatprep.mubr.bf16.mxu1 %v13596_v43  ;;  %v2119_v53 = vrot.slane %v2117_v59, 5  ;;  %v2541_v30 = vrot.slane %v2420_v62, 5  ;;  %v12411_v62 = vpop.f32.mrf.mxu0 }
 0x178   : > { %v2919_v11 = vsel %vm14213_vm14, %v2914_v16, %v2918_v46  ;;  %v2104_v39 = vor.u32 %v2103_v25, %v2100_v34  ;;  %5533 = vmatmul.mubr.bf16.gmra.mxu1 %v13598_v36  ;;  %v2544_v21 = vrot.slane %v2421_v15, 5  ;;  %v2686_v19 = vld [vmem:[#allocation2 + $0x60] sm:$0xf]  ;;  %v2687_v14 = vld [vmem:[#allocation2 + $0x64] sm:$0xf]  ;;  %v14864_v36 = vadd.f32 %v14709_v61, %v14705_v6 }
 0x179   : > { %v2929_v33 = vsel %vm14213_vm14, %v2924_v10, %v2928_v41  ;;  %3212 = vst [vmem:[#allocation3 + $0x184] sm:$0xf] %v2919_v11  ;;  %v2114_v23 = vor.u32 %v2113_v42, %v2109_v50  ;;  %v13599_v1 = vld [vmem:[#allocation3 + $0x17c] ss:$36 sps:$4 sm:$0xff]   ;;  %v2542_v46 = vsel %vm14184_vm13, %v11746_v24, %v2541_v30  ;;  %2718 = vst [vmem:[#allocation3 + $0x1c8] sm:$0xf] %v2686_v19  ;;  %v14874_v24 = vpop.f32.mrf.mxu1 }
 0x17a   : > { %v13601_v38 = vld [vmem:[#allocation3 + $0x178] ss:$36 sps:$4 sm:$0xff]   ;;  %3213 = vst [vmem:[#allocation3 + $0x1a8] sm:$0xf] %v2929_v33  ;;  %v2105_v12 = vrot.slane %v2104_v39, 4  ;;  %v14868_v41 = vadd.f32 %v14707_v7, %v14701_v52  ;;  %v2543_v59 = vrot.slane %v2541_v30, 4  ;;  %v14872_v16 = vadd.f32 %v14733_v57, %v14725_v63  ;;  %5379 = vmatprep.mubr.bf16.mxu0 %v13599_v1 }
 0x17b   : > { %2719 = vst [vmem:[#allocation3 + $0x1ec] sm:$0xf] %v2687_v14  ;;  %v2115_v34 = vrot.slane %v2114_v23, 4  ;;  %2653 = vst [vmem:[#allocation3 + $0x1c4] sm:$0xf] %v2542_v46  ;;  %v14876_v25 = vadd.f32 %v12411_v62, %v12410_v4  ;;  %5380 = vmatmul.mubr.bf16.gmra.mxu0 %v13601_v38  ;;  %v14884_v46 = vpop.f32.mrf.mxu1 }
 0x17c   : > { %v2756_v15 = vld [vmem:[#allocation2 + $0x60] sm:$0xf]  ;;  %v2757_v43 = vld [vmem:[#allocation2 + $0x64] sm:$0xf]  ;;  %v2110_v6 = vsel %vm14213_vm14, %v2105_v12, %v2109_v50  ;;  %v2758_v52 = vld [vmem:[#allocation2 + $0x68] sm:$0x1]  ;;  %v2545_v63 = vsel %vm14184_vm13, %v2543_v59, %v2544_v21 }
 0x17d   : > { %v2931_v7 = vshrl.u32 %v2756_v15, 16  ;;  %v2934_v61 = vshll.u32 %v2756_v15, 16  ;;  %v2940_v10 = vshll.u32 %v2757_v43, 16  ;;  %v2120_v42 = vsel %vm14213_vm14, %v2115_v34, %v2119_v53  ;;  %2381 = vst [vmem:[#allocation3 + $0x1c0] sm:$0xf] %v2110_v6 }
 0x17e   : > { %v2944_v57 = vshrl.u32 %v2757_v43, 16  ;;  %v2950_v11 = vshll.u32 %v2758_v52, 16  ;;  %v1926_v4 = vld [vmem:[#allocation2 + $0x60] sm:$0xf]  ;;  %v1927_v39 = vld [vmem:[#allocation2 + $0x64] sm:$0xf] }
 0x17f   : > { %2382 = vst [vmem:[#allocation3 + $0x1e4] sm:$0xf] %v2120_v42  ;;  %2654 = vst [vmem:[#allocation3 + $0x1e8] sm:$0xf] %v2545_v63  ;;  %v2933_v30 = vrot.slane %v2931_v7, 4  ;;  %v2936_v50 = vrot.slane %v2934_v61, 5  ;;  %v14888_v61 = vadd.f32 %v14727_v2, %v14717_v54 }
 0x180   : > { %v2942_v33 = vrot.slane %v2940_v10, 5  ;;  %v1928_v23 = vld [vmem:[#allocation2 + $0x68] sm:$0x1]  ;;  %v2122_v19 = vshrl.u32 %v1926_v4, 16  ;;  %v2946_v14 = vrot.slane %v2944_v57, 4  ;;  %v2952_v1 = vrot.slane %v2950_v11, 5 }
 0x181   : > { %v2125_v38 = vshll.u32 %v1926_v4, 16  ;;  %v2131_v12 = vshll.u32 %v1927_v39, 16  ;;  %v2422_v53 = vld [vmem:[#allocation2 + $0x60] sm:$0xe]  ;;  %v2937_v62 = vor.u32 %v2936_v50, %v2933_v30  ;;  %v2135_v34 = vshrl.u32 %v1927_v39, 16 }
 0x182   : > { %v2124_v21 = vrot.slane %v2122_v19, 4  ;;  %v2141_v59 = vshll.u32 %v1928_v23, 16  ;;  %v2423_v15 = vld [vmem:[#allocation2 + $0x64] sm:$0xf]  ;;  %v13602_v43 = vld [vmem:[#allocation3 + $0x184] ss:$36 sps:$4 sm:$0xff]   ;;  %v2947_v52 = vor.u32 %v2946_v14, %v2942_v33  ;;  %v14892_v10 = vadd.f32 %v14777_v45, %v14767_v0  ;;  %v12522_v14 = vpop.f32.mrf.mxu1 }
 0x183   : > { %v13604_v6 = vld [vmem:[#allocation3 + $0x180] ss:$36 sps:$4 sm:$0xff]   ;;  %v2127_v7 = vrot.slane %v2125_v38, 5  ;;  %v2938_v42 = vrot.slane %v2937_v62, 4  ;;  %v2133_v63 = vrot.slane %v2131_v12, 5  ;;  %v2137_v57 = vrot.slane %v2135_v34, 4  ;;  %5540 = vmatprep.mubr.bf16.mxu1 %v13602_v43  ;;  %v14900_v62 = vpop.f32.mrf.mxu0 }
 0x184   : > { %v2143_v11 = vrot.slane %v2141_v59, 5  ;;  %v2424_v4 = vld [vmem:[#allocation2 + $0x68] sm:$0x1]  ;;  %v2948_v39 = vrot.slane %v2947_v52, 4  ;;  %v11747_v50 = vrot.slane %v2422_v53, 9  ;;  %v2548_v23 = vrot.slane %v2423_v15, 5  ;;  %5541 = vmatmul.mubr.bf16.gmra.mxu1 %v13604_v6  ;;  %v12523_v43 = vpop.f32.mrf.mxu1 }
 0x185   : > { %v2128_v30 = vor.u32 %v2127_v7, %v2124_v21  ;;  %v2688_v19 = vld [vmem:[#allocation2 + $0x6c] sm:$0xf]  ;;  %v2943_v54 = vsel %vm14213_vm14, %v2938_v42, %v2942_v33  ;;  %v2138_v2 = vor.u32 %v2137_v57, %v2133_v63  ;;  %v2551_v38 = vrot.slane %v2424_v4, 5  ;;  %v2689_v0 = vld [vmem:[#allocation2 + $0x70] sm:$0xf] }
 0x186   : > { %2720 = vst [vmem:[#allocation3 + $0x210] sm:$0xf] %v2688_v19  ;;  %v2759_v45 = vld [vmem:[#allocation2 + $0x6c] sm:$0xf]  ;;  %v14898_v12 = vadd.f32 %v14765_v58, %v14752_v27  ;;  %v13605_v21 = vld [vmem:[#allocation3 + $0x1c4] ss:$36 sps:$4 sm:$0xff]   ;;  %v2953_v34 = vsel %vm14213_vm14, %v2948_v39, %v2952_v1  ;;  %v2549_v33 = vsel %vm14184_vm13, %v11747_v50, %v2548_v23  ;;  %v14908_v15 = vadd.f32 %v14802_v48, %v14797_v49  ;;  %v14918_v39 = vpop.f32.mrf.mxu1 }
 0x187   : > { %v13608_v53 = vld [vmem:[#allocation3 + $0x1c0] ss:$36 sps:$4 sm:$0xff]   ;;  %3214 = vst [vmem:[#allocation3 + $0x1cc] sm:$0xf] %v2943_v54  ;;  %v2129_v59 = vrot.slane %v2128_v30, 4  ;;  %v2139_v27 = vrot.slane %v2138_v2, 4  ;;  %v14912_v1 = vadd.f32 %v14804_v18, %v14799_v60  ;;  %v14914_v7 = vadd.f32 %v12523_v43, %v12522_v14  ;;  %5387 = vmatprep.mubr.bf16.mxu0 %v13605_v21  ;;  %v12414_v14 = vpop.f32.mrf.mxu0 }
 0x188   : > { %2721 = vst [vmem:[#allocation3 + $0x234] sm:$0xf] %v2689_v0  ;;  %3215 = vst [vmem:[#allocation3 + $0x1f0] sm:$0xf] %v2953_v34  ;;  %v2550_v58 = vrot.slane %v2548_v23, 4  ;;  %v2955_v57 = vshrl.u32 %v2759_v45, 16  ;;  %5388 = vmatmul.mubr.bf16.gmra.mxu0 %v13608_v53  ;;  %v12526_v21 = vpop.f32.mrf.mxu1 }
 0x189   : > { %2655 = vst [vmem:[#allocation3 + $0x20c] sm:$0xf] %v2549_v33  ;;  %v2760_v6 = vld [vmem:[#allocation2 + $0x70] sm:$0xf]  ;;  %v2761_v52 = vld [vmem:[#allocation2 + $0x74] sm:$0x1]  ;;  %v2134_v42 = vsel %vm14213_vm14, %v2129_v59, %v2133_v63  ;;  %v2144_v30 = vsel %vm14213_vm14, %v2139_v27, %v2143_v11 }
 0x18a   : > { %v2958_v49 = vshll.u32 %v2759_v45, 16  ;;  %v2964_v48 = vshll.u32 %v2760_v6, 16  ;;  %v1929_v4 = vld [vmem:[#allocation2 + $0x6c] sm:$0xf]  ;;  %2383 = vst [vmem:[#allocation3 + $0x208] sm:$0xf] %v2134_v42  ;;  %v2552_v60 = vsel %vm14184_vm13, %v2550_v58, %v2551_v38 }
 0x18b   : > { %v2968_v18 = vshrl.u32 %v2760_v6, 16  ;;  %v2974_v50 = vshll.u32 %v2761_v52, 16  ;;  %v1930_v23 = vld [vmem:[#allocation2 + $0x70] sm:$0xf]  ;;  %v1931_v19 = vld [vmem:[#allocation2 + $0x74] sm:$0x1] }
 0x18c   : > { %2384 = vst [vmem:[#allocation3 + $0x22c] sm:$0xf] %v2144_v30  ;;  %2656 = vst [vmem:[#allocation3 + $0x230] sm:$0xf] %v2552_v60  ;;  %v2957_v63 = vrot.slane %v2955_v57, 4  ;;  %v2960_v54 = vrot.slane %v2958_v49, 5  ;;  %v12416_v57 = vpop.f32.mrf.mxu0 }
 0x18d   : > { %v2966_v2 = vrot.slane %v2964_v48, 5  ;;  %v2146_v0 = vshrl.u32 %v1929_v4, 16  ;;  %v2425_v45 = vld [vmem:[#allocation2 + $0x6c] sm:$0xe]  ;;  %v2970_v53 = vrot.slane %v2968_v18, 4  ;;  %v2976_v34 = vrot.slane %v2974_v50, 5 }
 0x18e   : > { %v2149_v11 = vshll.u32 %v1929_v4, 16  ;;  %v2155_v59 = vshll.u32 %v1930_v23, 16  ;;  %v2426_v33 = vld [vmem:[#allocation2 + $0x70] sm:$0xf]  ;;  %v2961_v43 = vor.u32 %v2960_v54, %v2957_v63  ;;  %v2159_v27 = vshrl.u32 %v1930_v23, 16  ;;  %v12528_v23 = vpop.f32.mrf.mxu1 }
 0x18f   : > { %v2148_v38 = vrot.slane %v2146_v0, 4  ;;  %v2165_v58 = vshll.u32 %v1931_v19, 16  ;;  %v2427_v6 = vld [vmem:[#allocation2 + $0x74] sm:$0x1]  ;;  %v2971_v52 = vor.u32 %v2970_v53, %v2966_v2  ;;  %v11748_v60 = vrot.slane %v2425_v45, 9  ;;  %v12417_v45 = vpop.f32.mrf.mxu0 }
 0x190   : > { %v2151_v42 = vrot.slane %v2149_v11, 5  ;;  %v2157_v30 = vrot.slane %v2155_v59, 5  ;;  %v13609_v49 = vld [vmem:[#allocation3 + $0x1cc] ss:$36 sps:$4 sm:$0xff]   ;;  %v2962_v37 = vrot.slane %v2961_v43, 4  ;;  %v14926_v18 = vadd.f32 %v14831_v9, %v14827_v32 }
 0x191   : > { %v13611_v48 = vld [vmem:[#allocation3 + $0x1c8] ss:$36 sps:$4 sm:$0xff]   ;;  %v14930_v4 = vadd.f32 %v14833_v44, %v14829_v17  ;;  %v14934_v50 = vadd.f32 %v14851_v5, %v14843_v51  ;;  %v2972_v19 = vrot.slane %v2971_v52, 4  ;;  %v2161_v54 = vrot.slane %v2159_v27, 4  ;;  %5548 = vmatprep.mubr.bf16.mxu1 %v13609_v49  ;;  %v2690_v11 = vld [vmem:[#allocation2 + $0x78] sm:$0xf]  ;;  %v12529_v17 = vpop.f32.mrf.mxu1  ;;  %v14942_v27 = vpop.f32.mrf.mxu0 }
 0x192   : > { %v2152_v63 = vor.u32 %v2151_v42, %v2148_v38  ;;  %v2167_v0 = vrot.slane %v2165_v58, 5  ;;  %v2967_v53 = vsel %vm14213_vm14, %v2962_v37, %v2966_v2  ;;  %v2555_v32 = vrot.slane %v2426_v33, 5  ;;  %5549 = vmatmul.mubr.bf16.gmra.mxu1 %v13611_v48  ;;  %2722 = vst [vmem:[#allocation3 + $0x258] sm:$0xf] %v2690_v11  ;;  %v2691_v33 = vld [vmem:[#allocation2 + $0x7c] sm:$0xf] }
 0x193   : > { %v2558_v9 = vrot.slane %v2427_v6, 5  ;;  %v14938_v59 = vadd.f32 %v12417_v45, %v12416_v57  ;;  %v13612_v44 = vld [vmem:[#allocation3 + $0x20c] ss:$36 sps:$4 sm:$0xff]   ;;  %v2977_v5 = vsel %vm14213_vm14, %v2972_v19, %v2976_v34  ;;  %3216 = vst [vmem:[#allocation3 + $0x214] sm:$0xf] %v2967_v53  ;;  %v2162_v38 = vor.u32 %v2161_v54, %v2157_v30  ;;  %v14955_v42 = vpop.f32.mrf.mxu1 }
 0x194   : > { %v13614_v51 = vld [vmem:[#allocation3 + $0x208] ss:$36 sps:$4 sm:$0xff]   ;;  %v2153_v43 = vrot.slane %v2152_v63, 4  ;;  %v14944_v58 = vadd.f32 %v12529_v17, %v12528_v23  ;;  %3217 = vst [vmem:[#allocation3 + $0x238] sm:$0xf] %v2977_v5  ;;  %v2556_v37 = vsel %vm14184_vm13, %v11748_v60, %v2555_v32  ;;  %v2557_v2 = vrot.slane %v2555_v32, 4  ;;  %5395 = vmatprep.mubr.bf16.mxu0 %v13612_v44 }
 0x195   : > { %v2762_v6 = vld [vmem:[#allocation2 + $0x78] sm:$0xf]  ;;  %v14950_v52 = vadd.f32 %v14884_v46, %v14874_v24  ;;  %v14953_v34 = vadd.f32 %v12414_v14, %v14900_v62  ;;  %v2163_v49 = vrot.slane %v2162_v38, 4  ;;  %2657 = vst [vmem:[#allocation3 + $0x254] sm:$0xf] %v2556_v37  ;;  %v14960_v19 = vadd.f32 %v12526_v21, %v14918_v39  ;;  %v14962_v24 = vpop.f32.mrf.mxu0  ;;  %5396 = vmatmul.mubr.bf16.gmra.mxu0 %v13614_v51 }
 0x196   : > { %v2158_v57 = vsel %vm14213_vm14, %v2153_v43, %v2157_v30  ;;  %2723 = vst [vmem:[#allocation3 + $0x27c] sm:$0xf] %v2691_v33  ;;  %v2763_v60 = vld [vmem:[#allocation2 + $0x7c] sm:$0xf]  ;;  %v2764_v48 = vld [vmem:[#allocation2 + $0x80] sm:$0x1]  ;;  %v2559_v46 = vsel %vm14184_vm13, %v2557_v2, %v2558_v9  ;;  %v14975_v9 = vpop.f32.mrf.mxu1 }
 0x197   : > { %v2979_v23 = vshrl.u32 %v2762_v6, 16  ;;  %2385 = vst [vmem:[#allocation3 + $0x250] sm:$0xf] %v2158_v57  ;;  %v2982_v62 = vshll.u32 %v2762_v6, 16  ;;  %v2988_v14 = vshll.u32 %v2763_v60, 16  ;;  %v2992_v63 = vshrl.u32 %v2763_v60, 16  ;;  %v14979_v43 = vpop.f32.mrf.mxu0 }
 0x198   : > { %v14969_v30 = vld [vmem:[%s17747_s2] ss:$0 sm:$0xff]  ;;  %v2168_v54 = vsel %vm14213_vm14, %v2163_v49, %v2167_v0  ;;  %2658 = vst [vmem:[#allocation3 + $0x278] sm:$0xf] %v2559_v46  ;;  %v2998_v21 = vshll.u32 %v2764_v48, 16 }
 0x199   : > { %v2981_v39 = vrot.slane %v2979_v23, 4  ;;  %v5020_v45 = vadd.f32 %v14703_v40, %v14969_v30  ;;  %v1932_v53 = vld [vmem:[#allocation2 + $0x78] sm:$0xf]  ;;  %v1933_v32 = vld [vmem:[#allocation2 + $0x7c] sm:$0xf]  ;;  %v2984_v11 = vrot.slane %v2982_v62, 5  ;;  %v5023_v51 = vadd.f32 %v14864_v36, %v14969_v30  ;;  %v14984_v48 = vpop.f32.mrf.mxu0 }
 0x19a   : > { %2386 = vst [vmem:[#allocation3 + $0x274] sm:$0xf] %v2168_v54  ;;  %v2990_v17 = vrot.slane %v2988_v14, 5  ;;  %v2994_v44 = vrot.slane %v2992_v63, 4  ;;  %v1934_v5 = vld [vmem:[#allocation2 + $0x80] sm:$0x1]  ;;  %v5031_v14 = vadd.f32 %v14872_v16, %v14969_v30  ;;  %v14993_v63 = vpop.f32.mrf.mxu1 }
 0x19b   : > { %v3000_v0 = vrot.slane %v2998_v21, 5  ;;  %v14982_v38 = vadd.f32 %v14699_v8, %v5020_v45  ;;  %v2170_v37 = vshrl.u32 %v1932_v53, 16  ;;  %v2173_v40 = vshll.u32 %v1932_v53, 16  ;;  %v2428_v2 = vld [vmem:[#allocation2 + $0x78] sm:$0xe] }
 0x19c   : > { %v2985_v33 = vor.u32 %v2984_v11, %v2981_v39  ;;  %v2995_v6 = vor.u32 %v2994_v44, %v2990_v17  ;;  %v2179_v57 = vshll.u32 %v1933_v32, 16  ;;  %v2183_v49 = vshrl.u32 %v1933_v32, 16  ;;  %v2429_v60 = vld [vmem:[#allocation2 + $0x7c] sm:$0xf]  ;;  %v13615_v23 = vld [vmem:[#allocation3 + $0x214] ss:$36 sps:$4 sm:$0xff]   ;;  %v14995_v32 = vpop.f32.mrf.mxu0 }
 0x19d   : > { %17791 = vst [vmem:[#allocation14_spill] sm:$0xff] %v14982_v38  ;;  %v13617_v46 = vld [vmem:[#allocation3 + $0x210] ss:$36 sps:$4 sm:$0xff]   ;;  %v2172_v36 = vrot.slane %v2170_v37, 4  ;;  %v14987_v62 = vadd.f32 %v14868_v41, %v5023_v51  ;;  %v5028_v8 = vadd.f32 %v14719_v56, %v14969_v30  ;;  %v2175_v21 = vrot.slane %v2173_v40, 5  ;;  %5556 = vmatprep.mubr.bf16.mxu1 %v13615_v23 }
 0x19e   : > { %v2986_v54 = vrot.slane %v2985_v33, 4  ;;  %v2996_v39 = vrot.slane %v2995_v6, 4  ;;  %v2181_v45 = vrot.slane %v2179_v57, 5  ;;  %v2430_v53 = vld [vmem:[#allocation2 + $0x80] sm:$0x1]  ;;  %v2185_v11 = vrot.slane %v2183_v49, 4  ;;  %5557 = vmatmul.mubr.bf16.gmra.mxu1 %v13617_v46  ;;  %v15001_v57 = vpop.f32.mrf.mxu1 }
 0x19f   : > { %17792 = vst [vmem:[#allocation15_spill] sm:$0xff] %v14987_v62  ;;  %v2189_v44 = vshll.u32 %v1934_v5, 16  ;;  %v11749_v41 = vrot.slane %v2428_v2, 9  ;;  %v2562_v51 = vrot.slane %v2429_v60, 5  ;;  %v2176_v37 = vor.u32 %v2175_v21, %v2172_v36  ;;  %v2692_v6 = vld [vmem:[#allocation2 + $0x84] sm:$0xf] }
 0x1a0   : > { %v2991_v56 = vsel %vm14213_vm14, %v2986_v54, %v2990_v17  ;;  %v3001_v16 = vsel %vm14213_vm14, %v2996_v39, %v3000_v0  ;;  %v2565_v33 = vrot.slane %v2430_v53, 5  ;;  %v2693_v40 = vld [vmem:[#allocation2 + $0x88] sm:$0xf]  ;;  %v13618_v62 = vld [vmem:[#allocation3 + $0x254] ss:$36 sps:$4 sm:$0xff]   ;;  %v2186_v5 = vor.u32 %v2185_v11, %v2181_v45  ;;  %v15013_v39 = vpop.f32.mrf.mxu0 }
 0x1a1   : > { %v13621_v38 = vld [vmem:[#allocation3 + $0x250] ss:$36 sps:$4 sm:$0xff]   ;;  %3218 = vst [vmem:[#allocation3 + $0x25c] sm:$0xf] %v2991_v56  ;;  %3219 = vst [vmem:[#allocation3 + $0x280] sm:$0xf] %v3001_v16  ;;  %v2563_v49 = vsel %vm14184_vm13, %v11749_v41, %v2562_v51  ;;  %v15006_v17 = vadd.f32 %v14715_v47, %v5028_v8  ;;  %v15009_v36 = vadd.f32 %v14888_v61, %v5031_v14  ;;  %5403 = vmatprep.mubr.bf16.mxu0 %v13618_v62 }
 0x1a2   : > { %v2191_v2 = vrot.slane %v2189_v44, 5  ;;  %2724 = vst [vmem:[#allocation3 + $0x2a0] sm:$0xf] %v2692_v6  ;;  %2725 = vst [vmem:[#allocation3 + $0x2c4] sm:$0xf] %v2693_v40  ;;  %v2177_v0 = vrot.slane %v2176_v37, 4  ;;  %v5036_v54 = vadd.f32 %v14750_v26, %v14969_v30  ;;  %5404 = vmatmul.mubr.bf16.gmra.mxu0 %v13621_v38  ;;  %v15019_v26 = vpop.f32.mrf.mxu1 }
 0x1a3   : > { %17793 = vst [vmem:[#allocation16_spill] sm:$0xff] %v15006_v17  ;;  %v2564_v60 = vrot.slane %v2562_v51, 4  ;;  %2659 = vst [vmem:[#allocation3 + $0x29c] sm:$0xf] %v2563_v49  ;;  %v2765_v23 = vld [vmem:[#allocation2 + $0x84] sm:$0xf] }
 0x1a4   : > { %v2766_v46 = vld [vmem:[#allocation2 + $0x88] sm:$0xf]  ;;  %17794 = vst [vmem:[#allocation17_spill] sm:$0xff] %v15009_v36  ;;  %v2187_v21 = vrot.slane %v2186_v5, 4  ;;  %v2767_v53 = vld [vmem:[#allocation2 + $0x8c] sm:$0x1]  ;;  %v2182_v8 = vsel %vm14213_vm14, %v2177_v0, %v2181_v45  ;;  %v15023_v0 = vpop.f32.mrf.mxu0 }
 0x1a5   : > { %v3003_v11 = vshrl.u32 %v2765_v23, 16  ;;  %v3006_v44 = vshll.u32 %v2765_v23, 16  ;;  %v3012_v47 = vshll.u32 %v2766_v46, 16  ;;  %v2566_v41 = vsel %vm14184_vm13, %v2564_v60, %v2565_v33  ;;  %v1935_v51 = vld [vmem:[#allocation2 + $0x84] sm:$0xf] }
 0x1a6   : > { %v3016_v61 = vshrl.u32 %v2766_v46, 16  ;;  %v3022_v14 = vshll.u32 %v2767_v53, 16  ;;  %v1936_v56 = vld [vmem:[#allocation2 + $0x88] sm:$0xf]  ;;  %v2192_v62 = vsel %vm14213_vm14, %v2187_v21, %v2191_v2  ;;  %2387 = vst [vmem:[#allocation3 + $0x298] sm:$0xf] %v2182_v8  ;;  %v15030_v13 = vpop.f32.mrf.mxu0 }
 0x1a7   : > { %2660 = vst [vmem:[#allocation3 + $0x2c0] sm:$0xf] %v2566_v41  ;;  %v3005_v16 = vrot.slane %v3003_v11, 4  ;;  %v3008_v37 = vrot.slane %v3006_v44, 5  ;;  %v3014_v38 = vrot.slane %v3012_v47, 5  ;;  %v2194_v5 = vshrl.u32 %v1935_v51, 16  ;;  %v15028_v47 = vpop.f32.mrf.mxu1 }
 0x1a8   : > { %v1937_v6 = vld [vmem:[#allocation2 + $0x8c] sm:$0x1]  ;;  %2388 = vst [vmem:[#allocation3 + $0x2bc] sm:$0xf] %v2192_v62  ;;  %v3018_v45 = vrot.slane %v3016_v61, 4  ;;  %v3024_v40 = vrot.slane %v3022_v14, 5  ;;  %v15026_v44 = vadd.f32 %v14754_v29, %v5036_v54 }
 0x1a9   : > { %v2197_v33 = vshll.u32 %v1935_v51, 16  ;;  %v2431_v49 = vld [vmem:[#allocation2 + $0x84] sm:$0xe]  ;;  %v3009_v60 = vor.u32 %v3008_v37, %v3005_v16  ;;  %v2203_v23 = vshll.u32 %v1936_v56, 16  ;;  %v2207_v46 = vshrl.u32 %v1936_v56, 16 }
 0x1aa   : > { %v2213_v53 = vshll.u32 %v1937_v6, 16  ;;  %v2432_v36 = vld [vmem:[#allocation2 + $0x88] sm:$0xf]  ;;  %v13622_v2 = vld [vmem:[#allocation3 + $0x25c] ss:$36 sps:$4 sm:$0xff]   ;;  %v3019_v21 = vor.u32 %v3018_v45, %v3014_v38  ;;  %v2196_v8 = vrot.slane %v2194_v5, 4  ;;  %v5039_v5 = vadd.f32 %v14898_v12, %v14969_v30 }
 0x1ab   : > { %v2199_v11 = vrot.slane %v2197_v33, 5  ;;  %v13624_v41 = vld [vmem:[#allocation3 + $0x258] ss:$36 sps:$4 sm:$0xff]   ;;  %v3010_v61 = vrot.slane %v3009_v60, 4  ;;  %v2205_v14 = vrot.slane %v2203_v23, 5  ;;  %v2209_v51 = vrot.slane %v2207_v46, 4  ;;  %5564 = vmatprep.mubr.bf16.mxu1 %v13622_v2  ;;  %v15040_v46 = vpop.f32.mrf.mxu1 }
 0x1ac   : > { %v2215_v62 = vrot.slane %v2213_v53, 5  ;;  %v3020_v16 = vrot.slane %v3019_v21, 4  ;;  %v2433_v56 = vld [vmem:[#allocation2 + $0x8c] sm:$0x1]  ;;  %v11750_v6 = vrot.slane %v2431_v49, 9  ;;  %v2569_v17 = vrot.slane %v2432_v36, 5  ;;  %5565 = vmatmul.mubr.bf16.gmra.mxu1 %v13624_v41 }
 0x1ad   : > { %v2200_v37 = vor.u32 %v2199_v11, %v2196_v8  ;;  %v3015_v29 = vsel %vm14213_vm14, %v3010_v61, %v3014_v38  ;;  %v2210_v54 = vor.u32 %v2209_v51, %v2205_v14  ;;  %v2572_v45 = vrot.slane %v2433_v56, 5  ;;  %v2694_v23 = vld [vmem:[#allocation2 + $0x90] sm:$0xf]  ;;  %v2695_v11 = vld [vmem:[#allocation2 + $0x94] sm:$0xf] }
 0x1ae   : > { %v3025_v33 = vsel %vm14213_vm14, %v3020_v16, %v3024_v40  ;;  %3220 = vst [vmem:[#allocation3 + $0x2a4] sm:$0xf] %v3015_v29  ;;  %v2570_v49 = vsel %vm14184_vm13, %v11750_v6, %v2569_v17  ;;  %v2571_v36 = vrot.slane %v2569_v17, 4  ;;  %v13625_v53 = vld [vmem:[#allocation3 + $0x29c] ss:$36 sps:$4 sm:$0xff]   ;;  %v15043_v12 = vadd.f32 %v14892_v10, %v5039_v5  ;;  %v15057_v16 = vpop.f32.mrf.mxu0 }
 0x1af   : > { %v2201_v60 = vrot.slane %v2200_v37, 4  ;;  %v13627_v2 = vld [vmem:[#allocation3 + $0x298] ss:$36 sps:$4 sm:$0xff]   ;;  %3221 = vst [vmem:[#allocation3 + $0x2c8] sm:$0xf] %v3025_v33  ;;  %v2211_v38 = vrot.slane %v2210_v54, 4  ;;  %v5044_v40 = vadd.f32 %v14785_v3, %v14969_v30  ;;  %v5047_v21 = vadd.f32 %v14908_v15, %v14969_v30  ;;  %5411 = vmatprep.mubr.bf16.mxu0 %v13625_v53 }
 0x1b0   : > { %2661 = vst [vmem:[#allocation3 + $0x2e4] sm:$0xf] %v2570_v49  ;;  %2726 = vst [vmem:[#allocation3 + $0x2e8] sm:$0xf] %v2694_v23  ;;  %v2573_v8 = vsel %vm14184_vm13, %v2571_v36, %v2572_v45  ;;  %v2768_v41 = vld [vmem:[#allocation2 + $0x90] sm:$0xf]  ;;  %v5052_v51 = vadd.f32 %v14825_v28, %v14969_v30  ;;  %v5055_v10 = vadd.f32 %v14926_v18, %v14969_v30  ;;  %5412 = vmatmul.mubr.bf16.gmra.mxu0 %v13627_v2 }
 0x1b1   : > { %17795 = vst [vmem:[#allocation18_spill] sm:$0xff] %v15043_v12  ;;  %v2206_v17 = vsel %vm14213_vm14, %v2201_v60, %v2205_v14  ;;  %v2769_v61 = vld [vmem:[#allocation2 + $0x94] sm:$0xf]  ;;  %v2216_v3 = vsel %vm14213_vm14, %v2211_v38, %v2215_v62  ;;  %2662 = vst [vmem:[#allocation3 + $0x308] sm:$0xf] %v2573_v8  ;;  %v3027_v14 = vshrl.u32 %v2768_v41, 16  ;;  %v15062_v18 = vadd.f32 %v14806_v35, %v5044_v40  ;;  %v15067_v62 = vpop.f32.mrf.mxu1  ;;  %v15069_v8 = vpop.f32.mrf.mxu0 }
 0x1b2   : > { %2389 = vst [vmem:[#allocation3 + $0x2e0] sm:$0xf] %v2206_v17  ;;  %2727 = vst [vmem:[#allocation3 + $0x30c] sm:$0xf] %v2695_v11  ;;  %v2770_v15 = vld [vmem:[#allocation2 + $0x98] sm:$0x1]  ;;  %v15065_v45 = vadd.f32 %v14912_v1, %v5047_v21 }
 0x1b3   : > { %v3030_v37 = vshll.u32 %v2768_v41, 16  ;;  %v3036_v56 = vshll.u32 %v2769_v61, 16  ;;  %2390 = vst [vmem:[#allocation3 + $0x304] sm:$0xf] %v2216_v3  ;;  %v3040_v6 = vshrl.u32 %v2769_v61, 16  ;;  %v3046_v28 = vshll.u32 %v2770_v15, 16 }
 0x1b4   : > { %v1938_v29 = vld [vmem:[#allocation2 + $0x90] sm:$0xf]  ;;  %v1939_v54 = vld [vmem:[#allocation2 + $0x94] sm:$0xf]  ;;  %17796 = vst [vmem:[#allocation19_spill] sm:$0xff] %v15062_v18  ;;  %17797 = vst [vmem:[#allocation20_spill] sm:$0xff] %v15065_v45 }
 0x1b5   : > { %v3029_v5 = vrot.slane %v3027_v14, 4  ;;  %v3032_v33 = vrot.slane %v3030_v37, 5  ;;  %v3038_v60 = vrot.slane %v3036_v56, 5  ;;  %v1940_v49 = vld [vmem:[#allocation2 + $0x98] sm:$0x1]  ;;  %v2218_v36 = vshrl.u32 %v1938_v29, 16  ;;  %v15077_v56 = vpop.f32.mrf.mxu1 }
 0x1b6   : > { %v3042_v23 = vrot.slane %v3040_v6, 4  ;;  %v3048_v53 = vrot.slane %v3046_v28, 5  ;;  %v2221_v2 = vshll.u32 %v1938_v29, 16  ;;  %v2227_v38 = vshll.u32 %v1939_v54, 16  ;;  %v2434_v17 = vld [vmem:[#allocation2 + $0x90] sm:$0xe] }
 0x1b7   : > { %v3033_v11 = vor.u32 %v3032_v33, %v3029_v5  ;;  %v2220_v35 = vrot.slane %v2218_v36, 4  ;;  %v2231_v40 = vshrl.u32 %v1939_v54, 16  ;;  %v2237_v41 = vshll.u32 %v1940_v49, 16  ;;  %v2435_v1 = vld [vmem:[#allocation2 + $0x94] sm:$0xf] }
 0x1b8   : > { %v13628_v21 = vld [vmem:[#allocation3 + $0x2a4] ss:$36 sps:$4 sm:$0xff]   ;;  %v3043_v3 = vor.u32 %v3042_v23, %v3038_v60  ;;  %v2223_v15 = vrot.slane %v2221_v2, 5  ;;  %v15072_v14 = vadd.f32 %v14817_v55, %v5052_v51  ;;  %v15075_v37 = vadd.f32 %v14930_v4, %v5055_v10  ;;  %v2436_v33 = vld [vmem:[#allocation2 + $0x98] sm:$0x1]  ;;  %v15079_v2 = vpop.f32.mrf.mxu0 }
 0x1b9   : > { %v13630_v61 = vld [vmem:[#allocation3 + $0x2a0] ss:$36 sps:$4 sm:$0xff]   ;;  %v3034_v6 = vrot.slane %v3033_v11, 4  ;;  %v2229_v28 = vrot.slane %v2227_v38, 5  ;;  %v2233_v29 = vrot.slane %v2231_v40, 4  ;;  %v2239_v5 = vrot.slane %v2237_v41, 5  ;;  %5572 = vmatprep.mubr.bf16.mxu1 %v13628_v21 }
 0x1ba   : > { %17798 = vst [vmem:[#allocation21_spill] sm:$0xff] %v15072_v14  ;;  %17799 = vst [vmem:[#allocation22_spill] sm:$0xff] %v15075_v37  ;;  %v3044_v54 = vrot.slane %v3043_v3, 4  ;;  %v2224_v49 = vor.u32 %v2223_v15, %v2220_v35  ;;  %v11751_v36 = vrot.slane %v2434_v17, 9  ;;  %v2576_v45 = vrot.slane %v2435_v1, 5  ;;  %5573 = vmatmul.mubr.bf16.gmra.mxu1 %v13630_v61  ;;  %v17800_v38 = vld [vmem:[#allocation13_spill] sm:$0xff]  ;;  %v15089_v3 = vpop.f32.mrf.mxu1 }
 0x1bb   : > { %v2696_v23 = vld [vmem:[#allocation2 + $0x9c] sm:$0xf]  ;;  %v3039_v4 = vsel %vm14213_vm14, %v3034_v6, %v3038_v60  ;;  %v2234_v10 = vor.u32 %v2233_v29, %v2229_v28  ;;  %v2579_v11 = vrot.slane %v2436_v33, 5  ;;  %v5060_v40 = vadd.f32 %v17800_v38, %v14969_v30  ;;  %v2697_v21 = vld [vmem:[#allocation2 + $0xa0] sm:$0xf] }
 0x1bc   : > { %v13631_v55 = vld [vmem:[#allocation3 + $0x2e4] ss:$36 sps:$4 sm:$0xff]   ;;  %2728 = vst [vmem:[#allocation3 + $0x330] sm:$0xf] %v2696_v23  ;;  %v3049_v35 = vsel %vm14213_vm14, %v3044_v54, %v3048_v53  ;;  %3222 = vst [vmem:[#allocation3 + $0x2ec] sm:$0xf] %v3039_v4  ;;  %v2577_v41 = vsel %vm14184_vm13, %v11751_v36, %v2576_v45  ;;  %v5063_v33 = vadd.f32 %v14934_v50, %v14969_v30  ;;  %v15100_v4 = vpop.f32.mrf.mxu0 }
 0x1bd   : > { %v13634_v51 = vld [vmem:[#allocation3 + $0x2e0] ss:$36 sps:$4 sm:$0xff]   ;;  %v2225_v17 = vrot.slane %v2224_v49, 4  ;;  %v2578_v1 = vrot.slane %v2576_v45, 4  ;;  %5419 = vmatprep.mubr.bf16.mxu0 %v13631_v55  ;;  %3223 = vst [vmem:[#allocation3 + $0x310] sm:$0xf] %v3049_v35  ;;  %v15092_v53 = vadd.f32 %v14853_v20, %v5060_v40 }
 0x1be   : > { %v2771_v61 = vld [vmem:[#allocation2 + $0x9c] sm:$0xf]  ;;  %v2235_v60 = vrot.slane %v2234_v10, 4  ;;  %2663 = vst [vmem:[#allocation3 + $0x32c] sm:$0xf] %v2577_v41  ;;  %5420 = vmatmul.mubr.bf16.gmra.mxu0 %v13634_v51  ;;  %v15104_v41 = vpop.f32.mrf.mxu1 }
 0x1bf   : > { %2729 = vst [vmem:[#allocation3 + $0x354] sm:$0xf] %v2697_v21  ;;  %v2772_v15 = vld [vmem:[#allocation2 + $0xa0] sm:$0xf]  ;;  %v2773_v6 = vld [vmem:[#allocation2 + $0xa4] sm:$0x1]  ;;  %v2230_v45 = vsel %vm14213_vm14, %v2225_v17, %v2229_v28  ;;  %v2580_v54 = vsel %vm14184_vm13, %v2578_v1, %v2579_v11 }
 0x1c0   : > { %v3051_v29 = vshrl.u32 %v2771_v61, 16  ;;  %17801 = vst [vmem:[#allocation13_spill] sm:$0xff] %v15092_v53  ;;  %v3054_v49 = vshll.u32 %v2771_v61, 16  ;;  %v3060_v36 = vshll.u32 %v2772_v15, 16  ;;  %v1941_v23 = vld [vmem:[#allocation2 + $0x9c] sm:$0xf]  ;;  %v2240_v20 = vsel %vm14213_vm14, %v2235_v60, %v2239_v5 }
 0x1c1   : > { %v1942_v55 = vld [vmem:[#allocation2 + $0xa0] sm:$0xf]  ;;  %2391 = vst [vmem:[#allocation3 + $0x328] sm:$0xf] %v2230_v45  ;;  %2664 = vst [vmem:[#allocation3 + $0x350] sm:$0xf] %v2580_v54 }
 0x1c2   : > { %v3053_v10 = vrot.slane %v3051_v29, 4  ;;  %v3064_v50 = vshrl.u32 %v2772_v15, 16  ;;  %v3070_v51 = vshll.u32 %v2773_v6, 16  ;;  %v1943_v38 = vld [vmem:[#allocation2 + $0xa4] sm:$0x1]  ;;  %v3056_v28 = vrot.slane %v3054_v49, 5  ;;  %v15106_v6 = vpop.f32.mrf.mxu0 }
 0x1c3   : > { %2392 = vst [vmem:[#allocation3 + $0x34c] sm:$0xf] %v2240_v20  ;;  %v3062_v40 = vrot.slane %v3060_v36, 5  ;;  %v2242_v35 = vshrl.u32 %v1941_v23, 16  ;;  %v2245_v11 = vshll.u32 %v1941_v23, 16  ;;  %v2251_v61 = vshll.u32 %v1942_v55, 16 }
 0x1c4   : > { %v2437_v17 = vld [vmem:[#allocation2 + $0x9c] sm:$0xe]  ;;  %v3066_v1 = vrot.slane %v3064_v50, 4  ;;  %v3072_v21 = vrot.slane %v3070_v51, 5  ;;  %v2255_v53 = vshrl.u32 %v1942_v55, 16  ;;  %v3057_v5 = vor.u32 %v3056_v28, %v3053_v10  ;;  %v15113_v10 = vpop.f32.mrf.mxu1 }
 0x1c5   : > { %v2438_v37 = vld [vmem:[#allocation2 + $0xa0] sm:$0xf]  ;;  %v2244_v60 = vrot.slane %v2242_v35, 4  ;;  %v2247_v45 = vrot.slane %v2245_v11, 5  ;;  %v2261_v29 = vshll.u32 %v1943_v38, 16  ;;  %v2253_v49 = vrot.slane %v2251_v61, 5 }
 0x1c6   : > { %v2439_v15 = vld [vmem:[#allocation2 + $0xa4] sm:$0x1]  ;;  %v3067_v54 = vor.u32 %v3066_v1, %v3062_v40  ;;  %v2257_v36 = vrot.slane %v2255_v53, 4  ;;  %v11752_v20 = vrot.slane %v2437_v17, 9  ;;  %v3058_v18 = vrot.slane %v3057_v5, 4 }
 0x1c7   : > { %v13635_v23 = vld [vmem:[#allocation3 + $0x2ec] ss:$36 sps:$4 sm:$0xff]   ;;  %v2248_v12 = vor.u32 %v2247_v45, %v2244_v60  ;;  %v15109_v50 = vadd.f32 %v14950_v52, %v5063_v33  ;;  %v5068_v55 = vadd.f32 %v14876_v25, %v14969_v30  ;;  %v2263_v28 = vrot.slane %v2261_v29, 5  ;;  %v15120_v52 = vpop.f32.mrf.mxu0  ;;  %v15134_v29 = vpop.f32.mrf.mxu1 }
 0x1c8   : > { %v13637_v14 = vld [vmem:[#allocation3 + $0x2e8] ss:$36 sps:$4 sm:$0xff]   ;;  %v3068_v51 = vrot.slane %v3067_v54, 4  ;;  %v2258_v38 = vor.u32 %v2257_v36, %v2253_v49  ;;  %v2583_v35 = vrot.slane %v2438_v37, 5  ;;  %5580 = vmatprep.mubr.bf16.mxu1 %v13635_v23  ;;  %v3063_v53 = vsel %vm14213_vm14, %v3058_v18, %v3062_v40  ;;  %v2698_v1 = vld [vmem:[#allocation2 + $0xa8] sm:$0xf] }
 0x1c9   : > { %v2249_v11 = vrot.slane %v2248_v12, 4  ;;  %v2586_v17 = vrot.slane %v2439_v15, 5  ;;  %v15118_v61 = vadd.f32 %v14914_v7, %v5068_v55  ;;  %5581 = vmatmul.mubr.bf16.gmra.mxu1 %v13637_v14  ;;  %v13638_v25 = vld [vmem:[#allocation3 + $0x32c] ss:$36 sps:$4 sm:$0xff]   ;;  %3224 = vst [vmem:[#allocation3 + $0x334] sm:$0xf] %v3063_v53  ;;  %v5071_v12 = vadd.f32 %v14953_v34, %v14969_v30 }
 0x1ca   : > { %v13640_v33 = vld [vmem:[#allocation3 + $0x328] ss:$36 sps:$4 sm:$0xff]   ;;  %v3073_v5 = vsel %vm14213_vm14, %v3068_v51, %v3072_v21  ;;  %v2259_v37 = vrot.slane %v2258_v38, 4  ;;  %v2584_v60 = vsel %vm14184_vm13, %v11752_v20, %v2583_v35  ;;  %2730 = vst [vmem:[#allocation3 + $0x378] sm:$0xf] %v2698_v1  ;;  %v2585_v18 = vrot.slane %v2583_v35, 4  ;;  %5427 = vmatprep.mubr.bf16.mxu0 %v13638_v25  ;;  %v15143_v51 = vpop.f32.mrf.mxu0 }
 0x1cb   : > { %3225 = vst [vmem:[#allocation3 + $0x358] sm:$0xf] %v3073_v5  ;;  %v2254_v7 = vsel %vm14213_vm14, %v2249_v11, %v2253_v49  ;;  %2665 = vst [vmem:[#allocation3 + $0x374] sm:$0xf] %v2584_v60  ;;  %v2699_v14 = vld [vmem:[#allocation2 + $0xac] sm:$0xf]  ;;  %v5076_v21 = vadd.f32 %v14938_v59, %v14969_v30  ;;  %v12421_v45 = vadd.f32 %v14962_v24, %v14942_v27  ;;  %5428 = vmatmul.mubr.bf16.gmra.mxu0 %v13640_v33 }
 0x1cc   : > { %v2774_v40 = vld [vmem:[#allocation2 + $0xa8] sm:$0xf]  ;;  %v2264_v34 = vsel %vm14213_vm14, %v2259_v37, %v2263_v28  ;;  %2393 = vst [vmem:[#allocation3 + $0x370] sm:$0xf] %v2254_v7  ;;  %2731 = vst [vmem:[#allocation3 + $0x39c] sm:$0xf] %v2699_v14  ;;  %v15139_v20 = vadd.f32 %v14960_v19, %v5071_v12  ;;  %v2587_v59 = vsel %vm14184_vm13, %v2585_v18, %v2586_v17  ;;  %v15149_v37 = vpop.f32.mrf.mxu1  ;;  %v15151_v60 = vpop.f32.mrf.mxu0 }
 0x1cd   : > { %v2775_v15 = vld [vmem:[#allocation2 + $0xac] sm:$0xf]  ;;  %v2776_v54 = vld [vmem:[#allocation2 + $0xb0] sm:$0x1]  ;;  %v3075_v49 = vshrl.u32 %v2774_v40, 16  ;;  %v3078_v36 = vshll.u32 %v2774_v40, 16  ;;  %v15146_v11 = vadd.f32 %v14944_v58, %v5076_v21  ;;  %v5079_v19 = vadd.f32 %v12421_v45, %v14969_v30 }
 0x1ce   : > { %2394 = vst [vmem:[#allocation3 + $0x394] sm:$0xf] %v2264_v34  ;;  %v3084_v27 = vshll.u32 %v2775_v15, 16  ;;  %v3088_v24 = vshrl.u32 %v2775_v15, 16  ;;  %v3094_v23 = vshll.u32 %v2776_v54, 16 }
 0x1cf   : > { %v1944_v55 = vld [vmem:[#allocation2 + $0xa8] sm:$0xf]  ;;  %2666 = vst [vmem:[#allocation3 + $0x398] sm:$0xf] %v2587_v59  ;;  %v3077_v38 = vrot.slane %v3075_v49, 4  ;;  %v3080_v28 = vrot.slane %v3078_v36, 5  ;;  %v12533_v59 = vadd.f32 %v14975_v9, %v14955_v42 }
 0x1d0   : > { %v1945_v35 = vld [vmem:[#allocation2 + $0xac] sm:$0xf]  ;;  %v1946_v53 = vld [vmem:[#allocation2 + $0xb0] sm:$0x1]  ;;  %v3086_v1 = vrot.slane %v3084_v27, 5  ;;  %v3090_v25 = vrot.slane %v3088_v24, 4  ;;  %v12424_v27 = vadd.f32 %v14984_v48, %v14979_v43  ;;  %v15159_v24 = vadd.f32 %v15001_v57, %v14993_v63 }
 0x1d1   : > { %v3096_v33 = vrot.slane %v3094_v23, 5  ;;  %v2266_v17 = vshrl.u32 %v1944_v55, 16  ;;  %v2440_v5 = vld [vmem:[#allocation2 + $0xa8] sm:$0xe]  ;;  %v3081_v12 = vor.u32 %v3080_v28, %v3077_v38  ;;  %v2269_v7 = vshll.u32 %v1944_v55, 16  ;;  %v15161_v23 = vpop.f32.mrf.mxu0 }
 0x1d2   : > { %v2275_v18 = vshll.u32 %v1945_v35, 16  ;;  %v2279_v14 = vshrl.u32 %v1945_v35, 16  ;;  %v2441_v40 = vld [vmem:[#allocation2 + $0xac] sm:$0xf]  ;;  %v3091_v34 = vor.u32 %v3090_v25, %v3086_v1  ;;  %v2285_v58 = vshll.u32 %v1946_v53, 16  ;;  %v15163_v53 = vpop.f32.mrf.mxu1 }
 0x1d3   : > { %v2268_v15 = vrot.slane %v2266_v17, 4  ;;  %v2442_v21 = vld [vmem:[#allocation2 + $0xb0] sm:$0x1]  ;;  %v11753_v54 = vrot.slane %v2440_v5, 9  ;;  %v13643_v49 = vld [vmem:[#allocation3 + $0x330] ss:$36 sps:$4 sm:$0xff]  }
 0x1d4   : > { %v13641_v45 = vld [vmem:[#allocation3 + $0x334] ss:$36 sps:$4 sm:$0xff]   ;;  %v3082_v36 = vrot.slane %v3081_v12, 4  ;;  %v3092_v55 = vrot.slane %v3091_v34, 4  ;;  %v2271_v38 = vrot.slane %v2269_v7, 5  ;;  %v2277_v28 = vrot.slane %v2275_v18, 5 }
 0x1d5   : > { %v2281_v35 = vrot.slane %v2279_v14, 4  ;;  %5588 = vmatprep.mubr.bf16.mxu1 %v13641_v45  ;;  %v2287_v42 = vrot.slane %v2285_v58, 5  ;;  %v2590_v9 = vrot.slane %v2441_v40, 5  ;;  %v2593_v17 = vrot.slane %v2442_v21, 5  ;;  %v2700_v43 = vld [vmem:[#allocation2 + $0xb4] sm:$0xf]  ;;  %v15176_v21 = vpop.f32.mrf.mxu0 }
 0x1d6   : > { %v3087_v25 = vsel %vm14213_vm14, %v3082_v36, %v3086_v1  ;;  %5589 = vmatmul.mubr.bf16.gmra.mxu1 %v13643_v49  ;;  %v13644_v48 = vld [vmem:[#allocation3 + $0x374] ss:$36 sps:$4 sm:$0xff]   ;;  %v3097_v57 = vsel %vm14213_vm14, %v3092_v55, %v3096_v33  ;;  %v2272_v5 = vor.u32 %v2271_v38, %v2268_v15  ;;  %2732 = vst [vmem:[#allocation3 + $0x3c0] sm:$0xf] %v2700_v43  ;;  %v2701_v14 = vld [vmem:[#allocation2 + $0xb8] sm:$0xf]  ;;  %v15184_v36 = vpop.f32.mrf.mxu1 }
 0x1d7   : > { %v13647_v63 = vld [vmem:[#allocation3 + $0x370] ss:$36 sps:$4 sm:$0xff]   ;;  %3226 = vst [vmem:[#allocation3 + $0x37c] sm:$0xf] %v3087_v25  ;;  %v2282_v12 = vor.u32 %v2281_v35, %v2277_v28  ;;  %v15169_v7 = vadd.f32 %v12533_v59, %v5079_v19  ;;  %3227 = vst [vmem:[#allocation3 + $0x3a0] sm:$0xf] %v3097_v57  ;;  %v2591_v1 = vsel %vm14184_vm13, %v11753_v54, %v2590_v9  ;;  %5435 = vmatprep.mubr.bf16.mxu0 %v13644_v48 }
 0x1d8   : > { %v2592_v18 = vrot.slane %v2590_v9, 4  ;;  %v2777_v40 = vld [vmem:[#allocation2 + $0xb4] sm:$0xf]  ;;  %v5084_v34 = vadd.f32 %v12424_v27, %v14969_v30  ;;  %v12427_v58 = vadd.f32 %v15013_v39, %v14995_v32  ;;  %v2273_v33 = vrot.slane %v2272_v5, 4  ;;  %2667 = vst [vmem:[#allocation3 + $0x3bc] sm:$0xf] %v2591_v1  ;;  %5436 = vmatmul.mubr.bf16.gmra.mxu0 %v13647_v63  ;;  %v15192_v63 = vpop.f32.mrf.mxu0 }
 0x1d9   : > { %v2283_v15 = vrot.slane %v2282_v12, 4  ;;  %2733 = vst [vmem:[#allocation3 + $0x3e4] sm:$0xf] %v2701_v14  ;;  %v2778_v19 = vld [vmem:[#allocation2 + $0xb8] sm:$0xf]  ;;  %v12539_v54 = vadd.f32 %v15028_v47, %v15019_v26  ;;  %v15182_v49 = vadd.f32 %v15030_v13, %v15023_v0  ;;  %v3099_v39 = vshrl.u32 %v2777_v40, 16 }
 0x1da   : > { %v2779_v45 = vld [vmem:[#allocation2 + $0xbc] sm:$0x1]  ;;  %v2594_v32 = vsel %vm14184_vm13, %v2592_v18, %v2593_v17  ;;  %v3102_v59 = vshll.u32 %v2777_v40, 16  ;;  %v3108_v27 = vshll.u32 %v2778_v19, 16  ;;  %v1947_v55 = vld [vmem:[#allocation2 + $0xb4] sm:$0xf]  ;;  %v2278_v38 = vsel %vm14213_vm14, %v2273_v33, %v2277_v28 }
 0x1db   : > { %v2288_v26 = vsel %vm14213_vm14, %v2283_v15, %v2287_v42  ;;  %2668 = vst [vmem:[#allocation3 + $0x3e0] sm:$0xf] %v2594_v32  ;;  %v3112_v47 = vshrl.u32 %v2778_v19, 16  ;;  %v3118_v13 = vshll.u32 %v2779_v45, 16  ;;  %v1948_v0 = vld [vmem:[#allocation2 + $0xb8] sm:$0xf]  ;;  %v15194_v42 = vpop.f32.mrf.mxu1 }
 0x1dc   : > { %v1949_v35 = vld [vmem:[#allocation2 + $0xbc] sm:$0x1]  ;;  %2395 = vst [vmem:[#allocation3 + $0x3b8] sm:$0xf] %v2278_v38  ;;  %2396 = vst [vmem:[#allocation3 + $0x3dc] sm:$0xf] %v2288_v26 }
 0x1dd   : > { %v3101_v25 = vrot.slane %v3099_v39, 4  ;;  %v3104_v9 = vrot.slane %v3102_v59, 5  ;;  %v3110_v17 = vrot.slane %v3108_v27, 5  ;;  %v2290_v43 = vshrl.u32 %v1947_v55, 16  ;;  %v2443_v48 = vld [vmem:[#allocation2 + $0xb4] sm:$0xe] }
 0x1de   : > { %v3114_v57 = vrot.slane %v3112_v47, 4  ;;  %v3120_v5 = vrot.slane %v3118_v13, 5  ;;  %v2293_v28 = vshll.u32 %v1947_v55, 16  ;;  %v2299_v12 = vshll.u32 %v1948_v0, 16  ;;  %v2444_v1 = vld [vmem:[#allocation2 + $0xb8] sm:$0xf]  ;;  %v15200_v13 = vpop.f32.mrf.mxu0 }
 0x1df   : > { %v3105_v18 = vor.u32 %v3104_v9, %v3101_v25  ;;  %v2292_v14 = vrot.slane %v2290_v43, 4  ;;  %v2303_v40 = vshrl.u32 %v1948_v0, 16  ;;  %v2309_v33 = vshll.u32 %v1949_v35, 16  ;;  %v2445_v15 = vld [vmem:[#allocation2 + $0xbc] sm:$0x1]  ;;  %v15202_v43 = vpop.f32.mrf.mxu1 }
 0x1e0   : > { %v13648_v19 = vld [vmem:[#allocation3 + $0x37c] ss:$36 sps:$4 sm:$0xff]   ;;  %v3115_v32 = vor.u32 %v3114_v57, %v3110_v17  ;;  %v2295_v39 = vrot.slane %v2293_v28, 5  ;;  %v15197_v59 = vadd.f32 %v15159_v24, %v5084_v34  ;;  %v5087_v27 = vadd.f32 %v12427_v58, %v14969_v30  ;;  %v696_v28 = vld [vmem:[#allocation2 + $0xc8] sm:$0x1] }
 0x1e1   : > { %v13650_v45 = vld [vmem:[#allocation3 + $0x378] ss:$36 sps:$4 sm:$0xff]   ;;  %v3106_v38 = vrot.slane %v3105_v18, 4  ;;  %v2301_v55 = vrot.slane %v2299_v12, 5  ;;  %v2305_v26 = vrot.slane %v2303_v40, 4  ;;  %v2311_v47 = vrot.slane %v2309_v33, 5  ;;  %5596 = vmatprep.mubr.bf16.mxu1 %v13648_v19 }
 0x1e2   : > { %v3116_v25 = vrot.slane %v3115_v32, 4  ;;  %v2296_v0 = vor.u32 %v2295_v39, %v2292_v14  ;;  %v11754_v35 = vrot.slane %v2443_v48, 9  ;;  %v2597_v9 = vrot.slane %v2444_v1, 5  ;;  %v13686_v24 = vld [vmem:[%s17748_s3 + $0x78] sm:$0xff]   ;;  %5597 = vmatmul.mubr.bf16.gmra.mxu1 %v13650_v45  ;;  %v15209_v12 = vld [vmem:[#allocation2 + $0xc4] sm:$0x8] }
 0x1e3   : > { %v3111_v34 = vsel %vm14213_vm14, %v3106_v38, %v3110_v17  ;;  %v2306_v58 = vor.u32 %v2305_v26, %v2301_v55  ;;  %v2600_v57 = vrot.slane %v2445_v15, 5  ;;  %v15211_v18 = vadd.f32 %v12539_v54, %v5087_v27  ;;  %v13687_v48 = vld [vmem:[%s17748_s3 + $0x38] sm:$0xff]   ;;  %12830 = vmatprep.subr.bf16.mxu1 %v13686_v24  ;;  %v13653_v15 = vld [vmem:[#allocation3 + $0x3b8] ss:$36 sps:$4 sm:$0xff]   ;;  %v2702_v38 = vld [vmem:[#allocation2 + $0xc0] sm:$0xf]  ;;  %v15227_v26 = vpop.f32.mrf.mxu0 }
 0x1e4   : > { %v13651_v1 = vld [vmem:[#allocation3 + $0x3bc] ss:$36 sps:$4 sm:$0xff]   ;;  %v3121_v14 = vsel %vm14213_vm14, %v3116_v25, %v3120_v5  ;;  %3228 = vst [vmem:[#allocation3 + $0x3c4] sm:$0xf] %v3111_v34  ;;  %v2297_v40 = vrot.slane %v2296_v0, 4  ;;  %v2598_v17 = vsel %vm14184_vm13, %v11754_v35, %v2597_v9  ;;  %v2599_v33 = vrot.slane %v2597_v9, 4  ;;  %12831 = vmatpush3.bf16.msra.mxu1 %v13687_v48 }
 0x1e5   : > { %3229 = vst [vmem:[#allocation3 + $0x3e8] sm:$0xf] %v3121_v14  ;;  %v2307_v19 = vrot.slane %v2306_v58, 4  ;;  %2669 = vst [vmem:[#allocation3 + $0x404] sm:$0xf] %v2598_v17  ;;  %v17802_v54 = vld [vmem:[#allocation12_spill] sm:$0xff]  ;;  %v5092_v5 = vadd.f32 %v15182_v49, %v14969_v30  ;;  %5443 = vmatprep.mubr.bf16.mxu0 %v13651_v1  ;;  %v12542_v34 = vadd.f32 %v15067_v62, %v15040_v46  ;;  %v15237_v49 = vpop.f32.mrf.mxu1 }
 0x1e6   : > { %v17803_v45 = vrot.slane %v17802_v54, 4  ;;  %v2302_v25 = vsel %vm14213_vm14, %v2297_v40, %v2301_v55  ;;  %v2601_v0 = vsel %vm14184_vm13, %v2599_v33, %v2600_v57  ;;  %v2703_v35 = vld [vmem:[#allocation2 + $0xc4] sm:$0xf]  ;;  %2734 = vst [vmem:[#allocation3 + $0x408] sm:$0xf] %v2702_v38  ;;  %v12433_v30 = vadd.f32 %v15069_v8, %v15057_v16  ;;  %5444 = vmatmul.mubr.bf16.gmra.mxu0 %v13653_v15 }
 0x1e7   : > { %v2780_v9 = vld [vmem:[#allocation2 + $0xc0] sm:$0xf]  ;;  %v2781_v24 = vld [vmem:[#allocation2 + $0xc4] sm:$0xf]  ;;  %v2312_v55 = vsel %vm14213_vm14, %v2307_v19, %v2311_v47  ;;  %2397 = vst [vmem:[#allocation3 + $0x400] sm:$0xf] %v2302_v25  ;;  %v15241_v40 = vadd.f32 %v12542_v34, %v5092_v5  ;;  %v15243_v47 = vpop.f32.mrf.mxu0  ;;  %v15245_v25 = vpop.f32.mrf.mxu1 }
 0x1e8   : > { %v697_v39 = vsel %vm14124_vm4, %v17803_v45, %v696_v28  ;;  %2670 = vst [vmem:[#allocation3 + $0x428] sm:$0xf] %v2601_v0  ;;  %2735 = vst [vmem:[#allocation3 + $0x42c] sm:$0xf] %v2703_v35  ;;  %v3123_v58 = vshrl.u32 %v2780_v9, 16  ;;  %v3126_v57 = vshll.u32 %v2780_v9, 16 }
 0x1e9   : > { %698 = vst [vmem:[#allocation2 + $0xc8] sm:$0x1] %v697_v39  ;;  %v3132_v28 = vshll.u32 %v2781_v24, 16  ;;  %v1950_v48 = vld [vmem:[#allocation2 + $0xc0] sm:$0xf]  ;;  %v3136_v1 = vshrl.u32 %v2781_v24, 16 }
 0x1ea   : > { %2398 = vst [vmem:[#allocation3 + $0x424] sm:$0xf] %v2312_v55  ;;  %v1951_v14 = vld [vmem:[#allocation2 + $0xc4] sm:$0xf]  ;;  %v2314_v46 = vshrl.u32 %v1950_v48, 16  ;;  %v2317_v62 = vshll.u32 %v1950_v48, 16 }
 0x1eb   : > { %17805 = vst [vmem:[#allocation12_spill] sm:$0xff] %v15241_v40  ;;  %v3125_v16 = vrot.slane %v3123_v58, 4  ;;  %v3128_v8 = vrot.slane %v3126_v57, 5  ;;  %v3134_v17 = vrot.slane %v3132_v28, 5  ;;  %v2323_v33 = vshll.u32 %v1951_v14, 16  ;;  %v17806_v48 = vld [vmem:[#allocation11_spill] sm:$0xff] }
 0x1ec   : > { %v2446_v15 = vld [vmem:[#allocation2 + $0xc0] sm:$0xe]  ;;  %v3138_v19 = vrot.slane %v3136_v1, 4  ;;  %v2316_v54 = vrot.slane %v2314_v46, 4  ;;  %v2319_v45 = vrot.slane %v2317_v62, 5  ;;  %v2327_v39 = vshrl.u32 %v1951_v14, 16 }
 0x1ed   : > { %v2447_v38 = vld [vmem:[#allocation2 + $0xc4] sm:$0xf]  ;;  %v3129_v0 = vor.u32 %v3128_v8, %v3125_v16  ;;  %v2325_v35 = vrot.slane %v2323_v33, 5  ;;  %v11755_v9 = vrot.slane %v2446_v15, 9  ;;  %v707_v5 = vld [vmem:[#allocation2 + $0xcc] sm:$0xf]  ;;  %v15260_v15 = vpop.f32.mrf.mxu0 }
 0x1ee   : > { %v2604_v24 = vrot.slane %v2447_v38, 5  ;;  %v13654_v34 = vld [vmem:[#allocation3 + $0x3c4] ss:$36 sps:$4 sm:$0xff]   ;;  %v3139_v58 = vor.u32 %v3138_v19, %v3134_v17  ;;  %v2320_v57 = vor.u32 %v2319_v45, %v2316_v54  ;;  %v2329_v28 = vrot.slane %v2327_v39, 4  ;;  %v711_v16 = vld [vmem:[#allocation2 + $0xd4] sm:$0x1] }
 0x1ef   : > { %v13656_v55 = vld [vmem:[#allocation3 + $0x3c0] ss:$36 sps:$4 sm:$0xff]   ;;  %v708_v1 = vsel %vm14140_vm7, %v17806_v48, %v707_v5  ;;  %v3130_v62 = vrot.slane %v3129_v0, 4  ;;  %v15257_v8 = vld [vmem:[%s17747_s2] ss:$0 sm:$0xff]  ;;  %5604 = vmatprep.mubr.bf16.mxu1 %v13654_v34  ;;  %v17808_v19 = vrot.slane %v15209_v12, 11 }
 0x1f0   : > { %v997_v46 = vld [vmem:[#allocation2 + $0xc8] sm:$0x1]  ;;  %v2605_v14 = vsel %vm14184_vm13, %v11755_v9, %v2604_v24  ;;  %v15252_v40 = vrot.slane %v2604_v24, 4  ;;  %709 = vst [vmem:[#allocation2 + $0xcc] sm:$0xf] %v708_v1  ;;  %v5095_v33 = vadd.f32 %v15257_v8, %v12433_v30  ;;  %v15266_v39 = vrot.slane %v3139_v58, 4  ;;  %v15270_v24 = vpop.f32.mrf.mxu1  ;;  %5605 = vmatmul.mubr.bf16.gmra.mxu1 %v13656_v55 }
 0x1f1   : > { %v998_v45 = vsel %vm14167_vm10, %v17808_v19, %v997_v46  ;;  %v2321_v38 = vrot.slane %v2320_v57, 4  ;;  %v2330_v0 = vor.u32 %v2329_v28, %v2325_v35  ;;  %2671 = vst [vmem:[#allocation3 + $0x44c] sm:$0xf] %v2605_v14  ;;  %v15268_v9 = vld [vmem:[#allocation2 + $0xd0] sm:$0x8]  ;;  %v3135_v34 = vsel %vm14213_vm14, %v3130_v62, %v3134_v17  ;;  %v17810_v12 = vld [vmem:[#allocation10_spill] sm:$0xff] }
 0x1f2   : > { %v13657_v5 = vld [vmem:[#allocation3 + $0x404] ss:$36 sps:$4 sm:$0xff]   ;;  %999 = vst [vmem:[#allocation2 + $0xc8] sm:$0x1] %v998_v45  ;;  %v17811_v48 = vrot.slane %v17810_v12, 4  ;;  %v11723_v57 = vrot.slane %v15268_v9, 11  ;;  %v12545_v28 = vadd.f32 %v15089_v3, %v15077_v56  ;;  %v12436_v17 = vadd.f32 %v15100_v4, %v15079_v2 }
 0x1f3   : > { %v13660_v30 = vld [vmem:[#allocation3 + $0x400] ss:$36 sps:$4 sm:$0xff]   ;;  %3230 = vst [vmem:[#allocation3 + $0x40c] sm:$0xf] %v3135_v34  ;;  %v2326_v55 = vsel %vm14213_vm14, %v2321_v38, %v2325_v35  ;;  %v15283_v1 = vrot.slane %v2330_v0, 4  ;;  %v12548_v62 = vadd.f32 %v15113_v10, %v15104_v41  ;;  %5451 = vmatprep.mubr.bf16.mxu0 %v13657_v5  ;;  %v12439_v35 = vadd.f32 %v15120_v52, %v15106_v6  ;;  %v15293_v38 = vpop.f32.mrf.mxu0  ;;  %v15298_v5 = vpop.f32.mrf.mxu1  ;;  %v13688_v9 = vld [vmem:[%s17748_s3 + $0x70] sm:$0xff]  }
 0x1f4   : > { %v712_v58 = vsel %vm14124_vm4, %v17811_v48, %v711_v16  ;;  %v2705_v46 = vld [vmem:[#allocation2 + $0xd0] sm:$0xf]  ;;  %2399 = vst [vmem:[#allocation3 + $0x448] sm:$0xf] %v2326_v55  ;;  %v3234_v3 = vld [vmem:[#allocation2 + $0x18] sm:$0xe]  ;;  %v15289_v45 = vadd.f32 %v12545_v28, %v5095_v33  ;;  %5452 = vmatmul.mubr.bf16.gmra.mxu0 %v13660_v30  ;;  %v5100_v41 = vadd.f32 %v15257_v8, %v12436_v17 }
 0x1f5   : > { %713 = vst [vmem:[#allocation2 + $0xd4] sm:$0x1] %v712_v58  ;;  %v2784_v14 = vld [vmem:[#allocation2 + $0xd0] sm:$0xf]  ;;  %2737 = vst [vmem:[#allocation3 + $0x474] sm:$0xf] %v2705_v46  ;;  %v12551_v10 = vadd.f32 %v15149_v37, %v15134_v29  ;;  %12832 = vmatprep.subr.bf16.mxu1 %v13688_v9  ;;  %v12557_v9 = vadd.f32 %v15202_v43, %v15194_v42 }
 0x1f6   : > { %v3156_v16 = vshll.u32 %v2784_v14, 16  ;;  %v3160_v56 = vshrl.u32 %v2784_v14, 16  ;;  %v3235_v19 = vld [vmem:[#allocation2 + $0x1c] sm:$0xf]  ;;  %v3236_v0 = vld [vmem:[#allocation2 + $0x20] sm:$0x1]  ;;  %v15304_v14 = vadd.f32 %v12548_v62, %v5100_v41  ;;  %v12554_v41 = vadd.f32 %v15184_v36, %v15163_v53 }
 0x1f7   : > { %v11756_v2 = vrot.slane %v3234_v3, 9  ;;  %v3332_v4 = vrot.slane %v3235_v19, 5  ;;  %v3237_v34 = vld [vmem:[#allocation2 + $0x24] sm:$0xe]  ;;  %v3335_v48 = vrot.slane %v3236_v0, 5  ;;  %v12442_v3 = vadd.f32 %v15151_v60, %v15143_v51  ;;  %v15310_v19 = vpop.f32.mrf.mxu0 }
 0x1f8   : > { %v15300_v12 = vrot.slane %v3156_v16, 5  ;;  %v3162_v33 = vrot.slane %v3160_v56, 4  ;;  %v3238_v58 = vld [vmem:[#allocation2 + $0x28] sm:$0xf]  ;;  %v11757_v6 = vrot.slane %v3237_v34, 9  ;;  %v5103_v56 = vadd.f32 %v15257_v8, %v12439_v35 }
 0x1f9   : > { %v731_v52 = vld [vmem:[#allocation2 + $0xcc] sm:$0x2]  ;;  %v855_v28 = vld [vmem:[#allocation2 + $0xcc] sm:$0x1]  ;;  %v3333_v30 = vsel %vm14184_vm13, %v11756_v2, %v3332_v4  ;;  %v3334_v55 = vrot.slane %v3332_v4, 4  ;;  %v3339_v46 = vrot.slane %v3238_v58, 5  ;;  %v12445_v35 = vadd.f32 %v15176_v21, %v15161_v23 }
 0x1fa   : > { %v11705_v17 = vrot.slane %v731_v52, 9  ;;  %v3163_v29 = vor.u32 %v3162_v33, %v15300_v12  ;;  %3474 = vst [vmem:[#allocation3 + $0x20] sm:$0xf] %v3333_v30  ;;  %v3239_v37 = vld [vmem:[#allocation2 + $0x2c] sm:$0x1]  ;;  %v15320_v33 = vpop.f32.mrf.mxu1 }
 0x1fb   : > { %v3240_v16 = vld [vmem:[#allocation2 + $0x30] sm:$0xe]  ;;  %v2782_v0 = vld [vmem:[#allocation2 + $0xc8] sm:$0x1]  ;;  %v3336_v62 = vsel %vm14184_vm13, %v3334_v55, %v3335_v48  ;;  %v3340_v4 = vsel %vm14184_vm13, %v11757_v6, %v3339_v46  ;;  %v3341_v23 = vrot.slane %v3339_v46, 4  ;;  %v3342_v21 = vrot.slane %v3239_v37, 5 }
 0x1fc   : > { %v1952_v34 = vld [vmem:[#allocation2 + $0xc8] sm:$0x1]  ;;  %v3142_v51 = vshll.u32 %v2782_v0, 16  ;;  %v856_v52 = vsel %vm14124_vm4, %v11705_v17, %v855_v28  ;;  %v1000_v30 = vld [vmem:[#allocation2 + $0xd4] sm:$0x1]  ;;  %v15328_v36 = vrot.slane %v3163_v29, 4 }
 0x1fd   : > { %v2448_v2 = vld [vmem:[#allocation2 + $0xc8] sm:$0x1]  ;;  %v2333_v60 = vshll.u32 %v1952_v34, 16  ;;  %3475 = vst [vmem:[#allocation3 + $0x44] sm:$0xf] %v3336_v62  ;;  %v1001_v53 = vsel %vm14167_vm10, %v11723_v57, %v1000_v30  ;;  %v11758_v0 = vrot.slane %v3240_v16, 9  ;;  %v15333_v34 = vpop.f32.mrf.mxu0  ;;  %v3343_v57 = vsel %vm14184_vm13, %v3341_v23, %v3342_v21 }
 0x1fe   : > { %v2607_v58 = vrot.slane %v2448_v2, 5  ;;  %3476 = vst [vmem:[#allocation3 + $0x68] sm:$0xf] %v3340_v4  ;;  %857 = vst [vmem:[#allocation2 + $0xcc] sm:$0x1] %v856_v52  ;;  %v3144_v6 = vrot.slane %v3142_v51, 5  ;;  %v15340_v62 = vadd.f32 %v12551_v10, %v5103_v56 }
 0x1ff   : > { %v3241_v48 = vld [vmem:[#allocation2 + $0x34] sm:$0xf]  ;;  %v2335_v55 = vrot.slane %v2333_v60, 5  ;;  %1002 = vst [vmem:[#allocation2 + $0xd4] sm:$0x1] %v1001_v53 }
 0x200   : > { %v2608_v28 = vsel %vm14184_vm13, %v15252_v40, %v2607_v58  ;;  %v3242_v17 = vld [vmem:[#allocation2 + $0x38] sm:$0x1]  ;;  %v3346_v46 = vrot.slane %v3241_v48, 5  ;;  %v3243_v37 = vld [vmem:[#allocation2 + $0x3c] sm:$0xe]  ;;  %v15342_v40 = vpop.f32.mrf.mxu1  ;;  %v3145_v16 = vsel %vm14213_vm14, %v15266_v39, %v3144_v6  ;;  %v5108_v39 = vadd.f32 %v15257_v8, %v12442_v3 }
 0x201   : > { %2672 = vst [vmem:[#allocation3 + $0x470] sm:$0xf] %v2608_v28  ;;  %v3349_v29 = vrot.slane %v3242_v17, 5  ;;  %v3244_v2 = vld [vmem:[#allocation2 + $0x40] sm:$0xf]  ;;  %v2336_v4 = vsel %vm14213_vm14, %v15283_v1, %v2335_v55  ;;  %v11759_v60 = vrot.slane %v3243_v37, 9  ;;  %v15355_v55 = vpop.f32.mrf.mxu0  ;;  %v5111_v3 = vadd.f32 %v15257_v8, %v12445_v35 }
 0x202   : > { %3477 = vst [vmem:[#allocation3 + $0x8c] sm:$0xf] %v3343_v57  ;;  %v3245_v51 = vld [vmem:[#allocation2 + $0x44] sm:$0x1]  ;;  %v3353_v58 = vrot.slane %v3244_v2, 5  ;;  %v3347_v10 = vsel %vm14184_vm13, %v11758_v0, %v3346_v46  ;;  %v3348_v56 = vrot.slane %v3346_v46, 4  ;;  %v15362_v0 = vadd.f32 %v12554_v41, %v5108_v39  ;;  %v15367_v57 = vpop.f32.mrf.mxu1 }
 0x203   : > { %v3246_v52 = vld [vmem:[#allocation2 + $0x48] sm:$0xe]  ;;  %3231 = vst [vmem:[#allocation3 + $0x430] sm:$0xf] %v3145_v16  ;;  %2400 = vst [vmem:[#allocation3 + $0x46c] sm:$0xf] %v2336_v4  ;;  %v12459_v41 = vpop.f32.mrf.mxu0  ;;  %v15373_v43 = vadd.f32 %v12557_v9, %v5111_v3  ;;  %v12563_v9 = vadd.f32 %v15298_v5, %v15270_v24 }
 0x204   : > { %v3356_v30 = vrot.slane %v3245_v51, 5  ;;  %v3247_v53 = vld [vmem:[#allocation2 + $0x4c] sm:$0xf]  ;;  %3478 = vst [vmem:[#allocation3 + $0xb0] sm:$0xf] %v3347_v10  ;;  %v3354_v1 = vsel %vm14184_vm13, %v11759_v60, %v3353_v58  ;;  %v3355_v23 = vrot.slane %v3353_v58, 4  ;;  %v3350_v17 = vsel %vm14184_vm13, %v3348_v56, %v3349_v29 }
 0x205   : > { %v3248_v21 = vld [vmem:[#allocation2 + $0x50] sm:$0x1]  ;;  %v11760_v48 = vrot.slane %v3246_v52, 9  ;;  %v3360_v6 = vrot.slane %v3247_v53, 5  ;;  %3480 = vst [vmem:[#allocation3 + $0xf8] sm:$0xf] %v3354_v1  ;;  %v12448_v58 = vadd.f32 %v15200_v13, %v15192_v63  ;;  %v12560_v53 = vadd.f32 %v15245_v25, %v15237_v49  ;;  %v12461_v39 = vpop.f32.mrf.mxu0  ;;  %v12568_v13 = vpop.f32.mrf.mxu1 }
 0x206   : > { %v13689_v28 = vld [vmem:[%s17748_s3 + $0x30] sm:$0xff]   ;;  %v2704_v46 = vld [vmem:[#allocation2 + $0xcc] sm:$0xf]  ;;  %3479 = vst [vmem:[#allocation3 + $0xd4] sm:$0xf] %v3350_v17  ;;  %v3357_v2 = vsel %vm14184_vm13, %v3355_v23, %v3356_v30  ;;  %v3363_v4 = vrot.slane %v3248_v21, 5  ;;  %v12451_v63 = vadd.f32 %v15243_v47, %v15227_v26  ;;  %v12454_v49 = vadd.f32 %v15293_v38, %v15260_v15 }
 0x207   : > { %v2783_v37 = vld [vmem:[#allocation2 + $0xcc] sm:$0xf]  ;;  %v3361_v16 = vsel %vm14184_vm13, %v11760_v48, %v3360_v6  ;;  %v3362_v29 = vrot.slane %v3360_v6, 4  ;;  %12833 = vmatpush3.bf16.msra.mxu1 %v13689_v28  ;;  %2736 = vst [vmem:[#allocation3 + $0x450] sm:$0xf] %v2704_v46  ;;  %v5116_v6 = vadd.f32 %v15257_v8, %v12448_v58  ;;  %v12566_v25 = vadd.f32 %v15342_v40, %v15320_v33  ;;  %v12462_v38 = vpop.f32.mrf.mxu0 }
 0x208   : > { %v2785_v35 = vld [vmem:[#allocation2 + $0xd4] sm:$0x1]  ;;  %v3147_v51 = vshrl.u32 %v2783_v37, 16  ;;  %v3150_v60 = vshll.u32 %v2783_v37, 16  ;;  %3481 = vst [vmem:[#allocation3 + $0x11c] sm:$0xf] %v3357_v2  ;;  %v5119_v26 = vadd.f32 %v15257_v8, %v12451_v63  ;;  %v5124_v5 = vadd.f32 %v15257_v8, %v12454_v49 }
 0x209   : > { %3482 = vst [vmem:[#allocation3 + $0x140] sm:$0xf] %v3361_v16  ;;  %v3249_v42 = vld [vmem:[#allocation2 + $0x54] sm:$0xe]  ;;  %v3166_v52 = vshll.u32 %v2785_v35, 16  ;;  %v3364_v10 = vsel %vm14184_vm13, %v3362_v29, %v3363_v4  ;;  %v15390_v29 = vadd.f32 %v12560_v53, %v5116_v6  ;;  %v12457_v15 = vadd.f32 %v15333_v34, %v15310_v19 }
 0x20a   : > { %v3250_v56 = vld [vmem:[#allocation2 + $0x58] sm:$0xf]  ;;  %v11761_v30 = vrot.slane %v3249_v42, 9  ;;  %v3149_v1 = vrot.slane %v3147_v51, 4  ;;  %v3152_v23 = vrot.slane %v3150_v60, 5  ;;  %v15401_v35 = vadd.f32 %v12563_v9, %v5119_v26  ;;  %v12570_v51 = vpop.f32.mrf.mxu1 }
 0x20b   : > { %v13670_v21 = vld [vmem:[#allocation3 + $0x20] ss:$36 sps:$4 sm:$0xff]   ;;  %3483 = vst [vmem:[#allocation3 + $0x164] sm:$0xf] %v3364_v10  ;;  %v13661_v28 = vld [vmem:[#allocation3 + $0x40c] ss:$36 sps:$4 sm:$0xff]   ;;  %v5127_v60 = vadd.f32 %v15257_v8, %v12457_v15  ;;  %v12569_v19 = vadd.f32 %v12568_v13, %v15367_v57  ;;  %v12460_v34 = vadd.f32 %v12459_v41, %v15355_v55  ;;  %v12463_v53 = vadd.f32 %v12462_v38, %v12461_v39 }
 0x20c   : > { %v3251_v48 = vld [vmem:[#allocation2 + $0x5c] sm:$0x1]  ;;  %v13663_v17 = vld [vmem:[#allocation3 + $0x408] ss:$36 sps:$4 sm:$0xff]   ;;  %v3168_v3 = vrot.slane %v3166_v52, 5  ;;  %v3153_v2 = vor.u32 %v3152_v23, %v3149_v1  ;;  %v3367_v16 = vrot.slane %v3250_v56, 5  ;;  %5612 = vmatprep.mubr.bf16.mxu1 %v13661_v28 }
 0x20d   : > { %v13664_v46 = vld [vmem:[#allocation3 + $0x44c] ss:$36 sps:$4 sm:$0xff]   ;;  %v3370_v24 = vrot.slane %v3251_v48, 5  ;;  %5613 = vmatmul.mubr.bf16.gmra.mxu1 %v13663_v17  ;;  %v3252_v52 = vld [vmem:[#allocation2 + $0x60] sm:$0xe]  ;;  %v15413_v48 = vadd.f32 %v12569_v19, %v5127_v60  ;;  %v5132_v55 = vadd.f32 %v15257_v8, %v12460_v34 }
 0x20e   : > { %v13666_v37 = vld [vmem:[#allocation3 + $0x448] ss:$36 sps:$4 sm:$0xff]   ;;  %v3169_v47 = vsel %vm14213_vm14, %v15328_v36, %v3168_v3  ;;  %5459 = vmatprep.mubr.bf16.mxu0 %v13664_v46  ;;  %v3154_v33 = vrot.slane %v3153_v2, 4  ;;  %v3368_v40 = vsel %vm14184_vm13, %v11761_v30, %v3367_v16  ;;  %v3369_v4 = vrot.slane %v3367_v16, 4  ;;  %v3254_v56 = vld [vmem:[#allocation2 + $0x68] sm:$0x1]  ;;  %v12571_v30 = vpop.f32.mrf.mxu1 }
 0x20f   : > { %3233 = vst [vmem:[#allocation3 + $0x478] sm:$0xf] %v3169_v47  ;;  %5460 = vmatmul.mubr.bf16.gmra.mxu0 %v13666_v37  ;;  %3484 = vst [vmem:[#allocation3 + $0x188] sm:$0xf] %v3368_v40  ;;  %v15403_v36 = vadd.f32 %v12566_v25, %v5124_v5  ;;  %v3253_v10 = vld [vmem:[#allocation2 + $0x64] sm:$0xf]  ;;  %v12572_v63 = vadd.f32 %v12571_v30, %v12570_v51  ;;  %v5135_v2 = vadd.f32 %v15257_v8, %v12463_v53 }
 0x210   : > { %v3159_v42 = vsel %vm14213_vm14, %v3154_v33, %v15300_v12  ;;  %13318 = vmatprep.mubr.bf16.mxu0 %v13670_v21  ;;  %v3371_v58 = vsel %vm14184_vm13, %v3369_v4, %v3370_v24  ;;  %v13671_v1 = vld [vmem:[#allocation3 + $0x68] ss:$36 sps:$4 sm:$0xff]   ;;  %v11762_v23 = vrot.slane %v3252_v52, 9  ;;  %v3374_v57 = vrot.slane %v3253_v10, 5  ;;  %v13672_v41 = vld [vmem:[#allocation3 + $0xb0] ss:$36 sps:$4 sm:$0xff]   ;;  %v12573_v13 = vpop.f32.mrf.mxu1 }
 0x211   : > { %3232 = vst [vmem:[#allocation3 + $0x454] sm:$0xf] %v3159_v42  ;;  %3485 = vst [vmem:[#allocation3 + $0x1ac] sm:$0xf] %v3371_v58  ;;  %v3377_v12 = vrot.slane %v3254_v56, 5  ;;  %v15418_v37 = vadd.f32 %v12572_v63, %v5132_v55  ;;  %v12464_v56 = vpop.f32.mrf.mxu0 }
 0x212   : > { %v3255_v21 = vld [vmem:[#allocation2 + $0x6c] sm:$0xe]  ;;  %v3256_v6 = vld [vmem:[#allocation2 + $0x70] sm:$0xf]  ;;  %v3375_v28 = vsel %vm14184_vm13, %v11762_v23, %v3374_v57  ;;  %v3376_v17 = vrot.slane %v3374_v57, 4  ;;  %v12574_v16 = vpop.f32.mrf.mxu1 }
 0x213   : > { %v3257_v39 = vld [vmem:[#allocation2 + $0x74] sm:$0x1]  ;;  %v11763_v3 = vrot.slane %v3255_v21, 9  ;;  %v3381_v9 = vrot.slane %v3256_v6, 5  ;;  %3486 = vst [vmem:[#allocation3 + $0x1d0] sm:$0xf] %v3375_v28  ;;  %v12575_v4 = vadd.f32 %v12574_v16, %v12573_v13  ;;  %v12465_v6 = vpop.f32.mrf.mxu0 }
 0x214   : > { %v3384_v49 = vrot.slane %v3257_v39, 5  ;;  %v3258_v25 = vld [vmem:[#allocation2 + $0x78] sm:$0xe]  ;;  %v3259_v46 = vld [vmem:[#allocation2 + $0x7c] sm:$0xf]  ;;  %v3378_v26 = vsel %vm14184_vm13, %v3376_v17, %v3377_v12  ;;  %v12576_v63 = vpop.f32.mrf.mxu1 }
 0x215   : > { %v3382_v47 = vsel %vm14184_vm13, %v11763_v3, %v3381_v9  ;;  %v3383_v24 = vrot.slane %v3381_v9, 4  ;;  %v3260_v5 = vld [vmem:[#allocation2 + $0x80] sm:$0x1]  ;;  %v11764_v15 = vrot.slane %v3258_v25, 9  ;;  %3487 = vst [vmem:[#allocation3 + $0x1f4] sm:$0xf] %v3378_v26  ;;  %v15429_v30 = vadd.f32 %v12575_v4, %v5135_v2  ;;  %v12467_v2 = vpop.f32.mrf.mxu0 }
 0x216   : > { %3488 = vst [vmem:[#allocation3 + $0x218] sm:$0xf] %v3382_v47  ;;  %v3388_v38 = vrot.slane %v3259_v46, 5  ;;  %v3391_v33 = vrot.slane %v3260_v5, 5  ;;  %v3261_v40 = vld [vmem:[#allocation2 + $0x84] sm:$0xe]  ;;  %v12466_v46 = vadd.f32 %v12465_v6, %v12464_v56  ;;  %v12577_v16 = vpop.f32.mrf.mxu1 }
 0x217   : > { %13319 = vmatmul.mubr.bf16.vlgmr.msra.gmra.mxu0 %v13671_v1  ;;  %v3385_v51 = vsel %vm14184_vm13, %v3383_v24, %v3384_v49  ;;  %v3262_v60 = vld [vmem:[#allocation2 + $0x88] sm:$0xf]  ;;  %v3263_v19 = vld [vmem:[#allocation2 + $0x8c] sm:$0x1]  ;;  %v11765_v34 = vrot.slane %v3261_v40, 9  ;;  %v12578_v5 = vadd.f32 %v12577_v16, %v12576_v63 }
 0x218   : > { %v13667_v42 = vld [vmem:[#allocation3 + $0x454] ss:$36 sps:$4 sm:$0xff]   ;;  %13322 = vmatprep.mubr.bf16.mxu0 %v13672_v41  ;;  %3489 = vst [vmem:[#allocation3 + $0x23c] sm:$0xf] %v3385_v51  ;;  %v3389_v52 = vsel %vm14184_vm13, %v11764_v15, %v3388_v38  ;;  %v3390_v10 = vrot.slane %v3388_v38, 4  ;;  %v3395_v1 = vrot.slane %v3262_v60, 5  ;;  %v5140_v4 = vadd.f32 %v15257_v8, %v12466_v46  ;;  %v12468_v51 = vpop.f32.mrf.mxu0  ;;  %v12579_v60 = vpop.f32.mrf.mxu1 }
 0x219   : > { %v13669_v58 = vld [vmem:[#allocation3 + $0x450] ss:$36 sps:$4 sm:$0xff]   ;;  %v13673_v53 = vld [vmem:[#allocation3 + $0xf8] ss:$36 sps:$4 sm:$0xff]   ;;  %3490 = vst [vmem:[#allocation3 + $0x260] sm:$0xf] %v3389_v52  ;;  %5620 = vmatprep.mubr.bf16.mxu1 %v13667_v42 }
 0x21a   : > { %v3398_v23 = vrot.slane %v3263_v19, 5  ;;  %v13674_v57 = vld [vmem:[#allocation3 + $0x140] ss:$36 sps:$4 sm:$0xff]   ;;  %v3392_v55 = vsel %vm14184_vm13, %v3390_v10, %v3391_v33  ;;  %v3264_v12 = vld [vmem:[#allocation2 + $0x90] sm:$0xe]  ;;  %5621 = vmatmul.mubr.bf16.gmra.mxu1 %v13669_v58  ;;  %v3396_v13 = vsel %vm14184_vm13, %v11765_v34, %v3395_v1  ;;  %v3397_v28 = vrot.slane %v3395_v1, 4  ;;  %v12580_v1 = vpop.f32.mrf.mxu1 }
 0x21b   : > { %v3265_v21 = vld [vmem:[#allocation2 + $0x94] sm:$0xf]  ;;  %v3266_v41 = vld [vmem:[#allocation2 + $0x98] sm:$0x1]  ;;  %3491 = vst [vmem:[#allocation3 + $0x284] sm:$0xf] %v3392_v55  ;;  %v12469_v34 = vadd.f32 %v12468_v51, %v12467_v2  ;;  %v15450_v56 = vadd.f32 %v12578_v5, %v5140_v4 }
 0x21c   : > { %v11766_v17 = vrot.slane %v3264_v12, 9  ;;  %v3402_v39 = vrot.slane %v3265_v21, 5  ;;  %v13690_v3 = vld [vmem:[%s17748_s3 + $0x68] sm:$0xff]   ;;  %3492 = vst [vmem:[#allocation3 + $0x2a8] sm:$0xf] %v3396_v13  ;;  %v3405_v9 = vrot.slane %v3266_v41, 5  ;;  %v3399_v47 = vsel %vm14184_vm13, %v3397_v28, %v3398_v23  ;;  %v12598_v23 = vpop.f32.mrf.mxu0 }
 0x21d   : > { %v3267_v49 = vld [vmem:[#allocation2 + $0x9c] sm:$0xe]  ;;  %v3268_v25 = vld [vmem:[#allocation2 + $0xa0] sm:$0xf]  ;;  %v13691_v26 = vld [vmem:[%s17748_s3 + $0x28] sm:$0xff]   ;;  %12834 = vmatprep.subr.bf16.mxu1 %v13690_v3  ;;  %17812 = vst [vmem:[#allocation11_spill] sm:$0xff] %v15450_v56  ;;  %v12581_v41 = vadd.f32 %v12580_v1, %v12579_v60 }
 0x21e   : > { %v3403_v24 = vsel %vm14184_vm13, %v11766_v17, %v3402_v39  ;;  %3493 = vst [vmem:[#allocation3 + $0x2cc] sm:$0xf] %v3399_v47  ;;  %v3404_v15 = vrot.slane %v3402_v39, 4  ;;  %v3269_v38 = vld [vmem:[#allocation2 + $0xa4] sm:$0x1]  ;;  %v11767_v33 = vrot.slane %v3267_v49, 9  ;;  %12835 = vmatpush3.bf16.msra.mxu1 %v13691_v26  ;;  %v12599_v17 = vpop.f32.mrf.mxu0  ;;  %v15455_v39 = vpop.f32.mrf.mxu1 }
 0x21f   : > { %3494 = vst [vmem:[#allocation3 + $0x2f0] sm:$0xf] %v3403_v24  ;;  %v3409_v40 = vrot.slane %v3268_v25, 5  ;;  %13323 = vmatmul.mubr.bf16.gmra.mxu0 %v13673_v53  ;;  %v3412_v19 = vrot.slane %v3269_v38, 5  ;;  %v3270_v10 = vld [vmem:[#allocation2 + $0xa8] sm:$0xe]  ;;  %v12600_v25 = vadd.f32 %v12599_v17, %v12598_v23 }
 0x220   : > { %13326 = vmatprep.mubr.bf16.mxu0 %v13674_v57  ;;  %v3406_v42 = vsel %vm14184_vm13, %v3404_v15, %v3405_v9  ;;  %v13675_v55 = vld [vmem:[#allocation3 + $0x188] ss:$36 sps:$4 sm:$0xff]   ;;  %v3271_v12 = vld [vmem:[#allocation2 + $0xac] sm:$0xf]  ;;  %v3272_v53 = vld [vmem:[#allocation2 + $0xb0] sm:$0x1]  ;;  %v5143_v57 = vadd.f32 %v15257_v8, %v12469_v34  ;;  %v12601_v47 = vpop.f32.mrf.mxu0  ;;  %v15461_v24 = vpop.f32.mrf.mxu1 }
 0x221   : > { %v3410_v58 = vsel %vm14184_vm13, %v11767_v33, %v3409_v40  ;;  %v3411_v52 = vrot.slane %v3409_v40, 4  ;;  %3495 = vst [vmem:[#allocation3 + $0x314] sm:$0xf] %v3406_v42  ;;  %v11768_v21 = vrot.slane %v3270_v10, 9  ;;  %v13676_v6 = vld [vmem:[#allocation3 + $0x1d0] ss:$36 sps:$4 sm:$0xff]  }
 0x222   : > { %3496 = vst [vmem:[#allocation3 + $0x338] sm:$0xf] %v3410_v58  ;;  %v3416_v13 = vrot.slane %v3271_v12, 5  ;;  %v3419_v28 = vrot.slane %v3272_v53, 5  ;;  %v3273_v3 = vld [vmem:[#allocation2 + $0xb4] sm:$0xe]  ;;  %v15457_v49 = vadd.f32 %v12581_v41, %v5143_v57  ;;  %v15470_v34 = vpop.f32.mrf.mxu1 }
 0x223   : > { %v3413_v63 = vsel %vm14184_vm13, %v3411_v52, %v3412_v19  ;;  %v3274_v9 = vld [vmem:[#allocation2 + $0xb8] sm:$0xf]  ;;  %v3275_v2 = vld [vmem:[#allocation2 + $0xbc] sm:$0x1]  ;;  %v11769_v16 = vrot.slane %v3273_v3, 9  ;;  %v17814_v5 = vld [vmem:[#allocation14_spill] sm:$0xff]  ;;  %v12602_v19 = vpop.f32.mrf.mxu0 }
 0x224   : > { %3497 = vst [vmem:[#allocation3 + $0x35c] sm:$0xf] %v3413_v63  ;;  %17813 = vst [vmem:[#allocation10_spill] sm:$0xff] %v15457_v49  ;;  %v3417_v46 = vsel %vm14184_vm13, %v11768_v21, %v3416_v13  ;;  %v3418_v8 = vrot.slane %v3416_v13, 4  ;;  %v3423_v26 = vrot.slane %v3274_v9, 5  ;;  %v15464_v15 = vadd.f32 %v12600_v25, %v17814_v5  ;;  %v17815_v13 = vld [vmem:[#allocation15_spill] sm:$0xff]  ;;  %v15479_v9 = vpop.f32.mrf.mxu1 }
 0x225   : > { %3498 = vst [vmem:[#allocation3 + $0x380] sm:$0xf] %v3417_v46  ;;  %v3426_v4 = vrot.slane %v3275_v2, 5  ;;  %v3276_v51 = vld [vmem:[#allocation2 + $0xc0] sm:$0xe]  ;;  %v12603_v1 = vadd.f32 %v12602_v19, %v12601_v47  ;;  %v12604_v12 = vpop.f32.mrf.mxu0  ;;  %v17816_v5 = vld [vmem:[#allocation16_spill] sm:$0xff] }
 0x226   : > { %v3420_v38 = vsel %vm14184_vm13, %v3418_v8, %v3419_v28  ;;  %v3424_v33 = vsel %vm14184_vm13, %v11769_v16, %v3423_v26  ;;  %v3425_v40 = vrot.slane %v3423_v26, 4  ;;  %v3277_v60 = vld [vmem:[#allocation2 + $0xc4] sm:$0xf]  ;;  %v3278_v42 = vld [vmem:[#allocation2 + $0xc8] sm:$0x1]  ;;  %v11770_v58 = vrot.slane %v3276_v51, 9 }
 0x227   : > { %13327 = vmatmul.mubr.bf16.gmra.mxu0 %v13675_v55  ;;  %3499 = vst [vmem:[#allocation3 + $0x3a4] sm:$0xf] %v3420_v38  ;;  %3500 = vst [vmem:[#allocation3 + $0x3c8] sm:$0xf] %v3424_v33  ;;  %v3430_v52 = vrot.slane %v3277_v60, 5  ;;  %v3433_v41 = vrot.slane %v3278_v42, 5  ;;  %v15477_v28 = vadd.f32 %v12603_v1, %v17815_v13  ;;  %v12605_v25 = vpop.f32.mrf.mxu0 }
 0x228   : > { %v3279_v10 = vld [vmem:[#allocation2 + $0xcc] sm:$0xe]  ;;  %13330 = vmatprep.mubr.bf16.mxu0 %v13676_v6  ;;  %v3427_v23 = vsel %vm14184_vm13, %v3425_v40, %v3426_v4  ;;  %v13677_v53 = vld [vmem:[#allocation3 + $0x218] ss:$36 sps:$4 sm:$0xff]   ;;  %v13678_v17 = vld [vmem:[#allocation3 + $0x260] ss:$36 sps:$4 sm:$0xff]   ;;  %v12606_v2 = vadd.f32 %v12605_v25, %v12604_v12  ;;  %v15490_v40 = vpop.f32.mrf.mxu1 }
 0x229   : > { %3501 = vst [vmem:[#allocation3 + $0x3ec] sm:$0xf] %v3427_v23  ;;  %v3431_v21 = vsel %vm14184_vm13, %v11770_v58, %v3430_v52  ;;  %v3432_v57 = vrot.slane %v3430_v52, 4  ;;  %v3280_v55 = vld [vmem:[#allocation2 + $0xd0] sm:$0xf]  ;;  %v11771_v3 = vrot.slane %v3279_v10, 9  ;;  %v12607_v47 = vpop.f32.mrf.mxu0 }
 0x22a   : > { %v3281_v63 = vld [vmem:[#allocation2 + $0xd4] sm:$0x1]  ;;  %3502 = vst [vmem:[#allocation3 + $0x410] sm:$0xf] %v3431_v21  ;;  %v3437_v6 = vrot.slane %v3280_v55, 5  ;;  %v15486_v38 = vadd.f32 %v12606_v2, %v17816_v5  ;;  %v15492_v60 = vpop.f32.mrf.mxu1  ;;  %v17817_v42 = vld [vmem:[#allocation17_spill] sm:$0xff] }
 0x22b   : > { %v3434_v46 = vsel %vm14184_vm13, %v3432_v57, %v3433_v41  ;;  %v3440_v8 = vrot.slane %v3281_v63, 5  ;;  %v12608_v4 = vpop.f32.mrf.mxu0  ;;  %v13679_v19 = vld [vmem:[#allocation3 + $0x2a8] ss:$36 sps:$4 sm:$0xff]   ;;  %v13680_v23 = vld [vmem:[#allocation3 + $0x2f0] ss:$36 sps:$4 sm:$0xff]  }
 0x22c   : > { %3503 = vst [vmem:[#allocation3 + $0x434] sm:$0xf] %v3434_v46  ;;  %v3438_v16 = vsel %vm14184_vm13, %v11771_v3, %v3437_v6  ;;  %v3439_v26 = vrot.slane %v3437_v6, 4  ;;  %v12609_v51 = vadd.f32 %v12608_v4, %v12607_v47  ;;  %v15497_v52 = vpop.f32.mrf.mxu1  ;;  %v13692_v1 = vld [vmem:[%s17748_s3 + $0x60] sm:$0xff]   ;;  %v13681_v13 = vld [vmem:[#allocation3 + $0x338] ss:$36 sps:$4 sm:$0xff]  }
 0x22d   : > { %3504 = vst [vmem:[#allocation3 + $0x458] sm:$0xf] %v3438_v16  ;;  %v12610_v10 = vpop.f32.mrf.mxu0  ;;  %12836 = vmatprep.subr.bf16.mxu1 %v13692_v1  ;;  %v17818_v25 = vld [vmem:[#allocation18_spill] sm:$0xff] }
 0x22e   : > { %v3441_v33 = vsel %vm14184_vm13, %v3439_v26, %v3440_v8  ;;  %v15495_v58 = vadd.f32 %v12609_v51, %v17817_v42  ;;  %v15505_v57 = vpop.f32.mrf.mxu1  ;;  %v13682_v3 = vld [vmem:[#allocation3 + $0x380] ss:$36 sps:$4 sm:$0xff]   ;;  %v17819_v51 = vld [vmem:[#allocation19_spill] sm:$0xff] }
 0x22f   : > { %13331 = vmatmul.mubr.bf16.gmra.mxu0 %v13677_v53  ;;  %3505 = vst [vmem:[#allocation3 + $0x47c] sm:$0xf] %v3441_v33  ;;  %v12611_v12 = vpop.f32.mrf.mxu0  ;;  %v13693_v53 = vld [vmem:[%s17748_s3 + $0x20] sm:$0xff]  }
 0x230   : > { %13334 = vmatprep.mubr.bf16.mxu0 %v13678_v17  ;;  %v12612_v21 = vadd.f32 %v12611_v12, %v12610_v10  ;;  %12837 = vmatpush3.bf16.msra.mxu1 %v13693_v53  ;;  %v15510_v6 = vpop.f32.mrf.mxu1  ;;  %v13683_v47 = vld [vmem:[#allocation3 + $0x3c8] ss:$36 sps:$4 sm:$0xff]  }
 0x231   : > { %v12613_v41 = vpop.f32.mrf.mxu0 }
 0x232   : > { %v15508_v55 = vadd.f32 %v12612_v21, %v15026_v44  ;;  %v15515_v8 = vpop.f32.mrf.mxu1 }
 0x233   : > { %v12614_v63 = vpop.f32.mrf.mxu0  ;;  %v13684_v4 = vld [vmem:[#allocation3 + $0x410] ss:$36 sps:$4 sm:$0xff]  }
 0x234   : > { %v12615_v17 = vadd.f32 %v12614_v63, %v12613_v41  ;;  %v15517_v16 = vpop.f32.mrf.mxu1 }
 0x235   : > { %v12616_v2 = vpop.f32.mrf.mxu0 }
 0x236   : > { %v15513_v46 = vadd.f32 %v12615_v17, %v17818_v25  ;;  %v15519_v5 = vpop.f32.mrf.mxu1  ;;  %v13685_v21 = vld [vmem:[#allocation3 + $0x458] ss:$36 sps:$4 sm:$0xff]  }
 0x237   : > { %13335 = vmatmul.mubr.bf16.gmra.mxu0 %v13679_v19  ;;  %v12617_v26 = vpop.f32.mrf.mxu0 }
 0x238   : > { %13338 = vmatprep.mubr.bf16.mxu0 %v13680_v23  ;;  %v12618_v44 = vadd.f32 %v12617_v26, %v12616_v2  ;;  %v15524_v1 = vpop.f32.mrf.mxu1  ;;  %v17820_v23 = vld [vmem:[#allocation20_spill] sm:$0xff]  ;;  %v17822_v2 = vld [vmem:[#allocation21_spill] sm:$0xff] }
 0x239   : > { %v12619_v33 = vpop.f32.mrf.mxu0 }
 0x23a   : > { %v15522_v19 = vadd.f32 %v12618_v44, %v17819_v51  ;;  %v15529_v53 = vpop.f32.mrf.mxu1 }
 0x23b   : > { %v12620_v42 = vpop.f32.mrf.mxu0 }
 0x23c   : > { %v12621_v10 = vadd.f32 %v12620_v42, %v12619_v33  ;;  %v15531_v41 = vpop.f32.mrf.mxu1  ;;  %v17824_v42 = vld [vmem:[#allocation22_spill] sm:$0xff] }
 0x23d   : > { %v12622_v63 = vpop.f32.mrf.mxu0 }
 0x23e   : > { %v15527_v12 = vadd.f32 %v12621_v10, %v17820_v23  ;;  %v15533_v17 = vpop.f32.mrf.mxu1  ;;  %v13695_v23 = vld [vmem:[%s17748_s3 + $0x18] sm:$0xff]  }
 0x23f   : > { %13339 = vmatmul.mubr.bf16.gmra.mxu0 %v13681_v13  ;;  %v12623_v13 = vpop.f32.mrf.mxu0 }
 0x240   : > { %13342 = vmatprep.mubr.bf16.mxu0 %v13682_v3  ;;  %17821 = vst [vmem:[#allocation14_spill] sm:$0xff] %v15527_v12  ;;  %v12624_v3 = vadd.f32 %v12623_v13, %v12622_v63  ;;  %v15538_v33 = vpop.f32.mrf.mxu1 }
 0x241   : > { %v12625_v25 = vpop.f32.mrf.mxu0 }
 0x242   : > { %v15536_v26 = vadd.f32 %v12624_v3, %v17822_v2  ;;  %v15543_v51 = vpop.f32.mrf.mxu1 }
 0x243   : > { %v12626_v44 = vpop.f32.mrf.mxu0 }
 0x244   : > { %17823 = vst [vmem:[#allocation15_spill] sm:$0xff] %v15536_v26  ;;  %v15551_v63 = vpop.f32.mrf.mxu1  ;;  %v13702_v26 = vld [vmem:[%s17748_s3 + $0xf0] sm:$0xff]  }
 0x246   : > { %v15553_v3 = vpop.f32.mrf.mxu1 }
 0x247   : > { %13343 = vmatmul.mubr.bf16.gmra.mxu0 %v13683_v47  ;;  %v12627_v47 = vadd.f32 %v12626_v44, %v12625_v25  ;;  %v17826_v44 = vld [vmem:[#allocation13_spill] sm:$0xff] }
 0x248   : > { %13346 = vmatprep.mubr.bf16.mxu0 %v13684_v4  ;;  %v13694_v4 = vld [vmem:[%s17748_s3 + $0x58] sm:$0xff]  }
 0x249   : > { %v15546_v10 = vadd.f32 %v12627_v47, %v17824_v42  ;;  %12838 = vmatprep.subr.bf16.mxu1 %v13694_v4  ;;  %v15558_v47 = vpop.f32.mrf.mxu1 }
 0x24a   : > { %12839 = vmatpush3.bf16.msra.mxu1 %v13695_v23 }
 0x24b   : > { %17825 = vst [vmem:[#allocation16_spill] sm:$0xff] %v15546_v10  ;;  %v15560_v54 = vpop.f32.mrf.mxu1 }
 0x24d   : > { %v15565_v32 = vpop.f32.mrf.mxu1 }
 0x24f   : > { %13347 = vmatmul.mubr.bf16.gmra.mxu0 %v13685_v21  ;;  %v12628_v21 = vpop.f32.mrf.mxu0  ;;  %v15567_v56 = vpop.f32.mrf.mxu1 }
 0x251   : > { %v12629_v13 = vpop.f32.mrf.mxu0 }
 0x252   : > { %v12630_v25 = vadd.f32 %v12629_v13, %v12628_v21 }
 0x253   : > { %v12631_v2 = vpop.f32.mrf.mxu0 }
 0x254   : > { %v15556_v22 = vadd.f32 %v12630_v25, %v17826_v44 }
 0x255   : > { %v12632_v31 = vpop.f32.mrf.mxu0 }
 0x256   : > { %17827 = vst [vmem:[#allocation17_spill] sm:$0xff] %v15556_v22  ;;  %v12633_v42 = vadd.f32 %v12632_v31, %v12631_v2  ;;  %v15572_v22 = vpop.f32.mrf.mxu1 }
 0x257   : > { %v12634_v23 = vpop.f32.mrf.mxu0 }
 0x258   : > { %v15563_v4 = vadd.f32 %v12633_v42, %v15109_v50  ;;  %v15577_v50 = vpop.f32.mrf.mxu1 }
 0x259   : > { %v12635_v27 = vpop.f32.mrf.mxu0 }
 0x25a   : > { %17828 = vst [vmem:[#allocation18_spill] sm:$0xff] %v15563_v4  ;;  %v12636_v49 = vadd.f32 %v12635_v27, %v12634_v23  ;;  %v15579_v42 = vpop.f32.mrf.mxu1 }
 0x25b   : > { %v12637_v21 = vpop.f32.mrf.mxu0 }
 0x25c   : > { %v15570_v13 = vadd.f32 %v12636_v49, %v15118_v61  ;;  %v15581_v23 = vpop.f32.mrf.mxu1 }
 0x25d   : > { %v12638_v25 = vpop.f32.mrf.mxu0 }
 0x25e   : > { %17829 = vst [vmem:[#allocation19_spill] sm:$0xff] %v15570_v13  ;;  %v12639_v44 = vadd.f32 %v12638_v25, %v12637_v21  ;;  %v15586_v25 = vpop.f32.mrf.mxu1 }
 0x25f   : > { %v12640_v2 = vpop.f32.mrf.mxu0 }
 0x260   : > { %v15575_v31 = vadd.f32 %v12639_v44, %v15139_v20  ;;  %v15591_v44 = vpop.f32.mrf.mxu1 }
 0x261   : > { %v12641_v4 = vpop.f32.mrf.mxu0 }
 0x262   : > { %17830 = vst [vmem:[#allocation20_spill] sm:$0xff] %v15575_v31  ;;  %v12642_v27 = vadd.f32 %v12641_v4, %v12640_v2  ;;  %v15593_v31 = vpop.f32.mrf.mxu1  ;;  %v13696_v4 = vld [vmem:[%s17748_s3 + $0x50] sm:$0xff]  }
 0x263   : > { %v12643_v10 = vpop.f32.mrf.mxu0  ;;  %12840 = vmatprep.subr.bf16.mxu1 %v13696_v4 }
 0x264   : > { %v15584_v61 = vadd.f32 %v12642_v27, %v15146_v11  ;;  %v13698_v11 = vld [vmem:[%s17748_s3 + $0xf8] sm:$0xff]  }
 0x265   : > { %v12644_v49 = vpop.f32.mrf.mxu0  ;;  %12942 = vmatprep.subr.bf16.mxu0 %v13698_v11 }
 0x266   : > { %17831 = vst [vmem:[#allocation21_spill] sm:$0xff] %v15584_v61  ;;  %v12645_v21 = vadd.f32 %v12644_v49, %v12643_v10  ;;  %v13700_v10 = vld [vmem:[%s17748_s3 + $0xb8] sm:$0xff]  }
 0x267   : > { %v12646_v13 = vpop.f32.mrf.mxu0  ;;  %12943 = vmatpush3.bf16.msra.mxu0 %v13700_v10 }
 0x268   : > { %v15589_v20 = vadd.f32 %v12645_v21, %v15169_v7  ;;  %v15604_v7 = vpop.f32.mrf.mxu1  ;;  %v13697_v21 = vld [vmem:[%s17748_s3 + $0x10] sm:$0xff]   ;;  %12944 = vmatprep.subr.bf16.mxu0 %v13702_v26  ;;  %v13705_v26 = vld [vmem:[%s17748_s3 + $0xa8] sm:$0xff]  }
 0x269   : > { %v12647_v2 = vpop.f32.mrf.mxu0  ;;  %12841 = vmatpush3.bf16.msra.mxu1 %v13697_v21 }
 0x26a   : > { %17832 = vst [vmem:[#allocation22_spill] sm:$0xff] %v15589_v20  ;;  %v12648_v27 = vadd.f32 %v12647_v2, %v12646_v13  ;;  %v13703_v13 = vld [vmem:[%s17748_s3 + $0xb0] sm:$0xff]  }
 0x26b   : > { %v12649_v49 = vpop.f32.mrf.mxu0  ;;  %12945 = vmatpush3.bf16.msra.mxu0 %v13703_v13 }
 0x26c   : > { %v15610_v20 = vadd.f32 %v12648_v27, %v15197_v59  ;;  %v15615_v4 = vpop.f32.mrf.mxu1 }
 0x26d   : > { %v12650_v61 = vpop.f32.mrf.mxu0 }
 0x26e   : > { %17833 = vst [vmem:[#allocation13_spill] sm:$0xff] %v15610_v20  ;;  %v12651_v11 = vadd.f32 %v12650_v61, %v12649_v49  ;;  %v15620_v10 = vpop.f32.mrf.mxu1  ;;  %v13704_v61 = vld [vmem:[%s17748_s3 + $0xe8] sm:$0xff]  }
 0x26f   : > { %17834 = vst [vmem:[#allocation23_spill] sm:$0xff] %v15620_v10  ;;  %v17838_v10 = vld [vmem:[#allocation12_spill] sm:$0xff]  ;;  %12946 = vmatprep.subr.bf16.mxu0 %v13704_v61 }
 0x270   : > { %v15623_v2 = vadd.f32 %v12651_v11, %v15211_v18  ;;  %v15625_v59 = vpop.f32.mrf.mxu1  ;;  %v12652_v27 = vpop.f32.mrf.mxu0  ;;  %12947 = vmatpush3.bf16.msra.mxu0 %v13705_v26 }
 0x271   : > { %17836 = vst [vmem:[#allocation25_spill] sm:$0xff] %v15625_v59 }
 0x272   : > { %17835 = vst [vmem:[#allocation24_spill] sm:$0xff] %v15623_v2  ;;  %v12653_v21 = vpop.f32.mrf.mxu0  ;;  %v15627_v20 = vpop.f32.mrf.mxu1 }
 0x273   : > { %17837 = vst [vmem:[#allocation26_spill] sm:$0xff] %v15627_v20  ;;  %v12654_v12 = vadd.f32 %v12653_v21, %v12652_v27  ;;  %v13706_v27 = vld [vmem:[%s17748_s3 + $0xe0] sm:$0xff]  }
 0x274   : > { %v12655_v49 = vpop.f32.mrf.mxu0  ;;  %v13707_v21 = vld [vmem:[%s17748_s3 + $0xa0] sm:$0xff]   ;;  %12948 = vmatprep.subr.bf16.mxu0 %v13706_v27  ;;  %v13710_v27 = vld [vmem:[%s17748_s3 + $0x98] sm:$0xff]  }
 0x275   : > { %v15636_v18 = vadd.f32 %v12654_v12, %v17838_v10  ;;  %12949 = vmatpush3.bf16.msra.mxu0 %v13707_v21 }
 0x276   : > { %v12656_v11 = vpop.f32.mrf.mxu0 }
 0x277   : > { %17839 = vst [vmem:[#allocation12_spill] sm:$0xff] %v15636_v18  ;;  %v12657_v2 = vadd.f32 %v12656_v11, %v12655_v49  ;;  %v13699_v11 = vld [vmem:[%s17748_s3 + $0x48] sm:$0xff]   ;;  %v13708_v18 = vld [vmem:[%s17748_s3 + $0xd8] sm:$0xff]  }
 0x278   : > { %12842 = vmatprep.subr.bf16.mxu1 %v13699_v11  ;;  %12950 = vmatprep.subr.bf16.mxu0 %v13708_v18  ;;  %v13713_v18 = vld [vmem:[%s17748_s3 + $0x90] sm:$0xff]  }
 0x279   : > { %v15649_v59 = vadd.f32 %v12657_v2, %v15289_v45  ;;  %v13701_v2 = vld [vmem:[%s17748_s3 + $0x8] sm:$0xff]   ;;  %12951 = vmatpush3.bf16.msra.mxu0 %v13710_v27 }
 0x27a   : > { %v15638_v13 = vpop.f32.mrf.mxu1  ;;  %12843 = vmatpush3.bf16.msra.mxu1 %v13701_v2 }
 0x27b   : > { %17841 = vst [vmem:[#allocation28_spill] sm:$0xff] %v15649_v59 }
 0x27c   : > { %v15646_v20 = vpop.f32.mrf.mxu1 }
 0x27d   : > { %17840 = vst [vmem:[#allocation27_spill] sm:$0xff] %v15646_v20 }
 0x27e   : > { %v12658_v12 = vpop.f32.mrf.mxu0  ;;  %v15651_v10 = vpop.f32.mrf.mxu1 }
 0x280   : > { %v12659_v61 = vpop.f32.mrf.mxu0  ;;  %v15659_v20 = vpop.f32.mrf.mxu1 }
 0x281   : > { %v12660_v49 = vadd.f32 %v12659_v61, %v12658_v12  ;;  %17842 = vst [vmem:[#allocation29_spill] sm:$0xff] %v15659_v20 }
 0x282   : > { %v12661_v26 = vpop.f32.mrf.mxu0 }
 0x283   : > { %v15662_v45 = vadd.f32 %v12660_v49, %v15304_v14 }
 0x284   : > { %v12662_v21 = vpop.f32.mrf.mxu0 }
 0x285   : > { %17843 = vst [vmem:[#allocation30_spill] sm:$0xff] %v15662_v45  ;;  %v12663_v12 = vadd.f32 %v12662_v21, %v12661_v26  ;;  %v13712_v45 = vld [vmem:[%s17748_s3 + $0xd0] sm:$0xff]  }
 0x286   : > { %12952 = vmatprep.subr.bf16.mxu0 %v13712_v45  ;;  %v13714_v45 = vld [vmem:[%s17748_s3 + $0xc8] sm:$0xff]  }
 0x287   : > { %v15673_v59 = vadd.f32 %v12663_v12, %v15340_v62  ;;  %12953 = vmatpush3.bf16.msra.mxu0 %v13713_v18  ;;  %v13709_v12 = vld [vmem:[%s17748_s3 + $0x40] sm:$0xff]  }
 0x288   : > { %12844 = vmatprep.subr.bf16.mxu1 %v13709_v12  ;;  %12954 = vmatprep.subr.bf16.mxu0 %v13714_v45 }
 0x289   : > { %v15670_v61 = vpop.f32.mrf.mxu1  ;;  %17844 = vst [vmem:[#allocation31_spill] sm:$0xff] %v15673_v59 }
 0x28b   : > { %v15675_v14 = vpop.f32.mrf.mxu1  ;;  %v12664_v49 = vpop.f32.mrf.mxu0 }
 0x28c   : > { %17845 = vst [vmem:[#allocation32_spill] sm:$0xff] %v15675_v14 }
 0x28d   : > { %v15680_v20 = vpop.f32.mrf.mxu1  ;;  %v12665_v26 = vpop.f32.mrf.mxu0 }
 0x28e   : > { %17846 = vst [vmem:[#allocation33_spill] sm:$0xff] %v15680_v20  ;;  %v12666_v11 = vadd.f32 %v12665_v26, %v12664_v49  ;;  %v13711_v26 = vld [vmem:[%s17748_s3] sm:$0xff]  }
 0x28f   : > { %v15685_v2 = vpop.f32.mrf.mxu1  ;;  %v12667_v62 = vpop.f32.mrf.mxu0  ;;  %12845 = vmatpush3.bf16.msra.mxu1 %v13711_v26 }
 0x290   : > { %17847 = vst [vmem:[#allocation34_spill] sm:$0xff] %v15685_v2  ;;  %v15688_v27 = vadd.f32 %v12666_v11, %v15362_v0  ;;  %v13715_v0 = vld [vmem:[%s17748_s3 + $0x88] sm:$0xff]  }
 0x291   : > { %v12668_v21 = vpop.f32.mrf.mxu0  ;;  %12955 = vmatpush3.bf16.msra.mxu0 %v13715_v0 }
 0x292   : > { %17848 = vst [vmem:[#allocation35_spill] sm:$0xff] %v15688_v27  ;;  %v12669_v59 = vadd.f32 %v12668_v21, %v12667_v62 }
 0x294   : > { %v15699_v49 = vadd.f32 %v12669_v59, %v15373_v43  ;;  %v13716_v43 = vld [vmem:[%s17748_s3 + $0xc0] sm:$0xff]  }
 0x295   : > { %12956 = vmatprep.subr.bf16.mxu0 %v13716_v43 }
 0x296   : > { %v15693_v20 = vpop.f32.mrf.mxu1  ;;  %17850 = vst [vmem:[#allocation37_spill] sm:$0xff] %v15699_v49  ;;  %v13717_v49 = vld [vmem:[%s17748_s3 + $0x80] sm:$0xff]  }
 0x297   : > { %17849 = vst [vmem:[#allocation36_spill] sm:$0xff] %v15693_v20  ;;  %12957 = vmatpush3.bf16.msra.mxu0 %v13717_v49 }
 0x298   : > { %v15704_v18 = vpop.f32.mrf.mxu1  ;;  %v12670_v11 = vpop.f32.mrf.mxu0 }
 0x299   : > { %17851 = vst [vmem:[#allocation38_spill] sm:$0xff] %v15704_v18 }
 0x29a   : > { %v12671_v62 = vpop.f32.mrf.mxu0  ;;  %v15709_v21 = vpop.f32.mrf.mxu1 }
 0x29b   : > { %17852 = vst [vmem:[#allocation39_spill] sm:$0xff] %v15709_v21  ;;  %v12672_v12 = vadd.f32 %v12671_v62, %v12670_v11 }
 0x29c   : > { %v12673_v59 = vpop.f32.mrf.mxu0  ;;  %v15720_v0 = vpop.f32.mrf.mxu1 }
 0x29d   : > { %v15718_v27 = vadd.f32 %v12672_v12, %v15390_v29 }
 0x29e   : > { %v12674_v45 = vpop.f32.mrf.mxu0 }
 0x29f   : > { %17853 = vst [vmem:[#allocation40_spill] sm:$0xff] %v15718_v27  ;;  %v12675_v26 = vadd.f32 %v12674_v45, %v12673_v59 }
 0x2a1   : > { %v15723_v11 = vadd.f32 %v12675_v26, %v15401_v35 }
 0x2a2   : > { %v15725_v62 = vpop.f32.mrf.mxu1 }
 0x2a3   : > { %17854 = vst [vmem:[#allocation41_spill] sm:$0xff] %v15723_v11 }
 0x2a4   : > { %v15727_v20 = vpop.f32.mrf.mxu1 }
 0x2a5   : > { %17855 = vst [vmem:[#allocation42_spill] sm:$0xff] %v15727_v20 }
 0x2a6   : > { %v12676_v21 = vpop.f32.mrf.mxu0  ;;  %v15732_v43 = vpop.f32.mrf.mxu1 }
 0x2a8   : > { %v12677_v18 = vpop.f32.mrf.mxu0  ;;  %v15737_v35 = vpop.f32.mrf.mxu1 }
 0x2a9   : > { %v12678_v2 = vadd.f32 %v12677_v18, %v12676_v21 }
 0x2aa   : > { %v12679_v14 = vpop.f32.mrf.mxu0 }
 0x2ab   : > { %v15730_v29 = vadd.f32 %v12678_v2, %v15403_v36 }
 0x2ac   : > { %v12680_v12 = vpop.f32.mrf.mxu0 }
 0x2ad   : > { %v12681_v49 = vadd.f32 %v12680_v12, %v12679_v14  ;;  %v12712_v12 = vadd.f32 %v15461_v24, %v15455_v39  ;;  %v12727_v39 = vadd.f32 %v15519_v5, %v15517_v16  ;;  %v12730_v24 = vadd.f32 %v15529_v53, %v15524_v1 }
 0x2ae   : > { %v12742_v16 = vadd.f32 %v15560_v54, %v15558_v47 }
 0x2af   : > { %v15735_v59 = vadd.f32 %v12681_v49, %v15413_v48  ;;  %v15788_v53 = vadd.f32 %v12727_v39, %v15513_v46  ;;  %v15797_v54 = vadd.f32 %v12730_v24, %v15522_v19  ;;  %v17860_v19 = vld [vmem:[#allocation15_spill] sm:$0xff] }
 0x2b0   : > { %v15739_v27 = vpop.f32.mrf.mxu1  ;;  %v17868_v39 = vld [vmem:[#allocation19_spill] sm:$0xff] }
 0x2b2   : > { %v15744_v21 = vpop.f32.mrf.mxu1 }
 0x2b4   : > { %v12682_v45 = vpop.f32.mrf.mxu0  ;;  %v15749_v48 = vpop.f32.mrf.mxu1 }
 0x2b6   : > { %v12683_v26 = vpop.f32.mrf.mxu0  ;;  %v15753_v49 = vpop.f32.mrf.mxu1 }
 0x2b7   : > { %v12684_v11 = vadd.f32 %v12683_v26, %v12682_v45  ;;  %v12715_v45 = vadd.f32 %v15479_v9, %v15470_v34  ;;  %v12733_v34 = vadd.f32 %v15533_v17, %v15531_v41  ;;  %v12745_v41 = vadd.f32 %v15567_v56, %v15565_v32  ;;  %v17857_v32 = vld [vmem:[#allocation23_spill] sm:$0xff]  ;;  %v17858_v56 = vld [vmem:[#allocation25_spill] sm:$0xff] }
 0x2b8   : > { %v12685_v20 = vpop.f32.mrf.mxu0 }
 0x2b9   : > { %v15742_v18 = vadd.f32 %v12684_v11, %v15418_v37  ;;  %v12718_v37 = vadd.f32 %v15492_v60, %v15490_v40  ;;  %v12724_v11 = vadd.f32 %v15515_v8, %v15510_v6  ;;  %v5503_v40 = vadd.f32 %v12712_v12, %v15464_v15 }
 0x2ba   : > { %v12686_v36 = vpop.f32.mrf.mxu0  ;;  %v12736_v60 = vadd.f32 %v15543_v51, %v15538_v33  ;;  %v15779_v8 = vadd.f32 %v12715_v45, %v15477_v28  ;;  %v12751_v28 = vadd.f32 %v15581_v23, %v15579_v42  ;;  %v17856_v33 = vld [vmem:[#allocation14_spill] sm:$0xff]  ;;  %v17861_v23 = vld [vmem:[#allocation16_spill] sm:$0xff] }
 0x2bb   : > { %v12687_v2 = vadd.f32 %v12686_v36, %v12685_v20  ;;  %v13727_v20 = vld [vmem:[%s17748_s3 + $0x178] sm:$0xff]   ;;  %v5511_v6 = vadd.f32 %v12718_v37, %v15486_v38  ;;  %v15785_v15 = vadd.f32 %v12724_v11, %v15508_v55  ;;  %v12748_v38 = vadd.f32 %v15577_v50, %v15572_v22  ;;  %v17864_v36 = vld [vmem:[#allocation11_spill] sm:$0xff] }
 0x2bc   : > { %13054 = vmatprep.subr.bf16.mxu1 %v13727_v20  ;;  %v12757_v55 = vadd.f32 %v15604_v7, %v15593_v31  ;;  %v15804_v51 = vadd.f32 %v12733_v34, %v17856_v33  ;;  %v12760_v22 = vadd.f32 %v17857_v32, %v15615_v4  ;;  %v15811_v42 = vadd.f32 %v12736_v60, %v17860_v19  ;;  %v17862_v31 = vld [vmem:[#allocation27_spill] sm:$0xff]  ;;  %v17863_v7 = vld [vmem:[#allocation29_spill] sm:$0xff]  ;;  %v17866_v45 = vld [vmem:[#allocation32_spill] sm:$0xff] }
 0x2bd   : > { %v15747_v14 = vadd.f32 %v12687_v2, %v15429_v30  ;;  %v12721_v30 = vadd.f32 %v15505_v57, %v15497_v52  ;;  %v12739_v52 = vadd.f32 %v15553_v3, %v15551_v63  ;;  %v17859_v63 = vld [vmem:[#allocation26_spill] sm:$0xff]  ;;  %v12769_v26 = vadd.f32 %v17863_v7, %v15651_v10  ;;  %v17865_v4 = vld [vmem:[#allocation17_spill] sm:$0xff] }
 0x2be   : > { %v12763_v3 = vadd.f32 %v17859_v63, %v17858_v56  ;;  %v15824_v12 = vadd.f32 %v12742_v16, %v17865_v4  ;;  %v12772_v37 = vadd.f32 %v17866_v45, %v15670_v61  ;;  %v15832_v24 = vadd.f32 %v12748_v38, %v17868_v39  ;;  %v17870_v10 = vld [vmem:[#allocation33_spill] sm:$0xff]  ;;  %v17871_v60 = vld [vmem:[#allocation34_spill] sm:$0xff]  ;;  %v17874_v61 = vld [vmem:[#allocation36_spill] sm:$0xff] }
 0x2bf   : > { %v5514_v1 = vadd.f32 %v12721_v30, %v15495_v58  ;;  %v12754_v58 = vadd.f32 %v15591_v44, %v15586_v25  ;;  %v15814_v25 = vadd.f32 %v12739_v52, %v17861_v23  ;;  %v12766_v44 = vadd.f32 %v17862_v31, %v15638_v13  ;;  %v17867_v30 = vld [vmem:[#allocation18_spill] sm:$0xff]  ;;  %v17869_v13 = vld [vmem:[#allocation20_spill] sm:$0xff]  ;;  %v17876_v56 = vld [vmem:[#allocation39_spill] sm:$0xff] }
 0x2c0   : > { %v15829_v11 = vadd.f32 %v12745_v41, %v17867_v30  ;;  %v15835_v34 = vadd.f32 %v12751_v28, %v17869_v13  ;;  %v12775_v52 = vadd.f32 %v17871_v60, %v17870_v10  ;;  %v17875_v32 = vld [vmem:[#allocation38_spill] sm:$0xff]  ;;  %v12781_v38 = vadd.f32 %v15720_v0, %v17876_v56  ;;  %v17877_v28 = vld [vmem:[#allocation13_spill] sm:$0xff]  ;;  %v17878_v31 = vld [vmem:[#allocation24_spill] sm:$0xff] }
 0x2c1   : > { %v12778_v41 = vadd.f32 %v17875_v32, %v17874_v61  ;;  %v15850_v23 = vadd.f32 %v12760_v22, %v17877_v28  ;;  %v15853_v7 = vadd.f32 %v12763_v3, %v17878_v31  ;;  %v17881_v45 = vld [vmem:[#allocation28_spill] sm:$0xff]  ;;  %v17882_v0 = vld [vmem:[#allocation42_spill] sm:$0xff]  ;;  %v12787_v22 = vadd.f32 %v15737_v35, %v15732_v43  ;;  %v17884_v60 = vld [vmem:[#allocation31_spill] sm:$0xff] }
 0x2c2   : > { %v12784_v30 = vadd.f32 %v17882_v0, %v15725_v62  ;;  %v12790_v3 = vadd.f32 %v15744_v21, %v15739_v27  ;;  %v17883_v13 = vld [vmem:[#allocation30_spill] sm:$0xff]  ;;  %v17885_v43 = vld [vmem:[#allocation35_spill] sm:$0xff]  ;;  %v17886_v27 = vld [vmem:[#allocation37_spill] sm:$0xff] }
 0x2c3   : > { %v15871_v10 = vadd.f32 %v12772_v37, %v17883_v13  ;;  %v15879_v35 = vadd.f32 %v12778_v41, %v17885_v43  ;;  %v15882_v21 = vadd.f32 %v12781_v38, %v17886_v27  ;;  %v6302_v43 = vld [vmem:[#allocation2 + $0xc] sm:$0xf] }
 0x2cd   : > { %v12794_v9 = vpop.f32.mrf.mxu1 }
 0x2cf   : > { %v12688_v57 = vpop.f32.mrf.mxu0  ;;  %v12795_v5 = vpop.f32.mrf.mxu1 }
 0x2d0   : > { %v12796_v62 = vadd.f32 %v12795_v5, %v12794_v9  ;;  %v17888_v9 = vld [vmem:[#allocation41_spill] sm:$0xff] }
 0x2d1   : > { %v12689_v17 = vpop.f32.mrf.mxu0  ;;  %v12797_v47 = vpop.f32.mrf.mxu1  ;;  %v15891_v5 = vadd.f32 %v12787_v22, %v17888_v9 }
 0x2d2   : > { %v12690_v46 = vadd.f32 %v12689_v17, %v12688_v57  ;;  %v17872_v17 = vld [vmem:[#allocation21_spill] sm:$0xff]  ;;  %v15901_v22 = vadd.f32 %v12796_v62, %v15742_v18 }
 0x2d3   : > { %v12691_v50 = vpop.f32.mrf.mxu0  ;;  %v15840_v16 = vadd.f32 %v12754_v58, %v17872_v17  ;;  %v12798_v63 = vpop.f32.mrf.mxu1 }
 0x2d4   : > { %v15821_v2 = vadd.f32 %v12690_v46, %v17864_v36  ;;  %v17873_v46 = vld [vmem:[#allocation22_spill] sm:$0xff] }
 0x2d5   : > { %v12692_v20 = vpop.f32.mrf.mxu0  ;;  %v15843_v33 = vadd.f32 %v12757_v55, %v17873_v46  ;;  %v17880_v55 = vld [vmem:[#allocation12_spill] sm:$0xff] }
 0x2d6   : > { %v12693_v57 = vadd.f32 %v12692_v20, %v12691_v50  ;;  %v17879_v50 = vld [vmem:[#allocation10_spill] sm:$0xff]  ;;  %v15859_v4 = vadd.f32 %v12766_v44, %v17880_v55  ;;  %v15862_v20 = vadd.f32 %v12769_v26, %v17881_v45  ;;  %v12793_v26 = vadd.f32 %v15753_v49, %v15749_v48  ;;  %v17887_v48 = vld [vmem:[#allocation40_spill] sm:$0xff] }
 0x2d7   : > { %v13320_v19 = vpop.f32.mrf.mxu0  ;;  %v15888_v49 = vadd.f32 %v12784_v30, %v17887_v48 }
 0x2d8   : > { %v15856_v58 = vadd.f32 %v12693_v57, %v17879_v50  ;;  %v5672_v36 = vadd.f32 %v13320_v19, %v5511_v6  ;;  %v15874_v57 = vadd.f32 %v12775_v52, %v17884_v60  ;;  %v15885_v19 = vadd.f32 %v12790_v3, %v15730_v29 }
 0x2d9   : > { %v5663_v39 = vpop.f32.mrf.mxu0  ;;  %v15895_v45 = vadd.f32 %v12793_v26, %v15735_v59  ;;  %v15897_v29 = vadd.f32 %v12798_v63, %v12797_v47 }
 0x2da   : > { %vm5792_vm15 = vcmp.ge.f32.partialorder %v5672_v36, 0.0  ;;  %v5824_v6 = vmul.f32 0.01, %v5672_v36  ;;  %v5664_v44 = vadd.f32 %v5663_v39, %v5503_v40  ;;  %v12800_v17 = vpop.f32.mrf.mxu1 }
 0x2db   : > { %v13321_v46 = vpop.f32.mrf.mxu0 }
 0x2dc   : > { %v5856_v37 = vsel %vm5792_vm15, %v5672_v36, %v5824_v6  ;;  %vm5790_vm0 = vcmp.ge.f32.partialorder %v5664_v44, 0.0  ;;  %v5822_v61 = vmul.f32 0.01, %v5664_v44  ;;  %v5675_v32 = vadd.f32 %v13321_v46, %v5514_v1  ;;  %v12801_v40 = vpop.f32.mrf.mxu1  ;;  %v6309_v6 = vld [vmem:[#allocation2 + $0x18] sm:$0xf] }
 0x2dd   : > { %v12328_v56 = vpack.c.bf16 %v5856_v37, %v5856_v37  ;;  %v5666_v52 = vpop.f32.mrf.mxu0  ;;  %v12802_v41 = vadd.f32 %v12801_v40, %v12800_v17 }
 0x2de   : > { %v5854_v28 = vsel %vm5790_vm0, %v5664_v44, %v5822_v61  ;;  %vm5793_vm1 = vcmp.ge.f32.partialorder %v5675_v32, 0.0  ;;  %v5825_v38 = vmul.f32 0.01, %v5675_v32  ;;  %v12803_v31 = vpop.f32.mrf.mxu1  ;;  %v5667_v1 = vadd.f32 %v5666_v52, %v15779_v8  ;;  %v6414_v8 = vld [vmem:[#allocation2] sm:$0xf] }
 0x2df   : > { %v6000_v50 = vshrl.u32 %v12328_v56, 16  ;;  %v12326_v36 = vpack.c.bf16 %v5854_v28, %v5854_v28  ;;  %v13324_v55 = vpop.f32.mrf.mxu0  ;;  %v6003_v13 = vshll.u32 %v12328_v56, 16  ;;  %v15904_v47 = vadd.f32 %v12802_v41, %v15821_v2 }
 0x2e0   : > { %v5857_v0 = vsel %vm5793_vm1, %v5675_v32, %v5825_v38  ;;  %v5688_v30 = vadd.f32 %v13324_v55, %v15797_v54  ;;  %v12804_v3 = vpop.f32.mrf.mxu1  ;;  %vm5791_vm2 = vcmp.ge.f32.partialorder %v5667_v1, 0.0  ;;  %v5823_v59 = vmul.f32 0.01, %v5667_v1  ;;  %v6313_v38 = vld [vmem:[#allocation2 + $0x20] sm:$0x1] }
 0x2e1   : > { %v6002_v39 = vrot.slane %v6000_v50, 7  ;;  %v5983_v44 = vshrl.u32 %v12326_v36, 16  ;;  %v12329_v60 = vpack.c.bf16 %v5857_v0, %v5857_v0  ;;  %v5679_v17 = vpop.f32.mrf.mxu0  ;;  %v5986_v46 = vshll.u32 %v12326_v36, 16 }
 0x2e2   : > { %vm5796_vm3 = vcmp.ge.f32.partialorder %v5688_v30, 0.0  ;;  %v15908_v62 = vadd.f32 %v12804_v3, %v12803_v31  ;;  %v5855_v27 = vsel %vm5791_vm2, %v5667_v1, %v5823_v59  ;;  %v5828_v37 = vmul.f32 0.01, %v5688_v30  ;;  %v6418_v31 = vld [vmem:[#allocation2 + $0x8] sm:$0x1]  ;;  %v13802_v59 = vld [vmem:[%s17748_s3 + $0x110] sm:$0xff]  }
 0x2e3   : > { %v6005_v63 = vor.u32 %v6003_v13, %v6002_v39  ;;  %v15906_v26 = vrot.slane %v5983_v44, 7  ;;  %v6008_v54 = vshrl.u32 %v12329_v60, 16  ;;  %v13325_v18 = vpop.f32.mrf.mxu0  ;;  %v5680_v61 = vadd.f32 %v5679_v17, %v15785_v15 }
 0x2e4   : > { %v6011_v52 = vshll.u32 %v12329_v60, 16  ;;  %v12327_v41 = vpack.c.bf16 %v5855_v27, %v5855_v27  ;;  %v5860_v28 = vsel %vm5796_vm3, %v5688_v30, %v5828_v37  ;;  %v5691_v1 = vadd.f32 %v13325_v18, %v15804_v51 }
 0x2e5   : > { %v6310_v40 = vsel %vm14140_vm7, %v6005_v63, %v6309_v6  ;;  %v6415_v2 = vsel %vm14140_vm7, %v6005_v63, %v6414_v8  ;;  %v5988_v56 = vor.u32 %v5986_v46, %v15906_v26  ;;  %v5682_v48 = vpop.f32.mrf.mxu0  ;;  %v6010_v9 = vrot.slane %v6008_v54, 7 }
 0x2e6   : > { %6311 = vst [vmem:[#allocation2 + $0x18] sm:$0xf] %v6310_v40  ;;  %6416 = vst [vmem:[#allocation2] sm:$0xf] %v6415_v2  ;;  %vm5794_vm6 = vcmp.ge.f32.partialorder %v5680_v61, 0.0  ;;  %v12332_v50 = vpack.c.bf16 %v5860_v28, %v5860_v28  ;;  %v6006_v0 = vrot.slane %v6002_v39, 4 }
 0x2e7   : > { %v6303_v15 = vsel %vm14140_vm7, %v5988_v56, %v6302_v43  ;;  %v5826_v36 = vmul.f32 0.01, %v5680_v61  ;;  %v13328_v55 = vpop.f32.mrf.mxu0  ;;  %v6013_v3 = vor.u32 %v6011_v52, %v6010_v9  ;;  %v6015_v13 = vrot.slane %v6010_v9, 4  ;;  %v6306_v39 = vld [vmem:[#allocation2 + $0x14] sm:$0x1] }
 0x2e8   : > { %6304 = vst [vmem:[#allocation2 + $0xc] sm:$0xf] %v6303_v15  ;;  %v5991_v6 = vshrl.u32 %v12327_v41, 16  ;;  %v5994_v44 = vshll.u32 %v12327_v41, 16  ;;  %v6034_v60 = vshrl.u32 %v12332_v50, 16  ;;  %vm5797_vm8 = vcmp.ge.f32.partialorder %v5691_v1, 0.0 }
 0x2e9   : > { %v5858_v17 = vsel %vm5794_vm6, %v5680_v61, %v5826_v36  ;;  %v5695_v30 = vpop.f32.mrf.mxu0  ;;  %v6014_v46 = vsel %vm14131_vm5, %v6006_v0, %v6013_v3  ;;  %v6314_v63 = vsel %vm14124_vm4, %v6015_v13, %v6313_v38  ;;  %v6419_v51 = vsel %vm14124_vm4, %v6015_v13, %v6418_v31  ;;  %v6323_v52 = vld [vmem:[#allocation2 + $0x30] sm:$0xf] }
 0x2ea   : > { %v5993_v54 = vrot.slane %v5991_v6, 7  ;;  %6312 = vst [vmem:[#allocation2 + $0x1c] sm:$0xf] %v6014_v46  ;;  %6315 = vst [vmem:[#allocation2 + $0x20] sm:$0x1] %v6314_v63  ;;  %v15926_v18 = vrot.slane %v6034_v60, 7  ;;  %v12330_v27 = vpack.c.bf16 %v5858_v17, %v5858_v17  ;;  %v15930_v9 = vadd.f32 %v5682_v48, %v15788_v53 }
 0x2eb   : > { %6417 = vst [vmem:[#allocation2 + $0x4] sm:$0xf] %v6014_v46  ;;  %6420 = vst [vmem:[#allocation2 + $0x8] sm:$0x1] %v6419_v51  ;;  %v6037_v43 = vshll.u32 %v12332_v50, 16  ;;  %v13329_v61 = vpop.f32.mrf.mxu0  ;;  %v5989_v40 = vrot.slane %v15906_v26, 4  ;;  %v15935_v31 = vadd.f32 %v13328_v55, %v15824_v12  ;;  %v15938_v50 = vadd.f32 %v5695_v30, %v15811_v42 }
 0x2ec   : > { %v5829_v37 = vmul.f32 0.01, %v5691_v1  ;;  %v5996_v2 = vor.u32 %v5994_v44, %v5993_v54  ;;  %v5998_v56 = vrot.slane %v5993_v54, 4  ;;  %v15947_v55 = vadd.f32 %v13329_v61, %v15829_v11  ;;  %v6316_v63 = vld [vmem:[#allocation2 + $0x24] sm:$0xf] }
 0x2ed   : > { %v6428_v41 = vld [vmem:[#allocation2] sm:$0x2]  ;;  %v6430_v28 = vld [vmem:[#allocation2 + $0x18] sm:$0x2]  ;;  %v6039_v15 = vor.u32 %v6037_v43, %v15926_v18  ;;  %v5698_v36 = vpop.f32.mrf.mxu0  ;;  %v6518_v3 = vld [vmem:[#allocation2] sm:$0x1] }
 0x2ee   : > { %v5861_v38 = vsel %vm5797_vm8, %v5691_v1, %v5829_v37  ;;  %v12021_v26 = vrot.slane %v6428_v41, 9  ;;  %v12023_v0 = vrot.slane %v6430_v28, 9  ;;  %v5997_v53 = vsel %vm14131_vm5, %v5989_v40, %v5996_v2  ;;  %v6524_v13 = vld [vmem:[#allocation2 + $0x18] sm:$0x1] }
 0x2ef   : > { %v6307_v48 = vsel %vm14124_vm4, %v5998_v56, %v6306_v39  ;;  %v6429_v6 = vld [vmem:[#allocation2 + $0xc] sm:$0x2]  ;;  %6305 = vst [vmem:[#allocation2 + $0x10] sm:$0xf] %v5997_v53  ;;  %v6324_v12 = vsel %vm14140_vm7, %v6039_v15, %v6323_v52  ;;  %v6017_v1 = vshrl.u32 %v12330_v27, 16  ;;  %v12333_v42 = vpack.c.bf16 %v5861_v38, %v5861_v38  ;;  %v13332_v44 = vpop.f32.mrf.mxu0 }
 0x2f0   : > { %6308 = vst [vmem:[#allocation2 + $0x14] sm:$0x1] %v6307_v48  ;;  %v6519_v60 = vsel %vm14124_vm4, %v12021_v26, %v6518_v3  ;;  %v6525_v17 = vsel %vm14124_vm4, %v12023_v0, %v6524_v13  ;;  %v12022_v30 = vrot.slane %v6429_v6, 9  ;;  %v6040_v46 = vrot.slane %v15926_v18, 4  ;;  %6325 = vst [vmem:[#allocation2 + $0x30] sm:$0xf] %v6324_v12 }
 0x2f1   : > { %6520 = vst [vmem:[#allocation2] sm:$0x1] %v6519_v60  ;;  %6526 = vst [vmem:[#allocation2 + $0x18] sm:$0x1] %v6525_v17  ;;  %v6521_v51 = vld [vmem:[#allocation2 + $0xc] sm:$0x1]  ;;  %v5711_v37 = vpop.f32.mrf.mxu0  ;;  %v15960_v18 = vadd.f32 %v5698_v36, %v15814_v25  ;;  %v15963_v56 = vadd.f32 %v13332_v44, %v15840_v16 }
 0x2f2   : > { %v15954_v54 = vrot.slane %v6017_v1, 7  ;;  %v6020_v39 = vshll.u32 %v12330_v27, 16  ;;  %v6042_v11 = vshrl.u32 %v12333_v42, 16  ;;  %v6045_v43 = vshll.u32 %v12333_v42, 16  ;;  %v6572_v40 = vld [vmem:[#allocation2 + $0x4] sm:$0x8] }
 0x2f3   : > { %v6522_v61 = vsel %vm14124_vm4, %v12022_v30, %v6521_v51  ;;  %v6574_v2 = vld [vmem:[#allocation2 + $0x1c] sm:$0x8]  ;;  %vm5795_vm9 = vcmp.ge.f32.partialorder %v15930_v9, 0.0  ;;  %v12039_v52 = vrot.slane %v6572_v40, 11  ;;  %v6662_v27 = vld [vmem:[#allocation2 + $0x8] sm:$0x1]  ;;  %v15967_v38 = vadd.f32 %v5711_v37, %v15832_v24  ;;  %v15969_v26 = vpop.f32.mrf.mxu0 }
 0x2f4   : > { %6523 = vst [vmem:[#allocation2 + $0xc] sm:$0x1] %v6522_v61  ;;  %v12041_v41 = vrot.slane %v6574_v2, 11  ;;  %v6668_v28 = vld [vmem:[#allocation2 + $0x20] sm:$0x1]  ;;  %v6022_v15 = vor.u32 %v6020_v39, %v15954_v54  ;;  %v6044_v0 = vrot.slane %v6042_v11, 7 }
 0x2f5   : > { %v5827_v3 = vmul.f32 0.01, %v15930_v9  ;;  %vm5800_vm11 = vcmp.ge.f32.partialorder %v15935_v31, 0.0  ;;  %v5832_v25 = vmul.f32 0.01, %v15935_v31  ;;  %v6663_v36 = vsel %vm14167_vm10, %v12039_v52, %v6662_v27  ;;  %v15987_v30 = vpop.f32.mrf.mxu0 }
 0x2f6   : > { %v6669_v53 = vsel %vm14167_vm10, %v12041_v41, %v6668_v28  ;;  %v6023_v48 = vrot.slane %v15954_v54, 4  ;;  %v6317_v24 = vsel %vm14140_vm7, %v6022_v15, %v6316_v63  ;;  %v6327_v13 = vld [vmem:[#allocation2 + $0x38] sm:$0x1]  ;;  %v6717_v6 = vld [vmem:[#allocation2 + $0x4] sm:$0xf]  ;;  %v6047_v42 = vor.u32 %v6045_v43, %v6044_v0 }
 0x2f7   : > { %6664 = vst [vmem:[#allocation2 + $0x8] sm:$0x1] %v6663_v36  ;;  %6670 = vst [vmem:[#allocation2 + $0x20] sm:$0x1] %v6669_v53  ;;  %v6573_v12 = vld [vmem:[#allocation2 + $0x10] sm:$0x8]  ;;  %v5859_v60 = vsel %vm5795_vm9, %v15930_v9, %v5827_v3  ;;  %v5864_v17 = vsel %vm5800_vm11, %v15935_v31, %v5832_v25  ;;  %v16004_v3 = vpop.f32.mrf.mxu0 }
 0x2f8   : > { %v6665_v1 = vld [vmem:[#allocation2 + $0x14] sm:$0x1]  ;;  %6318 = vst [vmem:[#allocation2 + $0x24] sm:$0xf] %v6317_v24  ;;  %v6049_v44 = vrot.slane %v6044_v0, 4  ;;  %v12040_v63 = vrot.slane %v6573_v12, 11  ;;  %v12331_v11 = vpack.c.bf16 %v5859_v60, %v5859_v60  ;;  %v12336_v37 = vpack.c.bf16 %v5864_v17, %v5864_v17 }
 0x2f9   : > { %6749 = vst [vmem:[#allocation3 + $0x24] sm:$0xf] %v6717_v6  ;;  %v6432_v51 = vld [vmem:[#allocation2 + $0x30] sm:$0x2]  ;;  %v6530_v39 = vld [vmem:[#allocation2 + $0x30] sm:$0x1]  ;;  %v6048_v61 = vsel %vm14131_vm5, %v6040_v46, %v6047_v42 }
 0x2fa   : > { %vm5798_vm12 = vcmp.ge.f32.partialorder %v15938_v50, 0.0  ;;  %v12025_v43 = vrot.slane %v6432_v51, 9  ;;  %v6328_v9 = vsel %vm14124_vm4, %v6049_v44, %v6327_v13  ;;  %v5830_v40 = vmul.f32 0.01, %v15938_v50  ;;  %v7549_v31 = vld [vmem:[#allocation2 + $0x10] sm:$0xf] }
 0x2fb   : > { %v6666_v2 = vsel %vm14167_vm10, %v12040_v63, %v6665_v1  ;;  %6326 = vst [vmem:[#allocation2 + $0x34] sm:$0xf] %v6048_v61  ;;  %6329 = vst [vmem:[#allocation2 + $0x38] sm:$0x1] %v6328_v9  ;;  %v6025_v52 = vshrl.u32 %v12331_v11, 16  ;;  %v6068_v41 = vshrl.u32 %v12336_v37, 16 }
 0x2fc   : > { %vm5801_vm15 = vcmp.ge.f32.partialorder %v15947_v55, 0.0  ;;  %7581 = vst [vmem:[#allocation3 + $0x30] sm:$0xf] %v7549_v31  ;;  %v6716_v27 = vld [vmem:[#allocation2] sm:$0xf]  ;;  %v6531_v46 = vsel %vm14124_vm4, %v12025_v43, %v6530_v39  ;;  %v6028_v28 = vshll.u32 %v12331_v11, 16  ;;  %v5862_v15 = vsel %vm5798_vm12, %v15938_v50, %v5830_v40  ;;  %v5727_v43 = vpop.f32.mrf.mxu0 }
 0x2fd   : > { %6667 = vst [vmem:[#allocation2 + $0x14] sm:$0x1] %v6666_v2  ;;  %v5833_v0 = vmul.f32 0.01, %v15947_v55  ;;  %v7548_v25 = vld [vmem:[#allocation2 + $0xc] sm:$0xf]  ;;  %v12334_v6 = vpack.c.bf16 %v5862_v15, %v5862_v15 }
 0x2fe   : > { %6748 = vst [vmem:[#allocation3] sm:$0xf] %v6716_v27  ;;  %6532 = vst [vmem:[#allocation2 + $0x30] sm:$0x1] %v6531_v46  ;;  %v6027_v36 = vrot.slane %v6025_v52, 7  ;;  %v16006_v24 = vrot.slane %v6068_v41, 7 }
 0x2ff   : > { %v6320_v53 = vld [vmem:[#allocation2 + $0x2c] sm:$0x1]  ;;  %v6071_v13 = vshll.u32 %v12336_v37, 16  ;;  %7580 = vst [vmem:[#allocation3 + $0xc] sm:$0xf] %v7548_v25  ;;  %v5865_v1 = vsel %vm5801_vm15, %v15947_v55, %v5833_v0  ;;  %vm5799_vm0 = vcmp.ge.f32.partialorder %v15960_v18, 0.0 }
 0x300   : > { %v6337_v12 = vld [vmem:[#allocation2 + $0x48] sm:$0xf]  ;;  %v5831_v50 = vmul.f32 0.01, %v15960_v18  ;;  %vm5804_vm1 = vcmp.ge.f32.partialorder %v15963_v56, 0.0  ;;  %v6030_v44 = vor.u32 %v6028_v28, %v6027_v36  ;;  %v6032_v60 = vrot.slane %v6027_v36, 4 }
 0x301   : > { %v6431_v42 = vld [vmem:[#allocation2 + $0x24] sm:$0x2]  ;;  %v6073_v17 = vor.u32 %v6071_v13, %v16006_v24  ;;  %v5836_v63 = vmul.f32 0.01, %v15963_v56  ;;  %v6051_v39 = vshrl.u32 %v12334_v6, 16  ;;  %v6054_v11 = vshll.u32 %v12334_v6, 16  ;;  %v16034_v6 = vpop.f32.mrf.mxu0 }
 0x302   : > { %v12024_v51 = vrot.slane %v6431_v42, 9  ;;  %v12337_v37 = vpack.c.bf16 %v5865_v1, %v5865_v1  ;;  %v6527_v61 = vld [vmem:[#allocation2 + $0x24] sm:$0x1]  ;;  %v6031_v55 = vsel %vm14131_vm5, %v6023_v48, %v6030_v44  ;;  %v6321_v9 = vsel %vm14124_vm4, %v6032_v60, %v6320_v53  ;;  %v6576_v52 = vld [vmem:[#allocation2 + $0x34] sm:$0x8] }
 0x303   : > { %v6338_v40 = vsel %vm14140_vm7, %v6073_v17, %v6337_v12  ;;  %v5863_v31 = vsel %vm5799_vm0, %v15960_v18, %v5831_v50  ;;  %6319 = vst [vmem:[#allocation2 + $0x28] sm:$0xf] %v6031_v55  ;;  %6322 = vst [vmem:[#allocation2 + $0x2c] sm:$0x1] %v6321_v9  ;;  %v6053_v54 = vrot.slane %v6051_v39, 7  ;;  %v12043_v46 = vrot.slane %v6576_v52, 11 }
 0x304   : > { %v6528_v2 = vsel %vm14124_vm4, %v12024_v51, %v6527_v61  ;;  %6339 = vst [vmem:[#allocation2 + $0x48] sm:$0xf] %v6338_v40  ;;  %v6330_v41 = vld [vmem:[#allocation2 + $0x3c] sm:$0xf]  ;;  %v6076_v48 = vshrl.u32 %v12337_v37, 16  ;;  %v12335_v27 = vpack.c.bf16 %v5863_v31, %v5863_v31  ;;  %v6074_v15 = vrot.slane %v16006_v24, 4 }
 0x305   : > { %6529 = vst [vmem:[#allocation2 + $0x24] sm:$0x1] %v6528_v2  ;;  %v6674_v28 = vld [vmem:[#allocation2 + $0x38] sm:$0x1]  ;;  %v6079_v0 = vshll.u32 %v12337_v37, 16  ;;  %v5868_v18 = vsel %vm5804_vm1, %v15963_v56, %v5836_v63  ;;  %v6056_v36 = vor.u32 %v6054_v11, %v6053_v54  ;;  %vm5802_vm2 = vcmp.ge.f32.partialorder %v15967_v38, 0.0 }
 0x306   : > { %v6341_v25 = vld [vmem:[#allocation2 + $0x50] sm:$0x1]  ;;  %v6078_v53 = vrot.slane %v6076_v48, 7  ;;  %v6059_v13 = vshrl.u32 %v12335_v27, 16  ;;  %v7550_v12 = vld [vmem:[#allocation2 + $0x18] sm:$0xf]  ;;  %v6675_v1 = vsel %vm14167_vm10, %v12043_v46, %v6674_v28  ;;  %v12340_v42 = vpack.c.bf16 %v5868_v18, %v5868_v18 }
 0x307   : > { %v6062_v50 = vshll.u32 %v12335_v27, 16  ;;  %v5834_v24 = vmul.f32 0.01, %v15967_v38  ;;  %v7551_v44 = vld [vmem:[#allocation2 + $0x1c] sm:$0xf]  ;;  %v6331_v56 = vsel %vm14140_vm7, %v6056_v36, %v6330_v41  ;;  %v6057_v11 = vrot.slane %v6053_v54, 4  ;;  %v16050_v54 = vpop.f32.mrf.mxu0 }
 0x308   : > { %7582 = vst [vmem:[#allocation3 + $0x54] sm:$0xf] %v7550_v12  ;;  %6676 = vst [vmem:[#allocation2 + $0x38] sm:$0x1] %v6675_v1  ;;  %v6081_v60 = vor.u32 %v6079_v0, %v6078_v53  ;;  %v6083_v17 = vrot.slane %v6078_v53, 4  ;;  %v6061_v63 = vrot.slane %v6059_v13, 7  ;;  %v5723_v9 = vadd.f32 %v15969_v26, %v15843_v33 }
 0x309   : > { %7583 = vst [vmem:[#allocation3 + $0x78] sm:$0xf] %v7551_v44  ;;  %v6718_v51 = vld [vmem:[#allocation2 + $0xc] sm:$0xf]  ;;  %v6719_v39 = vld [vmem:[#allocation2 + $0x10] sm:$0xf]  ;;  %v5866_v55 = vsel %vm5802_vm2, %v15967_v38, %v5834_v24  ;;  %v5715_v33 = vadd.f32 %v15987_v30, %v15835_v34  ;;  %v16056_v26 = vadd.f32 %v16004_v3, %v15859_v4  ;;  %v16059_v27 = vadd.f32 %v5727_v43, %v15850_v23  ;;  %v13340_v1 = vpop.f32.mrf.mxu0 }
 0x30a   : > { %6332 = vst [vmem:[#allocation2 + $0x3c] sm:$0xf] %v6331_v56  ;;  %v6334_v37 = vld [vmem:[#allocation2 + $0x44] sm:$0x1]  ;;  %v6102_v61 = vshrl.u32 %v12340_v42, 16  ;;  %v6082_v40 = vsel %vm14131_vm5, %v6074_v15, %v6081_v60  ;;  %v6342_v31 = vsel %vm14124_vm4, %v6083_v17, %v6341_v25  ;;  %v6064_v2 = vor.u32 %v6062_v50, %v6061_v63 }
 0x30b   : > { %6750 = vst [vmem:[#allocation3 + $0x48] sm:$0xf] %v6718_v51  ;;  %6751 = vst [vmem:[#allocation3 + $0x6c] sm:$0xf] %v6719_v39  ;;  %v6066_v52 = vrot.slane %v6061_v63, 4  ;;  %v12338_v38 = vpack.c.bf16 %v5866_v55, %v5866_v55  ;;  %v6105_v4 = vshll.u32 %v12340_v42, 16 }
 0x30c   : > { %v6575_v41 = vld [vmem:[#allocation2 + $0x28] sm:$0x8]  ;;  %v6434_v48 = vld [vmem:[#allocation2 + $0x48] sm:$0x2]  ;;  %6340 = vst [vmem:[#allocation2 + $0x4c] sm:$0xf] %v6082_v40  ;;  %v6065_v25 = vsel %vm14131_vm5, %v6057_v11, %v6064_v2 }
 0x30d   : > { %6343 = vst [vmem:[#allocation2 + $0x50] sm:$0x1] %v6342_v31  ;;  %v12042_v46 = vrot.slane %v6575_v41, 11  ;;  %v6671_v28 = vld [vmem:[#allocation2 + $0x2c] sm:$0x1]  ;;  %v12027_v15 = vrot.slane %v6434_v48, 9  ;;  %v6335_v18 = vsel %vm14124_vm4, %v6066_v52, %v6334_v37  ;;  %v16086_v41 = vpop.f32.mrf.mxu0 }
 0x30e   : > { %v6536_v0 = vld [vmem:[#allocation2 + $0x48] sm:$0x1]  ;;  %v6351_v36 = vld [vmem:[#allocation2 + $0x60] sm:$0xf]  ;;  %6333 = vst [vmem:[#allocation2 + $0x40] sm:$0xf] %v6065_v25  ;;  %v16097_v25 = vadd.f32 %v16050_v54, %v15853_v7 }
 0x30f   : > { %6336 = vst [vmem:[#allocation2 + $0x44] sm:$0x1] %v6335_v18  ;;  %v16065_v34 = vrot.slane %v6102_v61, 7  ;;  %v6085_v30 = vshrl.u32 %v12338_v38, 16  ;;  %vm5805_vm3 = vcmp.ge.f32.partialorder %v5723_v9, 0.0  ;;  %v6672_v3 = vsel %vm14167_vm10, %v12042_v46, %v6671_v28 }
 0x310   : > { %v7552_v23 = vld [vmem:[#allocation2 + $0x24] sm:$0xf]  ;;  %v6537_v43 = vsel %vm14124_vm4, %v12027_v15, %v6536_v0  ;;  %v6088_v53 = vshll.u32 %v12338_v38, 16  ;;  %v6344_v13 = vld [vmem:[#allocation2 + $0x54] sm:$0xf]  ;;  %vm5803_vm6 = vcmp.ge.f32.partialorder %v5715_v33, 0.0  ;;  %v5739_v61 = vadd.f32 %v16034_v6, %v15862_v20 }
 0x311   : > { %v5837_v12 = vmul.f32 0.01, %v5723_v9  ;;  %v7553_v50 = vld [vmem:[#allocation2 + $0x28] sm:$0xf]  ;;  %7584 = vst [vmem:[#allocation3 + $0x9c] sm:$0xf] %v7552_v23  ;;  %v6107_v24 = vor.u32 %v6105_v4, %v16065_v34  ;;  %v16102_v23 = vadd.f32 %v13340_v1, %v15879_v35 }
 0x312   : > { %6673 = vst [vmem:[#allocation2 + $0x2c] sm:$0x1] %v6672_v3  ;;  %6538 = vst [vmem:[#allocation2 + $0x48] sm:$0x1] %v6537_v43  ;;  %v16072_v42 = vrot.slane %v6085_v30, 7  ;;  %v6108_v17 = vrot.slane %v16065_v34, 4 }
 0x313   : > { %v5835_v44 = vmul.f32 0.01, %v5715_v33  ;;  %7585 = vst [vmem:[#allocation3 + $0xc0] sm:$0xf] %v7553_v50  ;;  %v6720_v56 = vld [vmem:[#allocation2 + $0x18] sm:$0xf]  ;;  %v5869_v63 = vsel %vm5805_vm3, %v5723_v9, %v5837_v12  ;;  %v6352_v11 = vsel %vm14140_vm7, %v6107_v24, %v6351_v36 }
 0x314   : > { %v6433_v60 = vld [vmem:[#allocation2 + $0x3c] sm:$0x2]  ;;  %vm5808_vm8 = vcmp.ge.f32.partialorder %v16056_v26, 0.0  ;;  %vm5806_vm9 = vcmp.ge.f32.partialorder %v16059_v27, 0.0  ;;  %6752 = vst [vmem:[#allocation3 + $0x90] sm:$0xf] %v6720_v56  ;;  %v6090_v37 = vor.u32 %v6088_v53, %v16072_v42  ;;  %v12341_v31 = vpack.c.bf16 %v5869_v63, %v5869_v63 }
 0x315   : > { %v12026_v51 = vrot.slane %v6433_v60, 9  ;;  %v6533_v39 = vld [vmem:[#allocation2 + $0x3c] sm:$0x1]  ;;  %v6578_v40 = vld [vmem:[#allocation2 + $0x4c] sm:$0x8]  ;;  %v6091_v9 = vrot.slane %v16072_v42, 4  ;;  %v5867_v2 = vsel %vm5803_vm6, %v5715_v33, %v5835_v44 }
 0x316   : > { %v6721_v55 = vld [vmem:[#allocation2 + $0x1c] sm:$0xf]  ;;  %6353 = vst [vmem:[#allocation2 + $0x60] sm:$0xf] %v6352_v11  ;;  %v5840_v52 = vmul.f32 0.01, %v16056_v26  ;;  %v6345_v20 = vsel %vm14140_vm7, %v6090_v37, %v6344_v13  ;;  %v12339_v6 = vpack.c.bf16 %v5867_v2, %v5867_v2 }
 0x317   : > { %6753 = vst [vmem:[#allocation3 + $0xb4] sm:$0xf] %v6721_v55  ;;  %v6534_v48 = vsel %vm14124_vm4, %v12026_v51, %v6533_v39  ;;  %v12045_v38 = vrot.slane %v6578_v40, 11  ;;  %v6680_v46 = vld [vmem:[#allocation2 + $0x50] sm:$0x1]  ;;  %v6110_v15 = vshrl.u32 %v12341_v31, 16 }
 0x318   : > { %6535 = vst [vmem:[#allocation2 + $0x3c] sm:$0x1] %v6534_v48  ;;  %v6577_v28 = vld [vmem:[#allocation2 + $0x40] sm:$0x8]  ;;  %6346 = vst [vmem:[#allocation2 + $0x54] sm:$0xf] %v6345_v20  ;;  %v5872_v33 = vsel %vm5808_vm8, %v16056_v26, %v5840_v52  ;;  %v16105_v26 = vpop.f32.mrf.mxu0 }
 0x319   : > { %v6113_v0 = vshll.u32 %v12341_v31, 16  ;;  %v6681_v18 = vsel %vm14167_vm10, %v12045_v38, %v6680_v46  ;;  %v12044_v36 = vrot.slane %v6577_v28, 11  ;;  %v6355_v4 = vld [vmem:[#allocation2 + $0x68] sm:$0x1]  ;;  %v6093_v30 = vshrl.u32 %v12339_v6, 16  ;;  %v13780_v60 = vld [vmem:[%s17748_s3 + $0x1f8] sm:$0xff]  }
 0x31a   : > { %6682 = vst [vmem:[#allocation2 + $0x50] sm:$0x1] %v6681_v18  ;;  %v6677_v3 = vld [vmem:[#allocation2 + $0x44] sm:$0x1]  ;;  %v6112_v43 = vrot.slane %v6110_v15, 7  ;;  %v12344_v53 = vpack.c.bf16 %v5872_v33, %v5872_v33  ;;  %vm5809_vm11 = vcmp.ge.f32.partialorder %v5739_v61, 0.0  ;;  %v5746_v48 = vpop.f32.mrf.mxu0  ;;  %13166 = vmatprep.subr.bf16.mxu0 %v13780_v60 }
 0x31b   : > { %v5838_v13 = vmul.f32 0.01, %v16059_v27  ;;  %v6678_v7 = vsel %vm14167_vm10, %v12044_v36, %v6677_v3  ;;  %v6095_v54 = vrot.slane %v6093_v30, 7  ;;  %v6096_v12 = vshll.u32 %v12339_v6, 16  ;;  %v6348_v50 = vld [vmem:[#allocation2 + $0x5c] sm:$0x1] }
 0x31c   : > { %v5841_v24 = vmul.f32 0.01, %v5739_v61  ;;  %6679 = vst [vmem:[#allocation2 + $0x44] sm:$0x1] %v6678_v7  ;;  %v6115_v42 = vor.u32 %v6113_v0, %v6112_v43  ;;  %v6117_v35 = vrot.slane %v6112_v43, 4  ;;  %v6136_v1 = vshrl.u32 %v12344_v53, 16  ;;  %v13344_v7 = vpop.f32.mrf.mxu0 }
 0x31d   : > { %v6139_v44 = vshll.u32 %v12344_v53, 16  ;;  %v7554_v56 = vld [vmem:[#allocation2 + $0x30] sm:$0xf]  ;;  %v6436_v63 = vld [vmem:[#allocation2 + $0x60] sm:$0x2]  ;;  %v6098_v51 = vor.u32 %v6096_v12, %v6095_v54  ;;  %v6100_v39 = vrot.slane %v6095_v54, 4  ;;  %v5870_v37 = vsel %vm5806_vm9, %v16059_v27, %v5838_v13 }
 0x31e   : > { %v6365_v11 = vld [vmem:[#allocation2 + $0x78] sm:$0xf]  ;;  %v5873_v55 = vsel %vm5809_vm11, %v5739_v61, %v5841_v24  ;;  %7586 = vst [vmem:[#allocation3 + $0xe4] sm:$0xf] %v7554_v56  ;;  %v12029_v40 = vrot.slane %v6436_v63, 9  ;;  %v6116_v31 = vsel %vm14131_vm5, %v6108_v17, %v6115_v42  ;;  %v6356_v2 = vsel %vm14124_vm4, %v6117_v35, %v6355_v4 }
 0x31f   : > { %v16122_v52 = vrot.slane %v6136_v1, 7  ;;  %v7555_v38 = vld [vmem:[#allocation2 + $0x34] sm:$0xf]  ;;  %v6722_v20 = vld [vmem:[#allocation2 + $0x24] sm:$0xf]  ;;  %v6099_v61 = vsel %vm14131_vm5, %v6091_v9, %v6098_v51  ;;  %v6349_v34 = vsel %vm14124_vm4, %v6100_v39, %v6348_v50  ;;  %v12342_v17 = vpack.c.bf16 %v5870_v37, %v5870_v37 }
 0x320   : > { %v6542_v6 = vld [vmem:[#allocation2 + $0x60] sm:$0x1]  ;;  %v6435_v27 = vld [vmem:[#allocation2 + $0x54] sm:$0x2]  ;;  %6354 = vst [vmem:[#allocation2 + $0x64] sm:$0xf] %v6116_v31  ;;  %v12345_v46 = vpack.c.bf16 %v5873_v55, %v5873_v55  ;;  %v5744_v42 = vadd.f32 %v16086_v41, %v15871_v10  ;;  %v16150_v56 = vadd.f32 %v5746_v48, %v15874_v57  ;;  %v16154_v10 = vadd.f32 %v13344_v7, %v15885_v19 }
 0x321   : > { %6357 = vst [vmem:[#allocation2 + $0x68] sm:$0x1] %v6356_v2  ;;  %7587 = vst [vmem:[#allocation3 + $0x108] sm:$0xf] %v7555_v38  ;;  %v6723_v28 = vld [vmem:[#allocation2 + $0x28] sm:$0xf]  ;;  %v6543_v15 = vsel %vm14124_vm4, %v12029_v40, %v6542_v6  ;;  %v6141_v33 = vor.u32 %v6139_v44, %v16122_v52  ;;  %v5755_v44 = vadd.f32 %v16105_v26, %v15882_v21  ;;  %v5759_v6 = vpop.f32.mrf.mxu0 }
 0x322   : > { %6754 = vst [vmem:[#allocation3 + $0xd8] sm:$0xf] %v6722_v20  ;;  %v12028_v0 = vrot.slane %v6435_v27, 9  ;;  %6347 = vst [vmem:[#allocation2 + $0x58] sm:$0xf] %v6099_v61  ;;  %vm5807_vm12 = vcmp.ge.f32.partialorder %v16097_v25, 0.0 }
 0x323   : > { %6350 = vst [vmem:[#allocation2 + $0x5c] sm:$0x1] %v6349_v34  ;;  %6755 = vst [vmem:[#allocation3 + $0xfc] sm:$0xf] %v6723_v28  ;;  %v6539_v9 = vld [vmem:[#allocation2 + $0x54] sm:$0x1]  ;;  %v6366_v43 = vsel %vm14140_vm7, %v6141_v33, %v6365_v11  ;;  %v13345_v7 = vpop.f32.mrf.mxu0 }
 0x324   : > { %6544 = vst [vmem:[#allocation2 + $0x60] sm:$0x1] %v6543_v15  ;;  %v6119_v18 = vshrl.u32 %v12342_v17, 16  ;;  %v6122_v36 = vshll.u32 %v12342_v17, 16  ;;  %v6144_v4 = vshrl.u32 %v12345_v46, 16  ;;  %v6147_v30 = vshll.u32 %v12345_v46, 16 }
 0x325   : > { %v6540_v3 = vsel %vm14124_vm4, %v12028_v0, %v6539_v9  ;;  %v6358_v53 = vld [vmem:[#allocation2 + $0x6c] sm:$0xf]  ;;  %v5839_v13 = vmul.f32 0.01, %v16097_v25  ;;  %vm5812_vm15 = vcmp.ge.f32.partialorder %v16102_v23, 0.0  ;;  %v6142_v35 = vrot.slane %v16122_v52, 4 }
 0x326   : > { %6541 = vst [vmem:[#allocation2 + $0x54] sm:$0x1] %v6540_v3  ;;  %6367 = vst [vmem:[#allocation2 + $0x78] sm:$0xf] %v6366_v43  ;;  %v16138_v54 = vrot.slane %v6119_v18, 7  ;;  %v6146_v12 = vrot.slane %v6144_v4, 7 }
 0x327   : > { %v6369_v50 = vld [vmem:[#allocation2 + $0x80] sm:$0x1]  ;;  %v5844_v24 = vmul.f32 0.01, %v16102_v23  ;;  %v5871_v1 = vsel %vm5807_vm12, %v16097_v25, %v5839_v13  ;;  %v7556_v60 = vld [vmem:[#allocation2 + $0x3c] sm:$0xf] }
 0x328   : > { %v7557_v63 = vld [vmem:[#allocation2 + $0x40] sm:$0xf]  ;;  %v6124_v51 = vor.u32 %v6122_v36, %v16138_v54  ;;  %v6149_v39 = vor.u32 %v6147_v30, %v6146_v12  ;;  %v6151_v11 = vrot.slane %v6146_v12, 4  ;;  %7588 = vst [vmem:[#allocation3 + $0x12c] sm:$0xf] %v7556_v60  ;;  %v6125_v55 = vrot.slane %v16138_v54, 4 }
 0x329   : > { %7589 = vst [vmem:[#allocation3 + $0x150] sm:$0xf] %v7557_v63  ;;  %v6724_v41 = vld [vmem:[#allocation2 + $0x30] sm:$0xf]  ;;  %v6725_v37 = vld [vmem:[#allocation2 + $0x34] sm:$0xf]  ;;  %v12343_v21 = vpack.c.bf16 %v5871_v1, %v5871_v1  ;;  %v5876_v57 = vsel %vm5812_vm15, %v16102_v23, %v5844_v24 }
 0x32a   : > { %v6580_v25 = vld [vmem:[#allocation2 + $0x64] sm:$0x8]  ;;  %vm5810_vm0 = vcmp.ge.f32.partialorder %v5744_v42, 0.0  ;;  %6756 = vst [vmem:[#allocation3 + $0x120] sm:$0xf] %v6724_v41  ;;  %v6359_v19 = vsel %vm14140_vm7, %v6124_v51, %v6358_v53  ;;  %v6150_v2 = vsel %vm14131_vm5, %v6142_v35, %v6149_v39  ;;  %v6370_v52 = vsel %vm14124_vm4, %v6151_v11, %v6369_v50 }
 0x32b   : > { %6757 = vst [vmem:[#allocation3 + $0x144] sm:$0xf] %v6725_v37  ;;  %v12047_v26 = vrot.slane %v6580_v25, 11  ;;  %v6686_v40 = vld [vmem:[#allocation2 + $0x68] sm:$0x1]  ;;  %v6127_v23 = vshrl.u32 %v12343_v21, 16  ;;  %v12348_v20 = vpack.c.bf16 %v5876_v57, %v5876_v57  ;;  %v5760_v37 = vadd.f32 %v5759_v6, %v15888_v49 }
 0x32c   : > { %v6579_v31 = vld [vmem:[#allocation2 + $0x58] sm:$0x8]  ;;  %v6683_v38 = vld [vmem:[#allocation2 + $0x5c] sm:$0x1]  ;;  %6360 = vst [vmem:[#allocation2 + $0x6c] sm:$0xf] %v6359_v19  ;;  %v16190_v25 = vadd.f32 %v13345_v7, %v15895_v45  ;;  %v5762_v7 = vpop.f32.mrf.mxu0 }
 0x32d   : > { %v12046_v48 = vrot.slane %v6579_v31, 11  ;;  %6368 = vst [vmem:[#allocation2 + $0x7c] sm:$0xf] %v6150_v2  ;;  %6371 = vst [vmem:[#allocation2 + $0x80] sm:$0x1] %v6370_v52  ;;  %vm5813_vm1 = vcmp.ge.f32.partialorder %v5755_v44, 0.0  ;;  %v6687_v27 = vsel %vm14167_vm10, %v12047_v26, %v6686_v40 }
 0x32e   : > { %v6130_v61 = vshll.u32 %v12343_v21, 16  ;;  %v5842_v34 = vmul.f32 0.01, %v5744_v42  ;;  %v5845_v17 = vmul.f32 0.01, %v5755_v44  ;;  %v6129_v15 = vrot.slane %v6127_v23, 7 }
 0x32f   : > { %6688 = vst [vmem:[#allocation2 + $0x68] sm:$0x1] %v6687_v27  ;;  %v6684_v46 = vsel %vm14167_vm10, %v12046_v48, %v6683_v38  ;;  %v6438_v28 = vld [vmem:[#allocation2 + $0x78] sm:$0x2]  ;;  %v6170_v0 = vshrl.u32 %v12348_v20, 16  ;;  %vm5811_vm2 = vcmp.ge.f32.partialorder %v16150_v56, 0.0 }
 0x330   : > { %6685 = vst [vmem:[#allocation2 + $0x5c] sm:$0x1] %v6684_v46  ;;  %v12031_v33 = vrot.slane %v6438_v28, 9  ;;  %v6362_v9 = vld [vmem:[#allocation2 + $0x74] sm:$0x1]  ;;  %v6173_v18 = vshll.u32 %v12348_v20, 16  ;;  %v5874_v36 = vsel %vm5810_vm0, %v5744_v42, %v5842_v34  ;;  %v5877_v4 = vsel %vm5813_vm1, %v5755_v44, %v5845_v17 }
 0x331   : > { %v6548_v30 = vld [vmem:[#allocation2 + $0x78] sm:$0x1]  ;;  %v6132_v3 = vor.u32 %v6130_v61, %v6129_v15  ;;  %v6134_v43 = vrot.slane %v6129_v15, 4  ;;  %v16173_v53 = vrot.slane %v6170_v0, 7  ;;  %v12346_v13 = vpack.c.bf16 %v5874_v36, %v5874_v36  ;;  %v6379_v12 = vld [vmem:[#allocation2 + $0x90] sm:$0xf] }
 0x332   : > { %v6549_v54 = vsel %vm14124_vm4, %v12031_v33, %v6548_v30  ;;  %v12349_v50 = vpack.c.bf16 %v5877_v4, %v5877_v4  ;;  %v5843_v24 = vmul.f32 0.01, %v16150_v56  ;;  %vm5816_vm3 = vcmp.ge.f32.partialorder %v16154_v10, 0.0  ;;  %v7558_v60 = vld [vmem:[#allocation2 + $0x48] sm:$0xf] }
 0x333   : > { %6550 = vst [vmem:[#allocation2 + $0x78] sm:$0x1] %v6549_v54  ;;  %v6133_v42 = vsel %vm14131_vm5, %v6125_v55, %v6132_v3  ;;  %v6363_v35 = vsel %vm14124_vm4, %v6134_v43, %v6362_v9  ;;  %v6175_v1 = vor.u32 %v6173_v18, %v16173_v53  ;;  %v6176_v44 = vrot.slane %v16173_v53, 4  ;;  %v7559_v63 = vld [vmem:[#allocation2 + $0x4c] sm:$0xf] }
 0x334   : > { %v6437_v51 = vld [vmem:[#allocation2 + $0x6c] sm:$0x2]  ;;  %v6545_v39 = vld [vmem:[#allocation2 + $0x6c] sm:$0x1]  ;;  %v6582_v11 = vld [vmem:[#allocation2 + $0x7c] sm:$0x8]  ;;  %v5875_v41 = vsel %vm5811_vm2, %v16150_v56, %v5843_v24  ;;  %v16194_v55 = vadd.f32 %v15908_v62, %v15856_v58 }
 0x335   : > { %6361 = vst [vmem:[#allocation2 + $0x70] sm:$0xf] %v6133_v42  ;;  %6364 = vst [vmem:[#allocation2 + $0x74] sm:$0x1] %v6363_v35  ;;  %v12030_v21 = vrot.slane %v6437_v51, 9  ;;  %v12049_v57 = vrot.slane %v6582_v11, 11  ;;  %v6380_v40 = vsel %vm14140_vm7, %v6175_v1, %v6379_v12  ;;  %v12347_v45 = vpack.c.bf16 %v5875_v41, %v5875_v41 }
 0x336   : > { %7590 = vst [vmem:[#allocation3 + $0x174] sm:$0xf] %v7558_v60  ;;  %7591 = vst [vmem:[#allocation3 + $0x198] sm:$0xf] %v7559_v63  ;;  %v6692_v26 = vld [vmem:[#allocation2 + $0x80] sm:$0x1] }
 0x337   : > { %v6153_v31 = vshrl.u32 %v12346_v13, 16  ;;  %6381 = vst [vmem:[#allocation2 + $0x90] sm:$0xf] %v6380_v40  ;;  %v6156_v56 = vshll.u32 %v12346_v13, 16  ;;  %v6372_v19 = vld [vmem:[#allocation2 + $0x84] sm:$0xf]  ;;  %v6546_v58 = vsel %vm14124_vm4, %v12030_v21, %v6545_v39  ;;  %v6693_v62 = vsel %vm14167_vm10, %v12049_v57, %v6692_v26 }
 0x338   : > { %v6178_v49 = vshrl.u32 %v12349_v50, 16  ;;  %v6181_v2 = vshll.u32 %v12349_v50, 16  ;;  %v7276_v52 = vld [vmem:[#allocation2] sm:$0xe]  ;;  %v6726_v48 = vld [vmem:[#allocation2 + $0x3c] sm:$0xf]  ;;  %v16221_v40 = vadd.f32 %v5762_v7, %v15891_v5 }
 0x339   : > { %v6155_v38 = vrot.slane %v6153_v31, 7  ;;  %v5848_v23 = vmul.f32 0.01, %v16154_v10  ;;  %v6727_v20 = vld [vmem:[#allocation2 + $0x40] sm:$0xf]  ;;  %v6161_v27 = vshrl.u32 %v12347_v45, 16 }
 0x33a   : > { %6758 = vst [vmem:[#allocation3 + $0x168] sm:$0xf] %v6726_v48  ;;  %6547 = vst [vmem:[#allocation2 + $0x6c] sm:$0x1] %v6546_v58  ;;  %v6180_v6 = vrot.slane %v6178_v49, 7  ;;  %v6164_v61 = vshll.u32 %v12347_v45, 16 }
 0x33b   : > { %6694 = vst [vmem:[#allocation2 + $0x80] sm:$0x1] %v6693_v62  ;;  %vm5814_vm6 = vcmp.ge.f32.partialorder %v5760_v37, 0.0  ;;  %v7277_v34 = vld [vmem:[#allocation2 + $0x4] sm:$0xf]  ;;  %v6158_v17 = vor.u32 %v6156_v56, %v6155_v38  ;;  %v6159_v46 = vrot.slane %v6155_v38, 4  ;;  %v5880_v15 = vsel %vm5816_vm3, %v16154_v10, %v5848_v23 }
 0x33c   : > { %6759 = vst [vmem:[#allocation3 + $0x18c] sm:$0xf] %v6727_v20  ;;  %v6383_v28 = vld [vmem:[#allocation2 + $0x98] sm:$0x1]  ;;  %v5846_v0 = vmul.f32 0.01, %v5760_v37  ;;  %v6183_v33 = vor.u32 %v6181_v2, %v6180_v6  ;;  %v12352_v36 = vpack.c.bf16 %v5880_v15, %v5880_v15 }
 0x33d   : > { %v6185_v9 = vrot.slane %v6180_v6, 4  ;;  %v6163_v18 = vrot.slane %v6161_v27, 7  ;;  %v6581_v4 = vld [vmem:[#allocation2 + $0x70] sm:$0x8]  ;;  %v6373_v30 = vsel %vm14140_vm7, %v6158_v17, %v6372_v19  ;;  %v6376_v3 = vld [vmem:[#allocation2 + $0x8c] sm:$0x1] }
 0x33e   : > { %v5878_v43 = vsel %vm5814_vm6, %v5760_v37, %v5846_v0  ;;  %v12057_v53 = vrot.slane %v7276_v52, 9  ;;  %v7374_v13 = vrot.slane %v7277_v34, 5  ;;  %v12048_v54 = vrot.slane %v6581_v4, 11  ;;  %v6689_v12 = vld [vmem:[#allocation2 + $0x74] sm:$0x1] }
 0x33f   : > { %6374 = vst [vmem:[#allocation2 + $0x84] sm:$0xf] %v6373_v30  ;;  %v6184_v10 = vsel %vm14131_vm5, %v6176_v44, %v6183_v33  ;;  %v6384_v50 = vsel %vm14124_vm4, %v6185_v9, %v6383_v28  ;;  %v6166_v24 = vor.u32 %v6164_v61, %v6163_v18  ;;  %v7278_v42 = vld [vmem:[#allocation2 + $0x8] sm:$0x1]  ;;  %v6440_v35 = vld [vmem:[#allocation2 + $0x90] sm:$0x2]  ;;  %v12350_v51 = vpack.c.bf16 %v5878_v43, %v5878_v43  ;;  %v13348_v61 = vpop.f32.mrf.mxu0 }
 0x340   : > { %v6554_v1 = vld [vmem:[#allocation2 + $0x90] sm:$0x1]  ;;  %6382 = vst [vmem:[#allocation2 + $0x94] sm:$0xf] %v6184_v10  ;;  %6385 = vst [vmem:[#allocation2 + $0x98] sm:$0x1] %v6384_v50  ;;  %v7375_v11 = vsel %vm14184_vm13, %v12057_v53, %v7374_v13  ;;  %v6690_v44 = vsel %vm14167_vm10, %v12048_v54, %v6689_v12  ;;  %v16247_v12 = vadd.f32 %v13348_v61, %v15904_v47 }
 0x341   : > { %v6168_v60 = vrot.slane %v6163_v18, 4  ;;  %v6204_v63 = vshrl.u32 %v12352_v36, 16  ;;  %v6780_v41 = vld [vmem:[#allocation2] sm:$0xf]  ;;  %v16214_v37 = vld [vmem:[#allocation2 + $0x4] sm:$0xf]  ;;  %v6167_v57 = vsel %vm14131_vm5, %v6159_v46, %v6166_v24 }
 0x342   : > { %v12033_v21 = vrot.slane %v6440_v35, 9  ;;  %v6393_v26 = vld [vmem:[#allocation2 + $0xa8] sm:$0xf]  ;;  %7516 = vst [vmem:[#allocation3 + $0x8] sm:$0xf] %v7375_v11  ;;  %v6207_v2 = vshll.u32 %v12352_v36, 16  ;;  %v5775_v11 = vpop.f32.mrf.mxu0 }
 0x343   : > { %v7560_v31 = vld [vmem:[#allocation2 + $0x54] sm:$0xf]  ;;  %v7561_v56 = vld [vmem:[#allocation2 + $0x58] sm:$0xf]  ;;  %6691 = vst [vmem:[#allocation2 + $0x74] sm:$0x1] %v6690_v44  ;;  %v6377_v19 = vsel %vm14124_vm4, %v6168_v60, %v6376_v3 }
 0x344   : > { %6375 = vst [vmem:[#allocation2 + $0x88] sm:$0xf] %v6167_v57  ;;  %v16225_v49 = vrot.slane %v6204_v63, 7  ;;  %v6187_v45 = vshrl.u32 %v12350_v51, 16  ;;  %7592 = vst [vmem:[#allocation3 + $0x1bc] sm:$0xf] %v7560_v31  ;;  %v6555_v48 = vsel %vm14124_vm4, %v12033_v21, %v6554_v1 }
 0x345   : > { %7593 = vst [vmem:[#allocation3 + $0x1e0] sm:$0xf] %v7561_v56  ;;  %v6728_v52 = vld [vmem:[#allocation2 + $0x48] sm:$0xf]  ;;  %6378 = vst [vmem:[#allocation2 + $0x8c] sm:$0x1] %v6377_v19 }
 0x346   : > { %v7376_v5 = vrot.slane %v7374_v13, 4  ;;  %v7377_v58 = vrot.slane %v7278_v42, 5  ;;  %vm5817_vm8 = vcmp.ge.f32.partialorder %v16190_v25, 0.0  ;;  %v6729_v62 = vld [vmem:[#allocation2 + $0x4c] sm:$0xf]  ;;  %v6209_v38 = vor.u32 %v6207_v2, %v16225_v49 }
 0x347   : > { %6760 = vst [vmem:[#allocation3 + $0x1b0] sm:$0xf] %v6728_v52  ;;  %6556 = vst [vmem:[#allocation2 + $0x90] sm:$0x1] %v6555_v48  ;;  %v16231_v23 = vrot.slane %v6187_v45, 7  ;;  %v6190_v20 = vshll.u32 %v12350_v51, 16 }
 0x348   : > { %v6386_v6 = vld [vmem:[#allocation2 + $0x9c] sm:$0xf]  ;;  %v5849_v27 = vmul.f32 0.01, %v16190_v25  ;;  %6761 = vst [vmem:[#allocation3 + $0x1d4] sm:$0xf] %v6729_v62  ;;  %v7378_v34 = vsel %vm14184_vm13, %v7376_v5, %v7377_v58  ;;  %v6394_v9 = vsel %vm14140_vm7, %v6209_v38, %v6393_v26 }
 0x349   : > { %v6782_v17 = vld [vmem:[#allocation2 + $0x8] sm:$0x1]  ;;  %v6829_v46 = vshrl.u32 %v6780_v41, 16  ;;  %v6832_v28 = vshll.u32 %v6780_v41, 16  ;;  %v6838_v15 = vshll.u32 %v16214_v37, 16  ;;  %v6210_v33 = vrot.slane %v16225_v49, 4 }
 0x34a   : > { %v6439_v0 = vld [vmem:[#allocation2 + $0x84] sm:$0x2]  ;;  %v6192_v18 = vor.u32 %v6190_v20, %v16231_v23  ;;  %7517 = vst [vmem:[#allocation3 + $0x2c] sm:$0xf] %v7378_v34  ;;  %v5881_v36 = vsel %vm5817_vm8, %v16190_v25, %v5849_v27  ;;  %v7279_v4 = vld [vmem:[#allocation2 + $0xc] sm:$0xe] }
 0x34b   : > { %v7280_v30 = vld [vmem:[#allocation2 + $0x10] sm:$0xf]  ;;  %v12032_v3 = vrot.slane %v6439_v0, 9  ;;  %v6551_v43 = vld [vmem:[#allocation2 + $0x84] sm:$0x1]  ;;  %v12353_v13 = vpack.c.bf16 %v5881_v36, %v5881_v36  ;;  %v6831_v7 = vrot.slane %v6829_v46, 4 }
 0x34c   : > { %v6584_v53 = vld [vmem:[#allocation2 + $0x94] sm:$0x8]  ;;  %6395 = vst [vmem:[#allocation2 + $0xa8] sm:$0xf] %v6394_v9  ;;  %v16244_v54 = vld [vmem:[#allocation2 + $0x14] sm:$0x1]  ;;  %v6387_v24 = vsel %vm14140_vm7, %v6192_v18, %v6386_v6 }
 0x34d   : > { %v12051_v10 = vrot.slane %v6584_v53, 11  ;;  %v6698_v50 = vld [vmem:[#allocation2 + $0x98] sm:$0x1]  ;;  %v6834_v42 = vrot.slane %v6832_v28, 5  ;;  %v6840_v25 = vrot.slane %v6838_v15, 5  ;;  %v6552_v35 = vsel %vm14124_vm4, %v12032_v3, %v6551_v43  ;;  %v13796_v36 = vld [vmem:[%s17748_s3 + $0x1f0] sm:$0xff]  }
 0x34e   : > { %v6583_v1 = vld [vmem:[#allocation2 + $0x88] sm:$0x8]  ;;  %6388 = vst [vmem:[#allocation2 + $0x9c] sm:$0xf] %v6387_v24  ;;  %v6212_v60 = vshrl.u32 %v12353_v13, 16  ;;  %v6215_v63 = vshll.u32 %v12353_v13, 16 }
 0x34f   : > { %v6842_v51 = vshrl.u32 %v16214_v37, 16  ;;  %6553 = vst [vmem:[#allocation2 + $0x84] sm:$0x1] %v6552_v35  ;;  %v6699_v47 = vsel %vm14167_vm10, %v12051_v10, %v6698_v50  ;;  %v12050_v41 = vrot.slane %v6583_v1, 11  ;;  %v6397_v44 = vld [vmem:[#allocation2 + $0xb0] sm:$0x1]  ;;  %v6835_v21 = vor.u32 %v6834_v42, %v6831_v7 }
 0x350   : > { %v6848_v57 = vshll.u32 %v6782_v17, 16  ;;  %6700 = vst [vmem:[#allocation2 + $0x98] sm:$0x1] %v6699_v47  ;;  %v6695_v26 = vld [vmem:[#allocation2 + $0x8c] sm:$0x1]  ;;  %v6214_v31 = vrot.slane %v6212_v60, 7  ;;  %v13349_v17 = vpop.f32.mrf.mxu0  ;;  %v5776_v50 = vadd.f32 %v5775_v11, %v15901_v22 }
 0x351   : > { %v6844_v56 = vrot.slane %v6842_v51, 4  ;;  %v12058_v19 = vrot.slane %v7279_v4, 9  ;;  %v7381_v2 = vrot.slane %v7280_v30, 5  ;;  %v6696_v45 = vsel %vm14167_vm10, %v12050_v41, %v6695_v26  ;;  %v16259_v5 = vld [vmem:[#allocation2 + $0xc] sm:$0xf]  ;;  %v13781_v58 = vld [vmem:[%s17748_s3 + $0x1b8] sm:$0xff]  }
 0x352   : > { %v6836_v52 = vrot.slane %v6835_v21, 4  ;;  %v6850_v37 = vrot.slane %v6848_v57, 5  ;;  %v7384_v48 = vrot.slane %v16244_v54, 5  ;;  %6697 = vst [vmem:[#allocation2 + $0x8c] sm:$0x1] %v6696_v45  ;;  %v6217_v20 = vor.u32 %v6215_v63, %v6214_v31  ;;  %v13797_v7 = vld [vmem:[%s17748_s3 + $0x1b0] sm:$0xff]  }
 0x353   : > { %v13718_v62 = vld [vmem:[#allocation3 + $0x8] ss:$36 sps:$4 sm:$0xff]   ;;  %v6219_v6 = vrot.slane %v6214_v31, 4  ;;  %v6845_v27 = vor.u32 %v6844_v56, %v6840_v25  ;;  %v7382_v61 = vsel %vm14184_vm13, %v12058_v19, %v7381_v2  ;;  %v6784_v34 = vld [vmem:[#allocation2 + $0x10] sm:$0xf]  ;;  %v6193_v28 = vrot.slane %v16231_v23, 4 }
 0x354   : > { %v13720_v38 = vld [vmem:[#allocation3 + $0xc] ss:$36 sps:$4 sm:$0xff]   ;;  %v6841_v0 = vsel %vm14213_vm14, %v6836_v52, %v6840_v25  ;;  %v7383_v9 = vrot.slane %v7381_v2, 4  ;;  %7518 = vst [vmem:[#allocation3 + $0x50] sm:$0xf] %v7382_v61  ;;  %vm5815_vm9 = vcmp.ge.f32.partialorder %v16221_v40, 0.0  ;;  %v6218_v30 = vsel %vm14131_vm5, %v6210_v33, %v6217_v20 }
 0x355   : > { %v6442_v46 = vld [vmem:[#allocation2 + $0xa8] sm:$0x2]  ;;  %v6785_v18 = vld [vmem:[#allocation2 + $0x14] sm:$0x1]  ;;  %10884 = vmatprep.mubr.bf16.mxu0 %v13720_v38  ;;  %v6398_v3 = vsel %vm14124_vm4, %v6219_v6, %v6397_v44  ;;  %v6846_v43 = vrot.slane %v6845_v27, 4  ;;  %v16287_v24 = vadd.f32 %v13349_v17, %v16194_v55  ;;  %v6853_v1 = vshrl.u32 %v16259_v5, 16  ;;  %v5778_v38 = vpop.f32.mrf.mxu0 }
 0x356   : > { %v12035_v4 = vrot.slane %v6442_v46, 9  ;;  %7244 = vst [vmem:[#allocation3 + $0x4] sm:$0xf] %v6841_v0  ;;  %v7562_v53 = vld [vmem:[#allocation2 + $0x60] sm:$0xf]  ;;  %10885 = vmatmul.mubr.bf16.vlgmr.msra.gmra.mxu0 %v13718_v62  ;;  %v7385_v49 = vsel %vm14184_vm13, %v7383_v9, %v7384_v48  ;;  %v6856_v51 = vshll.u32 %v16259_v5, 16  ;;  %v5618_v17 = vadd.f32 %v15897_v29, %v15747_v14 }
 0x357   : > { %v7563_v13 = vld [vmem:[#allocation2 + $0x64] sm:$0xf]  ;;  %v6560_v54 = vld [vmem:[#allocation2 + $0xa8] sm:$0x1]  ;;  %v6441_v10 = vld [vmem:[#allocation2 + $0x9c] sm:$0x2]  ;;  %v6851_v35 = vsel %vm14213_vm14, %v6846_v43, %v6850_v37  ;;  %13167 = vmatpush3.bf16.msra.mxu0 %v13781_v58 }
 0x358   : > { %6396 = vst [vmem:[#allocation2 + $0xac] sm:$0xf] %v6218_v30  ;;  %6399 = vst [vmem:[#allocation2 + $0xb0] sm:$0x1] %v6398_v3  ;;  %v5847_v33 = vmul.f32 0.01, %v16221_v40  ;;  %v6561_v42 = vsel %vm14124_vm4, %v12035_v4, %v6560_v54  ;;  %13168 = vmatprep.subr.bf16.mxu0 %v13796_v36  ;;  %v16329_v54 = vadd.f32 %v5778_v38, %v5618_v17 }
 0x359   : > { %7594 = vst [vmem:[#allocation3 + $0x204] sm:$0xf] %v7562_v53  ;;  %7595 = vst [vmem:[#allocation3 + $0x228] sm:$0xf] %v7563_v13  ;;  %v12034_v25 = vrot.slane %v6441_v10, 9  ;;  %v6862_v11 = vshll.u32 %v6784_v34, 16 }
 0x35a   : > { %7519 = vst [vmem:[#allocation3 + $0x74] sm:$0xf] %v7385_v49  ;;  %v6730_v60 = vld [vmem:[#allocation2 + $0x54] sm:$0xf]  ;;  %v6731_v63 = vld [vmem:[#allocation2 + $0x58] sm:$0xf]  ;;  %v5879_v55 = vsel %vm5815_vm9, %v16221_v40, %v5847_v33 }
 0x35b   : > { %6562 = vst [vmem:[#allocation2 + $0xa8] sm:$0x1] %v6561_v42  ;;  %v6557_v22 = vld [vmem:[#allocation2 + $0x9c] sm:$0x1]  ;;  %7245 = vst [vmem:[#allocation3 + $0x28] sm:$0xf] %v6851_v35  ;;  %v12351_v21 = vpack.c.bf16 %v5879_v55, %v5879_v55  ;;  %13169 = vmatpush3.bf16.msra.mxu0 %v13797_v7 }
 0x35c   : > { %v6866_v47 = vshrl.u32 %v6784_v34, 16  ;;  %6762 = vst [vmem:[#allocation3 + $0x1f8] sm:$0xf] %v6730_v60  ;;  %6763 = vst [vmem:[#allocation3 + $0x21c] sm:$0xf] %v6731_v63  ;;  %v13812_v41 = vld [vmem:[%s17748_s3 + $0x1e8] sm:$0xff]   ;;  %v6558_v44 = vsel %vm14124_vm4, %v12034_v25, %v6557_v22 }
 0x35d   : > { %v6855_v57 = vrot.slane %v6853_v1, 4  ;;  %v6872_v26 = vshll.u32 %v6785_v18, 16  ;;  %6559 = vst [vmem:[#allocation2 + $0x9c] sm:$0x1] %v6558_v44  ;;  %v6858_v31 = vrot.slane %v6856_v51, 5  ;;  %v16303_v40 = vrot.slane %v6862_v11, 5  ;;  %13170 = vmatprep.subr.bf16.mxu0 %v13812_v41 }
 0x35e   : > { %v6868_v56 = vrot.slane %v6866_v47, 4  ;;  %vm5820_vm11 = vcmp.ge.f32.partialorder %v16247_v12, 0.0  ;;  %v13813_v19 = vld [vmem:[%s17748_s3 + $0x1a8] sm:$0xff]   ;;  %v6195_v2 = vshrl.u32 %v12351_v21, 16  ;;  %v6198_v45 = vshll.u32 %v12351_v21, 16  ;;  %v13728_v61 = vld [vmem:[%s17748_s3 + $0x138] sm:$0xff]  }
 0x35f   : > { %v16309_v52 = vrot.slane %v6872_v26, 5  ;;  %v5852_v37 = vmul.f32 0.01, %v16247_v12  ;;  %v6390_v48 = vld [vmem:[#allocation2 + $0xa4] sm:$0x1]  ;;  %v6859_v5 = vor.u32 %v6858_v31, %v6855_v57  ;;  %vm5818_vm12 = vcmp.ge.f32.partialorder %v5776_v50, 0.0  ;;  %13171 = vmatpush3.bf16.msra.mxu0 %v13813_v19 }
 0x360   : > { %v6869_v58 = vor.u32 %v6868_v56, %v16303_v40  ;;  %v5850_v62 = vmul.f32 0.01, %v5776_v50  ;;  %v6586_v20 = vld [vmem:[#allocation2 + $0xac] sm:$0x8]  ;;  %v6704_v6 = vld [vmem:[#allocation2 + $0xb0] sm:$0x1] }
 0x361   : > { %v6197_v27 = vrot.slane %v6195_v2, 7  ;;  %v5884_v34 = vsel %vm5820_vm11, %v16247_v12, %v5852_v37  ;;  %vm5821_vm15 = vcmp.ge.f32.partialorder %v16287_v24, 0.0  ;;  %v12053_v46 = vrot.slane %v6586_v20, 11  ;;  %v13724_v0 = vld [vmem:[#allocation3 + $0x50] ss:$36 sps:$4 sm:$0xff]   ;;  %v13741_v3 = vld [vmem:[%s17748_s3 + $0x170] sm:$0xff]  }
 0x362   : > { %v13726_v9 = vld [vmem:[#allocation3 + $0x54] ss:$36 sps:$4 sm:$0xff]   ;;  %v12356_v18 = vpack.c.bf16 %v5884_v34, %v5884_v34  ;;  %v5882_v36 = vsel %vm5818_vm12, %v5776_v50, %v5850_v62  ;;  %v16322_v4 = vld [vmem:[#allocation2 + $0x18] sm:$0xe]  ;;  %v16324_v30 = vld [vmem:[#allocation2 + $0x1c] sm:$0xf] }
 0x363   : > { %v13721_v43 = vld [vmem:[#allocation3] ss:$36 sps:$4 sm:$0xff]   ;;  %v6200_v53 = vor.u32 %v6198_v45, %v6197_v27  ;;  %v6202_v13 = vrot.slane %v6197_v27, 4  ;;  %v12354_v7 = vpack.c.bf16 %v5882_v36, %v5882_v36  ;;  %v6705_v14 = vsel %vm14167_vm10, %v12053_v46, %v6704_v6  ;;  %10892 = vmatprep.mubr.bf16.mxu0 %v13726_v9  ;;  %v16333_v33 = vld [vmem:[#allocation2 + $0x20] sm:$0x1]  ;;  %v13742_v63 = vld [vmem:[%s17748_s3 + $0x130] sm:$0xff]  }
 0x364   : > { %v13723_v12 = vld [vmem:[#allocation3 + $0x4] ss:$36 sps:$4 sm:$0xff]   ;;  %v6860_v29 = vrot.slane %v6859_v5, 4  ;;  %v6870_v10 = vrot.slane %v6869_v58, 4  ;;  %v6238_v49 = vshrl.u32 %v12356_v18, 16  ;;  %v6241_v35 = vshll.u32 %v12356_v18, 16  ;;  %10893 = vmatmul.mubr.bf16.gmra.mxu0 %v13724_v0 }
 0x365   : > { %v13828_v50 = vld [vmem:[%s17748_s3 + $0x1e0] sm:$0xff]   ;;  %6706 = vst [vmem:[#allocation2 + $0xb0] sm:$0x1] %v6705_v14  ;;  %10723 = vmatprep.mubr.bf16.mxu1 %v13723_v12  ;;  %v6201_v42 = vsel %vm14131_vm5, %v6193_v28, %v6200_v53  ;;  %v6391_v25 = vsel %vm14124_vm4, %v6202_v13, %v6390_v48  ;;  %v6221_v60 = vshrl.u32 %v12354_v7, 16  ;;  %v7564_v22 = vld [vmem:[#allocation2 + $0x6c] sm:$0xf] }
 0x366   : > { %v6407_v1 = vld [vmem:[#allocation2 + $0xc0] sm:$0xf]  ;;  %v7565_v55 = vld [vmem:[#allocation2 + $0x70] sm:$0xf]  ;;  %6389 = vst [vmem:[#allocation2 + $0xa0] sm:$0xf] %v6201_v42  ;;  %10724 = vmatmul.mubr.bf16.vlgmr.msra.gmra.mxu1 %v13721_v43  ;;  %v6865_v23 = vsel %vm14213_vm14, %v6860_v29, %v16303_v40  ;;  %v6875_v28 = vsel %vm14213_vm14, %v6870_v10, %v16309_v52  ;;  %13172 = vmatprep.subr.bf16.mxu0 %v13828_v50 }
 0x367   : > { %6392 = vst [vmem:[#allocation2 + $0xa4] sm:$0x1] %v6391_v25  ;;  %v16353_v51 = vrot.slane %v6238_v49, 7  ;;  %v6224_v11 = vshll.u32 %v12354_v7, 16  ;;  %v6400_v47 = vld [vmem:[#allocation2 + $0xb4] sm:$0xf]  ;;  %13055 = vmatpush3.bf16.msra.mxu1 %v13728_v61 }
 0x368   : > { %v6421_v41 = vld [vmem:[#allocation2 + $0xcc] sm:$0xf]  ;;  %7596 = vst [vmem:[#allocation3 + $0x24c] sm:$0xf] %v7564_v22  ;;  %7597 = vst [vmem:[#allocation3 + $0x270] sm:$0xf] %v7565_v55  ;;  %13056 = vmatprep.subr.bf16.mxu1 %v13741_v3 }
 0x369   : > { %v6732_v44 = vld [vmem:[#allocation2 + $0x60] sm:$0xf]  ;;  %v6733_v21 = vld [vmem:[#allocation2 + $0x64] sm:$0xf]  ;;  %7246 = vst [vmem:[#allocation3 + $0x4c] sm:$0xf] %v6865_v23  ;;  %v6243_v19 = vor.u32 %v6241_v35, %v16353_v51 }
 0x36a   : > { %7247 = vst [vmem:[#allocation3 + $0x70] sm:$0xf] %v6875_v28  ;;  %v16355_v57 = vrot.slane %v6221_v60, 7  ;;  %v5853_v26 = vmul.f32 0.01, %v16287_v24  ;;  %v12059_v31 = vrot.slane %v16322_v4, 9 }
 0x36b   : > { %v7388_v40 = vrot.slane %v16324_v30, 5  ;;  %6764 = vst [vmem:[#allocation3 + $0x240] sm:$0xf] %v6732_v44  ;;  %6765 = vst [vmem:[#allocation3 + $0x264] sm:$0xf] %v6733_v21  ;;  %v13829_v56 = vld [vmem:[%s17748_s3 + $0x1a0] sm:$0xff]   ;;  %v6408_v38 = vsel %vm14140_vm7, %v6243_v19, %v6407_v1  ;;  %13057 = vmatpush3.bf16.msra.mxu1 %v13742_v63 }
 0x36c   : > { %v6244_v2 = vrot.slane %v16353_v51, 4  ;;  %v7391_v45 = vrot.slane %v16333_v33, 5  ;;  %v6786_v52 = vld [vmem:[#allocation2 + $0x18] sm:$0xf]  ;;  %v13755_v37 = vld [vmem:[%s17748_s3 + $0x168] sm:$0xff]   ;;  %v6226_v5 = vor.u32 %v6224_v11, %v16355_v57  ;;  %v5885_v58 = vsel %vm5821_vm15, %v16287_v24, %v5853_v26  ;;  %13173 = vmatpush3.bf16.msra.mxu0 %v13829_v56  ;;  %v13769_v18 = vld [vmem:[%s17748_s3 + $0x160] sm:$0xff]  }
 0x36d   : > { %v13830_v48 = vld [vmem:[%s17748_s3 + $0x1d8] sm:$0xff]   ;;  %v7389_v62 = vsel %vm14184_vm13, %v12059_v31, %v7388_v40  ;;  %vm5819_vm0 = vcmp.ge.f32.partialorder %v16329_v54, 0.0  ;;  %v12357_v20 = vpack.c.bf16 %v5885_v58, %v5885_v58  ;;  %v7390_v6 = vrot.slane %v7388_v40, 4  ;;  %6409 = vst [vmem:[#allocation2 + $0xc0] sm:$0xf] %v6408_v38  ;;  %v13756_v9 = vld [vmem:[%s17748_s3 + $0x128] sm:$0xff]   ;;  %13058 = vmatprep.subr.bf16.mxu1 %v13755_v37 }
 0x36e   : > { %7520 = vst [vmem:[#allocation3 + $0x98] sm:$0xf] %v7389_v62  ;;  %v5851_v27 = vmul.f32 0.01, %v16329_v54  ;;  %13174 = vmatprep.subr.bf16.mxu0 %v13830_v48  ;;  %v13835_v61 = vld [vmem:[%s17748_s3 + $0x198] sm:$0xff]   ;;  %v6401_v24 = vsel %vm14140_vm7, %v6226_v5, %v6400_v47  ;;  %v6422_v34 = vsel %vm14140_vm7, %v6226_v5, %v6421_v41  ;;  %v6877_v46 = vshrl.u32 %v6786_v52, 16 }
 0x36f   : > { %v6787_v17 = vld [vmem:[#allocation2 + $0x1c] sm:$0xf]  ;;  %v6880_v0 = vshll.u32 %v6786_v52, 16  ;;  %v6227_v36 = vrot.slane %v16355_v57, 4  ;;  %6402 = vst [vmem:[#allocation2 + $0xb4] sm:$0xf] %v6401_v24  ;;  %v7392_v32 = vsel %vm14184_vm13, %v7390_v6, %v7391_v45  ;;  %13059 = vmatpush3.bf16.msra.mxu1 %v13756_v9 }
 0x370   : > { %6423 = vst [vmem:[#allocation2 + $0xcc] sm:$0xf] %v6422_v34  ;;  %v6246_v4 = vshrl.u32 %v12357_v20, 16  ;;  %v5883_v30 = vsel %vm5819_vm0, %v16329_v54, %v5851_v27  ;;  %v7566_v3 = vld [vmem:[#allocation2 + $0x78] sm:$0xf]  ;;  %v6249_v53 = vshll.u32 %v12357_v20, 16  ;;  %13175 = vmatpush3.bf16.msra.mxu0 %v13835_v61  ;;  %13060 = vmatprep.subr.bf16.mxu1 %v13769_v18 }
 0x371   : > { %v7567_v43 = vld [vmem:[#allocation2 + $0x7c] sm:$0xf]  ;;  %v6585_v12 = vld [vmem:[#allocation2 + $0xa0] sm:$0x8]  ;;  %v6411_v13 = vld [vmem:[#allocation2 + $0xc8] sm:$0x1]  ;;  %v12355_v7 = vpack.c.bf16 %v5883_v30, %v5883_v30 }
 0x372   : > { %7521 = vst [vmem:[#allocation3 + $0xbc] sm:$0xf] %v7392_v32  ;;  %v16401_v14 = vld [vmem:[#allocation2 + $0x20] sm:$0x1]  ;;  %v6879_v29 = vrot.slane %v6877_v46, 4  ;;  %v6882_v10 = vrot.slane %v6880_v0, 5 }
 0x373   : > { %v13770_v49 = vld [vmem:[%s17748_s3 + $0x120] sm:$0xff]   ;;  %7598 = vst [vmem:[#allocation3 + $0x294] sm:$0xf] %v7566_v3  ;;  %7599 = vst [vmem:[#allocation3 + $0x2b8] sm:$0xf] %v7567_v43  ;;  %v12052_v54 = vrot.slane %v6585_v12, 11 }
 0x374   : > { %v6701_v33 = vld [vmem:[#allocation2 + $0xa4] sm:$0x1]  ;;  %v6248_v50 = vrot.slane %v6246_v4, 7  ;;  %v13785_v42 = vld [vmem:[%s17748_s3 + $0x158] sm:$0xff]   ;;  %v6229_v1 = vshrl.u32 %v12355_v7, 16  ;;  %v6883_v60 = vor.u32 %v6882_v10, %v6879_v29  ;;  %v6886_v63 = vshll.u32 %v6787_v17, 16  ;;  %13061 = vmatpush3.bf16.msra.mxu1 %v13770_v49 }
 0x375   : > { %v13729_v25 = vld [vmem:[#allocation3 + $0x48] ss:$36 sps:$4 sm:$0xff]   ;;  %v6702_v55 = vsel %vm14167_vm10, %v12052_v54, %v6701_v33  ;;  %v6404_v11 = vld [vmem:[#allocation2 + $0xbc] sm:$0x1]  ;;  %v6425_v47 = vld [vmem:[#allocation2 + $0xd4] sm:$0x1]  ;;  %13062 = vmatprep.subr.bf16.mxu1 %v13785_v42 }
 0x376   : > { %v13731_v35 = vld [vmem:[#allocation3 + $0x4c] ss:$36 sps:$4 sm:$0xff]   ;;  %v6251_v23 = vor.u32 %v6249_v53, %v6248_v50  ;;  %v6253_v28 = vrot.slane %v6248_v50, 4  ;;  %v6890_v41 = vshrl.u32 %v6787_v17, 16  ;;  %v6734_v44 = vld [vmem:[#allocation2 + $0x6c] sm:$0xf] }
 0x377   : > { %v16409_v22 = vld [vmem:[#allocation2 + $0x24] sm:$0xe]  ;;  %v6735_v21 = vld [vmem:[#allocation2 + $0x70] sm:$0xf]  ;;  %6703 = vst [vmem:[#allocation2 + $0xa4] sm:$0x1] %v6702_v55  ;;  %10731 = vmatprep.mubr.bf16.mxu1 %v13731_v35 }
 0x378   : > { %v6231_v26 = vrot.slane %v6229_v1, 7  ;;  %v6232_v31 = vshll.u32 %v12355_v7, 16  ;;  %v6884_v40 = vrot.slane %v6883_v60, 4  ;;  %v6888_v56 = vrot.slane %v6886_v63, 5  ;;  %v13786_v19 = vld [vmem:[%s17748_s3 + $0x118] sm:$0xff]   ;;  %v13840_v45 = vld [vmem:[%s17748_s3 + $0x1d0] sm:$0xff]   ;;  %10732 = vmatmul.mubr.bf16.gmra.mxu1 %v13729_v25 }
 0x379   : > { %6766 = vst [vmem:[#allocation3 + $0x288] sm:$0xf] %v6734_v44  ;;  %6767 = vst [vmem:[#allocation3 + $0x2ac] sm:$0xf] %v6735_v21  ;;  %v6444_v52 = vld [vmem:[#allocation2 + $0xc0] sm:$0x2]  ;;  %v6252_v48 = vsel %vm14131_vm5, %v6244_v2, %v6251_v23  ;;  %v6412_v5 = vsel %vm14124_vm4, %v6253_v28, %v6411_v13  ;;  %13176 = vmatprep.subr.bf16.mxu0 %v13840_v45  ;;  %13063 = vmatpush3.bf16.msra.mxu1 %v13786_v19 }
 0x37a   : > { %v6566_v37 = vld [vmem:[#allocation2 + $0xc0] sm:$0x1]  ;;  %v6892_v58 = vrot.slane %v6890_v41, 4  ;;  %v6896_v62 = vshll.u32 %v16401_v14, 16  ;;  %v7286_v38 = vld [vmem:[#allocation2 + $0x28] sm:$0xf]  ;;  %v6234_v51 = vor.u32 %v6232_v31, %v6231_v26  ;;  %v6889_v2 = vsel %vm14213_vm14, %v6884_v40, %v6888_v56 }
 0x37b   : > { %v16426_v20 = vld [vmem:[#allocation2 + $0x2c] sm:$0x1]  ;;  %v6789_v6 = vld [vmem:[#allocation2 + $0x24] sm:$0xf]  ;;  %v12037_v27 = vrot.slane %v6444_v52, 9  ;;  %v6236_v34 = vrot.slane %v6231_v26, 4 }
 0x37c   : > { %v6443_v61 = vld [vmem:[#allocation2 + $0xb4] sm:$0x2]  ;;  %v6445_v24 = vld [vmem:[#allocation2 + $0xcc] sm:$0x2]  ;;  %6410 = vst [vmem:[#allocation2 + $0xc4] sm:$0xf] %v6252_v48  ;;  %v6893_v4 = vor.u32 %v6892_v58, %v6888_v56  ;;  %v6235_v53 = vsel %vm14131_vm5, %v6227_v36, %v6234_v51 }
 0x37d   : > { %6413 = vst [vmem:[#allocation2 + $0xc8] sm:$0x1] %v6412_v5  ;;  %v6790_v17 = vld [vmem:[#allocation2 + $0x28] sm:$0xf]  ;;  %v16430_v46 = vld [vmem:[#allocation2 + $0x2c] sm:$0x1]  ;;  %v6567_v3 = vsel %vm14124_vm4, %v12037_v27, %v6566_v37  ;;  %v6405_v13 = vsel %vm14124_vm4, %v6236_v34, %v6404_v11  ;;  %v6426_v7 = vsel %vm14124_vm4, %v6236_v34, %v6425_v47 }
 0x37e   : > { %v12036_v0 = vrot.slane %v6443_v61, 9  ;;  %v12038_v9 = vrot.slane %v6445_v24, 9  ;;  %v6563_v18 = vld [vmem:[#allocation2 + $0xb4] sm:$0x1]  ;;  %7248 = vst [vmem:[#allocation3 + $0x94] sm:$0xf] %v6889_v2 }
 0x37f   : > { %v12060_v32 = vrot.slane %v16409_v22, 9  ;;  %v13801_v30 = vld [vmem:[%s17748_s3 + $0x150] sm:$0xff]   ;;  %v6569_v43 = vld [vmem:[#allocation2 + $0xcc] sm:$0x1]  ;;  %6568 = vst [vmem:[#allocation2 + $0xc0] sm:$0x1] %v6567_v3 }
 0x380   : > { %v13734_v12 = vld [vmem:[#allocation3 + $0x9c] ss:$36 sps:$4 sm:$0xff]   ;;  %v6564_v14 = vsel %vm14124_vm4, %v12036_v0, %v6563_v18  ;;  %v6570_v29 = vsel %vm14124_vm4, %v12038_v9, %v6569_v43  ;;  %6403 = vst [vmem:[#allocation2 + $0xb8] sm:$0xf] %v6235_v53  ;;  %6406 = vst [vmem:[#allocation2 + $0xbc] sm:$0x1] %v6405_v13  ;;  %13064 = vmatprep.subr.bf16.mxu1 %v13801_v30 }
 0x381   : > { %v13732_v10 = vld [vmem:[#allocation3 + $0x98] ss:$36 sps:$4 sm:$0xff]   ;;  %6424 = vst [vmem:[#allocation2 + $0xd0] sm:$0xf] %v6235_v53  ;;  %6427 = vst [vmem:[#allocation2 + $0xd4] sm:$0x1] %v6426_v7  ;;  %10900 = vmatprep.mubr.bf16.mxu0 %v13734_v12  ;;  %13065 = vmatpush3.bf16.msra.mxu1 %v13802_v59 }
 0x382   : > { %v6894_v8 = vrot.slane %v6893_v4, 4  ;;  %v6898_v57 = vrot.slane %v6896_v62, 5  ;;  %6565 = vst [vmem:[#allocation2 + $0xb4] sm:$0x1] %v6564_v14  ;;  %6571 = vst [vmem:[#allocation2 + $0xcc] sm:$0x1] %v6570_v29  ;;  %10901 = vmatmul.mubr.bf16.gmra.mxu0 %v13732_v10 }
 0x383   : > { %v7395_v36 = vrot.slane %v7286_v38, 5  ;;  %v7398_v49 = vrot.slane %v16426_v20, 5  ;;  %v6901_v54 = vshrl.u32 %v6789_v6, 16  ;;  %v6904_v33 = vshll.u32 %v6789_v6, 16  ;;  %v7288_v50 = vld [vmem:[#allocation2 + $0x30] sm:$0xe] }
 0x384   : > { %v7289_v42 = vld [vmem:[#allocation2 + $0x34] sm:$0xf]  ;;  %v6899_v25 = vsel %vm14213_vm14, %v6894_v8, %v6898_v57  ;;  %v6910_v35 = vshll.u32 %v6790_v17, 16  ;;  %v6914_v1 = vshrl.u32 %v6790_v17, 16  ;;  %v6920_v60 = vshll.u32 %v16430_v46, 16  ;;  %v13817_v63 = vld [vmem:[%s17748_s3 + $0x148] sm:$0xff]  }
 0x385   : > { %v13841_v22 = vld [vmem:[%s17748_s3 + $0x190] sm:$0xff]   ;;  %7249 = vst [vmem:[#allocation3 + $0xb8] sm:$0xf] %v6899_v25  ;;  %v7396_v55 = vsel %vm14184_vm13, %v12060_v32, %v7395_v36  ;;  %v7397_v23 = vrot.slane %v7395_v36, 4  ;;  %v6903_v28 = vrot.slane %v6901_v54, 4  ;;  %v6906_v11 = vrot.slane %v6904_v33, 5  ;;  %13066 = vmatprep.subr.bf16.mxu1 %v13817_v63 }
 0x386   : > { %v16465_v47 = vld [vmem:[#allocation2 + $0x38] sm:$0x1]  ;;  %v13842_v41 = vld [vmem:[%s17748_s3 + $0x1c8] sm:$0xff]   ;;  %v6588_v44 = vld [vmem:[#allocation2 + $0xc4] sm:$0x8]  ;;  %v6912_v21 = vrot.slane %v6910_v35, 5  ;;  %13177 = vmatpush3.bf16.msra.mxu0 %v13841_v22 }
 0x387   : > { %7522 = vst [vmem:[#allocation3 + $0xe0] sm:$0xf] %v7396_v55  ;;  %v6916_v26 = vrot.slane %v6914_v1, 4  ;;  %v6792_v31 = vld [vmem:[#allocation2 + $0x30] sm:$0xf]  ;;  %v13818_v40 = vld [vmem:[%s17748_s3 + $0x108] sm:$0xff]   ;;  %v7399_v52 = vsel %vm14184_vm13, %v7397_v23, %v7398_v49  ;;  %v6907_v37 = vor.u32 %v6906_v11, %v6903_v28  ;;  %13178 = vmatprep.subr.bf16.mxu0 %v13842_v41 }
 0x388   : > { %v13834_v56 = vld [vmem:[%s17748_s3 + $0x140] sm:$0xff]   ;;  %v12055_v19 = vrot.slane %v6588_v44, 11  ;;  %v6710_v45 = vld [vmem:[#allocation2 + $0xc8] sm:$0x1]  ;;  %v6922_v48 = vrot.slane %v6920_v60, 5  ;;  %v12061_v62 = vrot.slane %v7288_v50, 9  ;;  %13067 = vmatpush3.bf16.msra.mxu1 %v13818_v40 }
 0x389   : > { %v13843_v5 = vld [vmem:[%s17748_s3 + $0x188] sm:$0xff]   ;;  %7523 = vst [vmem:[#allocation3 + $0x104] sm:$0xf] %v7399_v52  ;;  %v6917_v58 = vor.u32 %v6916_v26, %v6912_v21  ;;  %v7402_v38 = vrot.slane %v7289_v42, 5  ;;  %v7405_v20 = vrot.slane %v16465_v47, 5  ;;  %v13850_v61 = vld [vmem:[%s17748_s3 + $0x1c0] sm:$0xff]   ;;  %13068 = vmatprep.subr.bf16.mxu1 %v13834_v56 }
 0x38a   : > { %v16482_v6 = vld [vmem:[#allocation2 + $0x34] sm:$0xf]  ;;  %v7568_v27 = vld [vmem:[#allocation2 + $0x84] sm:$0xf]  ;;  %v6711_v24 = vsel %vm14167_vm10, %v12055_v19, %v6710_v45  ;;  %v6587_v51 = vld [vmem:[#allocation2 + $0xb8] sm:$0x8]  ;;  %13179 = vmatpush3.bf16.msra.mxu0 %v13843_v5 }
 0x38b   : > { %v6589_v34 = vld [vmem:[#allocation2 + $0xd0] sm:$0x8]  ;;  %v6707_v2 = vld [vmem:[#allocation2 + $0xbc] sm:$0x1]  ;;  %v6794_v17 = vld [vmem:[#allocation2 + $0x38] sm:$0x1]  ;;  %v7403_v43 = vsel %vm14184_vm13, %v12061_v62, %v7402_v38  ;;  %13180 = vmatprep.subr.bf16.mxu0 %v13850_v61 }
 0x38c   : > { %v7291_v46 = vld [vmem:[#allocation2 + $0x3c] sm:$0xe]  ;;  %v7292_v0 = vld [vmem:[#allocation2 + $0x40] sm:$0xf]  ;;  %7600 = vst [vmem:[#allocation3 + $0x2dc] sm:$0xf] %v7568_v27 }
 0x38d   : > { %6712 = vst [vmem:[#allocation2 + $0xc8] sm:$0x1] %v6711_v24  ;;  %v12054_v9 = vrot.slane %v6587_v51, 11  ;;  %v12056_v18 = vrot.slane %v6589_v34, 11  ;;  %v6713_v4 = vld [vmem:[#allocation2 + $0xd4] sm:$0x1] }
 0x38e   : > { %v6908_v32 = vrot.slane %v6907_v37, 4  ;;  %v6918_v30 = vrot.slane %v6917_v58, 4  ;;  %v13836_v3 = vld [vmem:[%s17748_s3 + $0x100] sm:$0xff]   ;;  %v7404_v12 = vrot.slane %v7402_v38, 4  ;;  %v6925_v53 = vshrl.u32 %v6792_v31, 16  ;;  %v13855_v40 = vld [vmem:[%s17748_s3 + $0x238] sm:$0xff]  }
 0x38f   : > { %v6928_v13 = vshll.u32 %v6792_v31, 16  ;;  %v7569_v7 = vld [vmem:[#allocation2 + $0x88] sm:$0xf]  ;;  %v13851_v14 = vld [vmem:[%s17748_s3 + $0x180] sm:$0xff]   ;;  %v6708_v29 = vsel %vm14167_vm10, %v12054_v9, %v6707_v2  ;;  %v6714_v10 = vsel %vm14167_vm10, %v12056_v18, %v6713_v4  ;;  %v13737_v57 = vld [vmem:[#allocation3 + $0x94] ss:$36 sps:$4 sm:$0xff]   ;;  %13069 = vmatpush3.bf16.msra.mxu1 %v13836_v3 }
 0x390   : > { %v13735_v8 = vld [vmem:[#allocation3 + $0x90] ss:$36 sps:$4 sm:$0xff]   ;;  %v6913_v36 = vsel %vm14213_vm14, %v6908_v32, %v6912_v21  ;;  %v6923_v49 = vsel %vm14213_vm14, %v6918_v30, %v6922_v48  ;;  %7524 = vst [vmem:[#allocation3 + $0x128] sm:$0xf] %v7403_v43  ;;  %v7293_v54 = vld [vmem:[#allocation2 + $0x44] sm:$0x1]  ;;  %v7406_v16 = vsel %vm14184_vm13, %v7404_v12, %v7405_v20  ;;  %10739 = vmatprep.mubr.bf16.mxu1 %v13737_v57 }
 0x391   : > { %v6795_v33 = vld [vmem:[#allocation2 + $0x3c] sm:$0xf]  ;;  %7601 = vst [vmem:[#allocation3 + $0x300] sm:$0xf] %v7569_v7  ;;  %6709 = vst [vmem:[#allocation2 + $0xbc] sm:$0x1] %v6708_v29  ;;  %13181 = vmatpush3.bf16.msra.mxu0 %v13851_v14  ;;  %10740 = vmatmul.mubr.bf16.gmra.mxu1 %v13735_v8 }
 0x392   : > { %6715 = vst [vmem:[#allocation2 + $0xd4] sm:$0x1] %v6714_v10  ;;  %7250 = vst [vmem:[#allocation3 + $0xdc] sm:$0xf] %v6913_v36  ;;  %v6927_v50 = vrot.slane %v6925_v53, 4  ;;  %v6930_v42 = vrot.slane %v6928_v13, 5  ;;  %13350 = vmatprep.subr.bf16.mxu1 %v13855_v40 }
 0x393   : > { %7251 = vst [vmem:[#allocation3 + $0x100] sm:$0xf] %v6923_v49  ;;  %v6934_v59 = vshll.u32 %v16482_v6, 16  ;;  %v6796_v25 = vld [vmem:[#allocation2 + $0x40] sm:$0xf]  ;;  %v6938_v1 = vshrl.u32 %v16482_v6, 16 }
 0x394   : > { %v6736_v35 = vld [vmem:[#allocation2 + $0x78] sm:$0xf]  ;;  %7525 = vst [vmem:[#allocation3 + $0x14c] sm:$0xf] %v7406_v16  ;;  %v6944_v60 = vshll.u32 %v6794_v17, 16  ;;  %v12062_v63 = vrot.slane %v7291_v46, 9  ;;  %v6931_v28 = vor.u32 %v6930_v42, %v6927_v50 }
 0x395   : > { %v7409_v22 = vrot.slane %v7292_v0, 5  ;;  %v6737_v55 = vld [vmem:[#allocation2 + $0x7c] sm:$0xf]  ;;  %6768 = vst [vmem:[#allocation3 + $0x2d0] sm:$0xf] %v6736_v35  ;;  %v6936_v11 = vrot.slane %v6934_v59, 5 }
 0x396   : > { %v13740_v23 = vld [vmem:[#allocation3 + $0xe4] ss:$36 sps:$4 sm:$0xff]   ;;  %v6797_v47 = vld [vmem:[#allocation2 + $0x44] sm:$0x1]  ;;  %6769 = vst [vmem:[#allocation3 + $0x2f4] sm:$0xf] %v6737_v55 }
 0x397   : > { %v13738_v41 = vld [vmem:[#allocation3 + $0xe0] ss:$36 sps:$4 sm:$0xff]   ;;  %v6940_v44 = vrot.slane %v6938_v1, 4  ;;  %v6946_v21 = vrot.slane %v6944_v60, 5  ;;  %v7410_v26 = vsel %vm14184_vm13, %v12062_v63, %v7409_v22  ;;  %v7411_v31 = vrot.slane %v7409_v22, 4  ;;  %10908 = vmatprep.mubr.bf16.mxu0 %v13740_v23 }
 0x398   : > { %v6932_v56 = vrot.slane %v6931_v28, 4  ;;  %v7412_v19 = vrot.slane %v7293_v54, 5  ;;  %7526 = vst [vmem:[#allocation3 + $0x170] sm:$0xf] %v7410_v26  ;;  %v6949_v45 = vshrl.u32 %v6795_v33, 16  ;;  %v6952_v52 = vshll.u32 %v6795_v33, 16  ;;  %10909 = vmatmul.mubr.bf16.gmra.mxu0 %v13738_v41 }
 0x399   : > { %v7294_v37 = vld [vmem:[#allocation2 + $0x48] sm:$0xe]  ;;  %v7295_v48 = vld [vmem:[#allocation2 + $0x4c] sm:$0xf]  ;;  %v6941_v5 = vor.u32 %v6940_v44, %v6936_v11  ;;  %v6958_v58 = vshll.u32 %v6796_v25, 16  ;;  %v6962_v62 = vshrl.u32 %v6796_v25, 16 }
 0x39a   : > { %v6968_v38 = vshll.u32 %v6797_v47, 16  ;;  %v7296_v20 = vld [vmem:[#allocation2 + $0x50] sm:$0x1]  ;;  %v6937_v6 = vsel %vm14213_vm14, %v6932_v56, %v6936_v11  ;;  %v7413_v27 = vsel %vm14184_vm13, %v7411_v31, %v7412_v19  ;;  %v6951_v61 = vrot.slane %v6949_v45, 4  ;;  %v6798_v51 = vld [vmem:[#allocation2 + $0x48] sm:$0xf] }
 0x39b   : > { %v6954_v24 = vrot.slane %v6952_v52, 5  ;;  %v6942_v34 = vrot.slane %v6941_v5, 4  ;;  %7252 = vst [vmem:[#allocation3 + $0x124] sm:$0xf] %v6937_v6  ;;  %7527 = vst [vmem:[#allocation3 + $0x194] sm:$0xf] %v7413_v27 }
 0x39c   : > { %v6960_v2 = vrot.slane %v6958_v58, 5  ;;  %v6799_v17 = vld [vmem:[#allocation2 + $0x4c] sm:$0xf]  ;;  %v13743_v46 = vld [vmem:[#allocation3 + $0xd8] ss:$36 sps:$4 sm:$0xff]   ;;  %v6964_v18 = vrot.slane %v6962_v62, 4 }
 0x39d   : > { %v13745_v0 = vld [vmem:[#allocation3 + $0xdc] ss:$36 sps:$4 sm:$0xff]   ;;  %v6955_v9 = vor.u32 %v6954_v24, %v6951_v61  ;;  %v6800_v4 = vld [vmem:[#allocation2 + $0x50] sm:$0x1]  ;;  %v13748_v32 = vld [vmem:[#allocation3 + $0x12c] ss:$36 sps:$4 sm:$0xff]   ;;  %v6947_v30 = vsel %vm14213_vm14, %v6942_v34, %v6946_v21 }
 0x39e   : > { %v6970_v3 = vrot.slane %v6968_v38, 5  ;;  %v12063_v43 = vrot.slane %v7294_v37, 9  ;;  %v7416_v12 = vrot.slane %v7295_v48, 5  ;;  %v7297_v53 = vld [vmem:[#allocation2 + $0x54] sm:$0xe]  ;;  %10747 = vmatprep.mubr.bf16.mxu1 %v13745_v0  ;;  %v6965_v7 = vor.u32 %v6964_v18, %v6960_v2  ;;  %10916 = vmatprep.mubr.bf16.mxu0 %v13748_v32 }
 0x39f   : > { %7253 = vst [vmem:[#allocation3 + $0x148] sm:$0xf] %v6947_v30  ;;  %v6956_v13 = vrot.slane %v6955_v9, 4  ;;  %v7419_v14 = vrot.slane %v7296_v20, 5  ;;  %v6973_v29 = vshrl.u32 %v6798_v51, 16  ;;  %10748 = vmatmul.mubr.bf16.gmra.mxu1 %v13743_v46  ;;  %v6976_v54 = vshll.u32 %v6798_v51, 16 }
 0x3a0   : > { %v7298_v10 = vld [vmem:[#allocation2 + $0x58] sm:$0xf]  ;;  %v16520_v8 = vld [vmem:[#allocation2 + $0x5c] sm:$0x1]  ;;  %v13746_v57 = vld [vmem:[#allocation3 + $0x128] ss:$36 sps:$4 sm:$0xff]   ;;  %v7417_v36 = vsel %vm14184_vm13, %v12063_v43, %v7416_v12 }
 0x3a1   : > { %v7418_v49 = vrot.slane %v7416_v12, 4  ;;  %v6982_v33 = vshll.u32 %v6799_v17, 16  ;;  %v6801_v16 = vld [vmem:[#allocation2 + $0x54] sm:$0xf]  ;;  %v16524_v50 = vld [vmem:[#allocation2 + $0x58] sm:$0xf]  ;;  %v6961_v42 = vsel %vm14213_vm14, %v6956_v13, %v6960_v2  ;;  %10917 = vmatmul.mubr.bf16.gmra.mxu0 %v13746_v57 }
 0x3a2   : > { %v6966_v59 = vrot.slane %v6965_v7, 4  ;;  %7528 = vst [vmem:[#allocation3 + $0x1b8] sm:$0xf] %v7417_v36  ;;  %v6975_v25 = vrot.slane %v6973_v29, 4  ;;  %v6986_v35 = vshrl.u32 %v6799_v17, 16  ;;  %v6978_v63 = vrot.slane %v6976_v54, 5 }
 0x3a3   : > { %v7570_v1 = vld [vmem:[#allocation2 + $0x90] sm:$0xf]  ;;  %7254 = vst [vmem:[#allocation3 + $0x16c] sm:$0xf] %v6961_v42  ;;  %v7420_v60 = vsel %vm14184_vm13, %v7418_v49, %v7419_v14  ;;  %v6984_v22 = vrot.slane %v6982_v33, 5  ;;  %v6992_v55 = vshll.u32 %v6800_v4, 16 }
 0x3a4   : > { %v7571_v23 = vld [vmem:[#allocation2 + $0x94] sm:$0xf]  ;;  %7602 = vst [vmem:[#allocation3 + $0x324] sm:$0xf] %v7570_v1  ;;  %v6971_v28 = vsel %vm14213_vm14, %v6966_v59, %v6970_v3  ;;  %7529 = vst [vmem:[#allocation3 + $0x1dc] sm:$0xf] %v7420_v60  ;;  %v6979_v21 = vor.u32 %v6978_v63, %v6975_v25 }
 0x3a5   : > { %v6988_v11 = vrot.slane %v6986_v35, 4  ;;  %v12064_v47 = vrot.slane %v7297_v53, 9  ;;  %v6803_v41 = vld [vmem:[#allocation2 + $0x5c] sm:$0x1]  ;;  %7603 = vst [vmem:[#allocation3 + $0x348] sm:$0xf] %v7571_v23 }
 0x3a6   : > { %v13754_v44 = vld [vmem:[#allocation3 + $0x174] ss:$36 sps:$4 sm:$0xff]   ;;  %7255 = vst [vmem:[#allocation3 + $0x190] sm:$0xf] %v6971_v28  ;;  %v6994_v26 = vrot.slane %v6992_v55, 5  ;;  %v7423_v31 = vrot.slane %v7298_v10, 5 }
 0x3a7   : > { %v7426_v40 = vrot.slane %v16520_v8, 5  ;;  %v6989_v56 = vor.u32 %v6988_v11, %v6984_v22  ;;  %v6997_v19 = vshrl.u32 %v6801_v16, 16  ;;  %v7000_v45 = vshll.u32 %v6801_v16, 16  ;;  %v6738_v37 = vld [vmem:[#allocation2 + $0x84] sm:$0xf]  ;;  %10924 = vmatprep.mubr.bf16.mxu0 %v13754_v44 }
 0x3a8   : > { %v7006_v52 = vshll.u32 %v16524_v50, 16  ;;  %v13749_v48 = vld [vmem:[#allocation3 + $0x120] ss:$36 sps:$4 sm:$0xff]   ;;  %v6980_v58 = vrot.slane %v6979_v21, 4  ;;  %v7424_v62 = vsel %vm14184_vm13, %v12064_v47, %v7423_v31  ;;  %v7300_v38 = vld [vmem:[#allocation2 + $0x60] sm:$0xe] }
 0x3a9   : > { %v13751_v5 = vld [vmem:[#allocation3 + $0x124] ss:$36 sps:$4 sm:$0xff]   ;;  %6770 = vst [vmem:[#allocation3 + $0x318] sm:$0xf] %v6738_v37  ;;  %v6990_v20 = vrot.slane %v6989_v56, 4  ;;  %v7425_v6 = vrot.slane %v7423_v31, 4 }
 0x3aa   : > { %7530 = vst [vmem:[#allocation3 + $0x200] sm:$0xf] %v7424_v62  ;;  %v6999_v27 = vrot.slane %v6997_v19, 4  ;;  %v7002_v61 = vrot.slane %v7000_v45, 5  ;;  %v7301_v24 = vld [vmem:[#allocation2 + $0x64] sm:$0xf]  ;;  %10755 = vmatprep.mubr.bf16.mxu1 %v13751_v5  ;;  %v6985_v2 = vsel %vm14213_vm14, %v6980_v58, %v6984_v22 }
 0x3ab   : > { %v6739_v51 = vld [vmem:[#allocation2 + $0x88] sm:$0xf]  ;;  %v7008_v17 = vrot.slane %v7006_v52, 5  ;;  %v7010_v46 = vshrl.u32 %v16524_v50, 16  ;;  %v7016_v0 = vshll.u32 %v6803_v41, 16  ;;  %10756 = vmatmul.mubr.bf16.gmra.mxu1 %v13749_v48  ;;  %v6995_v9 = vsel %vm14213_vm14, %v6990_v20, %v6994_v26 }
 0x3ac   : > { %v13752_v34 = vld [vmem:[#allocation3 + $0x170] ss:$36 sps:$4 sm:$0xff]   ;;  %6771 = vst [vmem:[#allocation3 + $0x33c] sm:$0xf] %v6739_v51  ;;  %7256 = vst [vmem:[#allocation3 + $0x1b4] sm:$0xf] %v6985_v2  ;;  %v7427_v18 = vsel %vm14184_vm13, %v7425_v6, %v7426_v40  ;;  %v7003_v4 = vor.u32 %v7002_v61, %v6999_v27 }
 0x3ad   : > { %v7302_v32 = vld [vmem:[#allocation2 + $0x68] sm:$0x1]  ;;  %v6804_v30 = vld [vmem:[#allocation2 + $0x60] sm:$0xf]  ;;  %10925 = vmatmul.mubr.bf16.gmra.mxu0 %v13752_v34  ;;  %v13762_v3 = vld [vmem:[#allocation3 + $0x1bc] ss:$36 sps:$4 sm:$0xff]  }
 0x3ae   : > { %7257 = vst [vmem:[#allocation3 + $0x1d8] sm:$0xf] %v6995_v9  ;;  %7531 = vst [vmem:[#allocation3 + $0x224] sm:$0xf] %v7427_v18  ;;  %v7012_v43 = vrot.slane %v7010_v46, 4  ;;  %v7004_v13 = vrot.slane %v7003_v4, 4  ;;  %10932 = vmatprep.mubr.bf16.mxu0 %v13762_v3 }
 0x3af   : > { %v6805_v12 = vld [vmem:[#allocation2 + $0x64] sm:$0xf]  ;;  %v12065_v7 = vrot.slane %v7300_v38, 9  ;;  %v7018_v29 = vrot.slane %v7016_v0, 5  ;;  %v7430_v10 = vrot.slane %v7301_v24, 5  ;;  %v7433_v8 = vrot.slane %v7302_v32, 5 }
 0x3b0   : > { %v13759_v53 = vld [vmem:[#allocation3 + $0x16c] ss:$36 sps:$4 sm:$0xff]   ;;  %v7013_v14 = vor.u32 %v7012_v43, %v7008_v17  ;;  %v7009_v36 = vsel %vm14213_vm14, %v7004_v13, %v7008_v17  ;;  %v7021_v49 = vshrl.u32 %v6804_v30, 16  ;;  %v7024_v54 = vshll.u32 %v6804_v30, 16  ;;  %v7303_v16 = vld [vmem:[#allocation2 + $0x6c] sm:$0xe] }
 0x3b1   : > { %v6806_v57 = vld [vmem:[#allocation2 + $0x68] sm:$0x1]  ;;  %10763 = vmatprep.mubr.bf16.mxu1 %v13759_v53  ;;  %v7030_v33 = vshll.u32 %v6805_v12, 16  ;;  %v7304_v50 = vld [vmem:[#allocation2 + $0x70] sm:$0xf]  ;;  %v7431_v25 = vsel %vm14184_vm13, %v12065_v7, %v7430_v10  ;;  %v7432_v35 = vrot.slane %v7430_v10, 4 }
 0x3b2   : > { %v13757_v42 = vld [vmem:[#allocation3 + $0x168] ss:$36 sps:$4 sm:$0xff]   ;;  %v7014_v59 = vrot.slane %v7013_v14, 4  ;;  %7258 = vst [vmem:[#allocation3 + $0x1fc] sm:$0xf] %v7009_v36  ;;  %v7034_v1 = vshrl.u32 %v6805_v12, 16 }
 0x3b3   : > { %v7305_v60 = vld [vmem:[#allocation2 + $0x74] sm:$0x1]  ;;  %v6807_v63 = vld [vmem:[#allocation2 + $0x6c] sm:$0xf]  ;;  %7532 = vst [vmem:[#allocation3 + $0x248] sm:$0xf] %v7431_v25  ;;  %v7434_v21 = vsel %vm14184_vm13, %v7432_v35, %v7433_v8  ;;  %10764 = vmatmul.mubr.bf16.gmra.mxu1 %v13757_v42 }
 0x3b4   : > { %v7023_v22 = vrot.slane %v7021_v49, 4  ;;  %v7026_v55 = vrot.slane %v7024_v54, 5  ;;  %v7032_v23 = vrot.slane %v7030_v33, 5  ;;  %v7040_v28 = vshll.u32 %v6806_v57, 16  ;;  %v6808_v11 = vld [vmem:[#allocation2 + $0x70] sm:$0xf] }
 0x3b5   : > { %v7572_v47 = vld [vmem:[#allocation2 + $0x9c] sm:$0xf]  ;;  %v13760_v41 = vld [vmem:[#allocation3 + $0x1b8] ss:$36 sps:$4 sm:$0xff]   ;;  %v7019_v44 = vsel %vm14213_vm14, %v7014_v59, %v7018_v29  ;;  %v7036_v26 = vrot.slane %v7034_v1, 4  ;;  %v12066_v48 = vrot.slane %v7303_v16, 9 }
 0x3b6   : > { %v7573_v31 = vld [vmem:[#allocation2 + $0xa0] sm:$0xf]  ;;  %7604 = vst [vmem:[#allocation3 + $0x36c] sm:$0xf] %v7572_v47  ;;  %v13765_v40 = vld [vmem:[#allocation3 + $0x1b4] ss:$36 sps:$4 sm:$0xff]   ;;  %v7027_v56 = vor.u32 %v7026_v55, %v7023_v22  ;;  %10933 = vmatmul.mubr.bf16.gmra.mxu0 %v13760_v41 }
 0x3b7   : > { %7259 = vst [vmem:[#allocation3 + $0x220] sm:$0xf] %v7019_v44  ;;  %7533 = vst [vmem:[#allocation3 + $0x26c] sm:$0xf] %v7434_v21  ;;  %v6809_v19 = vld [vmem:[#allocation2 + $0x74] sm:$0x1]  ;;  %v7037_v52 = vor.u32 %v7036_v26, %v7032_v23  ;;  %10771 = vmatprep.mubr.bf16.mxu1 %v13765_v40 }
 0x3b8   : > { %7605 = vst [vmem:[#allocation3 + $0x390] sm:$0xf] %v7573_v31  ;;  %v13768_v45 = vld [vmem:[#allocation3 + $0x204] ss:$36 sps:$4 sm:$0xff]   ;;  %v7042_v37 = vrot.slane %v7040_v28, 5  ;;  %v7437_v5 = vrot.slane %v7304_v50, 5 }
 0x3b9   : > { %v7306_v58 = vld [vmem:[#allocation2 + $0x78] sm:$0xe]  ;;  %v7307_v62 = vld [vmem:[#allocation2 + $0x7c] sm:$0xf]  ;;  %v7028_v38 = vrot.slane %v7027_v56, 4  ;;  %v7440_v20 = vrot.slane %v7305_v60, 5  ;;  %10940 = vmatprep.mubr.bf16.mxu0 %v13768_v45 }
 0x3ba   : > { %v7045_v6 = vshrl.u32 %v6807_v63, 16  ;;  %v7048_v27 = vshll.u32 %v6807_v63, 16  ;;  %v6740_v61 = vld [vmem:[#allocation2 + $0x90] sm:$0xf]  ;;  %v7038_v24 = vrot.slane %v7037_v52, 4  ;;  %v7438_v51 = vsel %vm14184_vm13, %v12066_v48, %v7437_v5 }
 0x3bb   : > { %v7439_v34 = vrot.slane %v7437_v5, 4  ;;  %v7054_v2 = vshll.u32 %v6808_v11, 16  ;;  %v6741_v17 = vld [vmem:[#allocation2 + $0x94] sm:$0xf]  ;;  %6772 = vst [vmem:[#allocation3 + $0x360] sm:$0xf] %v6740_v61  ;;  %v7033_v46 = vsel %vm14213_vm14, %v7028_v38, %v7032_v23 }
 0x3bc   : > { %7534 = vst [vmem:[#allocation3 + $0x290] sm:$0xf] %v7438_v51  ;;  %v7047_v0 = vrot.slane %v7045_v6, 4  ;;  %v7050_v9 = vrot.slane %v7048_v27, 5  ;;  %v7058_v18 = vshrl.u32 %v6808_v11, 16  ;;  %v7043_v30 = vsel %vm14213_vm14, %v7038_v24, %v7042_v37 }
 0x3bd   : > { %v7308_v4 = vld [vmem:[#allocation2 + $0x80] sm:$0x1]  ;;  %v6810_v32 = vld [vmem:[#allocation2 + $0x78] sm:$0xf]  ;;  %6773 = vst [vmem:[#allocation3 + $0x384] sm:$0xf] %v6741_v17  ;;  %v7441_v3 = vsel %vm14184_vm13, %v7439_v34, %v7440_v20 }
 0x3be   : > { %7260 = vst [vmem:[#allocation3 + $0x244] sm:$0xf] %v7033_v46  ;;  %v7056_v43 = vrot.slane %v7054_v2, 5  ;;  %v7064_v12 = vshll.u32 %v6809_v19, 16  ;;  %v6811_v53 = vld [vmem:[#allocation2 + $0x7c] sm:$0xf]  ;;  %v7051_v7 = vor.u32 %v7050_v9, %v7047_v0 }
 0x3bf   : > { %v13763_v13 = vld [vmem:[#allocation3 + $0x1b0] ss:$36 sps:$4 sm:$0xff]   ;;  %7261 = vst [vmem:[#allocation3 + $0x268] sm:$0xf] %v7043_v30  ;;  %7535 = vst [vmem:[#allocation3 + $0x2b4] sm:$0xf] %v7441_v3 }
 0x3c0   : > { %v7060_v14 = vrot.slane %v7058_v18, 4  ;;  %v12067_v29 = vrot.slane %v7306_v58, 9  ;;  %v7444_v10 = vrot.slane %v7307_v62, 5  ;;  %v6812_v8 = vld [vmem:[#allocation2 + $0x80] sm:$0x1]  ;;  %10772 = vmatmul.mubr.bf16.gmra.mxu1 %v13763_v13  ;;  %v7052_v54 = vrot.slane %v7051_v7, 4 }
 0x3c1   : > { %v13766_v57 = vld [vmem:[#allocation3 + $0x200] ss:$36 sps:$4 sm:$0xff]   ;;  %v13776_v49 = vld [vmem:[#allocation3 + $0x24c] ss:$36 sps:$4 sm:$0xff]   ;;  %v7066_v16 = vrot.slane %v7064_v12, 5  ;;  %v7447_v59 = vrot.slane %v7308_v4, 5 }
 0x3c2   : > { %v13773_v36 = vld [vmem:[#allocation3 + $0x1fc] ss:$36 sps:$4 sm:$0xff]   ;;  %v7061_v33 = vor.u32 %v7060_v14, %v7056_v43  ;;  %v7445_v50 = vsel %vm14184_vm13, %v12067_v29, %v7444_v10  ;;  %10941 = vmatmul.mubr.bf16.gmra.mxu0 %v13766_v57  ;;  %v7446_v42 = vrot.slane %v7444_v10, 4  ;;  %v7069_v25 = vshrl.u32 %v6810_v32, 16  ;;  %v7309_v1 = vld [vmem:[#allocation2 + $0x84] sm:$0xe] }
 0x3c3   : > { %10779 = vmatprep.mubr.bf16.mxu1 %v13773_v36  ;;  %7536 = vst [vmem:[#allocation3 + $0x2d8] sm:$0xf] %v7445_v50  ;;  %v7072_v35 = vshll.u32 %v6810_v32, 16  ;;  %v7310_v60 = vld [vmem:[#allocation2 + $0x88] sm:$0xf]  ;;  %10948 = vmatprep.mubr.bf16.mxu0 %v13776_v49  ;;  %v7057_v63 = vsel %vm14213_vm14, %v7052_v54, %v7056_v43  ;;  %v7078_v55 = vshll.u32 %v6811_v53, 16 }
 0x3c4   : > { %v7062_v22 = vrot.slane %v7061_v33, 4  ;;  %v7082_v23 = vshrl.u32 %v6811_v53, 16  ;;  %v7311_v28 = vld [vmem:[#allocation2 + $0x8c] sm:$0x1]  ;;  %v6813_v11 = vld [vmem:[#allocation2 + $0x84] sm:$0xf]  ;;  %v7448_v47 = vsel %vm14184_vm13, %v7446_v42, %v7447_v59 }
 0x3c5   : > { %7262 = vst [vmem:[#allocation3 + $0x28c] sm:$0xf] %v7057_v63  ;;  %v7071_v41 = vrot.slane %v7069_v25, 4  ;;  %v7074_v44 = vrot.slane %v7072_v35, 5  ;;  %v7088_v21 = vshll.u32 %v6812_v8, 16  ;;  %v7080_v56 = vrot.slane %v7078_v55, 5 }
 0x3c6   : > { %v6814_v26 = vld [vmem:[#allocation2 + $0x88] sm:$0xf]  ;;  %v13771_v31 = vld [vmem:[#allocation3 + $0x1f8] ss:$36 sps:$4 sm:$0xff]   ;;  %v7067_v40 = vsel %vm14213_vm14, %v7062_v22, %v7066_v16  ;;  %7537 = vst [vmem:[#allocation3 + $0x2fc] sm:$0xf] %v7448_v47 }
 0x3c7   : > { %v7084_v19 = vrot.slane %v7082_v23, 4  ;;  %v7574_v45 = vld [vmem:[#allocation2 + $0xa8] sm:$0xf]  ;;  %v13774_v52 = vld [vmem:[#allocation3 + $0x248] ss:$36 sps:$4 sm:$0xff]   ;;  %v7075_v48 = vor.u32 %v7074_v44, %v7071_v41  ;;  %v7090_v38 = vrot.slane %v7088_v21, 5 }
 0x3c8   : > { %v13779_v37 = vld [vmem:[#allocation3 + $0x244] ss:$36 sps:$4 sm:$0xff]   ;;  %7263 = vst [vmem:[#allocation3 + $0x2b0] sm:$0xf] %v7067_v40  ;;  %v6815_v5 = vld [vmem:[#allocation2 + $0x8c] sm:$0x1]  ;;  %10780 = vmatmul.mubr.bf16.gmra.mxu1 %v13771_v31 }
 0x3c9   : > { %7606 = vst [vmem:[#allocation3 + $0x3b4] sm:$0xf] %v7574_v45  ;;  %v13784_v58 = vld [vmem:[#allocation3 + $0x294] ss:$36 sps:$4 sm:$0xff]   ;;  %v7085_v62 = vor.u32 %v7084_v19, %v7080_v56  ;;  %v12068_v20 = vrot.slane %v7309_v1, 9  ;;  %v7451_v6 = vrot.slane %v7310_v60, 5  ;;  %10787 = vmatprep.mubr.bf16.mxu1 %v13779_v37 }
 0x3ca   : > { %v7076_v27 = vrot.slane %v7075_v48, 4  ;;  %v7454_v61 = vrot.slane %v7311_v28, 5  ;;  %v7093_v24 = vshrl.u32 %v6813_v11, 16  ;;  %v7096_v51 = vshll.u32 %v6813_v11, 16  ;;  %v7575_v34 = vld [vmem:[#allocation2 + $0xac] sm:$0xf]  ;;  %10949 = vmatmul.mubr.bf16.gmra.mxu0 %v13774_v52 }
 0x3cb   : > { %v7086_v2 = vrot.slane %v7085_v62, 4  ;;  %v7452_v17 = vsel %vm14184_vm13, %v12068_v20, %v7451_v6  ;;  %v7453_v46 = vrot.slane %v7451_v6, 4  ;;  %v7102_v0 = vshll.u32 %v6814_v26, 16  ;;  %v7312_v9 = vld [vmem:[#allocation2 + $0x90] sm:$0xe]  ;;  %10956 = vmatprep.mubr.bf16.mxu0 %v13784_v58 }
 0x3cc   : > { %v7313_v18 = vld [vmem:[#allocation2 + $0x94] sm:$0xf]  ;;  %7607 = vst [vmem:[#allocation3 + $0x3d8] sm:$0xf] %v7575_v34  ;;  %v6742_v4 = vld [vmem:[#allocation2 + $0x9c] sm:$0xf]  ;;  %v7081_v32 = vsel %vm14213_vm14, %v7076_v27, %v7080_v56 }
 0x3cd   : > { %7538 = vst [vmem:[#allocation3 + $0x320] sm:$0xf] %v7452_v17  ;;  %v7095_v30 = vrot.slane %v7093_v24, 4  ;;  %v7098_v3 = vrot.slane %v7096_v51, 5  ;;  %v7106_v43 = vshrl.u32 %v6814_v26, 16  ;;  %v7091_v53 = vsel %vm14213_vm14, %v7086_v2, %v7090_v38 }
 0x3ce   : > { %v6743_v12 = vld [vmem:[#allocation2 + $0xa0] sm:$0xf]  ;;  %6774 = vst [vmem:[#allocation3 + $0x3a8] sm:$0xf] %v6742_v4  ;;  %7264 = vst [vmem:[#allocation3 + $0x2d4] sm:$0xf] %v7081_v32  ;;  %v7455_v13 = vsel %vm14184_vm13, %v7453_v46, %v7454_v61 }
 0x3cf   : > { %v7104_v7 = vrot.slane %v7102_v0, 5  ;;  %v7112_v14 = vshll.u32 %v6815_v5, 16  ;;  %v7314_v29 = vld [vmem:[#allocation2 + $0x98] sm:$0x1]  ;;  %6775 = vst [vmem:[#allocation3 + $0x3cc] sm:$0xf] %v6743_v12  ;;  %v7099_v10 = vor.u32 %v7098_v3, %v7095_v30 }
 0x3d0   : > { %7265 = vst [vmem:[#allocation3 + $0x2f8] sm:$0xf] %v7091_v53  ;;  %7539 = vst [vmem:[#allocation3 + $0x344] sm:$0xf] %v7455_v13  ;;  %v7108_v8 = vrot.slane %v7106_v43, 4  ;;  %v12069_v42 = vrot.slane %v7312_v9, 9 }
 0x3d1   : > { %v6816_v57 = vld [vmem:[#allocation2 + $0x90] sm:$0xf]  ;;  %v6817_v36 = vld [vmem:[#allocation2 + $0x94] sm:$0xf]  ;;  %v7114_v49 = vrot.slane %v7112_v14, 5  ;;  %v7100_v16 = vrot.slane %v7099_v10, 4 }
 0x3d2   : > { %v6818_v54 = vld [vmem:[#allocation2 + $0x98] sm:$0x1]  ;;  %v7109_v50 = vor.u32 %v7108_v8, %v7104_v7  ;;  %v7458_v59 = vrot.slane %v7313_v18, 5  ;;  %v13782_v25 = vld [vmem:[#allocation3 + $0x290] ss:$36 sps:$4 sm:$0xff]   ;;  %v7461_v35 = vrot.slane %v7314_v29, 5 }
 0x3d3   : > { %v13777_v33 = vld [vmem:[#allocation3 + $0x240] ss:$36 sps:$4 sm:$0xff]   ;;  %v7117_v1 = vshrl.u32 %v6816_v57, 16  ;;  %v7120_v60 = vshll.u32 %v6816_v57, 16  ;;  %v7126_v63 = vshll.u32 %v6817_v36, 16  ;;  %v7105_v28 = vsel %vm14213_vm14, %v7100_v16, %v7104_v7  ;;  %10957 = vmatmul.mubr.bf16.gmra.mxu0 %v13782_v25 }
 0x3d4   : > { %v7315_v22 = vld [vmem:[#allocation2 + $0x9c] sm:$0xe]  ;;  %v13789_v55 = vld [vmem:[#allocation3 + $0x28c] ss:$36 sps:$4 sm:$0xff]   ;;  %v13792_v23 = vld [vmem:[#allocation3 + $0x2dc] ss:$36 sps:$4 sm:$0xff]   ;;  %v7459_v47 = vsel %vm14184_vm13, %v12069_v42, %v7458_v59  ;;  %10788 = vmatmul.mubr.bf16.gmra.mxu1 %v13777_v33 }
 0x3d5   : > { %v7110_v11 = vrot.slane %v7109_v50, 4  ;;  %v7460_v41 = vrot.slane %v7458_v59, 4  ;;  %7266 = vst [vmem:[#allocation3 + $0x31c] sm:$0xf] %v7105_v28  ;;  %7540 = vst [vmem:[#allocation3 + $0x368] sm:$0xf] %v7459_v47  ;;  %10795 = vmatprep.mubr.bf16.mxu1 %v13789_v55  ;;  %10964 = vmatprep.mubr.bf16.mxu0 %v13792_v23 }
 0x3d6   : > { %v7119_v44 = vrot.slane %v7117_v1, 4  ;;  %v7122_v21 = vrot.slane %v7120_v60, 5  ;;  %v7128_v26 = vrot.slane %v7126_v63, 5  ;;  %v7130_v31 = vshrl.u32 %v6817_v36, 16  ;;  %v7316_v45 = vld [vmem:[#allocation2 + $0xa0] sm:$0xf] }
 0x3d7   : > { %v7115_v40 = vsel %vm14213_vm14, %v7110_v11, %v7114_v49  ;;  %v7462_v56 = vsel %vm14184_vm13, %v7460_v41, %v7461_v35  ;;  %v7136_v19 = vshll.u32 %v6818_v54, 16  ;;  %v7317_v52 = vld [vmem:[#allocation2 + $0xa4] sm:$0x1]  ;;  %v6819_v5 = vld [vmem:[#allocation2 + $0x9c] sm:$0xf]  ;;  %v12070_v38 = vrot.slane %v7315_v22, 9 }
 0x3d8   : > { %7267 = vst [vmem:[#allocation3 + $0x340] sm:$0xf] %v7115_v40  ;;  %7541 = vst [vmem:[#allocation3 + $0x38c] sm:$0xf] %v7462_v56  ;;  %v7123_v37 = vor.u32 %v7122_v21, %v7119_v44  ;;  %v7132_v48 = vrot.slane %v7130_v31, 4  ;;  %v7465_v51 = vrot.slane %v7316_v45, 5 }
 0x3d9   : > { %v6820_v58 = vld [vmem:[#allocation2 + $0xa0] sm:$0xf]  ;;  %v7138_v62 = vrot.slane %v7136_v19, 5  ;;  %v6821_v20 = vld [vmem:[#allocation2 + $0xa4] sm:$0x1]  ;;  %v7468_v34 = vrot.slane %v7317_v52, 5 }
 0x3da   : > { %v7318_v6 = vld [vmem:[#allocation2 + $0xa8] sm:$0xe]  ;;  %v13787_v27 = vld [vmem:[#allocation3 + $0x288] ss:$36 sps:$4 sm:$0xff]   ;;  %v7124_v61 = vrot.slane %v7123_v37, 4  ;;  %v7133_v24 = vor.u32 %v7132_v48, %v7128_v26  ;;  %v7141_v9 = vshrl.u32 %v6819_v5, 16  ;;  %v7466_v12 = vsel %vm14184_vm13, %v12070_v38, %v7465_v51 }
 0x3db   : > { %v7319_v2 = vld [vmem:[#allocation2 + $0xac] sm:$0xf]  ;;  %v7576_v17 = vld [vmem:[#allocation2 + $0xb4] sm:$0xf]  ;;  %v7144_v18 = vshll.u32 %v6819_v5, 16  ;;  %v7150_v4 = vshll.u32 %v6820_v58, 16 }
 0x3dc   : > { %v13790_v46 = vld [vmem:[#allocation3 + $0x2d8] ss:$36 sps:$4 sm:$0xff]   ;;  %v7154_v32 = vshrl.u32 %v6820_v58, 16  ;;  %v7577_v30 = vld [vmem:[#allocation2 + $0xb8] sm:$0xf]  ;;  %v7129_v3 = vsel %vm14213_vm14, %v7124_v61, %v7128_v26  ;;  %v7134_v43 = vrot.slane %v7133_v24, 4  ;;  %10796 = vmatmul.mubr.bf16.gmra.mxu1 %v13787_v27 }
 0x3dd   : > { %v13795_v0 = vld [vmem:[#allocation3 + $0x2d4] ss:$36 sps:$4 sm:$0xff]   ;;  %7608 = vst [vmem:[#allocation3 + $0x3fc] sm:$0xf] %v7576_v17  ;;  %v7467_v53 = vrot.slane %v7465_v51, 4  ;;  %v7143_v14 = vrot.slane %v7141_v9, 4  ;;  %10965 = vmatmul.mubr.bf16.gmra.mxu0 %v13790_v46 }
 0x3de   : > { %7609 = vst [vmem:[#allocation3 + $0x420] sm:$0xf] %v7577_v30  ;;  %v6744_v13 = vld [vmem:[#allocation2 + $0xa8] sm:$0xf]  ;;  %v6745_v7 = vld [vmem:[#allocation2 + $0xac] sm:$0xf]  ;;  %v7139_v36 = vsel %vm14213_vm14, %v7134_v43, %v7138_v62  ;;  %10803 = vmatprep.mubr.bf16.mxu1 %v13795_v0 }
 0x3df   : > { %7268 = vst [vmem:[#allocation3 + $0x364] sm:$0xf] %v7129_v3  ;;  %7542 = vst [vmem:[#allocation3 + $0x3b0] sm:$0xf] %v7466_v12  ;;  %v7146_v29 = vrot.slane %v7144_v18, 5  ;;  %v7152_v10 = vrot.slane %v7150_v4, 5  ;;  %v7469_v49 = vsel %vm14184_vm13, %v7467_v53, %v7468_v34 }
 0x3e0   : > { %v7156_v8 = vrot.slane %v7154_v32, 4  ;;  %6776 = vst [vmem:[#allocation3 + $0x3f0] sm:$0xf] %v6744_v13  ;;  %6777 = vst [vmem:[#allocation3 + $0x414] sm:$0xf] %v6745_v7  ;;  %v7160_v54 = vshll.u32 %v6821_v20, 16 }
 0x3e1   : > { %v13800_v57 = vld [vmem:[#allocation3 + $0x324] ss:$36 sps:$4 sm:$0xff]   ;;  %v7320_v33 = vld [vmem:[#allocation2 + $0xb0] sm:$0x1]  ;;  %v12071_v16 = vrot.slane %v7318_v6, 9  ;;  %v7147_v50 = vor.u32 %v7146_v29, %v7143_v14  ;;  %v7472_v59 = vrot.slane %v7319_v2, 5 }
 0x3e2   : > { %7269 = vst [vmem:[#allocation3 + $0x388] sm:$0xf] %v7139_v36  ;;  %7543 = vst [vmem:[#allocation3 + $0x3d4] sm:$0xf] %v7469_v49  ;;  %v7157_v42 = vor.u32 %v7156_v8, %v7152_v10  ;;  %v6822_v25 = vld [vmem:[#allocation2 + $0xa8] sm:$0xf]  ;;  %10972 = vmatprep.mubr.bf16.mxu0 %v13800_v57 }
 0x3e3   : > { %v6823_v35 = vld [vmem:[#allocation2 + $0xac] sm:$0xf]  ;;  %v7162_v1 = vrot.slane %v7160_v54, 5  ;;  %v7148_v60 = vrot.slane %v7147_v50, 4  ;;  %v7473_v22 = vsel %vm14184_vm13, %v12071_v16, %v7472_v59  ;;  %v7474_v55 = vrot.slane %v7472_v59, 4 }
 0x3e4   : > { %v7158_v63 = vrot.slane %v7157_v42, 4  ;;  %v6824_v23 = vld [vmem:[#allocation2 + $0xb0] sm:$0x1]  ;;  %v13793_v28 = vld [vmem:[#allocation3 + $0x2d0] ss:$36 sps:$4 sm:$0xff]   ;;  %v7475_v11 = vrot.slane %v7320_v33, 5 }
 0x3e5   : > { %7544 = vst [vmem:[#allocation3 + $0x3f8] sm:$0xf] %v7473_v22  ;;  %v7165_v47 = vshrl.u32 %v6822_v25, 16  ;;  %v7168_v41 = vshll.u32 %v6822_v25, 16  ;;  %v7174_v44 = vshll.u32 %v6823_v35, 16  ;;  %v7153_v40 = vsel %vm14213_vm14, %v7148_v60, %v7152_v10  ;;  %10804 = vmatmul.mubr.bf16.gmra.mxu1 %v13793_v28 }
 0x3e6   : > { %v7321_v21 = vld [vmem:[#allocation2 + $0xb4] sm:$0xe]  ;;  %v13798_v26 = vld [vmem:[#allocation3 + $0x320] ss:$36 sps:$4 sm:$0xff]   ;;  %v7163_v56 = vsel %vm14213_vm14, %v7158_v63, %v7162_v1  ;;  %v7178_v19 = vshrl.u32 %v6823_v35, 16  ;;  %v7184_v45 = vshll.u32 %v6824_v23, 16  ;;  %v7476_v48 = vsel %vm14184_vm13, %v7474_v55, %v7475_v11 }
 0x3e7   : > { %v13805_v31 = vld [vmem:[#allocation3 + $0x31c] ss:$36 sps:$4 sm:$0xff]   ;;  %v7323_v37 = vld [vmem:[#allocation2 + $0xbc] sm:$0x1]  ;;  %7270 = vst [vmem:[#allocation3 + $0x3ac] sm:$0xf] %v7153_v40  ;;  %10973 = vmatmul.mubr.bf16.gmra.mxu0 %v13798_v26 }
 0x3e8   : > { %v7322_v52 = vld [vmem:[#allocation2 + $0xb8] sm:$0xf]  ;;  %7271 = vst [vmem:[#allocation3 + $0x3d0] sm:$0xf] %v7163_v56  ;;  %v7167_v5 = vrot.slane %v7165_v47, 4  ;;  %v7170_v58 = vrot.slane %v7168_v41, 5  ;;  %10811 = vmatprep.mubr.bf16.mxu1 %v13805_v31 }
 0x3e9   : > { %v7176_v62 = vrot.slane %v7174_v44, 5  ;;  %7545 = vst [vmem:[#allocation3 + $0x41c] sm:$0xf] %v7476_v48  ;;  %v7180_v38 = vrot.slane %v7178_v19, 4  ;;  %v12072_v20 = vrot.slane %v7321_v21, 9  ;;  %v7479_v6 = vrot.slane %v7322_v52, 5 }
 0x3ea   : > { %v7578_v27 = vld [vmem:[#allocation2 + $0xc0] sm:$0xf]  ;;  %v13808_v61 = vld [vmem:[#allocation3 + $0x36c] ss:$36 sps:$4 sm:$0xff]   ;;  %v7171_v24 = vor.u32 %v7170_v58, %v7167_v5  ;;  %v7482_v51 = vrot.slane %v7323_v37, 5  ;;  %v7186_v2 = vrot.slane %v7184_v45, 5 }
 0x3eb   : > { %7610 = vst [vmem:[#allocation3 + $0x444] sm:$0xf] %v7578_v27  ;;  %v7181_v34 = vor.u32 %v7180_v38, %v7176_v62  ;;  %v7480_v17 = vsel %vm14184_vm13, %v12072_v20, %v7479_v6  ;;  %v7481_v46 = vrot.slane %v7479_v6, 4  ;;  %10980 = vmatprep.mubr.bf16.mxu0 %v13808_v61  ;;  %v7579_v9 = vld [vmem:[#allocation2 + $0xc4] sm:$0xf] }
 0x3ec   : > { %v7172_v0 = vrot.slane %v7171_v24, 4  ;;  %7546 = vst [vmem:[#allocation3 + $0x440] sm:$0xf] %v7480_v17  ;;  %v6746_v18 = vld [vmem:[#allocation2 + $0xb4] sm:$0xf] }
 0x3ed   : > { %v7182_v4 = vrot.slane %v7181_v34, 4  ;;  %v7483_v32 = vsel %vm14184_vm13, %v7481_v46, %v7482_v51  ;;  %7611 = vst [vmem:[#allocation3 + $0x468] sm:$0xf] %v7579_v9  ;;  %v6747_v30 = vld [vmem:[#allocation2 + $0xb8] sm:$0xf] }
 0x3ee   : > { %6778 = vst [vmem:[#allocation3 + $0x438] sm:$0xf] %v6746_v18  ;;  %v6825_v3 = vld [vmem:[#allocation2 + $0xb4] sm:$0xf]  ;;  %v7177_v43 = vsel %vm14213_vm14, %v7172_v0, %v7176_v62  ;;  %7547 = vst [vmem:[#allocation3 + $0x464] sm:$0xf] %v7483_v32 }
 0x3ef   : > { %6779 = vst [vmem:[#allocation3 + $0x45c] sm:$0xf] %v6747_v30  ;;  %v6826_v12 = vld [vmem:[#allocation2 + $0xb8] sm:$0xf]  ;;  %v6827_v53 = vld [vmem:[#allocation2 + $0xbc] sm:$0x1]  ;;  %v7187_v29 = vsel %vm14213_vm14, %v7182_v4, %v7186_v2 }
 0x3f0   : > { %v7189_v13 = vshrl.u32 %v6825_v3, 16  ;;  %v7192_v7 = vshll.u32 %v6825_v3, 16  ;;  %v13803_v14 = vld [vmem:[#allocation3 + $0x318] ss:$36 sps:$4 sm:$0xff]   ;;  %7272 = vst [vmem:[#allocation3 + $0x3f4] sm:$0xf] %v7177_v43 }
 0x3f1   : > { %v7198_v10 = vshll.u32 %v6826_v12, 16  ;;  %v7202_v8 = vshrl.u32 %v6826_v12, 16  ;;  %v13806_v57 = vld [vmem:[#allocation3 + $0x368] ss:$36 sps:$4 sm:$0xff]   ;;  %7273 = vst [vmem:[#allocation3 + $0x418] sm:$0xf] %v7187_v29  ;;  %10812 = vmatmul.mubr.bf16.gmra.mxu1 %v13803_v14 }
 0x3f2   : > { %v13811_v36 = vld [vmem:[#allocation3 + $0x364] ss:$36 sps:$4 sm:$0xff]   ;;  %v7191_v49 = vrot.slane %v7189_v13, 4  ;;  %v13816_v54 = vld [vmem:[#allocation3 + $0x3b4] ss:$36 sps:$4 sm:$0xff]   ;;  %v7194_v33 = vrot.slane %v7192_v7, 5  ;;  %10981 = vmatmul.mubr.bf16.gmra.mxu0 %v13806_v57 }
 0x3f3   : > { %v7200_v16 = vrot.slane %v7198_v10, 5  ;;  %v7204_v50 = vrot.slane %v7202_v8, 4  ;;  %v7208_v42 = vshll.u32 %v6827_v53, 16  ;;  %v8380_v59 = vld [vmem:[#allocation2 + $0x18] sm:$0xf]  ;;  %10819 = vmatprep.mubr.bf16.mxu1 %v13811_v36  ;;  %10988 = vmatprep.mubr.bf16.mxu0 %v13816_v54 }
 0x3f4   : > { %v8381_v25 = vld [vmem:[#allocation2 + $0x1c] sm:$0xf]  ;;  %v8444_v35 = vld [vmem:[#allocation2 + $0x18] sm:$0xf]  ;;  %v7195_v1 = vor.u32 %v7194_v33, %v7191_v49  ;;  %8412 = vst [vmem:[#allocation3 + $0x18] sm:$0xf] %v8380_v59 }
 0x3f5   : > { %v7205_v60 = vor.u32 %v7204_v50, %v7200_v16  ;;  %v7210_v63 = vrot.slane %v7208_v42, 5  ;;  %8413 = vst [vmem:[#allocation3 + $0x3c] sm:$0xf] %v8381_v25  ;;  %v8445_v22 = vld [vmem:[#allocation2 + $0x1c] sm:$0xf]  ;;  %v8493_v55 = vshrl.u32 %v8444_v35, 16 }
 0x3f6   : > { %v8496_v23 = vshll.u32 %v8444_v35, 16  ;;  %v8502_v28 = vshll.u32 %v8445_v22, 16  ;;  %v8506_v11 = vshrl.u32 %v8445_v22, 16  ;;  %v7196_v47 = vrot.slane %v7195_v1, 4  ;;  %v8446_v41 = vld [vmem:[#allocation2 + $0x20] sm:$0x1] }
 0x3f7   : > { %v7612_v44 = vld [vmem:[#allocation2 + $0xc] sm:$0xf]  ;;  %v13809_v21 = vld [vmem:[#allocation3 + $0x360] ss:$36 sps:$4 sm:$0xff]   ;;  %v7206_v26 = vrot.slane %v7205_v60, 4  ;;  %v8495_v31 = vrot.slane %v8493_v55, 4 }
 0x3f8   : > { %v8498_v40 = vrot.slane %v8496_v23, 5  ;;  %v8504_v56 = vrot.slane %v8502_v28, 5  ;;  %v13814_v19 = vld [vmem:[#allocation3 + $0x3b0] ss:$36 sps:$4 sm:$0xff]   ;;  %v7201_v52 = vsel %vm14213_vm14, %v7196_v47, %v7200_v16  ;;  %v8508_v37 = vrot.slane %v8506_v11, 4 }
 0x3f9   : > { %v13821_v45 = vld [vmem:[#allocation3 + $0x3ac] ss:$36 sps:$4 sm:$0xff]   ;;  %v13824_v48 = vld [vmem:[#allocation3 + $0x3fc] ss:$36 sps:$4 sm:$0xff]   ;;  %v7211_v5 = vsel %vm14213_vm14, %v7206_v26, %v7210_v63  ;;  %7274 = vst [vmem:[#allocation3 + $0x43c] sm:$0xf] %v7201_v52  ;;  %10820 = vmatmul.mubr.bf16.gmra.mxu1 %v13809_v21 }
 0x3fa   : > { %v8499_v58 = vor.u32 %v8498_v40, %v8495_v31  ;;  %v8512_v62 = vshll.u32 %v8446_v41, 16  ;;  %v7613_v38 = vld [vmem:[#allocation2 + $0x10] sm:$0xf]  ;;  %v7614_v20 = vld [vmem:[#allocation2 + $0x14] sm:$0x1]  ;;  %v7661_v6 = vshrl.u32 %v7612_v44, 16  ;;  %v8509_v27 = vor.u32 %v8508_v37, %v8504_v56  ;;  %10827 = vmatprep.mubr.bf16.mxu1 %v13821_v45  ;;  %10989 = vmatmul.mubr.bf16.gmra.mxu0 %v13814_v19 }
 0x3fb   : > { %7275 = vst [vmem:[#allocation3 + $0x460] sm:$0xf] %v7211_v5  ;;  %v7664_v61 = vshll.u32 %v7612_v44, 16  ;;  %v7670_v24 = vshll.u32 %v7613_v38, 16  ;;  %v7674_v51 = vshrl.u32 %v7613_v38, 16  ;;  %v7680_v0 = vshll.u32 %v7614_v20, 16  ;;  %10996 = vmatprep.mubr.bf16.mxu0 %v13824_v48 }
 0x3fc   : > { %v8108_v34 = vld [vmem:[#allocation2 + $0xc] sm:$0xe]  ;;  %v8500_v2 = vrot.slane %v8499_v58, 4  ;;  %v8514_v17 = vrot.slane %v8512_v62, 5  ;;  %v7663_v46 = vrot.slane %v7661_v6, 4  ;;  %v8510_v18 = vrot.slane %v8509_v27, 4 }
 0x3fd   : > { %v8109_v9 = vld [vmem:[#allocation2 + $0x10] sm:$0xf]  ;;  %v7666_v4 = vrot.slane %v7664_v61, 5  ;;  %v7672_v32 = vrot.slane %v7670_v24, 5  ;;  %v7676_v30 = vrot.slane %v7674_v51, 4  ;;  %v7682_v12 = vrot.slane %v7680_v0, 5 }
 0x3fe   : > { %v8110_v3 = vld [vmem:[#allocation2 + $0x14] sm:$0x1]  ;;  %v8505_v43 = vsel %vm14213_vm14, %v8500_v2, %v8504_v56  ;;  %v12073_v53 = vrot.slane %v8108_v34, 9  ;;  %v8206_v13 = vrot.slane %v8109_v9, 5  ;;  %v8382_v7 = vld [vmem:[#allocation2 + $0x24] sm:$0xf]  ;;  %v8515_v14 = vsel %vm14213_vm14, %v8510_v18, %v8514_v17 }
 0x3ff   : > { %8908 = vst [vmem:[#allocation3 + $0x1c] sm:$0xf] %v8505_v43  ;;  %v7667_v29 = vor.u32 %v7666_v4, %v7663_v46  ;;  %v7677_v10 = vor.u32 %v7676_v30, %v7672_v32  ;;  %v8209_v8 = vrot.slane %v8110_v3, 5  ;;  %v8383_v57 = vld [vmem:[#allocation2 + $0x28] sm:$0xf] }
 0x400   : > { %8414 = vst [vmem:[#allocation3 + $0x60] sm:$0xf] %v8382_v7  ;;  %v8447_v36 = vld [vmem:[#allocation2 + $0x24] sm:$0xf]  ;;  %8909 = vst [vmem:[#allocation3 + $0x40] sm:$0xf] %v8515_v14  ;;  %v8207_v54 = vsel %vm14184_vm13, %v12073_v53, %v8206_v13 }
 0x401   : > { %v13819_v49 = vld [vmem:[#allocation3 + $0x3a8] ss:$36 sps:$4 sm:$0xff]   ;;  %v8208_v33 = vrot.slane %v8206_v13, 4  ;;  %8415 = vst [vmem:[#allocation3 + $0x84] sm:$0xf] %v8383_v57  ;;  %v8517_v42 = vshrl.u32 %v8447_v36, 16 }
 0x402   : > { %v8448_v16 = vld [vmem:[#allocation2 + $0x28] sm:$0xf]  ;;  %v8449_v50 = vld [vmem:[#allocation2 + $0x2c] sm:$0x1]  ;;  %v13822_v59 = vld [vmem:[#allocation3 + $0x3f8] ss:$36 sps:$4 sm:$0xff]   ;;  %10828 = vmatmul.mubr.bf16.gmra.mxu1 %v13819_v49 }
 0x403   : > { %v7668_v25 = vrot.slane %v7667_v29, 4  ;;  %v7678_v35 = vrot.slane %v7677_v10, 4  ;;  %8348 = vst [vmem:[#allocation3 + $0x14] sm:$0xf] %v8207_v54  ;;  %v8520_v1 = vshll.u32 %v8447_v36, 16  ;;  %v8526_v60 = vshll.u32 %v8448_v16, 16  ;;  %10997 = vmatmul.mubr.bf16.gmra.mxu0 %v13822_v59 }
 0x404   : > { %v13827_v63 = vld [vmem:[#allocation3 + $0x3f4] ss:$36 sps:$4 sm:$0xff]   ;;  %v13833_v22 = vld [vmem:[#allocation3 + $0x444] ss:$36 sps:$4 sm:$0xff]   ;;  %v8210_v55 = vsel %vm14184_vm13, %v8208_v33, %v8209_v8  ;;  %v8519_v23 = vrot.slane %v8517_v42, 4  ;;  %v8530_v26 = vshrl.u32 %v8448_v16, 16 }
 0x405   : > { %v7673_v28 = vsel %vm14213_vm14, %v7668_v25, %v7672_v32  ;;  %v7683_v11 = vsel %vm14213_vm14, %v7678_v35, %v7682_v12  ;;  %8349 = vst [vmem:[#allocation3 + $0x38] sm:$0xf] %v8210_v55  ;;  %v8522_v47 = vrot.slane %v8520_v1, 5  ;;  %v8528_v41 = vrot.slane %v8526_v60, 5  ;;  %v7615_v44 = vld [vmem:[#allocation2 + $0x18] sm:$0xf]  ;;  %10835 = vmatprep.mubr.bf16.mxu1 %v13827_v63  ;;  %11004 = vmatprep.mubr.bf16.mxu0 %v13833_v22 }
 0x406   : > { %v7616_v21 = vld [vmem:[#allocation2 + $0x1c] sm:$0xf]  ;;  %8076 = vst [vmem:[#allocation3 + $0x10] sm:$0xf] %v7673_v28  ;;  %8077 = vst [vmem:[#allocation3 + $0x34] sm:$0xf] %v7683_v11 }
 0x407   : > { %v8536_v31 = vshll.u32 %v8449_v50, 16  ;;  %v7617_v40 = vld [vmem:[#allocation2 + $0x20] sm:$0x1]  ;;  %v7685_v56 = vshrl.u32 %v7615_v44, 16  ;;  %v7688_v19 = vshll.u32 %v7615_v44, 16  ;;  %v8523_v45 = vor.u32 %v8522_v47, %v8519_v23 }
 0x408   : > { %v7694_v52 = vshll.u32 %v7616_v21, 16  ;;  %v7698_v37 = vshrl.u32 %v7616_v21, 16  ;;  %v7704_v48 = vshll.u32 %v7617_v40, 16  ;;  %v8532_v5 = vrot.slane %v8530_v26, 4  ;;  %v8111_v38 = vld [vmem:[#allocation2 + $0x18] sm:$0xe] }
 0x409   : > { %v7687_v58 = vrot.slane %v7685_v56, 4  ;;  %v7690_v62 = vrot.slane %v7688_v19, 5  ;;  %v8524_v20 = vrot.slane %v8523_v45, 4  ;;  %v8538_v6 = vrot.slane %v8536_v31, 5  ;;  %v13825_v27 = vld [vmem:[#allocation3 + $0x3f0] ss:$36 sps:$4 sm:$0xff]  }
 0x40a   : > { %v8533_v61 = vor.u32 %v8532_v5, %v8528_v41  ;;  %v7696_v51 = vrot.slane %v7694_v52, 5  ;;  %v7700_v34 = vrot.slane %v7698_v37, 4  ;;  %v8112_v2 = vld [vmem:[#allocation2 + $0x1c] sm:$0xf]  ;;  %v8113_v17 = vld [vmem:[#allocation2 + $0x20] sm:$0x1]  ;;  %10836 = vmatmul.mubr.bf16.gmra.mxu1 %v13825_v27 }
 0x40b   : > { %v7691_v24 = vor.u32 %v7690_v62, %v7687_v58  ;;  %v13831_v46 = vld [vmem:[#allocation3 + $0x440] ss:$36 sps:$4 sm:$0xff]   ;;  %v8529_v0 = vsel %vm14213_vm14, %v8524_v20, %v8528_v41  ;;  %v7706_v9 = vrot.slane %v7704_v48, 5  ;;  %v12074_v18 = vrot.slane %v8111_v38, 9  ;;  %v8384_v32 = vld [vmem:[#allocation2 + $0x30] sm:$0xf] }
 0x40c   : > { %v8213_v4 = vrot.slane %v8112_v2, 5  ;;  %v8534_v30 = vrot.slane %v8533_v61, 4  ;;  %8910 = vst [vmem:[#allocation3 + $0x64] sm:$0xf] %v8529_v0  ;;  %v7701_v43 = vor.u32 %v7700_v34, %v7696_v51  ;;  %v8216_v12 = vrot.slane %v8113_v17, 5  ;;  %11005 = vmatmul.mubr.bf16.gmra.mxu0 %v13831_v46 }
 0x40d   : > { %v7692_v3 = vrot.slane %v7691_v24, 4  ;;  %v8385_v53 = vld [vmem:[#allocation2 + $0x34] sm:$0xf]  ;;  %8416 = vst [vmem:[#allocation3 + $0xa8] sm:$0xf] %v8384_v32 }
 0x40e   : > { %v13839_v13 = vld [vmem:[#allocation3 + $0x43c] ss:$36 sps:$4 sm:$0xff]   ;;  %v8214_v7 = vsel %vm14184_vm13, %v12074_v18, %v8213_v4  ;;  %v8215_v14 = vrot.slane %v8213_v4, 4  ;;  %8417 = vst [vmem:[#allocation3 + $0xcc] sm:$0xf] %v8385_v53  ;;  %v8539_v10 = vsel %vm14213_vm14, %v8534_v30, %v8538_v6  ;;  %v7702_v57 = vrot.slane %v7701_v43, 4 }
 0x40f   : > { %v13846_v29 = vld [vmem:[#allocation3 + $0x1c] ss:$36 sps:$4 sm:$0xff]   ;;  %v7697_v8 = vsel %vm14213_vm14, %v7692_v3, %v7696_v51  ;;  %8350 = vst [vmem:[#allocation3 + $0x5c] sm:$0xf] %v8214_v7  ;;  %v8450_v36 = vld [vmem:[#allocation2 + $0x30] sm:$0xf]  ;;  %10843 = vmatprep.mubr.bf16.mxu1 %v13839_v13 }
 0x410   : > { %8911 = vst [vmem:[#allocation3 + $0x88] sm:$0xf] %v8539_v10  ;;  %8078 = vst [vmem:[#allocation3 + $0x58] sm:$0xf] %v7697_v8  ;;  %v8217_v49 = vsel %vm14184_vm13, %v8215_v14, %v8216_v12  ;;  %v8451_v54 = vld [vmem:[#allocation2 + $0x34] sm:$0xf]  ;;  %11206 = vmatprep.mubr.bf16.mxu0 %v13846_v29  ;;  %v7707_v42 = vsel %vm14213_vm14, %v7702_v57, %v7706_v9 }
 0x411   : > { %v8452_v33 = vld [vmem:[#allocation2 + $0x38] sm:$0x1]  ;;  %v8541_v16 = vshrl.u32 %v8450_v36, 16  ;;  %v8544_v50 = vshll.u32 %v8450_v36, 16  ;;  %8351 = vst [vmem:[#allocation3 + $0x80] sm:$0xf] %v8217_v49 }
 0x412   : > { %v8550_v59 = vshll.u32 %v8451_v54, 16  ;;  %v8554_v25 = vshrl.u32 %v8451_v54, 16  ;;  %v8560_v35 = vshll.u32 %v8452_v33, 16  ;;  %v7618_v1 = vld [vmem:[#allocation2 + $0x24] sm:$0xf] }
 0x413   : > { %8079 = vst [vmem:[#allocation3 + $0x7c] sm:$0xf] %v7707_v42  ;;  %v8543_v60 = vrot.slane %v8541_v16, 4  ;;  %v8546_v63 = vrot.slane %v8544_v50, 5  ;;  %v7619_v22 = vld [vmem:[#allocation2 + $0x28] sm:$0xf] }
 0x414   : > { %v7620_v55 = vld [vmem:[#allocation2 + $0x2c] sm:$0x1]  ;;  %v13837_v23 = vld [vmem:[#allocation3 + $0x438] ss:$36 sps:$4 sm:$0xff]   ;;  %v8552_v28 = vrot.slane %v8550_v59, 5  ;;  %v8556_v11 = vrot.slane %v8554_v25, 4 }
 0x415   : > { %v8562_v47 = vrot.slane %v8560_v35, 5  ;;  %v7709_v41 = vshrl.u32 %v7618_v1, 16  ;;  %v13844_v44 = vld [vmem:[#allocation3 + $0x18] ss:$36 sps:$4 sm:$0xff]   ;;  %v8547_v26 = vor.u32 %v8546_v63, %v8543_v60  ;;  %v7712_v31 = vshll.u32 %v7618_v1, 16  ;;  %10844 = vmatmul.mubr.bf16.gmra.mxu1 %v13837_v23 }
 0x416   : > { %v13849_v21 = vld [vmem:[#allocation3 + $0x14] ss:$36 sps:$4 sm:$0xff]   ;;  %v7718_v40 = vshll.u32 %v7619_v22, 16  ;;  %v7722_v56 = vshrl.u32 %v7619_v22, 16  ;;  %v8557_v19 = vor.u32 %v8556_v11, %v8552_v28  ;;  %v7728_v52 = vshll.u32 %v7620_v55, 16  ;;  %11207 = vmatmul.mubr.bf16.vlgmr.msra.gmra.mxu0 %v13844_v44 }
 0x417   : > { %v7711_v45 = vrot.slane %v7709_v41, 4  ;;  %v8114_v37 = vld [vmem:[#allocation2 + $0x24] sm:$0xe]  ;;  %v8115_v48 = vld [vmem:[#allocation2 + $0x28] sm:$0xf]  ;;  %v8548_v5 = vrot.slane %v8547_v26, 4  ;;  %11045 = vmatprep.mubr.bf16.mxu1 %v13849_v21 }
 0x418   : > { %v7714_v58 = vrot.slane %v7712_v31, 5  ;;  %v7720_v62 = vrot.slane %v7718_v40, 5  ;;  %v7724_v38 = vrot.slane %v7722_v56, 4  ;;  %v8386_v20 = vld [vmem:[#allocation2 + $0x3c] sm:$0xf]  ;;  %v8558_v27 = vrot.slane %v8557_v19, 4 }
 0x419   : > { %v13854_v6 = vld [vmem:[#allocation3 + $0x64] ss:$36 sps:$4 sm:$0xff]   ;;  %v8116_v61 = vld [vmem:[#allocation2 + $0x2c] sm:$0x1]  ;;  %8418 = vst [vmem:[#allocation3 + $0xf0] sm:$0xf] %v8386_v20  ;;  %v8553_v24 = vsel %vm14213_vm14, %v8548_v5, %v8552_v28 }
 0x41a   : > { %v7715_v51 = vor.u32 %v7714_v58, %v7711_v45  ;;  %v7725_v34 = vor.u32 %v7724_v38, %v7720_v62  ;;  %v7730_v2 = vrot.slane %v7728_v52, 5  ;;  %v8387_v17 = vld [vmem:[#allocation2 + $0x40] sm:$0xf]  ;;  %v8453_v46 = vld [vmem:[#allocation2 + $0x3c] sm:$0xf]  ;;  %11214 = vmatprep.mubr.bf16.mxu0 %v13854_v6  ;;  %v8563_v0 = vsel %vm14213_vm14, %v8558_v27, %v8562_v47  ;;  %v13868_v35 = vld [vmem:[%s17748_s3 + $0x230] sm:$0xff]  }
 0x41b   : > { %8912 = vst [vmem:[#allocation3 + $0xac] sm:$0xf] %v8553_v24  ;;  %v12075_v9 = vrot.slane %v8114_v37, 9  ;;  %v8220_v18 = vrot.slane %v8115_v48, 5  ;;  %8419 = vst [vmem:[#allocation3 + $0x114] sm:$0xf] %v8387_v17 }
 0x41c   : > { %8913 = vst [vmem:[#allocation3 + $0xd0] sm:$0xf] %v8563_v0  ;;  %v7716_v4 = vrot.slane %v7715_v51, 4  ;;  %v7726_v32 = vrot.slane %v7725_v34, 4  ;;  %v8223_v30 = vrot.slane %v8116_v61, 5  ;;  %v8565_v43 = vshrl.u32 %v8453_v46, 16 }
 0x41d   : > { %v8454_v3 = vld [vmem:[#allocation2 + $0x40] sm:$0xf]  ;;  %v13847_v12 = vld [vmem:[#allocation3 + $0x10] ss:$36 sps:$4 sm:$0xff]   ;;  %v8221_v53 = vsel %vm14184_vm13, %v12075_v9, %v8220_v18  ;;  %v8222_v13 = vrot.slane %v8220_v18, 4  ;;  %v8568_v14 = vshll.u32 %v8453_v46, 16 }
 0x41e   : > { %v8455_v7 = vld [vmem:[#allocation2 + $0x44] sm:$0x1]  ;;  %v8574_v29 = vshll.u32 %v8454_v3, 16  ;;  %v13858_v10 = vld [vmem:[#allocation3 + $0x5c] ss:$36 sps:$4 sm:$0xff]   ;;  %v7721_v8 = vsel %vm14213_vm14, %v7716_v4, %v7720_v62  ;;  %v7731_v57 = vsel %vm14213_vm14, %v7726_v32, %v7730_v2  ;;  %v8567_v36 = vrot.slane %v8565_v43, 4  ;;  %11046 = vmatmul.mubr.bf16.vlgmr.msra.gmra.mxu1 %v13847_v12 }
 0x41f   : > { %8352 = vst [vmem:[#allocation3 + $0xa4] sm:$0xf] %v8221_v53  ;;  %v8578_v49 = vshrl.u32 %v8454_v3, 16  ;;  %v7621_v54 = vld [vmem:[#allocation2 + $0x30] sm:$0xf]  ;;  %v8224_v50 = vsel %vm14184_vm13, %v8222_v13, %v8223_v30  ;;  %v8570_v42 = vrot.slane %v8568_v14, 5  ;;  %11053 = vmatprep.mubr.bf16.mxu1 %v13858_v10 }
 0x420   : > { %v7622_v33 = vld [vmem:[#allocation2 + $0x34] sm:$0xf]  ;;  %v13852_v16 = vld [vmem:[#allocation3 + $0x60] ss:$36 sps:$4 sm:$0xff]   ;;  %8080 = vst [vmem:[#allocation3 + $0xa0] sm:$0xf] %v7721_v8 }
 0x421   : > { %8081 = vst [vmem:[#allocation3 + $0xc4] sm:$0xf] %v7731_v57  ;;  %v8576_v59 = vrot.slane %v8574_v29, 5  ;;  %v8584_v25 = vshll.u32 %v8455_v7, 16  ;;  %v7623_v1 = vld [vmem:[#allocation2 + $0x38] sm:$0x1]  ;;  %v8571_v28 = vor.u32 %v8570_v42, %v8567_v36  ;;  %11215 = vmatmul.mubr.bf16.gmra.mxu0 %v13852_v16 }
 0x422   : > { %8353 = vst [vmem:[#allocation3 + $0xc8] sm:$0xf] %v8224_v50  ;;  %v8580_v60 = vrot.slane %v8578_v49, 4  ;;  %v7733_v63 = vshrl.u32 %v7621_v54, 16  ;;  %v7736_v22 = vshll.u32 %v7621_v54, 16  ;;  %v7742_v55 = vshll.u32 %v7622_v33, 16 }
 0x423   : > { %v8117_v23 = vld [vmem:[#allocation2 + $0x30] sm:$0xe]  ;;  %v8586_v11 = vrot.slane %v8584_v25, 5  ;;  %v7746_v47 = vshrl.u32 %v7622_v33, 16  ;;  %v7752_v41 = vshll.u32 %v7623_v1, 16  ;;  %v13968_v21 = vld [vmem:[%s17748_s3 + $0x238] sm:$0xff]  }
 0x424   : > { %v8118_v44 = vld [vmem:[#allocation2 + $0x34] sm:$0xf]  ;;  %13351 = vmatpush3.bf16.msra.mxu1 %v13968_v21  ;;  %v8581_v26 = vor.u32 %v8580_v60, %v8576_v59  ;;  %v7735_v31 = vrot.slane %v7733_v63, 4  ;;  %v7738_v40 = vrot.slane %v7736_v22, 5  ;;  %v7744_v56 = vrot.slane %v7742_v55, 5  ;;  %v13881_v37 = vld [vmem:[%s17748_s3 + $0x228] sm:$0xff]  }
 0x425   : > { %v8119_v19 = vld [vmem:[#allocation2 + $0x38] sm:$0x1]  ;;  %v13861_v45 = vld [vmem:[#allocation3 + $0xac] ss:$36 sps:$4 sm:$0xff]   ;;  %v8572_v52 = vrot.slane %v8571_v28, 4  ;;  %13352 = vmatprep.subr.bf16.mxu1 %v13868_v35  ;;  %v7748_v58 = vrot.slane %v7746_v47, 4 }
 0x426   : > { %v8582_v48 = vrot.slane %v8581_v26, 4  ;;  %v7739_v5 = vor.u32 %v7738_v40, %v7735_v31  ;;  %v7754_v62 = vrot.slane %v7752_v41, 5  ;;  %v8388_v38 = vld [vmem:[#allocation2 + $0x48] sm:$0xf]  ;;  %v13856_v20 = vld [vmem:[#allocation3 + $0x58] ss:$36 sps:$4 sm:$0xff]   ;;  %11222 = vmatprep.mubr.bf16.mxu0 %v13861_v45 }
 0x427   : > { %v8577_v6 = vsel %vm14213_vm14, %v8572_v52, %v8576_v59  ;;  %v12076_v27 = vrot.slane %v8117_v23, 9  ;;  %v8227_v61 = vrot.slane %v8118_v44, 5  ;;  %v8230_v24 = vrot.slane %v8119_v19, 5  ;;  %v8389_v51 = vld [vmem:[#allocation2 + $0x4c] sm:$0xf]  ;;  %v13894_v34 = vld [vmem:[%s17748_s3 + $0x220] sm:$0xff]   ;;  %11054 = vmatmul.mubr.bf16.gmra.mxu1 %v13856_v20 }
 0x428   : > { %8420 = vst [vmem:[#allocation3 + $0x138] sm:$0xf] %v8388_v38  ;;  %v8587_v2 = vsel %vm14213_vm14, %v8582_v48, %v8586_v11  ;;  %8914 = vst [vmem:[#allocation3 + $0xf4] sm:$0xf] %v8577_v6  ;;  %13353 = vmatpush3.bf16.msra.mxu1 %v13868_v35  ;;  %v7740_v17 = vrot.slane %v7739_v5, 4  ;;  %v7749_v46 = vor.u32 %v7748_v58, %v7744_v56  ;;  %v13907_v25 = vld [vmem:[%s17748_s3 + $0x218] sm:$0xff]  }
 0x429   : > { %8421 = vst [vmem:[#allocation3 + $0x15c] sm:$0xf] %v8389_v51  ;;  %v8456_v0 = vld [vmem:[#allocation2 + $0x48] sm:$0xf]  ;;  %v8457_v9 = vld [vmem:[#allocation2 + $0x4c] sm:$0xf]  ;;  %v8228_v32 = vsel %vm14184_vm13, %v12076_v27, %v8227_v61  ;;  %13354 = vmatprep.subr.bf16.mxu1 %v13881_v37 }
 0x42a   : > { %v13859_v18 = vld [vmem:[#allocation3 + $0xa8] ss:$36 sps:$4 sm:$0xff]   ;;  %8915 = vst [vmem:[#allocation3 + $0x118] sm:$0xf] %v8587_v2  ;;  %v8229_v30 = vrot.slane %v8227_v61, 4  ;;  %v7745_v3 = vsel %vm14213_vm14, %v7740_v17, %v7744_v56  ;;  %v7750_v43 = vrot.slane %v7749_v46, 4 }
 0x42b   : > { %v13864_v4 = vld [vmem:[#allocation3 + $0xa4] ss:$36 sps:$4 sm:$0xff]   ;;  %8354 = vst [vmem:[#allocation3 + $0xec] sm:$0xf] %v8228_v32  ;;  %v8458_v12 = vld [vmem:[#allocation2 + $0x50] sm:$0x1]  ;;  %11223 = vmatmul.mubr.bf16.gmra.mxu0 %v13859_v18 }
 0x42c   : > { %v8589_v53 = vshrl.u32 %v8456_v0, 16  ;;  %v8592_v13 = vshll.u32 %v8456_v0, 16  ;;  %8082 = vst [vmem:[#allocation3 + $0xe8] sm:$0xf] %v7745_v3  ;;  %v8231_v7 = vsel %vm14184_vm13, %v8229_v30, %v8230_v24  ;;  %v8598_v14 = vshll.u32 %v8457_v9, 16  ;;  %11061 = vmatprep.mubr.bf16.mxu1 %v13864_v4  ;;  %13355 = vmatpush3.bf16.msra.mxu1 %v13881_v37  ;;  %v13920_v31 = vld [vmem:[%s17748_s3 + $0x210] sm:$0xff]  }
 0x42d   : > { %v8602_v29 = vshrl.u32 %v8457_v9, 16  ;;  %v8608_v10 = vshll.u32 %v8458_v12, 16  ;;  %v7624_v8 = vld [vmem:[#allocation2 + $0x3c] sm:$0xf]  ;;  %v7755_v57 = vsel %vm14213_vm14, %v7750_v43, %v7754_v62  ;;  %8355 = vst [vmem:[#allocation3 + $0x110] sm:$0xf] %v8231_v7  ;;  %13356 = vmatprep.subr.bf16.mxu1 %v13894_v34 }
 0x42e   : > { %v8591_v36 = vrot.slane %v8589_v53, 4  ;;  %v8594_v49 = vrot.slane %v8592_v13, 5  ;;  %v7625_v54 = vld [vmem:[#allocation2 + $0x40] sm:$0xf]  ;;  %v7626_v33 = vld [vmem:[#allocation2 + $0x44] sm:$0x1] }
 0x42f   : > { %8083 = vst [vmem:[#allocation3 + $0x10c] sm:$0xf] %v7755_v57  ;;  %v8600_v16 = vrot.slane %v8598_v14, 5  ;;  %v8604_v50 = vrot.slane %v8602_v29, 4  ;;  %v7757_v42 = vshrl.u32 %v7624_v8, 16  ;;  %v7760_v1 = vshll.u32 %v7624_v8, 16 }
 0x430   : > { %v8120_v59 = vld [vmem:[#allocation2 + $0x3c] sm:$0xe]  ;;  %v8595_v35 = vor.u32 %v8594_v49, %v8591_v36  ;;  %v7766_v60 = vshll.u32 %v7625_v54, 16  ;;  %v7770_v63 = vshrl.u32 %v7625_v54, 16  ;;  %v8121_v22 = vld [vmem:[#allocation2 + $0x40] sm:$0xf]  ;;  %13357 = vmatpush3.bf16.msra.mxu1 %v13894_v34 }
 0x431   : > { %v13862_v55 = vld [vmem:[#allocation3 + $0xa0] ss:$36 sps:$4 sm:$0xff]   ;;  %v8605_v23 = vor.u32 %v8604_v50, %v8600_v16  ;;  %v8610_v28 = vrot.slane %v8608_v10, 5  ;;  %v7759_v11 = vrot.slane %v7757_v42, 4  ;;  %v7776_v47 = vshll.u32 %v7626_v33, 16  ;;  %13358 = vmatprep.subr.bf16.mxu1 %v13907_v25  ;;  %v13933_v46 = vld [vmem:[%s17748_s3 + $0x208] sm:$0xff]  }
 0x432   : > { %v8122_v41 = vld [vmem:[#allocation2 + $0x44] sm:$0x1]  ;;  %v13867_v44 = vld [vmem:[#allocation3 + $0xf4] ss:$36 sps:$4 sm:$0xff]   ;;  %v8596_v21 = vrot.slane %v8595_v35, 4  ;;  %v12077_v26 = vrot.slane %v8120_v59, 9  ;;  %11062 = vmatmul.mubr.bf16.gmra.mxu1 %v13862_v55 }
 0x433   : > { %v13865_v40 = vld [vmem:[#allocation3 + $0xf0] ss:$36 sps:$4 sm:$0xff]   ;;  %v8606_v56 = vrot.slane %v8605_v23, 4  ;;  %v7762_v19 = vrot.slane %v7760_v1, 5  ;;  %v7768_v45 = vrot.slane %v7766_v60, 5  ;;  %v7772_v52 = vrot.slane %v7770_v63, 4  ;;  %11230 = vmatprep.mubr.bf16.mxu0 %v13867_v44 }
 0x434   : > { %v8390_v37 = vld [vmem:[#allocation2 + $0x54] sm:$0xf]  ;;  %v8601_v48 = vsel %vm14213_vm14, %v8596_v21, %v8600_v16  ;;  %v7778_v5 = vrot.slane %v7776_v47, 5  ;;  %v8234_v58 = vrot.slane %v8121_v22, 5  ;;  %v8237_v62 = vrot.slane %v8122_v41, 5  ;;  %13359 = vmatpush3.bf16.msra.mxu1 %v13907_v25  ;;  %11231 = vmatmul.mubr.bf16.gmra.mxu0 %v13865_v40  ;;  %v13946_v1 = vld [vmem:[%s17748_s3 + $0x200] sm:$0xff]  }
 0x435   : > { %v8391_v38 = vld [vmem:[#allocation2 + $0x58] sm:$0xf]  ;;  %8422 = vst [vmem:[#allocation3 + $0x180] sm:$0xf] %v8390_v37  ;;  %v8611_v20 = vsel %vm14213_vm14, %v8606_v56, %v8610_v28  ;;  %8916 = vst [vmem:[#allocation3 + $0x13c] sm:$0xf] %v8601_v48  ;;  %v7763_v6 = vor.u32 %v7762_v19, %v7759_v11  ;;  %v7773_v27 = vor.u32 %v7772_v52, %v7768_v45  ;;  %13360 = vmatprep.subr.bf16.mxu1 %v13920_v31 }
 0x436   : > { %8423 = vst [vmem:[#allocation3 + $0x1a4] sm:$0xf] %v8391_v38  ;;  %v8459_v61 = vld [vmem:[#allocation2 + $0x54] sm:$0xf]  ;;  %v8460_v24 = vld [vmem:[#allocation2 + $0x58] sm:$0xf]  ;;  %v8235_v2 = vsel %vm14184_vm13, %v12077_v26, %v8234_v58 }
 0x437   : > { %v8461_v51 = vld [vmem:[#allocation2 + $0x5c] sm:$0x1]  ;;  %v13871_v34 = vld [vmem:[#allocation3 + $0xec] ss:$36 sps:$4 sm:$0xff]   ;;  %8917 = vst [vmem:[#allocation3 + $0x160] sm:$0xf] %v8611_v20 }
 0x438   : > { %v8236_v17 = vrot.slane %v8234_v58, 4  ;;  %v7764_v0 = vrot.slane %v7763_v6, 4  ;;  %v7774_v9 = vrot.slane %v7773_v27, 4  ;;  %8356 = vst [vmem:[#allocation3 + $0x134] sm:$0xf] %v8235_v2  ;;  %v8613_v18 = vshrl.u32 %v8459_v61, 16  ;;  %11069 = vmatprep.mubr.bf16.mxu1 %v13871_v34  ;;  %13361 = vmatpush3.bf16.msra.mxu1 %v13920_v31 }
 0x439   : > { %v8616_v4 = vshll.u32 %v8459_v61, 16  ;;  %v7627_v32 = vld [vmem:[#allocation2 + $0x48] sm:$0xf]  ;;  %v8622_v3 = vshll.u32 %v8460_v24, 16  ;;  %v8626_v43 = vshrl.u32 %v8460_v24, 16  ;;  %v8632_v12 = vshll.u32 %v8461_v51, 16  ;;  %13362 = vmatprep.subr.bf16.mxu1 %v13933_v46 }
 0x43a   : > { %v8238_v30 = vsel %vm14184_vm13, %v8236_v17, %v8237_v62  ;;  %v7628_v53 = vld [vmem:[#allocation2 + $0x4c] sm:$0xf]  ;;  %v13869_v13 = vld [vmem:[#allocation3 + $0xe8] ss:$36 sps:$4 sm:$0xff]   ;;  %v7769_v7 = vsel %vm14213_vm14, %v7764_v0, %v7768_v45  ;;  %v7779_v14 = vsel %vm14213_vm14, %v7774_v9, %v7778_v5  ;;  %v8615_v29 = vrot.slane %v8613_v18, 4 }
 0x43b   : > { %8357 = vst [vmem:[#allocation3 + $0x158] sm:$0xf] %v8238_v30  ;;  %v8618_v10 = vrot.slane %v8616_v4, 5  ;;  %v7629_v8 = vld [vmem:[#allocation2 + $0x50] sm:$0x1]  ;;  %v8624_v36 = vrot.slane %v8622_v3, 5  ;;  %11070 = vmatmul.mubr.bf16.gmra.mxu1 %v13869_v13 }
 0x43c   : > { %v8123_v57 = vld [vmem:[#allocation2 + $0x48] sm:$0xe]  ;;  %8084 = vst [vmem:[#allocation3 + $0x130] sm:$0xf] %v7769_v7  ;;  %8085 = vst [vmem:[#allocation3 + $0x154] sm:$0xf] %v7779_v14  ;;  %13363 = vmatpush3.bf16.msra.mxu1 %v13933_v46 }
 0x43d   : > { %v8628_v49 = vrot.slane %v8626_v43, 4  ;;  %v8634_v54 = vrot.slane %v8632_v12, 5  ;;  %v7781_v33 = vshrl.u32 %v7627_v32, 16  ;;  %v8124_v16 = vld [vmem:[#allocation2 + $0x4c] sm:$0xf]  ;;  %v8619_v50 = vor.u32 %v8618_v10, %v8615_v29  ;;  %13364 = vmatprep.subr.bf16.mxu1 %v13946_v1 }
 0x43e   : > { %v7784_v42 = vshll.u32 %v7627_v32, 16  ;;  %v7790_v59 = vshll.u32 %v7628_v53, 16  ;;  %v7794_v25 = vshrl.u32 %v7628_v53, 16  ;;  %v8125_v35 = vld [vmem:[#allocation2 + $0x50] sm:$0x1]  ;;  %v7800_v22 = vshll.u32 %v7629_v8, 16 }
 0x43f   : > { %v8629_v60 = vor.u32 %v8628_v49, %v8624_v36  ;;  %v7783_v63 = vrot.slane %v7781_v33, 4  ;;  %v12078_v55 = vrot.slane %v8123_v57, 9  ;;  %v8392_v23 = vld [vmem:[#allocation2 + $0x60] sm:$0xf]  ;;  %v13872_v28 = vld [vmem:[#allocation3 + $0x138] ss:$36 sps:$4 sm:$0xff]  }
 0x440   : > { %v13874_v11 = vld [vmem:[#allocation3 + $0x13c] ss:$36 sps:$4 sm:$0xff]   ;;  %v8620_v47 = vrot.slane %v8619_v50, 4  ;;  %8424 = vst [vmem:[#allocation3 + $0x1c8] sm:$0xf] %v8392_v23  ;;  %v7786_v44 = vrot.slane %v7784_v42, 5  ;;  %13365 = vmatpush3.bf16.msra.mxu1 %v13946_v1 }
 0x441   : > { %v8630_v41 = vrot.slane %v8629_v60, 4  ;;  %v7792_v21 = vrot.slane %v7790_v59, 5  ;;  %v7796_v26 = vrot.slane %v7794_v25, 4  ;;  %v8393_v31 = vld [vmem:[#allocation2 + $0x64] sm:$0xf]  ;;  %11238 = vmatprep.mubr.bf16.mxu0 %v13874_v11  ;;  %v7802_v56 = vrot.slane %v7800_v22, 5 }
 0x442   : > { %v8625_v40 = vsel %vm14213_vm14, %v8620_v47, %v8624_v36  ;;  %v8241_v19 = vrot.slane %v8124_v16, 5  ;;  %v8244_v45 = vrot.slane %v8125_v35, 5  ;;  %8425 = vst [vmem:[#allocation3 + $0x1ec] sm:$0xf] %v8393_v31  ;;  %v8462_v52 = vld [vmem:[#allocation2 + $0x60] sm:$0xf]  ;;  %11239 = vmatmul.mubr.bf16.gmra.mxu0 %v13872_v28  ;;  %v7787_v48 = vor.u32 %v7786_v44, %v7783_v63 }
 0x443   : > { %v8635_v37 = vsel %vm14213_vm14, %v8630_v41, %v8634_v54  ;;  %8918 = vst [vmem:[#allocation3 + $0x184] sm:$0xf] %v8625_v40  ;;  %v7797_v5 = vor.u32 %v7796_v26, %v7792_v21  ;;  %v8463_v58 = vld [vmem:[#allocation2 + $0x64] sm:$0xf]  ;;  %v8464_v62 = vld [vmem:[#allocation2 + $0x68] sm:$0x1] }
 0x444   : > { %v8637_v38 = vshrl.u32 %v8462_v52, 16  ;;  %v13875_v20 = vld [vmem:[#allocation3 + $0x130] ss:$36 sps:$4 sm:$0xff]   ;;  %8919 = vst [vmem:[#allocation3 + $0x1a8] sm:$0xf] %v8635_v37  ;;  %v8242_v6 = vsel %vm14184_vm13, %v12078_v55, %v8241_v19  ;;  %v8243_v27 = vrot.slane %v8241_v19, 4 }
 0x445   : > { %v8640_v61 = vshll.u32 %v8462_v52, 16  ;;  %v13877_v24 = vld [vmem:[#allocation3 + $0x134] ss:$36 sps:$4 sm:$0xff]   ;;  %v7788_v51 = vrot.slane %v7787_v48, 4  ;;  %v7798_v34 = vrot.slane %v7797_v5, 4  ;;  %v8646_v17 = vshll.u32 %v8463_v58, 16 }
 0x446   : > { %8358 = vst [vmem:[#allocation3 + $0x17c] sm:$0xf] %v8242_v6  ;;  %v8639_v2 = vrot.slane %v8637_v38, 4  ;;  %v8245_v46 = vsel %vm14184_vm13, %v8243_v27, %v8244_v45  ;;  %v8650_v9 = vshrl.u32 %v8463_v58, 16  ;;  %v8656_v18 = vshll.u32 %v8464_v62, 16  ;;  %11077 = vmatprep.mubr.bf16.mxu1 %v13877_v24 }
 0x447   : > { %v8642_v0 = vrot.slane %v8640_v61, 5  ;;  %v7630_v4 = vld [vmem:[#allocation2 + $0x54] sm:$0xf]  ;;  %v7793_v32 = vsel %vm14213_vm14, %v7788_v51, %v7792_v21  ;;  %v7803_v30 = vsel %vm14213_vm14, %v7798_v34, %v7802_v56  ;;  %8359 = vst [vmem:[#allocation3 + $0x1a0] sm:$0xf] %v8245_v46  ;;  %v8648_v3 = vrot.slane %v8646_v17, 5  ;;  %11078 = vmatmul.mubr.bf16.gmra.mxu1 %v13875_v20  ;;  %v12958_v21 = vpop.f32.mrf.mxu0 }
 0x448   : > { %v7631_v43 = vld [vmem:[#allocation2 + $0x58] sm:$0xf]  ;;  %v7632_v12 = vld [vmem:[#allocation2 + $0x5c] sm:$0x1]  ;;  %v7805_v53 = vshrl.u32 %v7630_v4, 16  ;;  %v8652_v7 = vrot.slane %v8650_v9, 4 }
 0x449   : > { %8086 = vst [vmem:[#allocation3 + $0x178] sm:$0xf] %v7793_v32  ;;  %8087 = vst [vmem:[#allocation3 + $0x19c] sm:$0xf] %v7803_v30  ;;  %v8643_v13 = vor.u32 %v8642_v0, %v8639_v2  ;;  %v7808_v14 = vshll.u32 %v7630_v4, 16  ;;  %v7814_v8 = vshll.u32 %v7631_v43, 16  ;;  %v12959_v58 = vpop.f32.mrf.mxu0 }
 0x44a   : > { %v8126_v29 = vld [vmem:[#allocation2 + $0x54] sm:$0xe]  ;;  %v7807_v10 = vrot.slane %v7805_v53, 4  ;;  %v7818_v57 = vshrl.u32 %v7631_v43, 16  ;;  %v7824_v36 = vshll.u32 %v7632_v12, 16  ;;  %v8653_v33 = vor.u32 %v8652_v7, %v8648_v3 }
 0x44b   : > { %v8127_v49 = vld [vmem:[#allocation2 + $0x58] sm:$0xf]  ;;  %v8644_v54 = vrot.slane %v8643_v13, 4  ;;  %v8658_v16 = vrot.slane %v8656_v18, 5  ;;  %v7810_v50 = vrot.slane %v7808_v14, 5  ;;  %v7816_v35 = vrot.slane %v7814_v8, 5  ;;  %v16721_v32 = vpop.f32.mrf.mxu0 }
 0x44c   : > { %v8128_v42 = vld [vmem:[#allocation2 + $0x5c] sm:$0x1]  ;;  %v8654_v60 = vrot.slane %v8653_v33, 4  ;;  %v7820_v22 = vrot.slane %v7818_v57, 4  ;;  %v8394_v55 = vld [vmem:[#allocation2 + $0x6c] sm:$0xf]  ;;  %v16719_v4 = vadd.f32 %v12959_v58, %v12958_v21  ;;  %v12846_v21 = vpop.f32.mrf.mxu1 }
 0x44d   : > { %v13878_v59 = vld [vmem:[#allocation3 + $0x180] ss:$36 sps:$4 sm:$0xff]   ;;  %v8649_v1 = vsel %vm14213_vm14, %v8644_v54, %v8648_v3  ;;  %v7811_v63 = vor.u32 %v7810_v50, %v7807_v10  ;;  %v8395_v23 = vld [vmem:[#allocation2 + $0x70] sm:$0xf]  ;;  %v7826_v28 = vrot.slane %v7824_v36, 5  ;;  %v12079_v11 = vrot.slane %v8126_v29, 9  ;;  %v16723_v50 = vpop.f32.mrf.mxu0 }
 0x44e   : > { %v13880_v25 = vld [vmem:[#allocation3 + $0x184] ss:$36 sps:$4 sm:$0xff]   ;;  %8920 = vst [vmem:[#allocation3 + $0x1cc] sm:$0xf] %v8649_v1  ;;  %v8248_v47 = vrot.slane %v8127_v49, 5  ;;  %v8251_v41 = vrot.slane %v8128_v42, 5  ;;  %v8659_v26 = vsel %vm14213_vm14, %v8654_v60, %v8658_v16  ;;  %v7821_v40 = vor.u32 %v7820_v22, %v7816_v35  ;;  %v12847_v58 = vpop.f32.mrf.mxu1 }
 0x44f   : > { %11246 = vmatprep.mubr.bf16.mxu0 %v13880_v25  ;;  %8426 = vst [vmem:[#allocation3 + $0x210] sm:$0xf] %v8394_v55  ;;  %8427 = vst [vmem:[#allocation3 + $0x234] sm:$0xf] %v8395_v23  ;;  %v8465_v44 = vld [vmem:[#allocation2 + $0x6c] sm:$0xf] }
 0x450   : > { %11247 = vmatmul.mubr.bf16.gmra.mxu0 %v13878_v59  ;;  %v7812_v31 = vrot.slane %v7811_v63, 4  ;;  %v8466_v56 = vld [vmem:[#allocation2 + $0x70] sm:$0xf]  ;;  %v8467_v19 = vld [vmem:[#allocation2 + $0x74] sm:$0x1]  ;;  %v8661_v45 = vshrl.u32 %v8465_v44, 16  ;;  %v8249_v37 = vsel %vm14184_vm13, %v12079_v11, %v8248_v47 }
 0x451   : > { %v13882_v52 = vld [vmem:[#allocation3 + $0x178] ss:$36 sps:$4 sm:$0xff]   ;;  %8921 = vst [vmem:[#allocation3 + $0x1f0] sm:$0xf] %v8659_v26  ;;  %v8250_v48 = vrot.slane %v8248_v47, 4  ;;  %v8664_v5 = vshll.u32 %v8465_v44, 16 }
 0x452   : > { %v13884_v62 = vld [vmem:[#allocation3 + $0x17c] ss:$36 sps:$4 sm:$0xff]   ;;  %v7817_v38 = vsel %vm14213_vm14, %v7812_v31, %v7816_v35  ;;  %v7822_v20 = vrot.slane %v7821_v40, 4  ;;  %8360 = vst [vmem:[#allocation3 + $0x1c4] sm:$0xf] %v8249_v37  ;;  %v8663_v6 = vrot.slane %v8661_v45, 4 }
 0x453   : > { %v8670_v27 = vshll.u32 %v8466_v56, 16  ;;  %8088 = vst [vmem:[#allocation3 + $0x1c0] sm:$0xf] %v7817_v38  ;;  %v8252_v61 = vsel %vm14184_vm13, %v8250_v48, %v8251_v41  ;;  %v8666_v24 = vrot.slane %v8664_v5, 5  ;;  %v8674_v51 = vshrl.u32 %v8466_v56, 16  ;;  %11085 = vmatprep.mubr.bf16.mxu1 %v13884_v62 }
 0x454   : > { %v8680_v34 = vshll.u32 %v8467_v19, 16  ;;  %v7633_v2 = vld [vmem:[#allocation2 + $0x60] sm:$0xf]  ;;  %v7827_v17 = vsel %vm14213_vm14, %v7822_v20, %v7826_v28  ;;  %8361 = vst [vmem:[#allocation3 + $0x1e8] sm:$0xf] %v8252_v61  ;;  %11086 = vmatmul.mubr.bf16.gmra.mxu1 %v13882_v52  ;;  %v12964_v19 = vpop.f32.mrf.mxu0 }
 0x455   : > { %v8672_v46 = vrot.slane %v8670_v27, 5  ;;  %v7634_v0 = vld [vmem:[#allocation2 + $0x64] sm:$0xf]  ;;  %v7635_v9 = vld [vmem:[#allocation2 + $0x68] sm:$0x1]  ;;  %v7829_v18 = vshrl.u32 %v7633_v2, 16  ;;  %v8667_v30 = vor.u32 %v8666_v24, %v8663_v6 }
 0x456   : > { %8089 = vst [vmem:[#allocation3 + $0x1e4] sm:$0xf] %v7827_v17  ;;  %v8676_v3 = vrot.slane %v8674_v51, 4  ;;  %v8682_v43 = vrot.slane %v8680_v34, 5  ;;  %v7832_v12 = vshll.u32 %v7633_v2, 16  ;;  %v7838_v7 = vshll.u32 %v7634_v0, 16 }
 0x457   : > { %v8129_v53 = vld [vmem:[#allocation2 + $0x60] sm:$0xe]  ;;  %v7831_v13 = vrot.slane %v7829_v18, 4  ;;  %v7842_v14 = vshrl.u32 %v7634_v0, 16  ;;  %v7848_v29 = vshll.u32 %v7635_v9, 16  ;;  %v8668_v10 = vrot.slane %v8667_v30, 4 }
 0x458   : > { %v8677_v8 = vor.u32 %v8676_v3, %v8672_v46  ;;  %v7834_v57 = vrot.slane %v7832_v12, 5  ;;  %v8130_v36 = vld [vmem:[#allocation2 + $0x64] sm:$0xf]  ;;  %v8131_v49 = vld [vmem:[#allocation2 + $0x68] sm:$0x1]  ;;  %v7840_v16 = vrot.slane %v7838_v7, 5  ;;  %v16737_v17 = vadd.f32 %v12847_v58, %v12846_v21 }
 0x459   : > { %v13885_v54 = vld [vmem:[#allocation3 + $0x1c8] ss:$36 sps:$4 sm:$0xff]   ;;  %v8673_v42 = vsel %vm14213_vm14, %v8668_v10, %v8672_v46  ;;  %v7844_v35 = vrot.slane %v7842_v14, 4  ;;  %v8396_v1 = vld [vmem:[#allocation2 + $0x78] sm:$0xf]  ;;  %v12080_v63 = vrot.slane %v8129_v53, 9  ;;  %v12849_v46 = vpop.f32.mrf.mxu1 }
 0x45a   : > { %v13887_v33 = vld [vmem:[#allocation3 + $0x1cc] ss:$36 sps:$4 sm:$0xff]   ;;  %v8678_v59 = vrot.slane %v8677_v8, 4  ;;  %v7835_v25 = vor.u32 %v7834_v57, %v7831_v13  ;;  %v8397_v60 = vld [vmem:[#allocation2 + $0x7c] sm:$0xf]  ;;  %v8255_v22 = vrot.slane %v8130_v36, 5 }
 0x45b   : > { %11254 = vmatprep.mubr.bf16.mxu0 %v13887_v33  ;;  %8922 = vst [vmem:[#allocation3 + $0x214] sm:$0xf] %v8673_v42  ;;  %v8258_v55 = vrot.slane %v8131_v49, 5  ;;  %8428 = vst [vmem:[#allocation3 + $0x258] sm:$0xf] %v8396_v1  ;;  %v7845_v11 = vor.u32 %v7844_v35, %v7840_v16  ;;  %v7850_v47 = vrot.slane %v7848_v29, 5  ;;  %v12850_v29 = vpop.f32.mrf.mxu1 }
 0x45c   : > { %8429 = vst [vmem:[#allocation3 + $0x27c] sm:$0xf] %v8397_v60  ;;  %11255 = vmatmul.mubr.bf16.gmra.mxu0 %v13885_v54  ;;  %v8683_v23 = vsel %vm14213_vm14, %v8678_v59, %v8682_v43  ;;  %v7836_v28 = vrot.slane %v7835_v25, 4  ;;  %v8468_v41 = vld [vmem:[#allocation2 + $0x78] sm:$0xf]  ;;  %v8256_v40 = vsel %vm14184_vm13, %v12080_v63, %v8255_v22  ;;  %v8257_v56 = vrot.slane %v8255_v22, 4  ;;  %v12965_v43 = vpop.f32.mrf.mxu0 }
 0x45d   : > { %v8469_v44 = vld [vmem:[#allocation2 + $0x7c] sm:$0xf]  ;;  %8923 = vst [vmem:[#allocation3 + $0x238] sm:$0xf] %v8683_v23  ;;  %v7846_v52 = vrot.slane %v7845_v11, 4  ;;  %v8685_v48 = vshrl.u32 %v8468_v41, 16  ;;  %v16739_v42 = vadd.f32 %v12850_v29, %v12849_v46  ;;  %v16741_v59 = vadd.f32 %v12965_v43, %v12964_v19 }
 0x45e   : > { %v13888_v26 = vld [vmem:[#allocation3 + $0x1c0] ss:$36 sps:$4 sm:$0xff]   ;;  %v7841_v45 = vsel %vm14213_vm14, %v7836_v28, %v7840_v16  ;;  %8362 = vst [vmem:[#allocation3 + $0x20c] sm:$0xf] %v8256_v40  ;;  %v8470_v37 = vld [vmem:[#allocation2 + $0x80] sm:$0x1]  ;;  %v8259_v62 = vsel %vm14184_vm13, %v8257_v56, %v8258_v55 }
 0x45f   : > { %v13890_v31 = vld [vmem:[#allocation3 + $0x1c4] ss:$36 sps:$4 sm:$0xff]   ;;  %v8688_v5 = vshll.u32 %v8468_v41, 16  ;;  %8090 = vst [vmem:[#allocation3 + $0x208] sm:$0xf] %v7841_v45  ;;  %v8694_v38 = vshll.u32 %v8469_v44, 16  ;;  %v7851_v61 = vsel %vm14213_vm14, %v7846_v52, %v7850_v47  ;;  %v16745_v47 = vpop.f32.mrf.mxu0 }
 0x460   : > { %11093 = vmatprep.mubr.bf16.mxu1 %v13890_v31  ;;  %v8698_v20 = vshrl.u32 %v8469_v44, 16  ;;  %v8704_v6 = vshll.u32 %v8470_v37, 16  ;;  %v7636_v27 = vld [vmem:[#allocation2 + $0x6c] sm:$0xf]  ;;  %8363 = vst [vmem:[#allocation3 + $0x230] sm:$0xf] %v8259_v62  ;;  %v12852_v37 = vpop.f32.mrf.mxu1 }
 0x461   : > { %11094 = vmatmul.mubr.bf16.gmra.mxu1 %v13888_v26  ;;  %v8687_v24 = vrot.slane %v8685_v48, 4  ;;  %v8690_v51 = vrot.slane %v8688_v5, 5  ;;  %v7637_v34 = vld [vmem:[#allocation2 + $0x70] sm:$0xf]  ;;  %v7638_v2 = vld [vmem:[#allocation2 + $0x74] sm:$0x1] }
 0x462   : > { %8091 = vst [vmem:[#allocation3 + $0x22c] sm:$0xf] %v7851_v61  ;;  %v8696_v0 = vrot.slane %v8694_v38, 5  ;;  %v8700_v9 = vrot.slane %v8698_v20, 4  ;;  %v8706_v18 = vrot.slane %v8704_v6, 5  ;;  %v7853_v30 = vshrl.u32 %v7636_v27, 16 }
 0x463   : > { %v8132_v3 = vld [vmem:[#allocation2 + $0x6c] sm:$0xe]  ;;  %v8691_v12 = vor.u32 %v8690_v51, %v8687_v24  ;;  %v7856_v53 = vshll.u32 %v7636_v27, 16  ;;  %v7862_v13 = vshll.u32 %v7637_v34, 16  ;;  %v7866_v7 = vshrl.u32 %v7637_v34, 16  ;;  %v12853_v51 = vpop.f32.mrf.mxu1  ;;  %v16753_v34 = vpop.f32.mrf.mxu0 }
 0x464   : > { %v8133_v14 = vld [vmem:[#allocation2 + $0x70] sm:$0xf]  ;;  %v8701_v10 = vor.u32 %v8700_v9, %v8696_v0  ;;  %v7855_v8 = vrot.slane %v7853_v30, 4  ;;  %v7872_v57 = vshll.u32 %v7638_v2, 16  ;;  %v8134_v36 = vld [vmem:[#allocation2 + $0x74] sm:$0x1] }
 0x465   : > { %v12081_v49 = vrot.slane %v8132_v3, 9  ;;  %v13891_v54 = vld [vmem:[#allocation3 + $0x210] ss:$36 sps:$4 sm:$0xff]   ;;  %v8692_v16 = vrot.slane %v8691_v12, 4  ;;  %v7858_v35 = vrot.slane %v7856_v53, 5  ;;  %v7864_v1 = vrot.slane %v7862_v13, 5  ;;  %v12855_v13 = vpop.f32.mrf.mxu1 }
 0x466   : > { %v13893_v33 = vld [vmem:[#allocation3 + $0x214] ss:$36 sps:$4 sm:$0xff]   ;;  %v8702_v25 = vrot.slane %v8701_v10, 4  ;;  %v7868_v60 = vrot.slane %v7866_v7, 4  ;;  %v8398_v63 = vld [vmem:[#allocation2 + $0x84] sm:$0xf] }
 0x467   : > { %11262 = vmatprep.mubr.bf16.mxu0 %v13893_v33  ;;  %v8697_v22 = vsel %vm14213_vm14, %v8692_v16, %v8696_v0  ;;  %v7874_v55 = vrot.slane %v7872_v57, 5  ;;  %v8262_v23 = vrot.slane %v8133_v14, 5  ;;  %v8265_v28 = vrot.slane %v8134_v36, 5  ;;  %v8399_v11 = vld [vmem:[#allocation2 + $0x88] sm:$0xf]  ;;  %v16759_v16 = vpop.f32.mrf.mxu0 }
 0x468   : > { %8430 = vst [vmem:[#allocation3 + $0x2a0] sm:$0xf] %v8398_v63  ;;  %11263 = vmatmul.mubr.bf16.gmra.mxu0 %v13891_v54  ;;  %v8707_v41 = vsel %vm14213_vm14, %v8702_v25, %v8706_v18  ;;  %8924 = vst [vmem:[#allocation3 + $0x25c] sm:$0xf] %v8697_v22  ;;  %v7859_v44 = vor.u32 %v7858_v35, %v7855_v8  ;;  %v7869_v21 = vor.u32 %v7868_v60, %v7864_v1  ;;  %v8471_v26 = vld [vmem:[#allocation2 + $0x84] sm:$0xf] }
 0x469   : > { %8431 = vst [vmem:[#allocation3 + $0x2c4] sm:$0xf] %v8399_v11  ;;  %v8472_v31 = vld [vmem:[#allocation2 + $0x88] sm:$0xf]  ;;  %v8473_v40 = vld [vmem:[#allocation2 + $0x8c] sm:$0x1]  ;;  %v8263_v45 = vsel %vm14184_vm13, %v12081_v49, %v8262_v23  ;;  %v16761_v60 = vadd.f32 %v12853_v51, %v12852_v37  ;;  %v12856_v11 = vpop.f32.mrf.mxu1 }
 0x46a   : > { %v13895_v56 = vld [vmem:[#allocation3 + $0x208] ss:$36 sps:$4 sm:$0xff]   ;;  %8925 = vst [vmem:[#allocation3 + $0x280] sm:$0xf] %v8707_v41  ;;  %v8264_v52 = vrot.slane %v8262_v23, 4  ;;  %v7860_v48 = vrot.slane %v7859_v44, 4  ;;  %v16763_v41 = vpop.f32.mrf.mxu0 }
 0x46b   : > { %v13897_v19 = vld [vmem:[#allocation3 + $0x20c] ss:$36 sps:$4 sm:$0xff]   ;;  %v7870_v5 = vrot.slane %v7869_v21, 4  ;;  %8364 = vst [vmem:[#allocation3 + $0x254] sm:$0xf] %v8263_v45  ;;  %v8709_v58 = vshrl.u32 %v8471_v26, 16 }
 0x46c   : > { %v8712_v62 = vshll.u32 %v8471_v26, 16  ;;  %v7639_v38 = vld [vmem:[#allocation2 + $0x78] sm:$0xf]  ;;  %11101 = vmatprep.mubr.bf16.mxu1 %v13897_v19  ;;  %v8266_v20 = vsel %vm14184_vm13, %v8264_v52, %v8265_v28  ;;  %v8718_v6 = vshll.u32 %v8472_v31, 16  ;;  %v8722_v27 = vshrl.u32 %v8472_v31, 16 }
 0x46d   : > { %v8728_v61 = vshll.u32 %v8473_v40, 16  ;;  %v7640_v24 = vld [vmem:[#allocation2 + $0x7c] sm:$0xf]  ;;  %11102 = vmatmul.mubr.bf16.gmra.mxu1 %v13895_v56  ;;  %v7865_v2 = vsel %vm14213_vm14, %v7860_v48, %v7864_v1  ;;  %v7875_v46 = vsel %vm14213_vm14, %v7870_v5, %v7874_v55  ;;  %8365 = vst [vmem:[#allocation3 + $0x278] sm:$0xf] %v8266_v20  ;;  %v8711_v0 = vrot.slane %v8709_v58, 4 }
 0x46e   : > { %v8714_v9 = vrot.slane %v8712_v62, 5  ;;  %v7641_v18 = vld [vmem:[#allocation2 + $0x80] sm:$0x1]  ;;  %v8135_v30 = vld [vmem:[#allocation2 + $0x78] sm:$0xe]  ;;  %v8720_v3 = vrot.slane %v8718_v6, 5  ;;  %v16771_v52 = vadd.f32 %v16723_v50, %v16721_v32  ;;  %v16775_v6 = vadd.f32 %v12856_v11, %v12855_v13 }
 0x46f   : > { %8092 = vst [vmem:[#allocation3 + $0x250] sm:$0xf] %v7865_v2  ;;  %8093 = vst [vmem:[#allocation3 + $0x274] sm:$0xf] %v7875_v46  ;;  %v8724_v43 = vrot.slane %v8722_v27, 4  ;;  %v8730_v12 = vrot.slane %v8728_v61, 5  ;;  %v12973_v27 = vpop.f32.mrf.mxu0 }
 0x470   : > { %v7877_v53 = vshrl.u32 %v7639_v38, 16  ;;  %v8715_v7 = vor.u32 %v8714_v9, %v8711_v0  ;;  %v7880_v14 = vshll.u32 %v7639_v38, 16  ;;  %v7886_v29 = vshll.u32 %v7640_v24, 16  ;;  %v8136_v8 = vld [vmem:[#allocation2 + $0x7c] sm:$0xf] }
 0x471   : > { %v7890_v10 = vshrl.u32 %v7640_v24, 16  ;;  %v8725_v57 = vor.u32 %v8724_v43, %v8720_v3  ;;  %v7896_v49 = vshll.u32 %v7641_v18, 16  ;;  %v8137_v54 = vld [vmem:[#allocation2 + $0x80] sm:$0x1]  ;;  %v12082_v33 = vrot.slane %v8135_v30, 9 }
 0x472   : > { %v7879_v36 = vrot.slane %v7877_v53, 4  ;;  %v13898_v25 = vld [vmem:[#allocation3 + $0x258] ss:$36 sps:$4 sm:$0xff]   ;;  %v8716_v1 = vrot.slane %v8715_v7, 4  ;;  %v7882_v22 = vrot.slane %v7880_v14, 5  ;;  %v7888_v55 = vrot.slane %v7886_v29, 5 }
 0x473   : > { %v13900_v35 = vld [vmem:[#allocation3 + $0x25c] ss:$36 sps:$4 sm:$0xff]   ;;  %v8726_v63 = vrot.slane %v8725_v57, 4  ;;  %v7892_v23 = vrot.slane %v7890_v10, 4  ;;  %v8400_v28 = vld [vmem:[#allocation2 + $0x90] sm:$0xf]  ;;  %v12974_v57 = vpop.f32.mrf.mxu0 }
 0x474   : > { %11270 = vmatprep.mubr.bf16.mxu0 %v13900_v35  ;;  %v8721_v44 = vsel %vm14213_vm14, %v8716_v1, %v8720_v3  ;;  %v7898_v21 = vrot.slane %v7896_v49, 5  ;;  %v8269_v26 = vrot.slane %v8136_v8, 5  ;;  %v8272_v31 = vrot.slane %v8137_v54, 5  ;;  %v8401_v40 = vld [vmem:[#allocation2 + $0x94] sm:$0xf] }
 0x475   : > { %8432 = vst [vmem:[#allocation3 + $0x2e8] sm:$0xf] %v8400_v28  ;;  %11271 = vmatmul.mubr.bf16.gmra.mxu0 %v13898_v25  ;;  %v8731_v56 = vsel %vm14213_vm14, %v8726_v63, %v8730_v12  ;;  %8926 = vst [vmem:[#allocation3 + $0x2a4] sm:$0xf] %v8721_v44  ;;  %v7883_v19 = vor.u32 %v7882_v22, %v7879_v36  ;;  %v7893_v45 = vor.u32 %v7892_v23, %v7888_v55  ;;  %v8474_v37 = vld [vmem:[#allocation2 + $0x90] sm:$0xf]  ;;  %v12858_v28 = vpop.f32.mrf.mxu1 }
 0x476   : > { %8433 = vst [vmem:[#allocation3 + $0x30c] sm:$0xf] %v8401_v40  ;;  %v8475_v48 = vld [vmem:[#allocation2 + $0x94] sm:$0xf]  ;;  %v8476_v5 = vld [vmem:[#allocation2 + $0x98] sm:$0x1]  ;;  %v8270_v62 = vsel %vm14184_vm13, %v12082_v33, %v8269_v26  ;;  %v16796_v40 = vadd.f32 %v12974_v57, %v12973_v27 }
 0x477   : > { %v13901_v58 = vld [vmem:[#allocation3 + $0x250] ss:$36 sps:$4 sm:$0xff]   ;;  %8927 = vst [vmem:[#allocation3 + $0x2c8] sm:$0xf] %v8731_v56  ;;  %v8271_v38 = vrot.slane %v8269_v26, 4  ;;  %v8733_v20 = vshrl.u32 %v8474_v37, 16  ;;  %v16790_v26 = vadd.f32 %v16753_v34, %v16745_v47 }
 0x478   : > { %v13903_v61 = vld [vmem:[#allocation3 + $0x254] ss:$36 sps:$4 sm:$0xff]   ;;  %v7884_v24 = vrot.slane %v7883_v19, 4  ;;  %v7894_v51 = vrot.slane %v7893_v45, 4  ;;  %8366 = vst [vmem:[#allocation3 + $0x29c] sm:$0xf] %v8270_v62 }
 0x479   : > { %v8736_v32 = vshll.u32 %v8474_v37, 16  ;;  %v8742_v50 = vshll.u32 %v8475_v48, 16  ;;  %v8273_v2 = vsel %vm14184_vm13, %v8271_v38, %v8272_v31  ;;  %v8735_v46 = vrot.slane %v8733_v20, 4  ;;  %v7642_v18 = vld [vmem:[#allocation2 + $0x84] sm:$0xf]  ;;  %11109 = vmatprep.mubr.bf16.mxu1 %v13903_v61  ;;  %v16800_v20 = vpop.f32.mrf.mxu0 }
 0x47a   : > { %v8746_v0 = vshrl.u32 %v8475_v48, 16  ;;  %v8752_v9 = vshll.u32 %v8476_v5, 16  ;;  %v7889_v30 = vsel %vm14213_vm14, %v7884_v24, %v7888_v55  ;;  %v7899_v3 = vsel %vm14213_vm14, %v7894_v51, %v7898_v21  ;;  %8367 = vst [vmem:[#allocation3 + $0x2c0] sm:$0xf] %v8273_v2  ;;  %v7643_v53 = vld [vmem:[#allocation2 + $0x88] sm:$0xf]  ;;  %11110 = vmatmul.mubr.bf16.gmra.mxu1 %v13901_v58  ;;  %v12859_v5 = vpop.f32.mrf.mxu1 }
 0x47b   : > { %v8738_v43 = vrot.slane %v8736_v32, 5  ;;  %v8744_v12 = vrot.slane %v8742_v50, 5  ;;  %v7644_v13 = vld [vmem:[#allocation2 + $0x8c] sm:$0x1]  ;;  %8094 = vst [vmem:[#allocation3 + $0x298] sm:$0xf] %v7889_v30  ;;  %v16794_v31 = vadd.f32 %v16763_v41, %v16759_v16  ;;  %v16804_v51 = vadd.f32 %v12859_v5, %v12858_v28 }
 0x47c   : > { %8095 = vst [vmem:[#allocation3 + $0x2bc] sm:$0xf] %v7899_v3  ;;  %v8748_v7 = vrot.slane %v8746_v0, 4  ;;  %v8754_v14 = vrot.slane %v8752_v9, 5  ;;  %v7901_v29 = vshrl.u32 %v7642_v18, 16  ;;  %v7904_v10 = vshll.u32 %v7642_v18, 16  ;;  %v12861_v32 = vpop.f32.mrf.mxu1  ;;  %v12977_v18 = vpop.f32.mrf.mxu0 }
 0x47d   : > { %v8138_v8 = vld [vmem:[#allocation2 + $0x84] sm:$0xe]  ;;  %v8739_v36 = vor.u32 %v8738_v43, %v8735_v46  ;;  %v7910_v49 = vshll.u32 %v7643_v53, 16  ;;  %v7914_v54 = vshrl.u32 %v7643_v53, 16  ;;  %v7920_v33 = vshll.u32 %v7644_v13, 16 }
 0x47e   : > { %v8139_v25 = vld [vmem:[#allocation2 + $0x88] sm:$0xf]  ;;  %v16786_v35 = vld [vmem:[%s17749_s4] ss:$0 sm:$0xff]  ;;  %v8749_v1 = vor.u32 %v8748_v7, %v8744_v12  ;;  %v7903_v63 = vrot.slane %v7901_v29, 4  ;;  %v7906_v22 = vrot.slane %v7904_v10, 5  ;;  %v12862_v13 = vpop.f32.mrf.mxu1  ;;  %v16820_v57 = vpop.f32.mrf.mxu0 }
 0x47f   : > { %v8140_v55 = vld [vmem:[#allocation2 + $0x8c] sm:$0x1]  ;;  %v12083_v23 = vrot.slane %v8138_v8, 9  ;;  %v13904_v11 = vld [vmem:[#allocation3 + $0x2a0] ss:$36 sps:$4 sm:$0xff]   ;;  %v8740_v21 = vrot.slane %v8739_v36, 4  ;;  %v16808_v2 = vadd.f32 %v16737_v17, %v16786_v35  ;;  %v16814_v3 = vadd.f32 %v16739_v42, %v16786_v35 }
 0x480   : > { %v13906_v44 = vld [vmem:[#allocation3 + $0x2a4] ss:$36 sps:$4 sm:$0xff]   ;;  %v8750_v56 = vrot.slane %v8749_v1, 4  ;;  %v7907_v19 = vor.u32 %v7906_v22, %v7903_v63  ;;  %v7912_v45 = vrot.slane %v7910_v49, 5  ;;  %v7916_v37 = vrot.slane %v7914_v54, 4  ;;  %v12864_v28 = vpop.f32.mrf.mxu1 }
 0x481   : > { %v8402_v48 = vld [vmem:[#allocation2 + $0x9c] sm:$0xf]  ;;  %11278 = vmatprep.mubr.bf16.mxu0 %v13906_v44  ;;  %v8745_v58 = vsel %vm14213_vm14, %v8740_v21, %v8744_v12  ;;  %v7922_v62 = vrot.slane %v7920_v33, 5  ;;  %v8276_v38 = vrot.slane %v8139_v25, 5  ;;  %v8279_v47 = vrot.slane %v8140_v55, 5 }
 0x482   : > { %v8403_v34 = vld [vmem:[#allocation2 + $0xa0] sm:$0xf]  ;;  %8434 = vst [vmem:[#allocation3 + $0x330] sm:$0xf] %v8402_v48  ;;  %11279 = vmatmul.mubr.bf16.gmra.mxu0 %v13904_v11  ;;  %v8755_v16 = vsel %vm14213_vm14, %v8750_v56, %v8754_v14  ;;  %8928 = vst [vmem:[#allocation3 + $0x2ec] sm:$0xf] %v8745_v58  ;;  %v7917_v27 = vor.u32 %v7916_v37, %v7912_v45  ;;  %v16824_v25 = vadd.f32 %v12862_v13, %v12861_v32  ;;  %v12980_v11 = vpop.f32.mrf.mxu0 }
 0x483   : > { %v7908_v41 = vrot.slane %v7907_v19, 4  ;;  %8435 = vst [vmem:[#allocation3 + $0x354] sm:$0xf] %v8403_v34  ;;  %v8477_v61 = vld [vmem:[#allocation2 + $0x9c] sm:$0xf]  ;;  %v8277_v46 = vsel %vm14184_vm13, %v12083_v23, %v8276_v38  ;;  %v8278_v0 = vrot.slane %v8276_v38, 4  ;;  %v12865_v38 = vpop.f32.mrf.mxu1 }
 0x484   : > { %v8478_v24 = vld [vmem:[#allocation2 + $0xa0] sm:$0xf]  ;;  %v13908_v50 = vld [vmem:[#allocation3 + $0x298] ss:$36 sps:$4 sm:$0xff]   ;;  %8929 = vst [vmem:[#allocation3 + $0x310] sm:$0xf] %v8755_v16 }
 0x485   : > { %v8757_v9 = vshrl.u32 %v8477_v61, 16  ;;  %v13910_v30 = vld [vmem:[#allocation3 + $0x29c] ss:$36 sps:$4 sm:$0xff]   ;;  %v7913_v43 = vsel %vm14213_vm14, %v7908_v41, %v7912_v45  ;;  %v7918_v12 = vrot.slane %v7917_v27, 4  ;;  %8368 = vst [vmem:[#allocation3 + $0x2e4] sm:$0xf] %v8277_v46  ;;  %v8280_v7 = vsel %vm14184_vm13, %v8278_v0, %v8279_v47  ;;  %v16826_v47 = vpop.f32.mrf.mxu0 }
 0x486   : > { %v8479_v53 = vld [vmem:[#allocation2 + $0xa4] sm:$0x1]  ;;  %v8760_v17 = vshll.u32 %v8477_v61, 16  ;;  %8096 = vst [vmem:[#allocation3 + $0x2e0] sm:$0xf] %v7913_v43  ;;  %v8766_v29 = vshll.u32 %v8478_v24, 16  ;;  %11117 = vmatprep.mubr.bf16.mxu1 %v13910_v30  ;;  %v16830_v41 = vadd.f32 %v16761_v60, %v16786_v35  ;;  %v16833_v61 = vadd.f32 %v12977_v18, %v16800_v20  ;;  %v12867_v30 = vpop.f32.mrf.mxu1 }
 0x487   : > { %v8759_v14 = vrot.slane %v8757_v9, 4  ;;  %v8770_v10 = vshrl.u32 %v8478_v24, 16  ;;  %v7645_v8 = vld [vmem:[#allocation2 + $0x90] sm:$0xf]  ;;  %v7923_v42 = vsel %vm14213_vm14, %v7918_v12, %v7922_v62  ;;  %8369 = vst [vmem:[#allocation3 + $0x308] sm:$0xf] %v8280_v7  ;;  %11118 = vmatmul.mubr.bf16.gmra.mxu1 %v13908_v50  ;;  %v16835_v24 = vadd.f32 %v12865_v38, %v12864_v28  ;;  %v16837_v43 = vpop.f32.mrf.mxu0 }
 0x488   : > { %v8762_v36 = vrot.slane %v8760_v17, 5  ;;  %v8776_v49 = vshll.u32 %v8479_v53, 16  ;;  %v7646_v54 = vld [vmem:[#allocation2 + $0x94] sm:$0xf]  ;;  %v7647_v33 = vld [vmem:[#allocation2 + $0x98] sm:$0x1] }
 0x489   : > { %8097 = vst [vmem:[#allocation3 + $0x304] sm:$0xf] %v7923_v42  ;;  %v8768_v1 = vrot.slane %v8766_v29, 5  ;;  %v8772_v63 = vrot.slane %v8770_v10, 4  ;;  %v7925_v22 = vshrl.u32 %v7645_v8, 16  ;;  %v7928_v55 = vshll.u32 %v7645_v8, 16  ;;  %v12868_v8 = vpop.f32.mrf.mxu1  ;;  %v16843_v42 = vpop.f32.mrf.mxu0 }
 0x48a   : > { %v8141_v23 = vld [vmem:[#allocation2 + $0x90] sm:$0xe]  ;;  %v8763_v44 = vor.u32 %v8762_v36, %v8759_v14  ;;  %v8778_v21 = vrot.slane %v8776_v49, 5  ;;  %v7934_v56 = vshll.u32 %v7646_v54, 16  ;;  %v7938_v19 = vshrl.u32 %v7646_v54, 16  ;;  %17895 = vst [vmem:[#allocation14_spill] sm:$0xff] %v16833_v61 }
 0x48b   : > { %v8142_v45 = vld [vmem:[#allocation2 + $0x94] sm:$0xf]  ;;  %v8773_v37 = vor.u32 %v8772_v63, %v8768_v1  ;;  %v7927_v48 = vrot.slane %v7925_v22, 4  ;;  %v7930_v5 = vrot.slane %v7928_v55, 5  ;;  %v7944_v58 = vshll.u32 %v7647_v33, 16 }
 0x48c   : > { %v8143_v62 = vld [vmem:[#allocation2 + $0x98] sm:$0x1]  ;;  %v13911_v34 = vld [vmem:[#allocation3 + $0x2e8] ss:$36 sps:$4 sm:$0xff]   ;;  %v8764_v27 = vrot.slane %v8763_v44, 4  ;;  %v7936_v46 = vrot.slane %v7934_v56, 5  ;;  %v16847_v54 = vadd.f32 %v16775_v6, %v16786_v35  ;;  %v16852_v63 = vadd.f32 %v12980_v11, %v16820_v57  ;;  %v12870_v11 = vpop.f32.mrf.mxu1 }
 0x48d   : > { %v13913_v16 = vld [vmem:[#allocation3 + $0x2ec] ss:$36 sps:$4 sm:$0xff]   ;;  %v8774_v32 = vrot.slane %v8773_v37, 4  ;;  %v7931_v50 = vor.u32 %v7930_v5, %v7927_v48  ;;  %v7940_v0 = vrot.slane %v7938_v19, 4  ;;  %v7946_v60 = vrot.slane %v7944_v58, 5 }
 0x48e   : > { %v8404_v9 = vld [vmem:[#allocation2 + $0xa8] sm:$0xf]  ;;  %11286 = vmatprep.mubr.bf16.mxu0 %v13913_v16  ;;  %v8769_v12 = vsel %vm14213_vm14, %v8764_v27, %v8768_v1  ;;  %v12084_v53 = vrot.slane %v8141_v23, 9  ;;  %v8283_v17 = vrot.slane %v8142_v45, 5  ;;  %v8405_v13 = vld [vmem:[#allocation2 + $0xac] sm:$0xf]  ;;  %v16862_v38 = vadd.f32 %v12868_v8, %v12867_v30 }
 0x48f   : > { %8436 = vst [vmem:[#allocation3 + $0x378] sm:$0xf] %v8404_v9  ;;  %11287 = vmatmul.mubr.bf16.gmra.mxu0 %v13911_v34  ;;  %v8779_v20 = vsel %vm14213_vm14, %v8774_v32, %v8778_v21  ;;  %8930 = vst [vmem:[#allocation3 + $0x334] sm:$0xf] %v8769_v12  ;;  %v7932_v18 = vrot.slane %v7931_v50, 4  ;;  %v7941_v7 = vor.u32 %v7940_v0, %v7936_v46  ;;  %v8286_v14 = vrot.slane %v8143_v62, 5  ;;  %v16856_v21 = vpop.f32.mrf.mxu0  ;;  %v12871_v0 = vpop.f32.mrf.mxu1 }
 0x490   : > { %8437 = vst [vmem:[#allocation3 + $0x39c] sm:$0xf] %v8405_v13  ;;  %v8480_v29 = vld [vmem:[#allocation2 + $0xa8] sm:$0xf]  ;;  %v8481_v10 = vld [vmem:[#allocation2 + $0xac] sm:$0xf]  ;;  %v8284_v33 = vsel %vm14184_vm13, %v12084_v53, %v8283_v17 }
 0x491   : > { %v13914_v36 = vld [vmem:[#allocation3 + $0x2e0] ss:$36 sps:$4 sm:$0xff]   ;;  %8931 = vst [vmem:[#allocation3 + $0x358] sm:$0xf] %v8779_v20  ;;  %v8285_v1 = vrot.slane %v8283_v17, 4  ;;  %17896 = vst [vmem:[#allocation23_spill] sm:$0xff] %v16852_v63  ;;  %v7937_v22 = vsel %vm14213_vm14, %v7932_v18, %v7936_v46  ;;  %v16864_v34 = vpop.f32.mrf.mxu0 }
 0x492   : > { %v13916_v49 = vld [vmem:[#allocation3 + $0x2e4] ss:$36 sps:$4 sm:$0xff]   ;;  %v7942_v55 = vrot.slane %v7941_v7, 4  ;;  %8370 = vst [vmem:[#allocation3 + $0x32c] sm:$0xf] %v8284_v33  ;;  %v8781_v28 = vshrl.u32 %v8480_v29, 16  ;;  %v16874_v33 = vadd.f32 %v16837_v43, %v16826_v47  ;;  %v16886_v43 = vadd.f32 %v16824_v25, %v16786_v35 }
 0x493   : > { %v8482_v23 = vld [vmem:[#allocation2 + $0xb0] sm:$0x1]  ;;  %v8784_v44 = vshll.u32 %v8480_v29, 16  ;;  %11125 = vmatprep.mubr.bf16.mxu1 %v13916_v49  ;;  %8098 = vst [vmem:[#allocation3 + $0x328] sm:$0xf] %v7937_v22  ;;  %v8287_v6 = vsel %vm14184_vm13, %v8285_v1, %v8286_v14  ;;  %v8790_v56 = vshll.u32 %v8481_v10, 16  ;;  %v16866_v13 = vpop.f32.mrf.mxu0  ;;  %v12873_v29 = vpop.f32.mrf.mxu1  ;;  %v16876_v1 = vadd.f32 %v12871_v0, %v12870_v11 }
 0x494   : > { %v8794_v19 = vshrl.u32 %v8481_v10, 16  ;;  %v8800_v45 = vshll.u32 %v8482_v23, 16  ;;  %v7648_v57 = vld [vmem:[#allocation2 + $0x9c] sm:$0xf]  ;;  %11126 = vmatmul.mubr.bf16.gmra.mxu1 %v13914_v36  ;;  %v7947_v37 = vsel %vm14213_vm14, %v7942_v55, %v7946_v60  ;;  %8371 = vst [vmem:[#allocation3 + $0x350] sm:$0xf] %v8287_v6  ;;  %v16870_v36 = vadd.f32 %v16804_v51, %v16786_v35 }
 0x495   : > { %v8783_v48 = vrot.slane %v8781_v28, 4  ;;  %v8786_v5 = vrot.slane %v8784_v44, 5  ;;  %v7649_v58 = vld [vmem:[#allocation2 + $0xa0] sm:$0xf]  ;;  %v7650_v62 = vld [vmem:[#allocation2 + $0xa4] sm:$0x1]  ;;  %v16878_v22 = vpop.f32.mrf.mxu0 }
 0x496   : > { %8099 = vst [vmem:[#allocation3 + $0x34c] sm:$0xf] %v7947_v37  ;;  %v8792_v16 = vrot.slane %v8790_v56, 5  ;;  %v8796_v27 = vrot.slane %v8794_v19, 4  ;;  %v8802_v32 = vrot.slane %v8800_v45, 5  ;;  %v7949_v50 = vshrl.u32 %v7648_v57, 16  ;;  %v12874_v56 = vpop.f32.mrf.mxu1 }
 0x497   : > { %v8144_v46 = vld [vmem:[#allocation2 + $0x9c] sm:$0xe]  ;;  %v8787_v9 = vor.u32 %v8786_v5, %v8783_v48  ;;  %v7952_v12 = vshll.u32 %v7648_v57, 16  ;;  %v7958_v53 = vshll.u32 %v7649_v58, 16  ;;  %v7962_v60 = vshrl.u32 %v7649_v58, 16  ;;  %17897 = vst [vmem:[#allocation25_spill] sm:$0xff] %v16874_v33  ;;  %v16882_v47 = vpop.f32.mrf.mxu0 }
 0x498   : > { %v8145_v17 = vld [vmem:[#allocation2 + $0xa0] sm:$0xf]  ;;  %v8797_v20 = vor.u32 %v8796_v27, %v8792_v16  ;;  %v7951_v18 = vrot.slane %v7949_v50, 4  ;;  %v7968_v30 = vshll.u32 %v7650_v62, 16  ;;  %v8146_v7 = vld [vmem:[#allocation2 + $0xa4] sm:$0x1]  ;;  %v12876_v27 = vpop.f32.mrf.mxu1 }
 0x499   : > { %v12085_v14 = vrot.slane %v8144_v46, 9  ;;  %v13917_v10 = vld [vmem:[#allocation3 + $0x330] ss:$36 sps:$4 sm:$0xff]   ;;  %v8788_v49 = vrot.slane %v8787_v9, 4  ;;  %v7954_v23 = vrot.slane %v7952_v12, 5  ;;  %v7960_v28 = vrot.slane %v7958_v53, 5  ;;  %v16898_v12 = vpop.f32.mrf.mxu0 }
 0x49a   : > { %v13919_v8 = vld [vmem:[#allocation3 + $0x334] ss:$36 sps:$4 sm:$0xff]   ;;  %v8798_v55 = vrot.slane %v8797_v20, 4  ;;  %v7964_v44 = vrot.slane %v7962_v60, 4  ;;  %v8406_v6 = vld [vmem:[#allocation2 + $0xb4] sm:$0xf]  ;;  %v16894_v9 = vadd.f32 %v16856_v21, %v16843_v42 }
 0x49b   : > { %11294 = vmatprep.mubr.bf16.mxu0 %v13919_v8  ;;  %v8793_v51 = vsel %vm14213_vm14, %v8788_v49, %v8792_v16  ;;  %v7970_v19 = vrot.slane %v7968_v30, 5  ;;  %v8290_v45 = vrot.slane %v8145_v17, 5  ;;  %v8293_v57 = vrot.slane %v8146_v7, 5  ;;  %v8407_v37 = vld [vmem:[#allocation2 + $0xb8] sm:$0xf]  ;;  %v12877_v30 = vpop.f32.mrf.mxu1  ;;  %v16902_v21 = vpop.f32.mrf.mxu0 }
 0x49c   : > { %8438 = vst [vmem:[#allocation3 + $0x3c0] sm:$0xf] %v8406_v6  ;;  %11295 = vmatmul.mubr.bf16.gmra.mxu0 %v13917_v10  ;;  %v8803_v11 = vsel %vm14213_vm14, %v8798_v55, %v8802_v32  ;;  %8932 = vst [vmem:[#allocation3 + $0x37c] sm:$0xf] %v8793_v51  ;;  %v7955_v48 = vor.u32 %v7954_v23, %v7951_v18  ;;  %v7965_v5 = vor.u32 %v7964_v44, %v7960_v28  ;;  %v8483_v58 = vld [vmem:[#allocation2 + $0xb4] sm:$0xf] }
 0x49d   : > { %8439 = vst [vmem:[#allocation3 + $0x3e4] sm:$0xf] %v8407_v37  ;;  %v8484_v62 = vld [vmem:[#allocation2 + $0xb8] sm:$0xf]  ;;  %v8485_v16 = vld [vmem:[#allocation2 + $0xbc] sm:$0x1]  ;;  %v8291_v0 = vsel %vm14184_vm13, %v12085_v14, %v8290_v45  ;;  %v16896_v32 = vadd.f32 %v12874_v56, %v12873_v29  ;;  %v16908_v56 = vpop.f32.mrf.mxu1 }
 0x49e   : > { %v13921_v50 = vld [vmem:[#allocation3 + $0x328] ss:$36 sps:$4 sm:$0xff]   ;;  %8933 = vst [vmem:[#allocation3 + $0x3a0] sm:$0xf] %v8803_v11  ;;  %v8292_v25 = vrot.slane %v8290_v45, 4  ;;  %17898 = vst [vmem:[#allocation26_spill] sm:$0xff] %v16894_v9 }
 0x49f   : > { %v13923_v46 = vld [vmem:[#allocation3 + $0x32c] ss:$36 sps:$4 sm:$0xff]   ;;  %v7956_v53 = vrot.slane %v7955_v48, 4  ;;  %v7966_v60 = vrot.slane %v7965_v5, 4  ;;  %8372 = vst [vmem:[#allocation3 + $0x374] sm:$0xf] %v8291_v0  ;;  %v16910_v48 = vpop.f32.mrf.mxu0 }
 0x4a0   : > { %v8805_v17 = vshrl.u32 %v8483_v58, 16  ;;  %v8808_v20 = vshll.u32 %v8483_v58, 16  ;;  %v7651_v18 = vld [vmem:[#allocation2 + $0xa8] sm:$0xf]  ;;  %11133 = vmatprep.mubr.bf16.mxu1 %v13923_v46  ;;  %v8294_v7 = vsel %vm14184_vm13, %v8292_v25, %v8293_v57  ;;  %v8814_v14 = vshll.u32 %v8484_v62, 16 }
 0x4a1   : > { %v8818_v10 = vshrl.u32 %v8484_v62, 16  ;;  %v8824_v8 = vshll.u32 %v8485_v16, 16  ;;  %v7652_v42 = vld [vmem:[#allocation2 + $0xac] sm:$0xf]  ;;  %11134 = vmatmul.mubr.bf16.gmra.mxu1 %v13921_v50  ;;  %v7961_v29 = vsel %vm14213_vm14, %v7956_v53, %v7960_v28  ;;  %v7971_v49 = vsel %vm14213_vm14, %v7966_v60, %v7970_v19  ;;  %8373 = vst [vmem:[#allocation3 + $0x398] sm:$0xf] %v8294_v7  ;;  %v16912_v16 = vpop.f32.mrf.mxu1  ;;  %v16914_v60 = vpop.f32.mrf.mxu0 }
 0x4a2   : > { %v8807_v55 = vrot.slane %v8805_v17, 4  ;;  %v8810_v23 = vrot.slane %v8808_v20, 5  ;;  %v7653_v44 = vld [vmem:[#allocation2 + $0xb0] sm:$0x1]  ;;  %v8147_v6 = vld [vmem:[#allocation2 + $0xa8] sm:$0xe]  ;;  %v16918_v7 = vadd.f32 %v16835_v24, %v16786_v35 }
 0x4a3   : > { %8100 = vst [vmem:[#allocation3 + $0x370] sm:$0xf] %v7961_v29  ;;  %8101 = vst [vmem:[#allocation3 + $0x394] sm:$0xf] %v7971_v49  ;;  %v8816_v51 = vrot.slane %v8814_v14, 5  ;;  %v8820_v45 = vrot.slane %v8818_v10, 4  ;;  %v16924_v10 = vadd.f32 %v12877_v30, %v12876_v27 }
 0x4a4   : > { %v8826_v57 = vrot.slane %v8824_v8, 5  ;;  %v7973_v37 = vshrl.u32 %v7651_v18, 16  ;;  %v8148_v11 = vld [vmem:[#allocation2 + $0xac] sm:$0xf]  ;;  %v8811_v28 = vor.u32 %v8810_v23, %v8807_v55  ;;  %v7976_v5 = vshll.u32 %v7651_v18, 16  ;;  %17899 = vst [vmem:[#allocation15_spill] sm:$0xff] %v16918_v7  ;;  %v16926_v8 = vpop.f32.mrf.mxu1 }
 0x4a5   : > { %v7982_v58 = vshll.u32 %v7652_v42, 16  ;;  %v7986_v19 = vshrl.u32 %v7652_v42, 16  ;;  %v8149_v62 = vld [vmem:[#allocation2 + $0xb0] sm:$0x1]  ;;  %v8821_v50 = vor.u32 %v8820_v45, %v8816_v51  ;;  %v7992_v0 = vshll.u32 %v7653_v44, 16  ;;  %v16928_v44 = vpop.f32.mrf.mxu0 }
 0x4a6   : > { %v7975_v46 = vrot.slane %v7973_v37, 4  ;;  %v12086_v25 = vrot.slane %v8147_v6, 9  ;;  %v8408_v53 = vld [vmem:[#allocation2 + $0xc0] sm:$0xf]  ;;  %v13924_v17 = vld [vmem:[#allocation3 + $0x378] ss:$36 sps:$4 sm:$0xff]   ;;  %v16922_v18 = vadd.f32 %v16866_v13, %v16864_v34  ;;  %v16932_v13 = vpop.f32.mrf.mxu1 }
 0x4a7   : > { %v13926_v20 = vld [vmem:[#allocation3 + $0x37c] ss:$36 sps:$4 sm:$0xff]   ;;  %v8812_v14 = vrot.slane %v8811_v28, 4  ;;  %8440 = vst [vmem:[#allocation3 + $0x408] sm:$0xf] %v8408_v53  ;;  %v8822_v42 = vrot.slane %v8821_v50, 4  ;;  %v16936_v50 = vpop.f32.mrf.mxu0 }
 0x4a8   : > { %17900 = vst [vmem:[#allocation16_spill] sm:$0xff] %v16922_v18  ;;  %v7978_v29 = vrot.slane %v7976_v5, 5  ;;  %v7984_v49 = vrot.slane %v7982_v58, 5  ;;  %v7988_v55 = vrot.slane %v7986_v19, 4  ;;  %v8409_v23 = vld [vmem:[#allocation2 + $0xc4] sm:$0xf]  ;;  %11302 = vmatprep.mubr.bf16.mxu0 %v13926_v20 }
 0x4a9   : > { %v8817_v24 = vsel %vm14213_vm14, %v8812_v14, %v8816_v51  ;;  %v7994_v6 = vrot.slane %v7992_v0, 5  ;;  %v8297_v45 = vrot.slane %v8148_v11, 5  ;;  %v8300_v37 = vrot.slane %v8149_v62, 5  ;;  %8441 = vst [vmem:[#allocation3 + $0x42c] sm:$0xf] %v8409_v23  ;;  %11303 = vmatmul.mubr.bf16.gmra.mxu0 %v13924_v17 }
 0x4aa   : > { %v8486_v34 = vld [vmem:[#allocation2 + $0xc0] sm:$0xf]  ;;  %v8827_v27 = vsel %vm14213_vm14, %v8822_v42, %v8826_v57  ;;  %8934 = vst [vmem:[#allocation3 + $0x3c4] sm:$0xf] %v8817_v24  ;;  %v7979_v30 = vor.u32 %v7978_v29, %v7975_v46  ;;  %v7989_v28 = vor.u32 %v7988_v55, %v7984_v49  ;;  %v8487_v5 = vld [vmem:[#allocation2 + $0xc4] sm:$0xf]  ;;  %v16940_v11 = vadd.f32 %v16862_v38, %v16786_v35  ;;  %v16944_v57 = vpop.f32.mrf.mxu1  ;;  %v16946_v29 = vpop.f32.mrf.mxu0 }
 0x4ab   : > { %v8488_v58 = vld [vmem:[#allocation2 + $0xc8] sm:$0x1]  ;;  %v8829_v19 = vshrl.u32 %v8486_v34, 16  ;;  %8935 = vst [vmem:[#allocation3 + $0x3e8] sm:$0xf] %v8827_v27  ;;  %v8298_v62 = vsel %vm14184_vm13, %v12086_v25, %v8297_v45  ;;  %v8299_v0 = vrot.slane %v8297_v45, 4 }
 0x4ac   : > { %v13927_v51 = vld [vmem:[#allocation3 + $0x370] ss:$36 sps:$4 sm:$0xff]   ;;  %17901 = vst [vmem:[#allocation27_spill] sm:$0xff] %v16940_v11  ;;  %v8832_v53 = vshll.u32 %v8486_v34, 16  ;;  %v7980_v17 = vrot.slane %v7979_v30, 4  ;;  %v7990_v20 = vrot.slane %v7989_v28, 4  ;;  %v16950_v25 = vpop.f32.mrf.mxu1  ;;  %v16956_v18 = vpop.f32.mrf.mxu0 }
 0x4ad   : > { %v13929_v46 = vld [vmem:[#allocation3 + $0x374] ss:$36 sps:$4 sm:$0xff]   ;;  %8374 = vst [vmem:[#allocation3 + $0x3bc] sm:$0xf] %v8298_v62  ;;  %v8831_v14 = vrot.slane %v8829_v19, 4  ;;  %v8838_v42 = vshll.u32 %v8487_v5, 16  ;;  %v8301_v38 = vsel %vm14184_vm13, %v8299_v0, %v8300_v37  ;;  %v16960_v37 = vadd.f32 %v16876_v1, %v16786_v35 }
 0x4ae   : > { %v8834_v55 = vrot.slane %v8832_v53, 5  ;;  %v8842_v23 = vshrl.u32 %v8487_v5, 16  ;;  %v8848_v24 = vshll.u32 %v8488_v58, 16  ;;  %v7654_v27 = vld [vmem:[#allocation2 + $0xb4] sm:$0xf]  ;;  %11141 = vmatprep.mubr.bf16.mxu1 %v13929_v46  ;;  %v7985_v45 = vsel %vm14213_vm14, %v7980_v17, %v7984_v49  ;;  %v16962_v53 = vpop.f32.mrf.mxu1 }
 0x4af   : > { %v7995_v34 = vsel %vm14213_vm14, %v7990_v20, %v7994_v6  ;;  %8375 = vst [vmem:[#allocation3 + $0x3e0] sm:$0xf] %v8301_v38  ;;  %v8840_v30 = vrot.slane %v8838_v42, 5  ;;  %v7655_v28 = vld [vmem:[#allocation2 + $0xb8] sm:$0xf]  ;;  %v7997_v62 = vshrl.u32 %v7654_v27, 16  ;;  %11142 = vmatmul.mubr.bf16.gmra.mxu1 %v13927_v51  ;;  %v16964_v38 = vpop.f32.mrf.mxu0 }
 0x4b0   : > { %v7656_v19 = vld [vmem:[#allocation2 + $0xbc] sm:$0x1]  ;;  %8102 = vst [vmem:[#allocation3 + $0x3b8] sm:$0xf] %v7985_v45  ;;  %8103 = vst [vmem:[#allocation3 + $0x3dc] sm:$0xf] %v7995_v34  ;;  %v8835_v5 = vor.u32 %v8834_v55, %v8831_v14  ;;  %v16966_v1 = vpop.f32.mrf.mxu1 }
 0x4b1   : > { %17902 = vst [vmem:[#allocation29_spill] sm:$0xff] %v16960_v37  ;;  %v8844_v58 = vrot.slane %v8842_v23, 4  ;;  %v8000_v49 = vshll.u32 %v7654_v27, 16  ;;  %v8150_v0 = vld [vmem:[#allocation2 + $0xb4] sm:$0xe]  ;;  %v7999_v6 = vrot.slane %v7997_v62, 4  ;;  %v16970_v27 = vadd.f32 %v16882_v47, %v16878_v22 }
 0x4b2   : > { %v8006_v46 = vshll.u32 %v7655_v28, 16  ;;  %v8010_v17 = vshrl.u32 %v7655_v28, 16  ;;  %v8016_v20 = vshll.u32 %v7656_v19, 16  ;;  %v8151_v42 = vld [vmem:[#allocation2 + $0xb8] sm:$0xf]  ;;  %v8836_v51 = vrot.slane %v8835_v5, 4  ;;  %v16984_v22 = vpop.f32.mrf.mxu1 }
 0x4b3   : > { %v8845_v45 = vor.u32 %v8844_v58, %v8840_v30  ;;  %v8850_v34 = vrot.slane %v8848_v24, 5  ;;  %v8002_v9 = vrot.slane %v8000_v49, 5  ;;  %v8152_v33 = vld [vmem:[#allocation2 + $0xbc] sm:$0x1]  ;;  %17903 = vst [vmem:[#allocation11_spill] sm:$0xff] %v16970_v27  ;;  %v16974_v28 = vadd.f32 %v16912_v16, %v16908_v56  ;;  %v16980_v24 = vpop.f32.mrf.mxu0 }
 0x4b4   : > { %v13930_v14 = vld [vmem:[#allocation3 + $0x3c0] ss:$36 sps:$4 sm:$0xff]   ;;  %v8008_v23 = vrot.slane %v8006_v46, 5  ;;  %v16978_v19 = vadd.f32 %v16902_v21, %v16898_v12  ;;  %v8841_v62 = vsel %vm14213_vm14, %v8836_v51, %v8840_v30  ;;  %v8012_v49 = vrot.slane %v8010_v17, 4  ;;  %v8410_v46 = vld [vmem:[#allocation2 + $0xcc] sm:$0xf] }
 0x4b5   : > { %v13932_v55 = vld [vmem:[#allocation3 + $0x3c4] ss:$36 sps:$4 sm:$0xff]   ;;  %v8846_v5 = vrot.slane %v8845_v45, 4  ;;  %v8003_v58 = vor.u32 %v8002_v9, %v7999_v6  ;;  %v8411_v37 = vld [vmem:[#allocation2 + $0xd0] sm:$0xf]  ;;  %v8018_v47 = vrot.slane %v8016_v20, 5  ;;  %v16986_v21 = vpop.f32.mrf.mxu0 }
 0x4b6   : > { %17904 = vst [vmem:[#allocation17_spill] sm:$0xff] %v16978_v19  ;;  %11310 = vmatprep.mubr.bf16.mxu0 %v13932_v55  ;;  %8936 = vst [vmem:[#allocation3 + $0x40c] sm:$0xf] %v8841_v62  ;;  %v12087_v56 = vrot.slane %v8150_v0, 9  ;;  %v8304_v16 = vrot.slane %v8151_v42, 5  ;;  %v8307_v27 = vrot.slane %v8152_v33, 5  ;;  %v8013_v6 = vor.u32 %v8012_v49, %v8008_v23  ;;  %v16990_v55 = vpop.f32.mrf.mxu1 }
 0x4b7   : > { %8442 = vst [vmem:[#allocation3 + $0x450] sm:$0xf] %v8410_v46  ;;  %8443 = vst [vmem:[#allocation3 + $0x474] sm:$0xf] %v8411_v37  ;;  %v8489_v12 = vld [vmem:[#allocation2 + $0xcc] sm:$0xf]  ;;  %11311 = vmatmul.mubr.bf16.gmra.mxu0 %v13930_v14  ;;  %v8851_v9 = vsel %vm14213_vm14, %v8846_v5, %v8850_v34  ;;  %v16996_v42 = vadd.f32 %v16932_v13, %v16926_v8  ;;  %v16998_v14 = vpop.f32.mrf.mxu0 }
 0x4b8   : > { %v8004_v30 = vrot.slane %v8003_v58, 4  ;;  %v8490_v17 = vld [vmem:[#allocation2 + $0xd0] sm:$0xf]  ;;  %v8491_v51 = vld [vmem:[#allocation2 + $0xd4] sm:$0x1]  ;;  %v8853_v45 = vshrl.u32 %v8489_v12, 16  ;;  %v8305_v33 = vsel %vm14184_vm13, %v12087_v56, %v8304_v16  ;;  %v17002_v46 = vpop.f32.mrf.mxu1 }
 0x4b9   : > { %v13934_v20 = vld [vmem:[#allocation3 + $0x3b8] ss:$36 sps:$4 sm:$0xff]   ;;  %8937 = vst [vmem:[#allocation3 + $0x430] sm:$0xf] %v8851_v9  ;;  %v8306_v37 = vrot.slane %v8304_v16, 4  ;;  %v8856_v0 = vshll.u32 %v8489_v12, 16  ;;  %v17006_v9 = vpop.f32.mrf.mxu0 }
 0x4ba   : > { %v13936_v34 = vld [vmem:[#allocation3 + $0x3bc] ss:$36 sps:$4 sm:$0xff]   ;;  %v8009_v62 = vsel %vm14213_vm14, %v8004_v30, %v8008_v23  ;;  %v8014_v5 = vrot.slane %v8013_v6, 4  ;;  %8376 = vst [vmem:[#allocation3 + $0x404] sm:$0xf] %v8305_v33  ;;  %v8855_v58 = vrot.slane %v8853_v45, 4  ;;  %v17010_v23 = vadd.f32 %v16896_v32, %v16786_v35 }
 0x4bb   : > { %v8862_v49 = vshll.u32 %v8490_v17, 16  ;;  %8104 = vst [vmem:[#allocation3 + $0x400] sm:$0xf] %v8009_v62  ;;  %v8308_v56 = vsel %vm14184_vm13, %v8306_v37, %v8307_v27  ;;  %v8858_v16 = vrot.slane %v8856_v0, 5  ;;  %v8866_v12 = vshrl.u32 %v8490_v17, 16  ;;  %11149 = vmatprep.mubr.bf16.mxu1 %v13936_v34  ;;  %v17014_v27 = vpop.f32.mrf.mxu1  ;;  %v17016_v19 = vpop.f32.mrf.mxu0 }
 0x4bc   : > { %v8872_v8 = vshll.u32 %v8491_v51, 16  ;;  %v7657_v13 = vld [vmem:[#allocation2 + $0xc0] sm:$0xf]  ;;  %17905 = vst [vmem:[#allocation32_spill] sm:$0xff] %v17010_v23  ;;  %v8019_v30 = vsel %vm14213_vm14, %v8014_v5, %v8018_v47  ;;  %8377 = vst [vmem:[#allocation3 + $0x428] sm:$0xf] %v8308_v56  ;;  %11150 = vmatmul.mubr.bf16.gmra.mxu1 %v13934_v20  ;;  %v17022_v20 = vadd.f32 %v16914_v60, %v16910_v48 }
 0x4bd   : > { %v8864_v6 = vrot.slane %v8862_v49, 5  ;;  %v7658_v45 = vld [vmem:[#allocation2 + $0xc4] sm:$0xf]  ;;  %v7659_v33 = vld [vmem:[#allocation2 + $0xc8] sm:$0x1]  ;;  %v8021_v62 = vshrl.u32 %v7657_v13, 16  ;;  %v8859_v17 = vor.u32 %v8858_v16, %v8855_v58  ;;  %v17018_v5 = vpop.f32.mrf.mxu1  ;;  %v17024_v58 = vpop.f32.mrf.mxu0 }
 0x4be   : > { %8105 = vst [vmem:[#allocation3 + $0x424] sm:$0xf] %v8019_v30  ;;  %v8868_v51 = vrot.slane %v8866_v12, 4  ;;  %v8874_v37 = vrot.slane %v8872_v8, 5  ;;  %v8024_v0 = vshll.u32 %v7657_v13, 16  ;;  %v8030_v23 = vshll.u32 %v7658_v45, 16 }
 0x4bf   : > { %v8153_v34 = vld [vmem:[#allocation2 + $0xc0] sm:$0xe]  ;;  %v8023_v32 = vrot.slane %v8021_v62, 4  ;;  %v8034_v63 = vshrl.u32 %v7658_v45, 16  ;;  %v8040_v47 = vshll.u32 %v7659_v33, 16  ;;  %v8860_v49 = vrot.slane %v8859_v17, 4  ;;  %v17038_v45 = vpop.f32.mrf.mxu1 }
 0x4c0   : > { %v8869_v56 = vor.u32 %v8868_v51, %v8864_v6  ;;  %v8026_v11 = vrot.slane %v8024_v0, 5  ;;  %v8154_v61 = vld [vmem:[#allocation2 + $0xc4] sm:$0xf]  ;;  %v8155_v7 = vld [vmem:[#allocation2 + $0xc8] sm:$0x1]  ;;  %v8032_v12 = vrot.slane %v8030_v23, 5  ;;  %v17028_v8 = vadd.f32 %v16950_v25, %v16944_v57  ;;  %v17042_v57 = vpop.f32.mrf.mxu0 }
 0x4c1   : > { %v13939_v16 = vld [vmem:[#allocation3 + $0x40c] ss:$36 sps:$4 sm:$0xff]   ;;  %v17032_v13 = vadd.f32 %v16936_v50, %v16928_v44  ;;  %v17036_v30 = vadd.f32 %v16966_v1, %v16962_v53  ;;  %v8865_v60 = vsel %vm14213_vm14, %v8860_v49, %v8864_v6  ;;  %v8036_v62 = vrot.slane %v8034_v63, 4  ;;  %v8940_v17 = vld [vmem:[#allocation2 + $0x18] sm:$0xe]  ;;  %v17048_v51 = vpop.f32.mrf.mxu1 }
 0x4c2   : > { %v13937_v48 = vld [vmem:[#allocation3 + $0x408] ss:$36 sps:$4 sm:$0xff]   ;;  %v8870_v33 = vrot.slane %v8869_v56, 4  ;;  %v8027_v23 = vor.u32 %v8026_v11, %v8023_v32  ;;  %11318 = vmatprep.mubr.bf16.mxu0 %v13939_v16  ;;  %v17046_v44 = vadd.f32 %v16924_v10, %v16786_v35  ;;  %8938 = vst [vmem:[#allocation3 + $0x454] sm:$0xf] %v8865_v60  ;;  %v12088_v50 = vrot.slane %v8153_v34, 9  ;;  %v17052_v56 = vpop.f32.mrf.mxu0 }
 0x4c3   : > { %v8311_v25 = vrot.slane %v8154_v61, 5  ;;  %v8314_v53 = vrot.slane %v8155_v7, 5  ;;  %v8941_v1 = vld [vmem:[#allocation2 + $0x1c] sm:$0xf]  ;;  %11319 = vmatmul.mubr.bf16.gmra.mxu0 %v13937_v48  ;;  %v8037_v6 = vor.u32 %v8036_v62, %v8032_v12  ;;  %v8042_v0 = vrot.slane %v8040_v47, 5  ;;  %v17064_v47 = vpop.f32.mrf.mxu1 }
 0x4c4   : > { %v8875_v11 = vsel %vm14213_vm14, %v8870_v33, %v8874_v37  ;;  %v8028_v63 = vrot.slane %v8027_v23, 4  ;;  %v8942_v32 = vld [vmem:[#allocation2 + $0x20] sm:$0x1]  ;;  %v8943_v49 = vld [vmem:[#allocation2 + $0x24] sm:$0xe]  ;;  %v17056_v61 = vadd.f32 %v16974_v28, %v16786_v35  ;;  %v17062_v37 = vadd.f32 %v16956_v18, %v16946_v29  ;;  %v17068_v62 = vpop.f32.mrf.mxu0 }
 0x4c5   : > { %v13940_v10 = vld [vmem:[#allocation3 + $0x400] ss:$36 sps:$4 sm:$0xff]   ;;  %8939 = vst [vmem:[#allocation3 + $0x478] sm:$0xf] %v8875_v11  ;;  %v8312_v7 = vsel %vm14184_vm13, %v12088_v50, %v8311_v25  ;;  %v8313_v34 = vrot.slane %v8311_v25, 4  ;;  %v8038_v60 = vrot.slane %v8037_v6, 4  ;;  %v17074_v18 = vadd.f32 %v16990_v55, %v16984_v22 }
 0x4c6   : > { %v13942_v16 = vld [vmem:[#allocation3 + $0x404] ss:$36 sps:$4 sm:$0xff]   ;;  %v8033_v48 = vsel %vm14213_vm14, %v8028_v63, %v8032_v12  ;;  %8378 = vst [vmem:[#allocation3 + $0x44c] sm:$0xf] %v8312_v7  ;;  %v12089_v33 = vrot.slane %v8940_v17, 9  ;;  %v9038_v23 = vrot.slane %v8941_v1, 5  ;;  %v17078_v29 = vadd.f32 %v16980_v24, %v16964_v38  ;;  %v17080_v1 = vpop.f32.mrf.mxu1  ;;  %v17090_v24 = vpop.f32.mrf.mxu0 }
 0x4c7   : > { %v8944_v28 = vld [vmem:[#allocation2 + $0x28] sm:$0xf]  ;;  %11157 = vmatprep.mubr.bf16.mxu1 %v13942_v16  ;;  %8106 = vst [vmem:[#allocation3 + $0x448] sm:$0xf] %v8033_v48  ;;  %v8315_v50 = vsel %vm14184_vm13, %v8313_v34, %v8314_v53  ;;  %v9041_v25 = vrot.slane %v8942_v32, 5  ;;  %v8043_v11 = vsel %vm14213_vm14, %v8038_v60, %v8042_v0  ;;  %v17086_v53 = vadd.f32 %v16996_v42, %v16786_v35 }
 0x4c8   : > { %v8945_v12 = vld [vmem:[#allocation2 + $0x2c] sm:$0x1]  ;;  %v8946_v17 = vld [vmem:[#allocation2 + $0x30] sm:$0xe]  ;;  %11158 = vmatmul.mubr.bf16.gmra.mxu1 %v13940_v10  ;;  %8379 = vst [vmem:[#allocation3 + $0x470] sm:$0xf] %v8315_v50  ;;  %v9039_v22 = vsel %vm14184_vm13, %v12089_v33, %v9038_v23  ;;  %v12904_v16 = vpop.f32.mrf.mxu1  ;;  %v12896_v34 = vadd.f32 %v17014_v27, %v17002_v46  ;;  %v17096_v60 = vpop.f32.mrf.mxu0 }
 0x4c9   : > { %v9040_v55 = vrot.slane %v9038_v23, 4  ;;  %v8947_v63 = vld [vmem:[#allocation2 + $0x34] sm:$0xf]  ;;  %v8948_v38 = vld [vmem:[#allocation2 + $0x38] sm:$0x1]  ;;  %v12090_v6 = vrot.slane %v8943_v49, 9  ;;  %v17102_v23 = vadd.f32 %v16998_v14, %v16986_v21 }
 0x4ca   : > { %8107 = vst [vmem:[#allocation3 + $0x46c] sm:$0xf] %v8043_v11  ;;  %9180 = vst [vmem:[#allocation3 + $0x20] sm:$0xf] %v9039_v22  ;;  %v9045_v32 = vrot.slane %v8944_v28, 5  ;;  %v9048_v10 = vrot.slane %v8945_v12, 5  ;;  %v17106_v28 = vadd.f32 %v17038_v45, %v17018_v5  ;;  %v12906_v12 = vpop.f32.mrf.mxu1  ;;  %v17121_v5 = vadd.f32 %v17016_v19, %v17006_v9  ;;  %v13024_v45 = vpop.f32.mrf.mxu0 }
 0x4cb   : > { %v12091_v15 = vrot.slane %v8946_v17, 9  ;;  %v8949_v0 = vld [vmem:[#allocation2 + $0x3c] sm:$0xe]  ;;  %v9042_v35 = vsel %vm14184_vm13, %v9040_v55, %v9041_v25  ;;  %v9052_v42 = vrot.slane %v8947_v63, 5  ;;  %v9055_v7 = vrot.slane %v8948_v38, 5 }
 0x4cc   : > { %v8950_v48 = vld [vmem:[#allocation2 + $0x40] sm:$0xf]  ;;  %9181 = vst [vmem:[#allocation3 + $0x44] sm:$0xf] %v9042_v35  ;;  %v9046_v49 = vsel %vm14184_vm13, %v12090_v6, %v9045_v32  ;;  %v9047_v33 = vrot.slane %v9045_v32, 4  ;;  %v12907_v32 = vpop.f32.mrf.mxu1 }
 0x4cd   : > { %v8951_v50 = vld [vmem:[#allocation2 + $0x44] sm:$0x1]  ;;  %v8952_v25 = vld [vmem:[#allocation2 + $0x48] sm:$0xe]  ;;  %v13945_v27 = vld [vmem:[#allocation3 + $0x454] ss:$36 sps:$4 sm:$0xff]   ;;  %v9053_v21 = vsel %vm14184_vm13, %v12091_v15, %v9052_v42 }
 0x4ce   : > { %v13943_v46 = vld [vmem:[#allocation3 + $0x450] ss:$36 sps:$4 sm:$0xff]   ;;  %v17111_v17 = vld [vmem:[%s17749_s4] ss:$0 sm:$0xff]  ;;  %9182 = vst [vmem:[#allocation3 + $0x68] sm:$0xf] %v9046_v49  ;;  %v9049_v55 = vsel %vm14184_vm13, %v9047_v33, %v9048_v10  ;;  %11326 = vmatprep.mubr.bf16.mxu0 %v13945_v27  ;;  %v12902_v49 = vadd.f32 %v17064_v47, %v17048_v51 }
 0x4cf   : > { %v17115_v11 = vadd.f32 %v17111_v17, %v17028_v8  ;;  %v9054_v14 = vrot.slane %v9052_v42, 4  ;;  %v17125_v22 = vadd.f32 %v17111_v17, %v17036_v30  ;;  %9184 = vst [vmem:[#allocation3 + $0xb0] sm:$0xf] %v9053_v21  ;;  %v12092_v8 = vrot.slane %v8949_v0, 9  ;;  %v8953_v38 = vld [vmem:[#allocation2 + $0x4c] sm:$0xf]  ;;  %v13025_v30 = vpop.f32.mrf.mxu0  ;;  %11327 = vmatmul.mubr.bf16.gmra.mxu0 %v13943_v46  ;;  %v12909_v21 = vpop.f32.mrf.mxu1 }
 0x4d0   : > { %v9059_v63 = vrot.slane %v8950_v48, 5  ;;  %v8954_v6 = vld [vmem:[#allocation2 + $0x50] sm:$0x1]  ;;  %9183 = vst [vmem:[#allocation3 + $0x8c] sm:$0xf] %v9049_v55  ;;  %v9062_v9 = vrot.slane %v8951_v50, 5  ;;  %v17139_v46 = vadd.f32 %v17042_v57, %v17024_v58  ;;  %v17144_v51 = vadd.f32 %v17111_v17, %v17074_v18 }
 0x4d1   : > { %v9056_v19 = vsel %vm14184_vm13, %v9054_v14, %v9055_v7  ;;  %v12093_v15 = vrot.slane %v8952_v25, 9  ;;  %v9066_v35 = vrot.slane %v8953_v38, 5  ;;  %v8955_v42 = vld [vmem:[#allocation2 + $0x54] sm:$0xe]  ;;  %v9069_v48 = vrot.slane %v8954_v6, 5 }
 0x4d2   : > { %9185 = vst [vmem:[#allocation3 + $0xd4] sm:$0xf] %v9056_v19  ;;  %v9060_v10 = vsel %vm14184_vm13, %v12092_v8, %v9059_v63  ;;  %v9061_v0 = vrot.slane %v9059_v63, 4  ;;  %v8956_v33 = vld [vmem:[#allocation2 + $0x58] sm:$0xf]  ;;  %v12905_v14 = vadd.f32 %v12904_v16, %v17080_v1  ;;  %v13027_v8 = vpop.f32.mrf.mxu0  ;;  %v17150_v63 = vadd.f32 %v17068_v62, %v17052_v56  ;;  %v12910_v19 = vpop.f32.mrf.mxu1 }
 0x4d3   : > { %v8957_v27 = vld [vmem:[#allocation2 + $0x5c] sm:$0x1]  ;;  %v13947_v55 = vld [vmem:[#allocation3 + $0x448] ss:$36 sps:$4 sm:$0xff]   ;;  %9186 = vst [vmem:[#allocation3 + $0xf8] sm:$0xf] %v9060_v10  ;;  %v9067_v50 = vsel %vm14184_vm13, %v12093_v15, %v9066_v35  ;;  %v17153_v57 = vadd.f32 %v17111_v17, %v12896_v34  ;;  %v17157_v62 = vadd.f32 %v12907_v32, %v12906_v12  ;;  %v17165_v10 = vadd.f32 %v13025_v30, %v13024_v45 }
 0x4d4   : > { %v13949_v7 = vld [vmem:[#allocation3 + $0x44c] ss:$36 sps:$4 sm:$0xff]   ;;  %v9068_v25 = vrot.slane %v9066_v35, 4  ;;  %v9063_v47 = vsel %vm14184_vm13, %v9061_v0, %v9062_v9  ;;  %9188 = vst [vmem:[#allocation3 + $0x140] sm:$0xf] %v9067_v50  ;;  %v12094_v38 = vrot.slane %v8955_v42, 9  ;;  %v13028_v9 = vpop.f32.mrf.mxu0  ;;  %v17161_v35 = vadd.f32 %v17096_v60, %v17090_v24  ;;  %v12912_v34 = vpop.f32.mrf.mxu1 }
 0x4d5   : > { %v8958_v6 = vld [vmem:[#allocation2 + $0x60] sm:$0xe]  ;;  %11165 = vmatprep.mubr.bf16.mxu1 %v13949_v7  ;;  %v13950_v58 = vld [vmem:[#allocation3 + $0x20] ss:$36 sps:$4 sm:$0xff]   ;;  %9187 = vst [vmem:[#allocation3 + $0x11c] sm:$0xf] %v9063_v47  ;;  %v17163_v42 = vadd.f32 %v12910_v19, %v12909_v21  ;;  %v17171_v12 = vadd.f32 %v17111_v17, %v17106_v28  ;;  %v17174_v24 = vadd.f32 %v17111_v17, %v12902_v49 }
 0x4d6   : > { %v9070_v18 = vsel %vm14184_vm13, %v9068_v25, %v9069_v48  ;;  %v9073_v1 = vrot.slane %v8956_v33, 5  ;;  %v9076_v16 = vrot.slane %v8957_v27, 5  ;;  %11166 = vmatmul.mubr.bf16.gmra.mxu1 %v13947_v55  ;;  %v8959_v15 = vld [vmem:[#allocation2 + $0x64] sm:$0xf]  ;;  %v8960_v56 = vld [vmem:[#allocation2 + $0x68] sm:$0x1]  ;;  %v13030_v55 = vpop.f32.mrf.mxu0  ;;  %v12913_v32 = vpop.f32.mrf.mxu1  ;;  %v17176_v45 = vadd.f32 %v13028_v9, %v13027_v8 }
 0x4d7   : > { %9189 = vst [vmem:[#allocation3 + $0x164] sm:$0xf] %v9070_v18  ;;  %13366 = vmatprep.mubr.bf16.mxu1 %v13950_v58  ;;  %v12095_v33 = vrot.slane %v8958_v6, 9  ;;  %v9080_v27 = vrot.slane %v8959_v15, 5  ;;  %v9083_v60 = vrot.slane %v8960_v56, 5  ;;  %v17182_v50 = vadd.f32 %v12913_v32, %v12912_v34 }
 0x4d8   : > { %v9074_v0 = vsel %vm14184_vm13, %v12094_v38, %v9073_v1  ;;  %v9075_v48 = vrot.slane %v9073_v1, 4  ;;  %v13031_v25 = vpop.f32.mrf.mxu0  ;;  %v8961_v28 = vld [vmem:[#allocation2 + $0x6c] sm:$0xe]  ;;  %v8962_v49 = vld [vmem:[#allocation2 + $0x70] sm:$0xf]  ;;  %v12915_v47 = vpop.f32.mrf.mxu1  ;;  %v17188_v8 = vadd.f32 %v16719_v4, %v16808_v2  ;;  %v17192_v6 = vadd.f32 %v16771_v52, %v16814_v3 }
 0x4d9   : > { %9190 = vst [vmem:[#allocation3 + $0x188] sm:$0xf] %v9074_v0  ;;  %v9081_v21 = vsel %vm14184_vm13, %v12095_v33, %v9080_v27  ;;  %v9082_v7 = vrot.slane %v9080_v27, 4  ;;  %v17184_v38 = vadd.f32 %v13031_v25, %v13030_v55  ;;  %v17196_v19 = vadd.f32 %v16741_v59, %v16830_v41  ;;  %v8963_v1 = vld [vmem:[#allocation2 + $0x74] sm:$0x1]  ;;  %v17907_v27 = vld [vmem:[#allocation14_spill] sm:$0xff] }
 0x4da   : > { %v9077_v30 = vsel %vm14184_vm13, %v9075_v48, %v9076_v16  ;;  %9192 = vst [vmem:[#allocation3 + $0x1d0] sm:$0xf] %v9081_v21  ;;  %v17199_v58 = vadd.f32 %v17111_v17, %v12905_v14  ;;  %v12096_v16 = vrot.slane %v8961_v28, 9  ;;  %v9087_v9 = vrot.slane %v8962_v49, 5  ;;  %v13033_v15 = vpop.f32.mrf.mxu0  ;;  %v13951_v4 = vld [vmem:[#allocation3 + $0x68] ss:$36 sps:$4 sm:$0xff]   ;;  %v12916_v56 = vpop.f32.mrf.mxu1 }
 0x4db   : > { %9191 = vst [vmem:[#allocation3 + $0x1ac] sm:$0xf] %v9077_v30  ;;  %v9084_v18 = vsel %vm14184_vm13, %v9082_v7, %v9083_v60  ;;  %v9090_v2 = vrot.slane %v8963_v1, 5  ;;  %v17205_v52 = vadd.f32 %v16790_v26, %v16847_v54  ;;  %v17209_v59 = vadd.f32 %v16794_v31, %v16870_v36  ;;  %v13952_v41 = vld [vmem:[#allocation3 + $0xb0] ss:$36 sps:$4 sm:$0xff]   ;;  %v17906_v33 = vld [vmem:[#allocation15_spill] sm:$0xff] }
 0x4dc   : > { %9193 = vst [vmem:[#allocation3 + $0x1f4] sm:$0xf] %v9084_v18  ;;  %v17213_v3 = vadd.f32 %v16796_v40, %v16886_v43  ;;  %v9088_v14 = vsel %vm14184_vm13, %v12096_v16, %v9087_v9  ;;  %v9089_v34 = vrot.slane %v9087_v9, 4  ;;  %v17217_v0 = vadd.f32 %v12916_v56, %v12915_v47  ;;  %v13034_v48 = vpop.f32.mrf.mxu0  ;;  %v8964_v31 = vld [vmem:[#allocation2 + $0x78] sm:$0xe]  ;;  %v12918_v55 = vpop.f32.mrf.mxu1  ;;  %v17908_v43 = vld [vmem:[#allocation27_spill] sm:$0xff] }
 0x4dd   : > { %v17221_v26 = vadd.f32 %v17907_v27, %v17906_v33  ;;  %9194 = vst [vmem:[#allocation3 + $0x218] sm:$0xf] %v9088_v14  ;;  %v8965_v54 = vld [vmem:[#allocation2 + $0x7c] sm:$0xf]  ;;  %v8966_v36 = vld [vmem:[#allocation2 + $0x80] sm:$0x1]  ;;  %v17223_v40 = vadd.f32 %v13034_v48, %v13033_v15  ;;  %v17241_v15 = vadd.f32 %v17111_v17, %v17157_v62 }
 0x4de   : > { %13367 = vmatmul.mubr.bf16.vlgmr.msra.gmra.mxu1 %v13951_v4  ;;  %v17909_v60 = vld [vmem:[#allocation23_spill] sm:$0xff]  ;;  %v17910_v30 = vld [vmem:[#allocation29_spill] sm:$0xff]  ;;  %v17912_v25 = vld [vmem:[#allocation32_spill] sm:$0xff]  ;;  %v9091_v47 = vsel %vm14184_vm13, %v9089_v34, %v9090_v2  ;;  %v12097_v18 = vrot.slane %v8964_v31, 9  ;;  %v9094_v1 = vrot.slane %v8965_v54, 5  ;;  %v9097_v16 = vrot.slane %v8966_v36, 5  ;;  %v13036_v9 = vpop.f32.mrf.mxu0  ;;  %v12919_v48 = vpop.f32.mrf.mxu1 }
 0x4df   : > { %v17227_v32 = vadd.f32 %v17909_v60, %v17908_v43  ;;  %v17911_v21 = vld [vmem:[#allocation25_spill] sm:$0xff]  ;;  %v17913_v28 = vld [vmem:[#allocation26_spill] sm:$0xff]  ;;  %13370 = vmatprep.mubr.bf16.mxu1 %v13952_v41  ;;  %9195 = vst [vmem:[#allocation3 + $0x23c] sm:$0xf] %v9091_v47  ;;  %v17914_v33 = vld [vmem:[#allocation16_spill] sm:$0xff]  ;;  %v17257_v54 = vadd.f32 %v12919_v48, %v12918_v55  ;;  %v17261_v43 = vadd.f32 %v17022_v20, %v17115_v11 }
 0x4e0   : > { %v17231_v7 = vadd.f32 %v17911_v21, %v17910_v30  ;;  %v17235_v49 = vadd.f32 %v17913_v28, %v17912_v25  ;;  %v8967_v4 = vld [vmem:[#allocation2 + $0x84] sm:$0xe]  ;;  %v8968_v56 = vld [vmem:[#allocation2 + $0x88] sm:$0xf]  ;;  %v8969_v14 = vld [vmem:[#allocation2 + $0x8c] sm:$0x1]  ;;  %v17245_v27 = vadd.f32 %v17914_v33, %v17046_v44  ;;  %v9095_v62 = vsel %vm14184_vm13, %v12097_v18, %v9094_v1  ;;  %v13037_v36 = vpop.f32.mrf.mxu0  ;;  %v12921_v28 = vpop.f32.mrf.mxu1 }
 0x4e1   : > { %v17915_v41 = vld [vmem:[#allocation11_spill] sm:$0xff]  ;;  %v17916_v34 = vld [vmem:[#allocation17_spill] sm:$0xff]  ;;  %v17265_v44 = vadd.f32 %v17032_v13, %v17125_v22  ;;  %v9096_v60 = vrot.slane %v9094_v1, 4  ;;  %9196 = vst [vmem:[#allocation3 + $0x260] sm:$0xf] %v9095_v62  ;;  %v12098_v30 = vrot.slane %v8967_v4, 9  ;;  %v17269_v55 = vadd.f32 %v17111_v17, %v17163_v42 }
 0x4e2   : > { %v17249_v2 = vadd.f32 %v17915_v41, %v17056_v61  ;;  %v17253_v31 = vadd.f32 %v17916_v34, %v17086_v53  ;;  %v13953_v61 = vld [vmem:[#allocation3 + $0xf8] ss:$36 sps:$4 sm:$0xff]   ;;  %v9101_v53 = vrot.slane %v8968_v56, 5  ;;  %v9104_v21 = vrot.slane %v8969_v14, 5  ;;  %v13954_v47 = vld [vmem:[#allocation3 + $0x140] ss:$36 sps:$4 sm:$0xff]   ;;  %v13039_v11 = vpop.f32.mrf.mxu0 }
 0x4e3   : > { %v8970_v25 = vld [vmem:[#allocation2 + $0x90] sm:$0xe]  ;;  %v8971_v18 = vld [vmem:[#allocation2 + $0x94] sm:$0xf]  ;;  %v17271_v20 = vadd.f32 %v13037_v36, %v13036_v9  ;;  %v17275_v13 = vadd.f32 %v17062_v37, %v17144_v51  ;;  %v17279_v22 = vadd.f32 %v17078_v29, %v17153_v57  ;;  %v9098_v1 = vsel %vm14184_vm13, %v9096_v60, %v9097_v16  ;;  %v8972_v56 = vld [vmem:[#allocation2 + $0x98] sm:$0x1]  ;;  %v12922_v9 = vpop.f32.mrf.mxu1 }
 0x4e4   : > { %v9102_v4 = vsel %vm14184_vm13, %v12098_v30, %v9101_v53  ;;  %v9103_v42 = vrot.slane %v9101_v53, 4  ;;  %v12099_v14 = vrot.slane %v8970_v25, 9  ;;  %v8973_v48 = vld [vmem:[#allocation2 + $0x9c] sm:$0xe]  ;;  %9197 = vst [vmem:[#allocation3 + $0x284] sm:$0xf] %v9098_v1  ;;  %v17285_v51 = vadd.f32 %v12922_v9, %v12921_v28  ;;  %v13040_v29 = vpop.f32.mrf.mxu0 }
 0x4e5   : > { %9198 = vst [vmem:[#allocation3 + $0x2a8] sm:$0xf] %v9102_v4  ;;  %v9108_v33 = vrot.slane %v8971_v18, 5  ;;  %v9111_v37 = vrot.slane %v8972_v56, 5  ;;  %v8974_v41 = vld [vmem:[#allocation2 + $0xa0] sm:$0xf]  ;;  %v17289_v57 = vadd.f32 %v17102_v23, %v17171_v12  ;;  %v12924_v34 = vpop.f32.mrf.mxu1  ;;  %v17293_v53 = vadd.f32 %v13040_v29, %v13039_v11 }
 0x4e6   : > { %13371 = vmatmul.mubr.bf16.gmra.mxu1 %v13953_v61  ;;  %v9105_v16 = vsel %vm14184_vm13, %v9103_v42, %v9104_v21  ;;  %v8975_v62 = vld [vmem:[#allocation2 + $0xa4] sm:$0x1]  ;;  %v12100_v36 = vrot.slane %v8973_v48, 9  ;;  %v9115_v60 = vrot.slane %v8974_v41, 5  ;;  %v8976_v30 = vld [vmem:[#allocation2 + $0xa8] sm:$0xe]  ;;  %v10814_v25 = vadd.f32 %v17111_v17, %v17182_v50  ;;  %v13042_v28 = vpop.f32.mrf.mxu0 }
 0x4e7   : > { %13374 = vmatprep.mubr.bf16.mxu1 %v13954_v47  ;;  %9199 = vst [vmem:[#allocation3 + $0x2cc] sm:$0xf] %v9105_v16  ;;  %v9109_v23 = vsel %vm14184_vm13, %v12099_v14, %v9108_v33  ;;  %v9110_v12 = vrot.slane %v9108_v33, 4  ;;  %v9118_v61 = vrot.slane %v8975_v62, 5  ;;  %v8977_v1 = vld [vmem:[#allocation2 + $0xac] sm:$0xf]  ;;  %v12925_v42 = vpop.f32.mrf.mxu1  ;;  %v17303_v47 = vadd.f32 %v17121_v5, %v17174_v24 }
 0x4e8   : > { %9200 = vst [vmem:[#allocation3 + $0x2f0] sm:$0xf] %v9109_v23  ;;  %v9116_v21 = vsel %vm14184_vm13, %v12100_v36, %v9115_v60  ;;  %v9117_v18 = vrot.slane %v9115_v60, 4  ;;  %v8978_v4 = vld [vmem:[#allocation2 + $0xb0] sm:$0x1]  ;;  %v12101_v11 = vrot.slane %v8976_v30, 9  ;;  %v17307_v9 = vadd.f32 %v12925_v42, %v12924_v34  ;;  %v13043_v48 = vpop.f32.mrf.mxu0 }
 0x4e9   : > { %v9112_v50 = vsel %vm14184_vm13, %v9110_v12, %v9111_v37  ;;  %9202 = vst [vmem:[#allocation3 + $0x338] sm:$0xf] %v9116_v21  ;;  %v9122_v56 = vrot.slane %v8977_v1, 5  ;;  %v9125_v14 = vrot.slane %v8978_v4, 5  ;;  %v8979_v33 = vld [vmem:[#allocation2 + $0xb4] sm:$0xe]  ;;  %v10817_v29 = vadd.f32 %v17111_v17, %v17217_v0  ;;  %v12927_v5 = vpop.f32.mrf.mxu1 }
 0x4ea   : > { %v13955_v41 = vld [vmem:[#allocation3 + $0x188] ss:$36 sps:$4 sm:$0xff]   ;;  %9201 = vst [vmem:[#allocation3 + $0x314] sm:$0xf] %v9112_v50  ;;  %v9119_v16 = vsel %vm14184_vm13, %v9117_v18, %v9118_v61  ;;  %v17313_v24 = vadd.f32 %v13043_v48, %v13042_v28  ;;  %v8980_v62 = vld [vmem:[#allocation2 + $0xb8] sm:$0xf]  ;;  %v17317_v36 = vadd.f32 %v17139_v46, %v17199_v58  ;;  %v13045_v12 = vpop.f32.mrf.mxu0  ;;  %v17323_v28 = vadd.f32 %v17150_v63, %v17241_v15 }
 0x4eb   : > { %v8981_v37 = vld [vmem:[#allocation2 + $0xbc] sm:$0x1]  ;;  %9203 = vst [vmem:[#allocation3 + $0x35c] sm:$0xf] %v9119_v16  ;;  %v9123_v34 = vsel %vm14184_vm13, %v12101_v11, %v9122_v56  ;;  %v9124_v60 = vrot.slane %v9122_v56, 4  ;;  %v12102_v30 = vrot.slane %v8979_v33, 9  ;;  %v12928_v61 = vpop.f32.mrf.mxu1  ;;  %v17327_v46 = vadd.f32 %v17161_v35, %v17269_v55 }
 0x4ec   : > { %v9129_v0 = vrot.slane %v8980_v62, 5  ;;  %v8982_v23 = vld [vmem:[#allocation2 + $0xc0] sm:$0xe]  ;;  %9204 = vst [vmem:[#allocation3 + $0x380] sm:$0xf] %v9123_v34  ;;  %v17330_v58 = vadd.f32 %v17165_v10, %v10814_v25  ;;  %v17334_v4 = vadd.f32 %v12928_v61, %v12927_v5  ;;  %v13046_v50 = vpop.f32.mrf.mxu0  ;;  %v9132_v55 = vrot.slane %v8981_v37, 5 }
 0x4ed   : > { %v8983_v21 = vld [vmem:[#allocation2 + $0xc4] sm:$0xf]  ;;  %v13956_v18 = vld [vmem:[#allocation3 + $0x1d0] ss:$36 sps:$4 sm:$0xff]   ;;  %v9126_v1 = vsel %vm14184_vm13, %v9124_v60, %v9125_v14  ;;  %v12930_v15 = vpop.f32.mrf.mxu1  ;;  %v12103_v10 = vrot.slane %v8982_v23, 9  ;;  %v17338_v25 = vadd.f32 %v13046_v50, %v13045_v12  ;;  %v17341_v16 = vadd.f32 %v17176_v45, %v10817_v29 }
 0x4ee   : > { %v9130_v11 = vsel %vm14184_vm13, %v12102_v30, %v9129_v0  ;;  %v8984_v42 = vld [vmem:[#allocation2 + $0xc8] sm:$0x1]  ;;  %v8985_v63 = vld [vmem:[#allocation2 + $0xcc] sm:$0xe]  ;;  %13375 = vmatmul.mubr.bf16.gmra.mxu1 %v13955_v41  ;;  %9205 = vst [vmem:[#allocation3 + $0x3a4] sm:$0xf] %v9126_v1  ;;  %v13048_v48 = vpop.f32.mrf.mxu0  ;;  %v10822_v61 = vadd.f32 %v17111_v17, %v17257_v54 }
 0x4ef   : > { %v9131_v35 = vrot.slane %v9129_v0, 4  ;;  %9206 = vst [vmem:[#allocation3 + $0x3c8] sm:$0xf] %v9130_v11  ;;  %13378 = vmatprep.mubr.bf16.mxu1 %v13956_v18  ;;  %v9136_v56 = vrot.slane %v8983_v21, 5  ;;  %v9139_v14 = vrot.slane %v8984_v42, 5  ;;  %v12931_v41 = vpop.f32.mrf.mxu1  ;;  %v12104_v34 = vrot.slane %v8985_v63, 9 }
 0x4f0   : > { %v8986_v33 = vld [vmem:[#allocation2 + $0xd0] sm:$0xf]  ;;  %v8987_v62 = vld [vmem:[#allocation2 + $0xd4] sm:$0x1]  ;;  %v12932_v0 = vadd.f32 %v12931_v41, %v12930_v15  ;;  %v13049_v23 = vpop.f32.mrf.mxu0  ;;  %v13958_v54 = vld [vmem:[#allocation3 + $0x260] ss:$36 sps:$4 sm:$0xff]  }
 0x4f1   : > { %v9133_v5 = vsel %vm14184_vm13, %v9131_v35, %v9132_v55  ;;  %v9143_v60 = vrot.slane %v8986_v33, 5  ;;  %v9137_v37 = vsel %vm14184_vm13, %v12103_v10, %v9136_v56  ;;  %v9138_v30 = vrot.slane %v9136_v56, 4  ;;  %v12933_v45 = vpop.f32.mrf.mxu1  ;;  %v13957_v42 = vld [vmem:[#allocation3 + $0x218] ss:$36 sps:$4 sm:$0xff]  }
 0x4f2   : > { %9207 = vst [vmem:[#allocation3 + $0x3ec] sm:$0xf] %v9133_v5  ;;  %v9146_v12 = vrot.slane %v8987_v62, 5  ;;  %9208 = vst [vmem:[#allocation3 + $0x410] sm:$0xf] %v9137_v37  ;;  %v17349_v29 = vadd.f32 %v13049_v23, %v13048_v48  ;;  %v13051_v11 = vpop.f32.mrf.mxu0  ;;  %v17360_v56 = vadd.f32 %v17184_v38, %v10822_v61  ;;  %v10830_v38 = vadd.f32 %v17111_v17, %v17307_v9 }
 0x4f3   : > { %v9144_v21 = vsel %vm14184_vm13, %v12104_v34, %v9143_v60  ;;  %v9145_v18 = vrot.slane %v9143_v60, 4  ;;  %v9140_v1 = vsel %vm14184_vm13, %v9138_v30, %v9139_v14  ;;  %v12934_v50 = vpop.f32.mrf.mxu1  ;;  %v10825_v14 = vadd.f32 %v17111_v17, %v17285_v51  ;;  %v13959_v37 = vld [vmem:[#allocation3 + $0x2a8] ss:$36 sps:$4 sm:$0xff]   ;;  %v13960_v23 = vld [vmem:[#allocation3 + $0x2f0] ss:$36 sps:$4 sm:$0xff]  }
 0x4f4   : > { %9210 = vst [vmem:[#allocation3 + $0x458] sm:$0xf] %v9144_v21  ;;  %9209 = vst [vmem:[#allocation3 + $0x434] sm:$0xf] %v9140_v1  ;;  %v12935_v15 = vadd.f32 %v12934_v50, %v12933_v45  ;;  %v13052_v35 = vpop.f32.mrf.mxu0 }
 0x4f5   : > { %v9147_v63 = vsel %vm14184_vm13, %v9145_v18, %v9146_v12  ;;  %v12936_v55 = vpop.f32.mrf.mxu1  ;;  %v17357_v10 = vadd.f32 %v13052_v35, %v13051_v11  ;;  %v17367_v60 = vadd.f32 %v17223_v40, %v10825_v14  ;;  %v17376_v40 = vadd.f32 %v17271_v20, %v10830_v38 }
 0x4f6   : > { %9211 = vst [vmem:[#allocation3 + $0x47c] sm:$0xf] %v9147_v63  ;;  %13379 = vmatmul.mubr.bf16.gmra.mxu1 %v13957_v42  ;;  %v13182_v48 = vpop.f32.mrf.mxu0  ;;  %v10833_v11 = vadd.f32 %v17111_v17, %v17334_v4  ;;  %v13961_v63 = vld [vmem:[#allocation3 + $0x338] ss:$36 sps:$4 sm:$0xff]   ;;  %v10838_v4 = vadd.f32 %v17111_v17, %v12932_v0 }
 0x4f7   : > { %13382 = vmatprep.mubr.bf16.mxu1 %v13958_v54  ;;  %v12937_v33 = vpop.f32.mrf.mxu1 }
 0x4f8   : > { %v12938_v5 = vadd.f32 %v12937_v33, %v12936_v55  ;;  %v13183_v39 = vpop.f32.mrf.mxu0  ;;  %v13962_v55 = vld [vmem:[#allocation3 + $0x380] ss:$36 sps:$4 sm:$0xff]   ;;  %v17390_v20 = vadd.f32 %v17293_v53, %v10833_v11  ;;  %v17402_v38 = vadd.f32 %v17313_v24, %v10838_v4 }
 0x4f9   : > { %v12939_v41 = vpop.f32.mrf.mxu1  ;;  %v17364_v62 = vadd.f32 %v13183_v39, %v13182_v48  ;;  %v13963_v53 = vld [vmem:[#allocation3 + $0x3c8] ss:$36 sps:$4 sm:$0xff]  }
 0x4fa   : > { %v13185_v34 = vpop.f32.mrf.mxu0 }
 0x4fb   : > { %v12940_v30 = vpop.f32.mrf.mxu1 }
 0x4fc   : > { %v12941_v12 = vadd.f32 %v12940_v30, %v12939_v41  ;;  %v13186_v61 = vpop.f32.mrf.mxu0 }
 0x4fd   : > { %v13070_v51 = vpop.f32.mrf.mxu1  ;;  %v17371_v45 = vadd.f32 %v13186_v61, %v13185_v34  ;;  %v10841_v61 = vadd.f32 %v17111_v17, %v12935_v15  ;;  %v13965_v4 = vld [vmem:[#allocation3 + $0x458] ss:$36 sps:$4 sm:$0xff]  }
 0x4fe   : > { %13383 = vmatmul.mubr.bf16.gmra.mxu1 %v13959_v37  ;;  %v17373_v18 = vpop.f32.mrf.mxu0 }
 0x4ff   : > { %13386 = vmatprep.mubr.bf16.mxu1 %v13960_v23  ;;  %v13071_v21 = vpop.f32.mrf.mxu1  ;;  %v17415_v24 = vadd.f32 %v17338_v25, %v10841_v61 }
 0x500   : > { %v13072_v1 = vadd.f32 %v13071_v21, %v13070_v51  ;;  %v17380_v50 = vpop.f32.mrf.mxu0 }
 0x501   : > { %v13073_v42 = vpop.f32.mrf.mxu1 }
 0x502   : > { %v17383_v9 = vadd.f32 %v13072_v1, %v17188_v8  ;;  %v17385_v35 = vpop.f32.mrf.mxu0 }
 0x503   : > { %v13074_v54 = vpop.f32.mrf.mxu1 }
 0x504   : > { %v13075_v14 = vadd.f32 %v13074_v54, %v13073_v42  ;;  %v17387_v33 = vpop.f32.mrf.mxu0  ;;  %v10846_v54 = vadd.f32 %v17111_v17, %v12938_v5  ;;  %v10849_v5 = vadd.f32 %v17111_v17, %v12941_v12 }
 0x505   : > { %v13076_v48 = vpop.f32.mrf.mxu1 }
 0x506   : > { %13387 = vmatmul.mubr.bf16.gmra.mxu1 %v13961_v63  ;;  %v11051_v39 = vadd.f32 %v13075_v14, %v17192_v6  ;;  %v17394_v41 = vpop.f32.mrf.mxu0  ;;  %v13964_v6 = vld [vmem:[#allocation3 + $0x410] ss:$36 sps:$4 sm:$0xff]   ;;  %v17428_v25 = vadd.f32 %v17349_v29, %v10846_v54 }
 0x507   : > { %13390 = vmatprep.mubr.bf16.mxu1 %v13962_v55  ;;  %v13077_v8 = vpop.f32.mrf.mxu1 }
 0x508   : > { %v13078_v34 = vadd.f32 %v13077_v8, %v13076_v48  ;;  %v17396_v30 = vpop.f32.mrf.mxu0  ;;  %17917 = vst [vmem:[#allocation18_spill] sm:$0xff] %v17428_v25 }
 0x509   : > { %v13079_v37 = vpop.f32.mrf.mxu1 }
 0x50a   : > { %v17399_v23 = vadd.f32 %v13078_v34, %v17196_v19  ;;  %v17405_v0 = vpop.f32.mrf.mxu0 }
 0x50b   : > { %v13080_v51 = vpop.f32.mrf.mxu1 }
 0x50c   : > { %v13081_v21 = vadd.f32 %v13080_v51, %v13079_v37  ;;  %v17407_v11 = vpop.f32.mrf.mxu0 }
 0x50d   : > { %v13082_v1 = vpop.f32.mrf.mxu1 }
 0x50e   : > { %13391 = vmatmul.mubr.bf16.gmra.mxu1 %v13963_v53  ;;  %v17410_v42 = vadd.f32 %v13081_v21, %v17205_v52  ;;  %v17412_v63 = vpop.f32.mrf.mxu0 }
 0x50f   : > { %13394 = vmatprep.mubr.bf16.mxu1 %v13964_v6  ;;  %v13083_v19 = vpop.f32.mrf.mxu1 }
 0x510   : > { %v13084_v15 = vadd.f32 %v13083_v19, %v13082_v1  ;;  %v17418_v14 = vpop.f32.mrf.mxu0 }
 0x511   : > { %v13085_v55 = vpop.f32.mrf.mxu1 }
 0x512   : > { %v17421_v48 = vadd.f32 %v13084_v15, %v17209_v59  ;;  %v17423_v34 = vpop.f32.mrf.mxu0  ;;  %v17442_v15 = vadd.f32 %v17357_v10, %v10849_v5  ;;  %v17456_v10 = vadd.f32 %v17364_v62, %v17383_v9 }
 0x513   : > { %v13086_v8 = vpop.f32.mrf.mxu1 }
 0x514   : > { %v13087_v52 = vadd.f32 %v13086_v8, %v13085_v55  ;;  %v17425_v53 = vpop.f32.mrf.mxu0  ;;  %17918 = vst [vmem:[#allocation19_spill] sm:$0xff] %v17442_v15 }
 0x515   : > { %v13088_v37 = vpop.f32.mrf.mxu1 }
 0x516   : > { %13395 = vmatmul.mubr.bf16.gmra.mxu1 %v13965_v4  ;;  %v17432_v61 = vadd.f32 %v13087_v52, %v17213_v3  ;;  %v17434_v6 = vpop.f32.mrf.mxu0 }
 0x517   : > { %v13089_v51 = vpop.f32.mrf.mxu1 }
 0x518   : > { %v13090_v59 = vadd.f32 %v13089_v51, %v13088_v37  ;;  %v17439_v19 = vpop.f32.mrf.mxu0 }
 0x519   : > { %v13091_v21 = vpop.f32.mrf.mxu1 }
 0x51a   : > { %v17437_v1 = vadd.f32 %v13090_v59, %v17221_v26  ;;  %v17447_v3 = vpop.f32.mrf.mxu0  ;;  %v17464_v59 = vadd.f32 %v17371_v45, %v11051_v39 }
 0x51b   : > { %v13092_v29 = vpop.f32.mrf.mxu1 }
 0x51c   : > { %v13093_v54 = vadd.f32 %v13092_v29, %v13091_v21  ;;  %v17452_v26 = vpop.f32.mrf.mxu0 }
 0x51d   : > { %v13094_v55 = vpop.f32.mrf.mxu1 }
 0x51e   : > { %v17445_v17 = vadd.f32 %v13093_v54, %v17227_v32  ;;  %v17461_v32 = vpop.f32.mrf.mxu0 }
 0x51f   : > { %v13095_v12 = vpop.f32.mrf.mxu1 }
 0x520   : > { %v13096_v4 = vadd.f32 %v13095_v12, %v13094_v55  ;;  %v17466_v29 = vpop.f32.mrf.mxu0 }
 0x521   : > { %v13097_v8 = vpop.f32.mrf.mxu1 }
 0x522   : > { %v17450_v52 = vadd.f32 %v13096_v4, %v17231_v7  ;;  %v17471_v62 = vpop.f32.mrf.mxu0 }
 0x523   : > { %v13098_v37 = vpop.f32.mrf.mxu1 }
 0x524   : > { %v13099_v5 = vadd.f32 %v13098_v37, %v13097_v8  ;;  %v17476_v8 = vpop.f32.mrf.mxu0 }
 0x525   : > { %v13100_v21 = vpop.f32.mrf.mxu1 }
 0x526   : > { %v17459_v51 = vadd.f32 %v13099_v5, %v17235_v49  ;;  %v17478_v5 = vpop.f32.mrf.mxu0 }
 0x527   : > { %v13101_v7 = vpop.f32.mrf.mxu1 }
 0x528   : > { %17919 = vst [vmem:[#allocation20_spill] sm:$0xff] %v17459_v51  ;;  %v13102_v54 = vadd.f32 %v13101_v7, %v13100_v21 }
 0x529   : > { %v13103_v55 = vpop.f32.mrf.mxu1 }
 0x52a   : > { %v17469_v12 = vadd.f32 %v13102_v54, %v17245_v27  ;;  %v17483_v54 = vpop.f32.mrf.mxu0 }
 0x52b   : > { %v13104_v9 = vpop.f32.mrf.mxu1 }
 0x52c   : > { %v13105_v4 = vadd.f32 %v13104_v9, %v13103_v55  ;;  %v17488_v9 = vpop.f32.mrf.mxu0 }
 0x52d   : > { %v13106_v45 = vpop.f32.mrf.mxu1  ;;  %17922 = vst [vmem:[#allocation21_spill] sm:$0xff] %v17488_v9 }
 0x52e   : > { %v17474_v49 = vadd.f32 %v13105_v4, %v17249_v2 }
 0x52f   : > { %v13107_v39 = vpop.f32.mrf.mxu1 }
 0x530   : > { %v13108_v37 = vadd.f32 %v13107_v39, %v13106_v45  ;;  %v17490_v45 = vpop.f32.mrf.mxu0 }
 0x531   : > { %v13109_v15 = vpop.f32.mrf.mxu1  ;;  %17923 = vst [vmem:[#allocation22_spill] sm:$0xff] %v17490_v45 }
 0x532   : > { %v17481_v21 = vadd.f32 %v13108_v37, %v17253_v31 }
 0x533   : > { %v13110_v27 = vpop.f32.mrf.mxu1 }
 0x534   : > { %17920 = vst [vmem:[#allocation33_spill] sm:$0xff] %v17481_v21  ;;  %v13111_v7 = vadd.f32 %v13110_v27, %v13109_v15  ;;  %v17495_v21 = vpop.f32.mrf.mxu0 }
 0x535   : > { %v13112_v2 = vpop.f32.mrf.mxu1 }
 0x536   : > { %v17486_v55 = vadd.f32 %v13111_v7, %v17261_v43  ;;  %v17500_v27 = vpop.f32.mrf.mxu0 }
 0x537   : > { %v13113_v4 = vpop.f32.mrf.mxu1 }
 0x538   : > { %17921 = vst [vmem:[#allocation34_spill] sm:$0xff] %v17486_v55  ;;  %v13114_v25 = vadd.f32 %v13113_v4, %v13112_v2  ;;  %v17502_v2 = vpop.f32.mrf.mxu0 }
 0x539   : > { %v13115_v51 = vpop.f32.mrf.mxu1 }
 0x53a   : > { %v17493_v39 = vadd.f32 %v13114_v25, %v17265_v44  ;;  %v17507_v45 = vpop.f32.mrf.mxu0 }
 0x53b   : > { %v13116_v31 = vpop.f32.mrf.mxu1 }
 0x53c   : > { %17924 = vst [vmem:[#allocation36_spill] sm:$0xff] %v17493_v39  ;;  %v13117_v37 = vadd.f32 %v13116_v31, %v13115_v51  ;;  %v17512_v31 = vpop.f32.mrf.mxu0 }
 0x53d   : > { %v13118_v43 = vpop.f32.mrf.mxu1  ;;  %17928 = vst [vmem:[#allocation24_spill] sm:$0xff] %v17512_v31 }
 0x53e   : > { %v17498_v15 = vadd.f32 %v13117_v37, %v17275_v13 }
 0x53f   : > { %v13119_v7 = vpop.f32.mrf.mxu1 }
 0x540   : > { %17925 = vst [vmem:[#allocation38_spill] sm:$0xff] %v17498_v15  ;;  %v13120_v55 = vadd.f32 %v13119_v7, %v13118_v43  ;;  %v17517_v7 = vpop.f32.mrf.mxu0 }
 0x541   : > { %v13121_v9 = vpop.f32.mrf.mxu1 }
 0x542   : > { %v17505_v4 = vadd.f32 %v13120_v55, %v17279_v22 }
 0x543   : > { %v13122_v44 = vpop.f32.mrf.mxu1 }
 0x544   : > { %17926 = vst [vmem:[#allocation39_spill] sm:$0xff] %v17505_v4  ;;  %v13123_v25 = vadd.f32 %v13122_v44, %v13121_v9  ;;  %v17522_v44 = vpop.f32.mrf.mxu0 }
 0x545   : > { %17930 = vst [vmem:[#allocation12_spill] sm:$0xff] %v17522_v44 }
 0x546   : > { %v17510_v51 = vadd.f32 %v13123_v25, %v17289_v57  ;;  %v17524_v4 = vpop.f32.mrf.mxu0 }
 0x547   : > { %v13124_v13 = vpop.f32.mrf.mxu1  ;;  %17931 = vst [vmem:[#allocation28_spill] sm:$0xff] %v17524_v4 }
 0x548   : > { %17927 = vst [vmem:[#allocation13_spill] sm:$0xff] %v17510_v51 }
 0x549   : > { %v13125_v37 = vpop.f32.mrf.mxu1 }
 0x54a   : > { %v13126_v15 = vadd.f32 %v13125_v37, %v13124_v13  ;;  %v17529_v37 = vpop.f32.mrf.mxu0 }
 0x54b   : > { %v13127_v39 = vpop.f32.mrf.mxu1 }
 0x54c   : > { %v17515_v43 = vadd.f32 %v13126_v15, %v17303_v47 }
 0x54d   : > { %v13128_v22 = vpop.f32.mrf.mxu1 }
 0x54e   : > { %v13129_v55 = vadd.f32 %v13128_v22, %v13127_v39  ;;  %v17534_v22 = vpop.f32.mrf.mxu0 }
 0x550   : > { %v17520_v9 = vadd.f32 %v13129_v55, %v17317_v36 }
 0x552   : > { %17929 = vst [vmem:[#allocation10_spill] sm:$0xff] %v17520_v9 }
 0x554   : > { %v13130_v57 = vpop.f32.mrf.mxu1 }
 0x556   : > { %v13131_v25 = vpop.f32.mrf.mxu1 }
 0x557   : > { %v13132_v51 = vadd.f32 %v13131_v25, %v13130_v57  ;;  %v17536_v57 = vpop.f32.mrf.mxu0 }
 0x558   : > { %v13133_v31 = vpop.f32.mrf.mxu1 }
 0x559   : > { %v17527_v13 = vadd.f32 %v13132_v51, %v17323_v28 }
 0x55a   : > { %v13134_v47 = vpop.f32.mrf.mxu1 }
 0x55b   : > { %17932 = vst [vmem:[#allocation42_spill] sm:$0xff] %v17527_v13  ;;  %v13135_v15 = vadd.f32 %v13134_v47, %v13133_v31  ;;  %v17541_v13 = vpop.f32.mrf.mxu0 }
 0x55d   : > { %v17532_v39 = vadd.f32 %v13135_v15, %v17327_v46  ;;  %v17546_v47 = vpop.f32.mrf.mxu0 }
 0x55e   : > { %17936 = vst [vmem:[#allocation37_spill] sm:$0xff] %v17546_v47 }
 0x55f   : > { %17933 = vst [vmem:[#allocation30_spill] sm:$0xff] %v17532_v39 }
 0x561   : > { %v13136_v36 = vpop.f32.mrf.mxu1 }
 0x563   : > { %v13137_v55 = vpop.f32.mrf.mxu1 }
 0x564   : > { %v13138_v9 = vadd.f32 %v13137_v55, %v13136_v36  ;;  %v17548_v36 = vpop.f32.mrf.mxu0 }
 0x565   : > { %v13139_v44 = vpop.f32.mrf.mxu1 }
 0x566   : > { %v17539_v25 = vadd.f32 %v13138_v9, %v17330_v58 }
 0x567   : > { %v13140_v28 = vpop.f32.mrf.mxu1 }
 0x568   : > { %17934 = vst [vmem:[#allocation31_spill] sm:$0xff] %v17539_v25  ;;  %v13141_v51 = vadd.f32 %v13140_v28, %v13139_v44  ;;  %v17553_v25 = vpop.f32.mrf.mxu0 }
 0x56a   : > { %v17544_v31 = vadd.f32 %v13141_v51, %v17341_v16  ;;  %v17558_v28 = vpop.f32.mrf.mxu0 }
 0x56c   : > { %17935 = vst [vmem:[#allocation35_spill] sm:$0xff] %v17544_v31 }
 0x56f   : > { %v13142_v46 = vpop.f32.mrf.mxu1 }
 0x571   : > { %v13143_v15 = vpop.f32.mrf.mxu1 }
 0x572   : > { %v13144_v39 = vadd.f32 %v13143_v15, %v13142_v46  ;;  %v17563_v15 = vpop.f32.mrf.mxu0 }
 0x573   : > { %v13145_v4 = vpop.f32.mrf.mxu1 }
 0x574   : > { %v17551_v55 = vadd.f32 %v13144_v39, %v17360_v56 }
 0x575   : > { %v13146_v58 = vpop.f32.mrf.mxu1 }
 0x576   : > { %17937 = vst [vmem:[#allocation40_spill] sm:$0xff] %v17551_v55  ;;  %v13147_v9 = vadd.f32 %v13146_v58, %v13145_v4  ;;  %v17568_v58 = vpop.f32.mrf.mxu0 }
 0x578   : > { %v17556_v44 = vadd.f32 %v13147_v9, %v17367_v60  ;;  %v17570_v55 = vpop.f32.mrf.mxu0 }
 0x57a   : > { %17938 = vst [vmem:[#allocation41_spill] sm:$0xff] %v17556_v44 }
 0x57c   : > { %v13148_v16 = vpop.f32.mrf.mxu1 }
 0x57e   : > { %v13149_v51 = vpop.f32.mrf.mxu1 }
 0x57f   : > { %v13150_v31 = vadd.f32 %v13149_v51, %v13148_v16 }
 0x580   : > { %v13151_v47 = vpop.f32.mrf.mxu1 }
 0x581   : > { %v17561_v46 = vadd.f32 %v13150_v31, %v17376_v40 }
 0x582   : > { %v13152_v56 = vpop.f32.mrf.mxu1 }
 0x583   : > { %17939 = vst [vmem:[#allocation6_spill] sm:$0xff] %v17561_v46  ;;  %v13153_v39 = vadd.f32 %v13152_v56, %v13151_v47  ;;  %v17575_v46 = vpop.f32.mrf.mxu0 }
 0x585   : > { %v17566_v4 = vadd.f32 %v13153_v39, %v17390_v20  ;;  %v17582_v56 = vpop.f32.mrf.mxu0 }
 0x587   : > { %17940 = vst [vmem:[#allocation5_spill] sm:$0xff] %v17566_v4 }
 0x588   : > { %v13154_v60 = vpop.f32.mrf.mxu1 }
 0x58a   : > { %v13155_v9 = vpop.f32.mrf.mxu1 }
 0x58b   : > { %v13156_v44 = vadd.f32 %v13155_v9, %v13154_v60  ;;  %v13190_v9 = vadd.f32 %v17380_v50, %v17373_v18 }
 0x58c   : > { %v13157_v16 = vpop.f32.mrf.mxu1 }
 0x58d   : > { %v17573_v51 = vadd.f32 %v13156_v44, %v17402_v38  ;;  %v17590_v38 = vpop.f32.mrf.mxu0 }
 0x58e   : > { %v13158_v40 = vpop.f32.mrf.mxu1 }
 0x58f   : > { %17941 = vst [vmem:[#allocation4_spill] sm:$0xff] %v17573_v51  ;;  %v13159_v31 = vadd.f32 %v13158_v40, %v13157_v16  ;;  %v11217_v16 = vadd.f32 %v13190_v9, %v17399_v23  ;;  %v13193_v40 = vadd.f32 %v17387_v33, %v17385_v35  ;;  %v13202_v9 = vadd.f32 %v17418_v14, %v17412_v63 }
 0x590   : > { %v13205_v14 = vadd.f32 %v17425_v53, %v17423_v34 }
 0x591   : > { %v17578_v47 = vadd.f32 %v13159_v31, %v17415_v24  ;;  %v17598_v31 = vpop.f32.mrf.mxu0  ;;  %v11220_v23 = vadd.f32 %v13193_v40, %v17410_v42 }
 0x593   : > { %17942 = vst [vmem:[#allocation7_spill] sm:$0xff] %v17578_v47  ;;  %v17609_v33 = vpop.f32.mrf.mxu0 }
 0x596   : > { %v17580_v20 = vpop.f32.mrf.mxu1 }
 0x598   : > { %v17584_v39 = vpop.f32.mrf.mxu1 }
 0x59a   : > { %v17586_v60 = vpop.f32.mrf.mxu1 }
 0x59b   : > { %17943 = vst [vmem:[#allocation8_spill] sm:$0xff] %v17586_v60 }
 0x59c   : > { %v17592_v44 = vpop.f32.mrf.mxu1 }
 0x59d   : > { %17944 = vst [vmem:[#allocation9_spill] sm:$0xff] %v17592_v44  ;;  %v13196_v44 = vadd.f32 %v17396_v30, %v17394_v41 }
 0x59e   : > { %v13368_v24 = vpop.f32.mrf.mxu1 }
 0x59f   : > { %v11378_v47 = vadd.f32 %v13368_v24, %v11217_v16  ;;  %v11225_v40 = vadd.f32 %v13196_v44, %v17421_v48  ;;  %v13214_v48 = vadd.f32 %v17466_v29, %v17461_v32 }
 0x5a0   : > { %v11369_v51 = vpop.f32.mrf.mxu1 }
 0x5a1   : > { %vm11498_vm4 = vcmp.ge.f32.partialorder %v11378_v47, 0.0  ;;  %v11530_v18 = vmul.f32 0.01, %v11378_v47  ;;  %v11370_v50 = vadd.f32 %v11369_v51, %v17456_v10  ;;  %v11233_v10 = vadd.f32 %v13202_v9, %v17437_v1 }
 0x5a2   : > { %v13369_v35 = vpop.f32.mrf.mxu1  ;;  %v13199_v1 = vadd.f32 %v17407_v11, %v17405_v0 }
 0x5a3   : > { %v11562_v16 = vsel %vm11498_vm4, %v11378_v47, %v11530_v18  ;;  %vm11496_vm5 = vcmp.ge.f32.partialorder %v11370_v50, 0.0  ;;  %v11528_v24 = vmul.f32 0.01, %v11370_v50  ;;  %v11381_v4 = vadd.f32 %v13369_v35, %v11220_v23  ;;  %v17620_v18 = vpop.f32.mrf.mxu0 }
 0x5a4   : > { %11594 = vst [vmem:[%s17603_s30 + $0x10] sm:$0xff] %v11562_v16  ;;  %v11372_v60 = vpop.f32.mrf.mxu1  ;;  %v11228_v44 = vadd.f32 %v13199_v1, %v17432_v61  ;;  %v13217_v61 = vadd.f32 %v17476_v8, %v17471_v62 }
 0x5a5   : > { %v11560_v42 = vsel %vm11496_vm5, %v11370_v50, %v11528_v24  ;;  %vm11499_vm7 = vcmp.ge.f32.partialorder %v11381_v4, 0.0  ;;  %v11531_v51 = vmul.f32 0.01, %v11381_v4  ;;  %v11373_v63 = vadd.f32 %v11372_v60, %v17464_v59  ;;  %v17630_v9 = vpop.f32.mrf.mxu0 }
 0x5a6   : > { %11592 = vst [vmem:[%s17603_s30] sm:$0xff] %v11560_v42  ;;  %v13372_v47 = vpop.f32.mrf.mxu1  ;;  %v11236_v59 = vadd.f32 %v13205_v14, %v17445_v17  ;;  %v13208_v17 = vadd.f32 %v17439_v19, %v17434_v6  ;;  %v11249_v24 = vadd.f32 %v13214_v48, %v17469_v12  ;;  %v13211_v12 = vadd.f32 %v17452_v26, %v17447_v3 }
 0x5a7   : > { %v11563_v41 = vsel %vm11499_vm7, %v11381_v4, %v11531_v51  ;;  %vm11497_vm10 = vcmp.ge.f32.partialorder %v11373_v63, 0.0  ;;  %v11529_v30 = vmul.f32 0.01, %v11373_v63  ;;  %v11394_v23 = vadd.f32 %v13372_v47, %v11233_v10 }
 0x5a8   : > { %11595 = vst [vmem:[%s17603_s30 + $0x18] sm:$0xff] %v11563_v41  ;;  %v11385_v50 = vpop.f32.mrf.mxu1  ;;  %v11241_v51 = vadd.f32 %v13208_v17, %v17450_v52  ;;  %v13226_v52 = vadd.f32 %v17500_v27, %v17495_v21 }
 0x5a9   : > { %v11561_v34 = vsel %vm11497_vm10, %v11373_v63, %v11529_v30  ;;  %vm11502_vm13 = vcmp.ge.f32.partialorder %v11394_v23, 0.0  ;;  %v11534_v53 = vmul.f32 0.01, %v11394_v23  ;;  %v11386_v60 = vadd.f32 %v11385_v50, %v11225_v40  ;;  %v17640_v63 = vpop.f32.mrf.mxu0 }
 0x5aa   : > { %11593 = vst [vmem:[%s17603_s30 + $0x8] sm:$0xff] %v11561_v34  ;;  %v13373_v4 = vpop.f32.mrf.mxu1  ;;  %v11252_v40 = vadd.f32 %v13217_v61, %v17474_v49  ;;  %v13220_v49 = vadd.f32 %v17483_v54, %v17478_v5 }
 0x5ab   : > { %v11566_v0 = vsel %vm11502_vm13, %v11394_v23, %v11534_v53  ;;  %vm11500_vm14 = vcmp.ge.f32.partialorder %v11386_v60, 0.0  ;;  %v11532_v11 = vmul.f32 0.01, %v11386_v60  ;;  %v11397_v35 = vadd.f32 %v13373_v4, %v11236_v59  ;;  %v17945_v23 = vld [vmem:[#allocation20_spill] sm:$0xff]  ;;  %v17650_v50 = vpop.f32.mrf.mxu0 }
 0x5ac   : > { %11598 = vst [vmem:[%s17603_s30 + $0x30] sm:$0xff] %v11566_v0  ;;  %v11388_v16 = vpop.f32.mrf.mxu1  ;;  %v11244_v1 = vadd.f32 %v13211_v12, %v17945_v23  ;;  %v17946_v53 = vld [vmem:[#allocation36_spill] sm:$0xff]  ;;  %v13229_v4 = vadd.f32 %v17507_v45, %v17502_v2  ;;  %v17947_v0 = vld [vmem:[#allocation33_spill] sm:$0xff] }
 0x5ad   : > { %v11564_v32 = vsel %vm11500_vm14, %v11386_v60, %v11532_v11  ;;  %vm11503_vm1 = vcmp.ge.f32.partialorder %v11397_v35, 0.0  ;;  %v11535_v29 = vmul.f32 0.01, %v11397_v35  ;;  %v11389_v10 = vadd.f32 %v11388_v16, %v11228_v44  ;;  %v17948_v16 = vld [vmem:[#allocation21_spill] sm:$0xff] }
 0x5ae   : > { %11596 = vst [vmem:[%s17603_s30 + $0x20] sm:$0xff] %v11564_v32  ;;  %v13376_v42 = vpop.f32.mrf.mxu1  ;;  %v11265_v60 = vadd.f32 %v13226_v52, %v17946_v53  ;;  %v11257_v11 = vadd.f32 %v13220_v49, %v17947_v0  ;;  %v13250_v0 = vadd.f32 %v17568_v58, %v17563_v15 }
 0x5af   : > { %v11567_v6 = vsel %vm11503_vm1, %v11397_v35, %v11535_v29  ;;  %vm11501_vm2 = vcmp.ge.f32.partialorder %v11389_v10, 0.0  ;;  %v11533_v19 = vmul.f32 0.01, %v11389_v10  ;;  %v11410_v14 = vadd.f32 %v13376_v42, %v11249_v24  ;;  %v17660_v35 = vpop.f32.mrf.mxu0  ;;  %v17949_v24 = vld [vmem:[#allocation22_spill] sm:$0xff] }
 0x5b0   : > { %11599 = vst [vmem:[%s17603_s30 + $0x38] sm:$0xff] %v11567_v6  ;;  %v11401_v47 = vpop.f32.mrf.mxu1  ;;  %v13223_v32 = vadd.f32 %v17949_v24, %v17948_v16 }
 0x5b1   : > { %v11565_v62 = vsel %vm11501_vm2, %v11389_v10, %v11533_v19  ;;  %vm11506_vm3 = vcmp.ge.f32.partialorder %v11410_v14, 0.0  ;;  %v11538_v8 = vmul.f32 0.01, %v11410_v14  ;;  %v11402_v41 = vadd.f32 %v11401_v47, %v11241_v51  ;;  %v17950_v10 = vld [vmem:[#allocation38_spill] sm:$0xff]  ;;  %v17670_v12 = vpop.f32.mrf.mxu0 }
 0x5b2   : > { %11597 = vst [vmem:[%s17603_s30 + $0x28] sm:$0xff] %v11565_v62  ;;  %v13377_v30 = vpop.f32.mrf.mxu1  ;;  %v11268_v61 = vadd.f32 %v13229_v4, %v17950_v10  ;;  %v13238_v51 = vadd.f32 %v17534_v22, %v17529_v37  ;;  %v17951_v19 = vld [vmem:[#allocation34_spill] sm:$0xff] }
 0x5b3   : > { %v11570_v3 = vsel %vm11506_vm3, %v11410_v14, %v11538_v8  ;;  %vm11504_vm6 = vcmp.ge.f32.partialorder %v11402_v41, 0.0  ;;  %v11536_v26 = vmul.f32 0.01, %v11402_v41  ;;  %v11413_v59 = vadd.f32 %v13377_v30, %v11252_v40  ;;  %v17952_v8 = vld [vmem:[#allocation24_spill] sm:$0xff]  ;;  %v17680_v49 = vpop.f32.mrf.mxu0 }
 0x5b4   : > { %11602 = vst [vmem:[%s17603_s30 + $0x50] sm:$0xff] %v11570_v3  ;;  %v11404_v34 = vpop.f32.mrf.mxu1  ;;  %v11260_v14 = vadd.f32 %v13223_v32, %v17951_v19  ;;  %v11281_v30 = vadd.f32 %v13238_v51, %v17515_v43  ;;  %v17955_v43 = vld [vmem:[#allocation28_spill] sm:$0xff]  ;;  %v13253_v51 = vadd.f32 %v17575_v46, %v17570_v55  ;;  %v17960_v19 = vld [vmem:[#allocation42_spill] sm:$0xff] }
 0x5b5   : > { %v11568_v21 = vsel %vm11504_vm6, %v11402_v41, %v11536_v26  ;;  %vm11507_vm8 = vcmp.ge.f32.partialorder %v11413_v59, 0.0  ;;  %v11539_v27 = vmul.f32 0.01, %v11413_v59  ;;  %v11405_v48 = vadd.f32 %v11404_v34, %v11244_v1  ;;  %v17953_v26 = vld [vmem:[#allocation39_spill] sm:$0xff] }
 0x5b6   : > { %11600 = vst [vmem:[%s17603_s30 + $0x40] sm:$0xff] %v11568_v21  ;;  %v13380_v44 = vpop.f32.mrf.mxu1  ;;  %v13232_v41 = vadd.f32 %v17517_v7, %v17952_v8  ;;  %v13241_v1 = vadd.f32 %v17541_v13, %v17536_v57  ;;  %v13247_v8 = vadd.f32 %v17558_v28, %v17553_v25 }
 0x5b7   : > { %v11571_v5 = vsel %vm11507_vm8, %v11413_v59, %v11539_v27  ;;  %vm11505_vm9 = vcmp.ge.f32.partialorder %v11405_v48, 0.0  ;;  %v11537_v54 = vmul.f32 0.01, %v11405_v48  ;;  %v11426_v17 = vadd.f32 %v13380_v44, %v11265_v60  ;;  %v17954_v60 = vld [vmem:[#allocation12_spill] sm:$0xff] }
 0x5b8   : > { %11603 = vst [vmem:[%s17603_s30 + $0x58] sm:$0xff] %v11571_v5  ;;  %v11417_v29 = vpop.f32.mrf.mxu1  ;;  %v11273_v59 = vadd.f32 %v13232_v41, %v17953_v26  ;;  %v13235_v21 = vadd.f32 %v17955_v43, %v17954_v60  ;;  %v17957_v5 = vld [vmem:[#allocation13_spill] sm:$0xff]  ;;  %v17963_v60 = vld [vmem:[#allocation6_spill] sm:$0xff] }
 0x5b9   : > { %v11569_v45 = vsel %vm11505_vm9, %v11405_v48, %v11537_v54  ;;  %vm11510_vm11 = vcmp.ge.f32.partialorder %v11426_v17, 0.0  ;;  %v11542_v2 = vmul.f32 0.01, %v11426_v17  ;;  %v11418_v42 = vadd.f32 %v11417_v29, %v11257_v11  ;;  %v17956_v48 = vld [vmem:[#allocation10_spill] sm:$0xff]  ;;  %v17958_v29 = vld [vmem:[#allocation37_spill] sm:$0xff] }
 0x5ba   : > { %11601 = vst [vmem:[%s17603_s30 + $0x48] sm:$0xff] %v11569_v45  ;;  %v13381_v6 = vpop.f32.mrf.mxu1  ;;  %v11284_v4 = vadd.f32 %v13241_v1, %v17956_v48  ;;  %v11276_v54 = vadd.f32 %v13235_v21, %v17957_v5  ;;  %v13244_v10 = vadd.f32 %v17548_v36, %v17958_v29  ;;  %v17959_v45 = vld [vmem:[#allocation31_spill] sm:$0xff]  ;;  %v17962_v1 = vld [vmem:[#allocation30_spill] sm:$0xff]  ;;  %v17967_v5 = vld [vmem:[#allocation9_spill] sm:$0xff] }
 0x5bb   : > { %v11574_v47 = vsel %vm11510_vm11, %v11426_v17, %v11542_v2  ;;  %vm11508_vm12 = vcmp.ge.f32.partialorder %v11418_v42, 0.0  ;;  %v11540_v40 = vmul.f32 0.01, %v11418_v42  ;;  %v11429_v62 = vadd.f32 %v13381_v6, %v11268_v61  ;;  %v17690_v17 = vpop.f32.mrf.mxu0 }
 0x5bc   : > { %11606 = vst [vmem:[%s17603_s30 + $0x70] sm:$0xff] %v11574_v47  ;;  %v11420_v52 = vpop.f32.mrf.mxu1  ;;  %v11297_v2 = vadd.f32 %v13250_v0, %v17959_v45  ;;  %v17969_v45 = vld [vmem:[#allocation41_spill] sm:$0xff] }
 0x5bd   : > { %v11572_v37 = vsel %vm11508_vm12, %v11418_v42, %v11540_v40  ;;  %vm11511_vm15 = vcmp.ge.f32.partialorder %v11429_v62, 0.0  ;;  %v11543_v22 = vmul.f32 0.01, %v11429_v62  ;;  %v11421_v23 = vadd.f32 %v11420_v52, %v11260_v14  ;;  %v13272_v47 = vpop.f32.mrf.mxu0  ;;  %v17961_v52 = vld [vmem:[#allocation35_spill] sm:$0xff] }
 0x5be   : > { %11604 = vst [vmem:[%s17603_s30 + $0x60] sm:$0xff] %v11572_v37  ;;  %v13384_v3 = vpop.f32.mrf.mxu1  ;;  %v11289_v14 = vadd.f32 %v13244_v10, %v17960_v19 }
 0x5bf   : > { %v11575_v7 = vsel %vm11511_vm15, %v11429_v62, %v11543_v22  ;;  %vm11509_vm0 = vcmp.ge.f32.partialorder %v11421_v23, 0.0  ;;  %v11541_v34 = vmul.f32 0.01, %v11421_v23  ;;  %v11442_v53 = vadd.f32 %v13384_v3, %v11281_v30  ;;  %v13273_v26 = vpop.f32.mrf.mxu0 }
 0x5c0   : > { %11607 = vst [vmem:[%s17603_s30 + $0x78] sm:$0xff] %v11575_v7  ;;  %v11433_v27 = vpop.f32.mrf.mxu1  ;;  %v11300_v30 = vadd.f32 %v13253_v51, %v17961_v52  ;;  %v13262_v22 = vadd.f32 %v17630_v9, %v17620_v18  ;;  %v11292_v3 = vadd.f32 %v13247_v8, %v17962_v1  ;;  %v13256_v7 = vadd.f32 %v17590_v38, %v17582_v56  ;;  %v17970_v51 = vld [vmem:[#allocation19_spill] sm:$0xff] }
 0x5c1   : > { %v11573_v13 = vsel %vm11509_vm0, %v11421_v23, %v11541_v34  ;;  %vm11514_vm4 = vcmp.ge.f32.partialorder %v11442_v53, 0.0  ;;  %v11546_v57 = vmul.f32 0.01, %v11442_v53  ;;  %v11434_v44 = vadd.f32 %v11433_v27, %v11273_v59  ;;  %v13275_v56 = vpop.f32.mrf.mxu0 }
 0x5c2   : > { %11605 = vst [vmem:[%s17603_s30 + $0x68] sm:$0xff] %v11573_v13  ;;  %v13385_v11 = vpop.f32.mrf.mxu1  ;;  %v13162_v34 = vadd.f32 %v17584_v39, %v17580_v20  ;;  %v11313_v18 = vadd.f32 %v13262_v22, %v17963_v60  ;;  %v13265_v27 = vadd.f32 %v17650_v50, %v17640_v63  ;;  %v17968_v50 = vld [vmem:[#allocation5_spill] sm:$0xff]  ;;  %v13274_v10 = vadd.f32 %v13273_v26, %v13272_v47  ;;  %v17972_v26 = vld [vmem:[#allocation7_spill] sm:$0xff] }
 0x5c3   : > { %v11578_v16 = vsel %vm11514_vm4, %v11442_v53, %v11546_v57  ;;  %vm11512_vm5 = vcmp.ge.f32.partialorder %v11434_v44, 0.0  ;;  %v11544_v24 = vmul.f32 0.01, %v11434_v44  ;;  %v11445_v32 = vadd.f32 %v13385_v11, %v11284_v4  ;;  %v17964_v4 = vld [vmem:[#allocation40_spill] sm:$0xff] }
 0x5c4   : > { %11610 = vst [vmem:[%s17603_s30 + $0x90] sm:$0xff] %v11578_v16  ;;  %v11436_v61 = vpop.f32.mrf.mxu1  ;;  %v11305_v13 = vadd.f32 %v13256_v7, %v17964_v4  ;;  %v13259_v57 = vadd.f32 %v17609_v33, %v17598_v31  ;;  %v17966_v11 = vld [vmem:[#allocation8_spill] sm:$0xff]  ;;  %v11316_v16 = vadd.f32 %v13265_v27, %v17968_v50  ;;  %v13276_v31 = vpop.f32.mrf.mxu0 }
 0x5c5   : > { %v11576_v15 = vsel %vm11512_vm5, %v11434_v44, %v11544_v24  ;;  %vm11515_vm7 = vcmp.ge.f32.partialorder %v11445_v32, 0.0  ;;  %v11547_v58 = vmul.f32 0.01, %v11445_v32  ;;  %v11437_v42 = vadd.f32 %v11436_v61, %v11276_v54  ;;  %v17965_v44 = vld [vmem:[#allocation18_spill] sm:$0xff] }
 0x5c6   : > { %11608 = vst [vmem:[%s17603_s30 + $0x80] sm:$0xff] %v11576_v15  ;;  %v13388_v6 = vpop.f32.mrf.mxu1  ;;  %v11168_v0 = vadd.f32 %v13162_v34, %v17965_v44  ;;  %v13165_v54 = vadd.f32 %v17967_v5, %v17966_v11 }
 0x5c7   : > { %v11579_v40 = vsel %vm11515_vm7, %v11445_v32, %v11547_v58  ;;  %vm11513_vm10 = vcmp.ge.f32.partialorder %v11437_v42, 0.0  ;;  %v11545_v36 = vmul.f32 0.01, %v11437_v42  ;;  %v11458_v62 = vadd.f32 %v13388_v6, %v11297_v2 }
 0x5c8   : > { %11611 = vst [vmem:[%s17603_s30 + $0x98] sm:$0xff] %v11579_v40  ;;  %v11449_v41 = vpop.f32.mrf.mxu1  ;;  %v11308_v2 = vadd.f32 %v13259_v57, %v17969_v45  ;;  %v11171_v6 = vadd.f32 %v13165_v54, %v17970_v51 }
 0x5c9   : > { %v11577_v37 = vsel %vm11513_vm10, %v11437_v42, %v11545_v36  ;;  %vm11518_vm13 = vcmp.ge.f32.partialorder %v11458_v62, 0.0  ;;  %v11550_v55 = vmul.f32 0.01, %v11458_v62  ;;  %v11450_v46 = vadd.f32 %v11449_v41, %v11289_v14  ;;  %v17971_v41 = vld [vmem:[#allocation4_spill] sm:$0xff] }
 0x5ca   : > { %11609 = vst [vmem:[%s17603_s30 + $0x88] sm:$0xff] %v11577_v37  ;;  %v13389_v23 = vpop.f32.mrf.mxu1  ;;  %v13268_v42 = vadd.f32 %v17670_v12, %v17660_v35  ;;  %v11329_v14 = vadd.f32 %v13274_v10, %v11168_v0  ;;  %v13271_v12 = vadd.f32 %v17690_v17, %v17680_v49 }
 0x5cb   : > { %v11582_v59 = vsel %vm11518_vm13, %v11458_v62, %v11550_v55  ;;  %vm11516_vm14 = vcmp.ge.f32.partialorder %v11450_v46, 0.0  ;;  %v11548_v25 = vmul.f32 0.01, %v11450_v46  ;;  %v11461_v28 = vadd.f32 %v13389_v23, %v11300_v30 }
 0x5cc   : > { %11614 = vst [vmem:[%s17603_s30 + $0xb0] sm:$0xff] %v11582_v59  ;;  %v11452_v53 = vpop.f32.mrf.mxu1  ;;  %v13277_v62 = vadd.f32 %v13276_v31, %v13275_v56  ;;  %v11321_v52 = vadd.f32 %v13268_v42, %v17971_v41  ;;  %v11324_v59 = vadd.f32 %v13271_v12, %v17972_v26 }
 0x5cd   : > { %v11580_v9 = vsel %vm11516_vm14, %v11450_v46, %v11548_v25  ;;  %vm11519_vm1 = vcmp.ge.f32.partialorder %v11461_v28, 0.0  ;;  %v11551_v43 = vmul.f32 0.01, %v11461_v28  ;;  %v11453_v21 = vadd.f32 %v11452_v53, %v11292_v3 }
 0x5ce   : > { %11612 = vst [vmem:[%s17603_s30 + $0xa0] sm:$0xff] %v11580_v9  ;;  %v13392_v48 = vpop.f32.mrf.mxu1  ;;  %v11332_v46 = vadd.f32 %v13277_v62, %v11171_v6 }
 0x5cf   : > { %v11583_v38 = vsel %vm11519_vm1, %v11461_v28, %v11551_v43  ;;  %vm11517_vm2 = vcmp.ge.f32.partialorder %v11453_v21, 0.0  ;;  %v11549_v20 = vmul.f32 0.01, %v11453_v21  ;;  %v11474_v39 = vadd.f32 %v13392_v48, %v11313_v18 }
 0x5d0   : > { %11615 = vst [vmem:[%s17603_s30 + $0xb8] sm:$0xff] %v11583_v38  ;;  %v11465_v63 = vpop.f32.mrf.mxu1 }
 0x5d1   : > { %v11581_v24 = vsel %vm11517_vm2, %v11453_v21, %v11549_v20  ;;  %vm11522_vm3 = vcmp.ge.f32.partialorder %v11474_v39, 0.0  ;;  %v11554_v32 = vmul.f32 0.01, %v11474_v39  ;;  %v11466_v29 = vadd.f32 %v11465_v63, %v11305_v13 }
 0x5d2   : > { %11613 = vst [vmem:[%s17603_s30 + $0xa8] sm:$0xff] %v11581_v24  ;;  %v13393_v61 = vpop.f32.mrf.mxu1 }
 0x5d3   : > { %v11586_v33 = vsel %vm11522_vm3, %v11474_v39, %v11554_v32  ;;  %vm11520_vm6 = vcmp.ge.f32.partialorder %v11466_v29, 0.0  ;;  %v11552_v15 = vmul.f32 0.01, %v11466_v29  ;;  %v11477_v58 = vadd.f32 %v13393_v61, %v11316_v16 }
 0x5d4   : > { %11618 = vst [vmem:[%s17603_s30 + $0xd0] sm:$0xff] %v11586_v33  ;;  %v11468_v19 = vpop.f32.mrf.mxu1 }
 0x5d5   : > { %v11584_v47 = vsel %vm11520_vm6, %v11466_v29, %v11552_v15  ;;  %vm11523_vm8 = vcmp.ge.f32.partialorder %v11477_v58, 0.0  ;;  %v11555_v40 = vmul.f32 0.01, %v11477_v58  ;;  %v11469_v36 = vadd.f32 %v11468_v19, %v11308_v2 }
 0x5d6   : > { %11616 = vst [vmem:[%s17603_s30 + $0xc0] sm:$0xff] %v11584_v47  ;;  %v13396_v8 = vpop.f32.mrf.mxu1 }
 0x5d7   : > { %v11587_v30 = vsel %vm11523_vm8, %v11477_v58, %v11555_v40  ;;  %vm11521_vm9 = vcmp.ge.f32.partialorder %v11469_v36, 0.0  ;;  %v11553_v37 = vmul.f32 0.01, %v11469_v36  ;;  %v11490_v35 = vadd.f32 %v13396_v8, %v11329_v14 }
 0x5d8   : > { %11619 = vst [vmem:[%s17603_s30 + $0xd8] sm:$0xff] %v11587_v30  ;;  %v11481_v55 = vpop.f32.mrf.mxu1 }
 0x5d9   : > { %v11585_v22 = vsel %vm11521_vm9, %v11469_v36, %v11553_v37  ;;  %vm11526_vm11 = vcmp.ge.f32.partialorder %v11490_v35, 0.0  ;;  %v11558_v23 = vmul.f32 0.01, %v11490_v35  ;;  %v11482_v1 = vadd.f32 %v11481_v55, %v11321_v52 }
 0x5da   : > { %11617 = vst [vmem:[%s17603_s30 + $0xc8] sm:$0xff] %v11585_v22  ;;  %v13397_v3 = vpop.f32.mrf.mxu1 }
 0x5db   : > { %v11590_v25 = vsel %vm11526_vm11, %v11490_v35, %v11558_v23  ;;  %vm11524_vm12 = vcmp.ge.f32.partialorder %v11482_v1, 0.0  ;;  %v11556_v28 = vmul.f32 0.01, %v11482_v1  ;;  %v11493_v7 = vadd.f32 %v13397_v3, %v11332_v46 }
 0x5dc   : > { %11622 = vst [vmem:[%s17603_s30 + $0xf0] sm:$0xff] %v11590_v25  ;;  %v11484_v49 = vpop.f32.mrf.mxu1 }
 0x5dd   : > { %v11588_v17 = vsel %vm11524_vm12, %v11482_v1, %v11556_v28  ;;  %vm11527_vm15 = vcmp.ge.f32.partialorder %v11493_v7, 0.0  ;;  %v11559_v34 = vmul.f32 0.01, %v11493_v7  ;;  %v11485_v53 = vadd.f32 %v11484_v49, %v11324_v59 }
 0x5de   : > { %11620 = vst [vmem:[%s17603_s30 + $0xe0] sm:$0xff] %v11588_v17 }
 0x5df   : > { %v11591_v60 = vsel %vm11527_vm15, %v11493_v7, %v11559_v34  ;;  %vm11525_vm0 = vcmp.ge.f32.partialorder %v11485_v53, 0.0  ;;  %v11557_v18 = vmul.f32 0.01, %v11485_v53 }
 0x5e0   : > { %11623 = vst [vmem:[%s17603_s30 + $0xf8] sm:$0xff] %v11591_v60 }
 0x5e1   : > { %v11589_v9 = vsel %vm11525_vm0, %v11485_v53, %v11557_v18 }
 0x5e2   : > { %11621 = vst [vmem:[%s17603_s30 + $0xe8] sm:$0xff] %v11589_v9 }
 0x5e3 PF: > { %s15_s18 = sadd.s32 1, %s13976_s18  }
 0x5e4   : > { %p12_p4 = scmp.ge.s32.totalorder %s15_s18, 4  }
 0x5e6   :  { %14 = sbr.rel (!%p12_p4) target bundleno = 1 (0x1), region = 73 }

</bundles_post_ra>
